<compile_context>
chip_gen: v7x
topology: tpu7x:2x2x1
jax: 0.10.0
libtpu: 0.0.40
codegen_flags: <defaults>
</compile_context>

<pallas_src>
import jax
import jax.numpy as jnp
from jax.experimental import pallas as pl
from jax.experimental.pallas import tpu as pltpu

IN_FEATURES = 84 * 84 * 3   # 21168
H1 = 150
H2 = 50
OUT = 16


def fcnn_kernel(x_ref, w1_ref, b1_ref, w2_ref, b2_ref, w3_ref, b3_ref, o_ref):
    # fc1: bf16 x / bf16 w1 on the MXU, f32 accumulate; bias + relu in f32.
    h1 = jnp.dot(x_ref[...], w1_ref[...], preferred_element_type=jnp.float32)
    h1 = jnp.maximum(h1 + b1_ref[...], 0.0)
    # fc2 + relu (tiny, f32)
    h2 = jnp.dot(h1, w2_ref[...], preferred_element_type=jnp.float32)
    h2 = jnp.maximum(h2 + b2_ref[...], 0.0)
    # fc3
    logits = jnp.dot(h2, w3_ref[...], preferred_element_type=jnp.float32)
    logits = logits + b3_ref[...]
    # log_softmax over the class axis (PyTorch F.log_softmax dim=1 on 2-D input),
    # max-shifted for stability.
    m = jnp.max(logits, axis=-1, keepdims=True)
    shifted = logits - m
    lse = jnp.log(jnp.sum(jnp.exp(shifted), axis=-1, keepdims=True))
    o_ref[...] = shifted - lse


def fcnn_forward(x_nchw, params, *, tm_max=128):
    w1, b1, w2, b2, w3, b3 = params
    B = x_nchw.shape[0]

    # x.view(-1, 84*84*3): row-major flatten over (C, H, W). Stream fc1 inputs
    # as bf16 (HBM-bound on w1); everything downstream stays f32.
    x = x_nchw.reshape(B, IN_FEATURES).astype(jnp.bfloat16)
    w1 = w1.astype(jnp.bfloat16)
    b1 = b1.astype(jnp.float32)
    w2 = w2.astype(jnp.float32)
    b2 = b2.astype(jnp.float32)
    w3 = w3.astype(jnp.float32)
    b3 = b3.astype(jnp.float32)

    # Batch tile: multiple of 8 sublanes, capped at tm_max (v7x VMEM budget:
    # resident bf16 w1 ~6.4 MiB + 2x bf16 x tiles of 128x21168 ~10.8 MiB).
    tm = min(tm_max, ((B + 7) // 8) * 8)
    n_tiles = pl.cdiv(B, tm)
    b_pad = n_tiles * tm
    if b_pad != B:
        x = jnp.pad(x, ((0, b_pad - B), (0, 0)))

    flops = 2 * B * (IN_FEATURES * H1 + H1 * H2 + H2 * OUT)
    bytes_accessed = (
        b_pad * IN_FEATURES * 2            # x (bf16)
        + IN_FEATURES * H1 * 2             # w1 (bf16)
        + (H1 * H2 + H2 * OUT + H1 + H2 + OUT) * 4  # small weights/biases (f32)
        + b_pad * OUT * 4                  # output (f32)
    )
    cost = pl.CostEstimate(
        flops=flops, transcendentals=B * OUT, bytes_accessed=bytes_accessed
    )

    out = pl.pallas_call(
        fcnn_kernel,
        out_shape=jax.ShapeDtypeStruct((b_pad, OUT), jnp.float32),
        grid=(n_tiles,),
        in_specs=[
            # x: tiled over the batch, double-buffered by the pipeline.
            pl.BlockSpec((tm, IN_FEATURES), lambda i: (i, 0)),
            # Weights / biases: same block every step -> stay resident in VMEM.
            pl.BlockSpec((IN_FEATURES, H1), lambda i: (0, 0)),
            pl.BlockSpec((1, H1), lambda i: (0, 0)),
            pl.BlockSpec((H1, H2), lambda i: (0, 0)),
            pl.BlockSpec((1, H2), lambda i: (0, 0)),
            pl.BlockSpec((H2, OUT), lambda i: (0, 0)),
            pl.BlockSpec((1, OUT), lambda i: (0, 0)),
        ],
        out_specs=pl.BlockSpec((tm, OUT), lambda i: (i, 0)),
        compiler_params=pltpu.CompilerParams(
            dimension_semantics=("parallel",),   # megacore sharding on v7x
            vmem_limit_bytes=48 << 20,           # < 64 MiB physical on v7x
        ),
        cost_estimate=cost,
    )(x, w1, b1, w2, b2, w3, b3)

    return out[:B]


def init_params(key):
    """Deterministic init mimicking nn.Linear default: U(-1/sqrt(fan_in), +)."""
    keys = jax.random.split(key, 6)

    def linear(kw, kb, fan_in, fan_out):
        bound = 1.0 / jnp.sqrt(jnp.float32(fan_in))
        w = jax.random.uniform(kw, (fan_in, fan_out), jnp.float32, -bound, bound)
        b = jax.random.uniform(kb, (1, fan_out), jnp.float32, -bound, bound)
        return w, b

    w1, b1 = linear(keys[0], keys[1], IN_FEATURES, H1)
    w2, b2 = linear(keys[2], keys[3], H1, H2)
    w3, b3 = linear(keys[4], keys[5], H2, OUT)
    # fc1 weight is stored/streamed in bf16 (the HBM-dominant operand).
    return (w1.astype(jnp.bfloat16), b1, w2, b2, w3, b3)


if __name__ == "__main__":
    key = jax.random.PRNGKey(0)
    k_params, k_x = jax.random.split(key)
    params = init_params(k_params)

    B = 2
    x = jax.random.normal(k_x, (B, 3, 84, 84), dtype=jnp.float32)  # NCHW

    out = fcnn_forward(x, params)
    out = jax.block_until_ready(out)

    # Sanity: shape, finite, and log-softmax rows sum to 1 in prob space.
    assert out.shape == (B, OUT)
    assert bool(jnp.all(jnp.isfinite(out)))
    row_sums = jnp.exp(out.astype(jnp.float32)).sum(axis=-1)
    assert jnp.allclose(row_sums, 1.0, atol=1e-4)

    # Cross-check against a pure-JAX reference with the same bf16 fc1 stream.
    w1, b1, w2, b2, w3, b3 = params
    xr = x.reshape(B, IN_FEATURES).astype(jnp.bfloat16)
    h1 = jnp.maximum(
        jnp.dot(xr, w1.astype(jnp.bfloat16), preferred_element_type=jnp.float32)
        + b1, 0.0)
    h2 = jnp.maximum(jnp.dot(h1, w2) + b2, 0.0)
    logits = jnp.dot(h2, w3) + b3
    ref = jax.nn.log_softmax(logits, axis=-1)
    assert jnp.allclose(out, ref, atol=1e-3, rtol=1e-3)

    print("KERNEL_OK")
</pallas_src>

<mosaic_0001>
module attributes {stable_mosaic.version = 11 : i64} {
  func.func @fcnn_kernel(%arg0: i32, %arg1: memref<8x21168xbf16, #tpu.memory_space<vmem>>, %arg2: memref<21168x150xbf16, #tpu.memory_space<vmem>>, %arg3: memref<1x150xf32, #tpu.memory_space<vmem>>, %arg4: memref<150x50xf32, #tpu.memory_space<vmem>>, %arg5: memref<1x50xf32, #tpu.memory_space<vmem>>, %arg6: memref<50x16xf32, #tpu.memory_space<vmem>>, %arg7: memref<1x16xf32, #tpu.memory_space<vmem>>, %arg8: memref<8x16xf32, #tpu.memory_space<vmem>>) attributes {dimension_semantics = [#tpu.dimension_semantics<parallel>], iteration_bounds = array<i64: 1>, scalar_prefetch = 0 : i64, scratch_operands = 0 : i64, tpu.core_type = #tpu.core_type<tc>, window_params = [{transform_indices = @transform_0, window_bounds = array<i64: 8, 21168>}, {pipeline_mode = #tpu.pipeline_mode<synchronous>, transform_indices = @transform_1, window_bounds = array<i64: 21168, 150>}, {pipeline_mode = #tpu.pipeline_mode<synchronous>, transform_indices = @transform_2, window_bounds = array<i64: 1, 150>}, {pipeline_mode = #tpu.pipeline_mode<synchronous>, transform_indices = @transform_3, window_bounds = array<i64: 150, 50>}, {pipeline_mode = #tpu.pipeline_mode<synchronous>, transform_indices = @transform_4, window_bounds = array<i64: 1, 50>}, {pipeline_mode = #tpu.pipeline_mode<synchronous>, transform_indices = @transform_5, window_bounds = array<i64: 50, 16>}, {pipeline_mode = #tpu.pipeline_mode<synchronous>, transform_indices = @transform_6, window_bounds = array<i64: 1, 16>}, {transform_indices = @transform_7, window_bounds = array<i64: 8, 16>}]} {
    %c0 = arith.constant 0 : index
    %c0_0 = arith.constant 0 : index
    %0 = vector.load %arg1[%c0, %c0_0] : memref<8x21168xbf16, #tpu.memory_space<vmem>>, vector<8x21168xbf16>
    %c0_1 = arith.constant 0 : index
    %c0_2 = arith.constant 0 : index
    %1 = vector.load %arg2[%c0_1, %c0_2] : memref<21168x150xbf16, #tpu.memory_space<vmem>>, vector<21168x150xbf16>
    %cst = arith.constant dense<0.000000e+00> : vector<8x150xf32>
    %2 = tpu.matmul %0, %1, %cst {dimension_numbers = #tpu.dot_dimension_numbers<[1], [0], [0], [1], [0, 0, 1, 1], [], []>} : vector<8x21168xbf16>, vector<21168x150xbf16>, vector<8x150xf32> -> vector<8x150xf32>
    %c0_3 = arith.constant 0 : index
    %c0_4 = arith.constant 0 : index
    %3 = vector.load %arg3[%c0_3, %c0_4] : memref<1x150xf32, #tpu.memory_space<vmem>>, vector<1x150xf32>
    %4 = vector.broadcast %3 : vector<1x150xf32> to vector<8x150xf32>
    %5 = arith.addf %2, %4 : vector<8x150xf32>
    %cst_5 = arith.constant 0.000000e+00 : f32
    %6 = vector.broadcast %cst_5 : f32 to vector<8x150xf32>
    %7 = arith.maximumf %5, %6 : vector<8x150xf32>
    %c0_6 = arith.constant 0 : index
    %c0_7 = arith.constant 0 : index
    %8 = vector.load %arg4[%c0_6, %c0_7] : memref<150x50xf32, #tpu.memory_space<vmem>>, vector<150x50xf32>
    %cst_8 = arith.constant dense<0.000000e+00> : vector<8x50xf32>
    %9 = tpu.matmul %7, %8, %cst_8 {dimension_numbers = #tpu.dot_dimension_numbers<[1], [0], [0], [1], [0, 0, 1, 1], [], []>} : vector<8x150xf32>, vector<150x50xf32>, vector<8x50xf32> -> vector<8x50xf32>
    %c0_9 = arith.constant 0 : index
    %c0_10 = arith.constant 0 : index
    %10 = vector.load %arg5[%c0_9, %c0_10] : memref<1x50xf32, #tpu.memory_space<vmem>>, vector<1x50xf32>
    %11 = vector.broadcast %10 : vector<1x50xf32> to vector<8x50xf32>
    %12 = arith.addf %9, %11 : vector<8x50xf32>
    %cst_11 = arith.constant 0.000000e+00 : f32
    %13 = vector.broadcast %cst_11 : f32 to vector<8x50xf32>
    %14 = arith.maximumf %12, %13 : vector<8x50xf32>
    %c0_12 = arith.constant 0 : index
    %c0_13 = arith.constant 0 : index
    %15 = vector.load %arg6[%c0_12, %c0_13] : memref<50x16xf32, #tpu.memory_space<vmem>>, vector<50x16xf32>
    %cst_14 = arith.constant dense<0.000000e+00> : vector<8x16xf32>
    %16 = tpu.matmul %14, %15, %cst_14 {dimension_numbers = #tpu.dot_dimension_numbers<[1], [0], [0], [1], [0, 0, 1, 1], [], []>} : vector<8x50xf32>, vector<50x16xf32>, vector<8x16xf32> -> vector<8x16xf32>
    %c0_15 = arith.constant 0 : index
    %c0_16 = arith.constant 0 : index
    %17 = vector.load %arg7[%c0_15, %c0_16] : memref<1x16xf32, #tpu.memory_space<vmem>>, vector<1x16xf32>
    %18 = vector.broadcast %17 : vector<1x16xf32> to vector<8x16xf32>
    %19 = arith.addf %16, %18 : vector<8x16xf32>
    %cst_17 = arith.constant dense<0xFF800000> : vector<8xf32>
    %20 = vector.multi_reduction <maximumf>, %19, %cst_17 [1] : vector<8x16xf32> to vector<8xf32>
    %21 = vector.shape_cast %20 : vector<8xf32> to vector<8x1xf32>
    %22 = vector.broadcast %21 : vector<8x1xf32> to vector<8x16xf32>
    %23 = arith.subf %19, %22 : vector<8x16xf32>
    %24 = math.exp %23 : vector<8x16xf32>
    %cst_18 = arith.constant dense<0.000000e+00> : vector<8xf32>
    %25 = vector.multi_reduction <add>, %24, %cst_18 [1] : vector<8x16xf32> to vector<8xf32>
    %26 = vector.shape_cast %25 : vector<8xf32> to vector<8x1xf32>
    %27 = math.log %26 : vector<8x1xf32>
    %28 = vector.broadcast %27 : vector<8x1xf32> to vector<8x16xf32>
    %29 = arith.subf %23, %28 : vector<8x16xf32>
    %c0_19 = arith.constant 0 : index
    %c0_20 = arith.constant 0 : index
    %30 = vector.load %arg8[%c0_19, %c0_20] : memref<8x16xf32, #tpu.memory_space<vmem>>, vector<8x16xf32>
    tpu.vector_store %arg8[%c0_19, %c0_20], %29 {strides = array<i32>} : memref<8x16xf32, #tpu.memory_space<vmem>>, vector<8x16xf32>,
    return
  }
  func.func @transform_0(%arg0: i32) -> (i32, i32) {
    %c0_i32 = arith.constant 0 : i32
    %c0_i32_0 = arith.constant 0 : i32
    return %arg0, %c0_i32 : i32, i32
  }
  func.func @transform_1(%arg0: i32) -> (i32, i32) {
    %c0_i32 = arith.constant 0 : i32
    %c0_i32_0 = arith.constant 0 : i32
    %c0_i32_1 = arith.constant 0 : i32
    return %c0_i32, %c0_i32_0 : i32, i32
  }
  func.func @transform_2(%arg0: i32) -> (i32, i32) {
    %c0_i32 = arith.constant 0 : i32
    %c0_i32_0 = arith.constant 0 : i32
    %c0_i32_1 = arith.constant 0 : i32
    return %c0_i32, %c0_i32_0 : i32, i32
  }
  func.func @transform_3(%arg0: i32) -> (i32, i32) {
    %c0_i32 = arith.constant 0 : i32
    %c0_i32_0 = arith.constant 0 : i32
    %c0_i32_1 = arith.constant 0 : i32
    return %c0_i32, %c0_i32_0 : i32, i32
  }
  func.func @transform_4(%arg0: i32) -> (i32, i32) {
    %c0_i32 = arith.constant 0 : i32
    %c0_i32_0 = arith.constant 0 : i32
    %c0_i32_1 = arith.constant 0 : i32
    return %c0_i32, %c0_i32_0 : i32, i32
  }
  func.func @transform_5(%arg0: i32) -> (i32, i32) {
    %c0_i32 = arith.constant 0 : i32
    %c0_i32_0 = arith.constant 0 : i32
    %c0_i32_1 = arith.constant 0 : i32
    return %c0_i32, %c0_i32_0 : i32, i32
  }
  func.func @transform_6(%arg0: i32) -> (i32, i32) {
    %c0_i32 = arith.constant 0 : i32
    %c0_i32_0 = arith.constant 0 : i32
    %c0_i32_1 = arith.constant 0 : i32
    return %c0_i32, %c0_i32_0 : i32, i32
  }
  func.func @transform_7(%arg0: i32) -> (i32, i32) {
    %c0_i32 = arith.constant 0 : i32
    %c0_i32_0 = arith.constant 0 : i32
    return %arg0, %c0_i32 : i32, i32
  }
}

</mosaic_0001>

<bundles_post_ra>
// kernel: tpu_custom_call.1
= control target key start
LH: loop header
LB: loop body
LE: loop exit
PB: predicated region body
PF: predicated region fallthrough
CT: control target
= control target key end

     0   :  { %s36413_s0 = inlined_call_operand.vmem [shape: bf16[8,21168], index: 0, kind: input, shape index: {}]   ;;  %s36414_s1 = inlined_call_operand.vmem [shape: bf16[21168,150], index: 1, kind: input, shape index: {}]   ;;  %s36415_s2 = inlined_call_operand.vmem [shape: f32[1,150], index: 2, kind: input, shape index: {}]   ;;  %s36416_s3 = inlined_call_operand.vmem [shape: f32[150,50], index: 3, kind: input, shape index: {}]   ;;  %s36417_s4 = inlined_call_operand.vmem [shape: f32[1,50], index: 4, kind: input, shape index: {}]   ;;  %s36418_s5 = inlined_call_operand.vmem [shape: f32[50,16], index: 5, kind: input, shape index: {}]   ;;  %s36419_s6 = inlined_call_operand.vmem [shape: f32[1,16], index: 6, kind: input, shape index: {}]   ;;  %s36420_s7 = inlined_call_operand.hbm [shape: f32[8,16], index: 7, kind: output, shape index: {}]  }
   0x1   :  { %v23425_v0 = vld [vmem:[%s36414_s1 + $0x4] ss:$8 sps:$4 sm:$0xff]   ;;  %v23429_v2 = vld [vmem:[%s36414_s1] ss:$8 sps:$4 sm:$0xff]   ;;  %v23431_v4 = vld [vmem:[%s36414_s1 + $0x14] ss:$8 sps:$4 sm:$0xff]  }
   0x2   :  { %v23427_v1 = vld [vmem:[%s36414_s1 + $0x2904] ss:$8 sps:$4 sm:$0xff]   ;;  %16583 = vmatprep.subr.bf16.mxu1 %v23425_v0  ;;  %v23430_v3 = vld [vmem:[%s36414_s1 + $0x2900] ss:$8 sps:$4 sm:$0xff]   ;;  %v23433_v5 = vld [vmem:[%s36414_s1 + $0x2914] ss:$8 sps:$4 sm:$0xff]  }
   0x3   :  { %18264 = vmatprep.subr.bf16.mxu0 %v23427_v1  ;;  %16584 = vmatpush1.bf16.msra.mxu1 %v23429_v2  ;;  %v23435_v6 = vld [vmem:[%s36414_s1 + $0x10] ss:$8 sps:$4 sm:$0xff]   ;;  %v23437_v8 = vld [vmem:[%s36414_s1 + $0x24] ss:$8 sps:$4 sm:$0xff]   ;;  %v23441_v10 = vld [vmem:[%s36414_s1 + $0x20] ss:$8 sps:$4 sm:$0xff]  }
   0x4   :  { %18265 = vmatpush1.bf16.msra.mxu0 %v23430_v3  ;;  %16585 = vmatprep.subr.bf16.mxu1 %v23431_v4  ;;  %v23436_v7 = vld [vmem:[%s36414_s1 + $0x2910] ss:$8 sps:$4 sm:$0xff]   ;;  %v23439_v9 = vld [vmem:[%s36414_s1 + $0x2924] ss:$8 sps:$4 sm:$0xff]   ;;  %v23442_v11 = vld [vmem:[%s36414_s1 + $0x2920] ss:$8 sps:$4 sm:$0xff]  }
   0x5   :  { %18266 = vmatprep.subr.bf16.mxu0 %v23433_v5  ;;  %v23443_v12 = vld [vmem:[%s36414_s1 + $0x34] ss:$8 sps:$4 sm:$0xff]   ;;  %v23447_v14 = vld [vmem:[%s36414_s1 + $0x30] ss:$8 sps:$4 sm:$0xff]   ;;  %v23449_v16 = vld [vmem:[%s36414_s1 + $0x44] ss:$8 sps:$4 sm:$0xff]  }
   0x6   :  { %v23445_v13 = vld [vmem:[%s36414_s1 + $0x2934] ss:$8 sps:$4 sm:$0xff]   ;;  %v23448_v15 = vld [vmem:[%s36414_s1 + $0x2930] ss:$8 sps:$4 sm:$0xff]   ;;  %v23451_v17 = vld [vmem:[%s36414_s1 + $0x2944] ss:$8 sps:$4 sm:$0xff]  }
   0x7   :  { %16586 = vmatpush1.bf16.msra.mxu1 %v23435_v6  ;;  %v23453_v18 = vld [vmem:[%s36414_s1 + $0x40] ss:$8 sps:$4 sm:$0xff]   ;;  %v23455_v20 = vld [vmem:[%s36414_s1 + $0x54] ss:$8 sps:$4 sm:$0xff]   ;;  %v23459_v22 = vld [vmem:[%s36414_s1 + $0x50] ss:$8 sps:$4 sm:$0xff]  }
   0x8   :  { %18267 = vmatpush1.bf16.msra.mxu0 %v23436_v7  ;;  %16587 = vmatprep.subr.bf16.mxu1 %v23437_v8  ;;  %v23454_v19 = vld [vmem:[%s36414_s1 + $0x2940] ss:$8 sps:$4 sm:$0xff]   ;;  %v23457_v21 = vld [vmem:[%s36414_s1 + $0x2954] ss:$8 sps:$4 sm:$0xff]   ;;  %v23460_v23 = vld [vmem:[%s36414_s1 + $0x2950] ss:$8 sps:$4 sm:$0xff]  }
   0x9   :  { %18268 = vmatprep.subr.bf16.mxu0 %v23439_v9  ;;  %v23461_v24 = vld [vmem:[%s36414_s1 + $0x64] ss:$8 sps:$4 sm:$0xff]   ;;  %v23465_v26 = vld [vmem:[%s36414_s1 + $0x60] ss:$8 sps:$4 sm:$0xff]   ;;  %v23467_v28 = vld [vmem:[%s36414_s1 + $0x74] ss:$8 sps:$4 sm:$0xff]  }
   0xa   :  { %v23463_v25 = vld [vmem:[%s36414_s1 + $0x2964] ss:$8 sps:$4 sm:$0xff]   ;;  %v23466_v27 = vld [vmem:[%s36414_s1 + $0x2960] ss:$8 sps:$4 sm:$0xff]   ;;  %v23469_v29 = vld [vmem:[%s36414_s1 + $0x2974] ss:$8 sps:$4 sm:$0xff]  }
   0xb   :  { %16588 = vmatpush1.bf16.msra.mxu1 %v23441_v10  ;;  %v23471_v30 = vld [vmem:[%s36414_s1 + $0x70] ss:$8 sps:$4 sm:$0xff]   ;;  %v23473_v32 = vld [vmem:[%s36414_s1 + $0x84] ss:$8 sps:$4 sm:$0xff]   ;;  %v23477_v34 = vld [vmem:[%s36414_s1 + $0x80] ss:$8 sps:$4 sm:$0xff]  }
   0xc   :  { %18269 = vmatpush1.bf16.msra.mxu0 %v23442_v11  ;;  %16589 = vmatprep.subr.bf16.mxu1 %v23443_v12  ;;  %v23472_v31 = vld [vmem:[%s36414_s1 + $0x2970] ss:$8 sps:$4 sm:$0xff]   ;;  %v23475_v33 = vld [vmem:[%s36414_s1 + $0x2984] ss:$8 sps:$4 sm:$0xff]   ;;  %v23478_v35 = vld [vmem:[%s36414_s1 + $0x2980] ss:$8 sps:$4 sm:$0xff]  }
   0xd   :  { %18270 = vmatprep.subr.bf16.mxu0 %v23445_v13  ;;  %v23479_v36 = vld [vmem:[%s36414_s1 + $0x94] ss:$8 sps:$4 sm:$0xff]   ;;  %v23483_v38 = vld [vmem:[%s36414_s1 + $0x90] ss:$8 sps:$4 sm:$0xff]   ;;  %v23485_v40 = vld [vmem:[%s36414_s1 + $0xa4] ss:$8 sps:$4 sm:$0xff]  }
   0xe   :  { %v23481_v37 = vld [vmem:[%s36414_s1 + $0x2994] ss:$8 sps:$4 sm:$0xff]   ;;  %v23484_v39 = vld [vmem:[%s36414_s1 + $0x2990] ss:$8 sps:$4 sm:$0xff]   ;;  %v23487_v41 = vld [vmem:[%s36414_s1 + $0x29a4] ss:$8 sps:$4 sm:$0xff]  }
   0xf   :  { %16590 = vmatpush1.bf16.msra.mxu1 %v23447_v14  ;;  %v23489_v42 = vld [vmem:[%s36414_s1 + $0xa0] ss:$8 sps:$4 sm:$0xff]   ;;  %v23491_v44 = vld [vmem:[%s36414_s1 + $0xb4] ss:$8 sps:$4 sm:$0xff]   ;;  %v23495_v47 = vld [vmem:[%s36414_s1 + $0xb0] ss:$8 sps:$4 sm:$0xff]  }
  0x10   :  { %18271 = vmatpush1.bf16.msra.mxu0 %v23448_v15  ;;  %16591 = vmatprep.subr.bf16.mxu1 %v23449_v16  ;;  %v23490_v43 = vld [vmem:[%s36414_s1 + $0x29a0] ss:$8 sps:$4 sm:$0xff]   ;;  %v23493_v45 = vld [vmem:[%s36414_s1 + $0x29b4] ss:$8 sps:$4 sm:$0xff]   ;;  %v23496_v49 = vld [vmem:[%s36414_s1 + $0x29b0] ss:$8 sps:$4 sm:$0xff]  }
  0x11   :  { %18272 = vmatprep.subr.bf16.mxu0 %v23451_v17  ;;  %v28_v46 = vld [vmem:[%s36413_s0] sm:$0xff]  ;;  %v69_v50 = vld [vmem:[%s36413_s0 + $0x148] sm:$0xff]  ;;  %v23503_v56 = vld [vmem:[%s36414_s1 + $0xd4] ss:$8 sps:$4 sm:$0xff]  }
  0x12   :  { %v20214_v48 = vcombine.high %v28_v46, %v28_v46  ;;  %v23497_v51 = vld [vmem:[%s36414_s1 + $0xc4] ss:$8 sps:$4 sm:$0xff]   ;;  %v20296_v53 = vcombine.high %v69_v50, %v69_v50  ;;  %v23501_v54 = vld [vmem:[%s36414_s1 + $0xc0] ss:$8 sps:$4 sm:$0xff]   ;;  %v23505_v57 = vld [vmem:[%s36414_s1 + $0x29d4] ss:$8 sps:$4 sm:$0xff]   ;;  %v20213_v6 = vcombine.low %v28_v46, %v28_v46  ;;  %v20295_v7 = vcombine.low %v69_v50, %v69_v50 }
  0x13   :  { %16592 = vmatpush1.bf16.msra.mxu1 %v23453_v18  ;;  %v23499_v52 = vld [vmem:[%s36414_s1 + $0x29c4] ss:$8 sps:$4 sm:$0xff]   ;;  %v23502_v55 = vld [vmem:[%s36414_s1 + $0x29c0] ss:$8 sps:$4 sm:$0xff]   ;;  %v23507_v58 = vld [vmem:[%s36414_s1 + $0xd0] ss:$8 sps:$4 sm:$0xff]  }
  0x14   :  { %18273 = vmatpush1.bf16.msra.mxu0 %v23454_v19  ;;  %16593 = vmatprep.subr.bf16.mxu1 %v23455_v20  ;;  %v23508_v59 = vld [vmem:[%s36414_s1 + $0x29d0] ss:$8 sps:$4 sm:$0xff]   ;;  %v23509_v60 = vld [vmem:[%s36414_s1 + $0xe4] ss:$8 sps:$4 sm:$0xff]   ;;  %v23513_v62 = vld [vmem:[%s36414_s1 + $0xe0] ss:$8 sps:$4 sm:$0xff]  }
  0x15   :  { %18274 = vmatprep.subr.bf16.mxu0 %v23457_v21  ;;  %16615 = vmatprep.mubr.bf16.mxu1 %v20214_v48  ;;  %v23511_v61 = vld [vmem:[%s36414_s1 + $0x29e4] ss:$8 sps:$4 sm:$0xff]   ;;  %v23514_v63 = vld [vmem:[%s36414_s1 + $0x29e0] ss:$8 sps:$4 sm:$0xff]   ;;  %v23515_v0 = vld [vmem:[%s36414_s1 + $0xf4] ss:$8 sps:$4 sm:$0xff]  }
  0x16   :  { %18296 = vmatprep.mubr.bf16.mxu0 %v20296_v53  ;;  %v23517_v1 = vld [vmem:[%s36414_s1 + $0x29f4] ss:$8 sps:$4 sm:$0xff]   ;;  %v23519_v2 = vld [vmem:[%s36414_s1 + $0xf0] ss:$8 sps:$4 sm:$0xff]   ;;  %v23525_v4 = vld [vmem:[%s36414_s1 + $0x104] ss:$8 sps:$4 sm:$0xff]  }
  0x17   :  { %16594 = vmatpush1.bf16.msra.mxu1 %v23459_v22  ;;  %v23520_v3 = vld [vmem:[%s36414_s1 + $0x29f0] ss:$8 sps:$4 sm:$0xff]   ;;  %v23530_v5 = vld [vmem:[%s36414_s1 + $0x2a04] ss:$8 sps:$4 sm:$0xff]   ;;  %v23523_v8 = vld [vmem:[%s36414_s1 + $0x100] ss:$8 sps:$4 sm:$0xff]  }
  0x18   :  { %18275 = vmatpush1.bf16.msra.mxu0 %v23460_v23  ;;  %16595 = vmatprep.subr.bf16.mxu1 %v23461_v24  ;;  %v23528_v9 = vld [vmem:[%s36414_s1 + $0x2a00] ss:$8 sps:$4 sm:$0xff]   ;;  %v23533_v10 = vld [vmem:[%s36414_s1 + $0x114] ss:$8 sps:$4 sm:$0xff]   ;;  %v23531_v12 = vld [vmem:[%s36414_s1 + $0x110] ss:$8 sps:$4 sm:$0xff]  }
  0x19   :  { %18276 = vmatprep.subr.bf16.mxu0 %v23463_v25  ;;  %v23536_v11 = vld [vmem:[%s36414_s1 + $0x2a14] ss:$8 sps:$4 sm:$0xff]   ;;  %v23534_v13 = vld [vmem:[%s36414_s1 + $0x2a10] ss:$8 sps:$4 sm:$0xff]   ;;  %v23539_v14 = vld [vmem:[%s36414_s1 + $0x124] ss:$8 sps:$4 sm:$0xff]  }
  0x1a   :  { %v23542_v15 = vld [vmem:[%s36414_s1 + $0x2a24] ss:$8 sps:$4 sm:$0xff]   ;;  %v23537_v16 = vld [vmem:[%s36414_s1 + $0x120] ss:$8 sps:$4 sm:$0xff]   ;;  %v23545_v18 = vld [vmem:[%s36414_s1 + $0x134] ss:$8 sps:$4 sm:$0xff]  }
  0x1b   :  { %16596 = vmatpush1.bf16.msra.mxu1 %v23465_v26  ;;  %v23540_v17 = vld [vmem:[%s36414_s1 + $0x2a20] ss:$8 sps:$4 sm:$0xff]   ;;  %v23548_v19 = vld [vmem:[%s36414_s1 + $0x2a34] ss:$8 sps:$4 sm:$0xff]   ;;  %v23543_v20 = vld [vmem:[%s36414_s1 + $0x130] ss:$8 sps:$4 sm:$0xff]  }
  0x1c   :  { %18277 = vmatpush1.bf16.msra.mxu0 %v23466_v27  ;;  %16597 = vmatprep.subr.bf16.mxu1 %v23467_v28  ;;  %v23546_v21 = vld [vmem:[%s36414_s1 + $0x2a30] ss:$8 sps:$4 sm:$0xff]   ;;  %v23551_v22 = vld [vmem:[%s36414_s1 + $0x144] ss:$8 sps:$4 sm:$0xff]   ;;  %v23549_v24 = vld [vmem:[%s36414_s1 + $0x140] ss:$8 sps:$4 sm:$0xff]  }
  0x1d   :  { %18278 = vmatprep.subr.bf16.mxu0 %v23469_v29  ;;  %v23554_v23 = vld [vmem:[%s36414_s1 + $0x2a44] ss:$8 sps:$4 sm:$0xff]   ;;  %v23552_v25 = vld [vmem:[%s36414_s1 + $0x2a40] ss:$8 sps:$4 sm:$0xff]   ;;  %v23557_v26 = vld [vmem:[%s36414_s1 + $0x154] ss:$8 sps:$4 sm:$0xff]  }
  0x1e   :  { %v23560_v27 = vld [vmem:[%s36414_s1 + $0x2a54] ss:$8 sps:$4 sm:$0xff]   ;;  %v23555_v28 = vld [vmem:[%s36414_s1 + $0x150] ss:$8 sps:$4 sm:$0xff]   ;;  %v23587_v50 = vld [vmem:[%s36414_s1 + $0x1a4] ss:$8 sps:$4 sm:$0xff]  }
  0x1f   :  { %16598 = vmatpush1.bf16.msra.mxu1 %v23471_v30  ;;  %v23558_v29 = vld [vmem:[%s36414_s1 + $0x2a50] ss:$8 sps:$4 sm:$0xff]   ;;  %v23563_v30 = vld [vmem:[%s36414_s1 + $0x164] ss:$8 sps:$4 sm:$0xff]   ;;  %v23581_v46 = vld [vmem:[%s36414_s1 + $0x194] ss:$8 sps:$4 sm:$0xff]  }
  0x20   :  { %18279 = vmatpush1.bf16.msra.mxu0 %v23472_v31  ;;  %16599 = vmatprep.subr.bf16.mxu1 %v23473_v32  ;;  %v23566_v31 = vld [vmem:[%s36414_s1 + $0x2a64] ss:$8 sps:$4 sm:$0xff]   ;;  %v23579_v48 = vld [vmem:[%s36414_s1 + $0x190] ss:$8 sps:$4 sm:$0xff]   ;;  %v23588_v53 = vld [vmem:[%s36414_s1 + $0x2aa0] ss:$8 sps:$4 sm:$0xff]  }
  0x21   :  { %18280 = vmatprep.subr.bf16.mxu0 %v23475_v33  ;;  %v27911_v32 = vld [vmem:[%s36413_s0 + $0x8] sm:$0xff] }
  0x22   :  { %v23561_v33 = vld [vmem:[%s36414_s1 + $0x160] ss:$8 sps:$4 sm:$0xff]  }
  0x23   :  { %16600 = vmatpush1.bf16.msra.mxu1 %v23477_v34  ;;  %v23564_v34 = vld [vmem:[%s36414_s1 + $0x2a60] ss:$8 sps:$4 sm:$0xff]  }
  0x24   :  { %18281 = vmatpush1.bf16.msra.mxu0 %v23478_v35  ;;  %16601 = vmatprep.subr.bf16.mxu1 %v23479_v36  ;;  %v20216_v35 = vcombine.high %v27911_v32, %v27911_v32  ;;  %v27924_v36 = vld [vmem:[%s36413_s0 + $0x150] sm:$0xff] }
  0x25   :  { %18282 = vmatprep.subr.bf16.mxu0 %v23481_v37  ;;  %v23569_v37 = vld [vmem:[%s36414_s1 + $0x174] ss:$8 sps:$4 sm:$0xff]  }
  0x27   :  { %16602 = vmatpush1.bf16.msra.mxu1 %v23483_v38  ;;  %v20298_v38 = vcombine.high %v27924_v36, %v27924_v36 }
  0x28   :  { %18283 = vmatpush1.bf16.msra.mxu0 %v23484_v39  ;;  %16603 = vmatprep.subr.bf16.mxu1 %v23485_v40  ;;  %v23572_v39 = vld [vmem:[%s36414_s1 + $0x2a74] ss:$8 sps:$4 sm:$0xff]   ;;  %v23567_v40 = vld [vmem:[%s36414_s1 + $0x170] ss:$8 sps:$4 sm:$0xff]  }
  0x29   :  { %18284 = vmatprep.subr.bf16.mxu0 %v23487_v41  ;;  %v23570_v41 = vld [vmem:[%s36414_s1 + $0x2a70] ss:$8 sps:$4 sm:$0xff]  }
  0x2b   :  { %16604 = vmatpush1.bf16.msra.mxu1 %v23489_v42  ;;  %v23575_v42 = vld [vmem:[%s36414_s1 + $0x184] ss:$8 sps:$4 sm:$0xff]  }
  0x2c   :  { %18285 = vmatpush1.bf16.msra.mxu0 %v23490_v43  ;;  %16605 = vmatprep.subr.bf16.mxu1 %v23491_v44  ;;  %v23578_v43 = vld [vmem:[%s36414_s1 + $0x2a84] ss:$8 sps:$4 sm:$0xff]   ;;  %v23573_v44 = vld [vmem:[%s36414_s1 + $0x180] ss:$8 sps:$4 sm:$0xff]  }
  0x2d   :  { %18286 = vmatprep.subr.bf16.mxu0 %v23493_v45  ;;  %v23576_v45 = vld [vmem:[%s36414_s1 + $0x2a80] ss:$8 sps:$4 sm:$0xff]  }
  0x2f   :  { %16606 = vmatpush1.bf16.msra.mxu1 %v23495_v47  ;;  %v23584_v47 = vld [vmem:[%s36414_s1 + $0x2a94] ss:$8 sps:$4 sm:$0xff]  }
  0x30   :  { %18287 = vmatpush1.bf16.msra.mxu0 %v23496_v49  ;;  %16607 = vmatprep.subr.bf16.mxu1 %v23497_v51  ;;  %v23582_v49 = vld [vmem:[%s36414_s1 + $0x2a90] ss:$8 sps:$4 sm:$0xff]   ;;  %v23590_v51 = vld [vmem:[%s36414_s1 + $0x2aa4] ss:$8 sps:$4 sm:$0xff]  }
  0x31   :  { %18288 = vmatprep.subr.bf16.mxu0 %v23499_v52  ;;  %v23585_v52 = vld [vmem:[%s36414_s1 + $0x1a0] ss:$8 sps:$4 sm:$0xff]  }
  0x33   :  { %16608 = vmatpush1.bf16.msra.mxu1 %v23501_v54  ;;  %v23593_v54 = vld [vmem:[%s36414_s1 + $0x1b4] ss:$8 sps:$4 sm:$0xff]  }
  0x34   :  { %18289 = vmatpush1.bf16.msra.mxu0 %v23502_v55  ;;  %16609 = vmatprep.subr.bf16.mxu1 %v23503_v56  ;;  %v23596_v55 = vld [vmem:[%s36414_s1 + $0x2ab4] ss:$8 sps:$4 sm:$0xff]   ;;  %v23591_v56 = vld [vmem:[%s36414_s1 + $0x1b0] ss:$8 sps:$4 sm:$0xff]  }
  0x35   :  { %18290 = vmatprep.subr.bf16.mxu0 %v23505_v57  ;;  %v23594_v57 = vld [vmem:[%s36414_s1 + $0x2ab0] ss:$8 sps:$4 sm:$0xff]  }
  0x37   :  { %16610 = vmatpush1.bf16.msra.mxu1 %v23507_v58  ;;  %v23599_v58 = vld [vmem:[%s36414_s1 + $0x1c4] ss:$8 sps:$4 sm:$0xff]  }
  0x38   :  { %18291 = vmatpush1.bf16.msra.mxu0 %v23508_v59  ;;  %16611 = vmatprep.subr.bf16.mxu1 %v23509_v60  ;;  %v23602_v59 = vld [vmem:[%s36414_s1 + $0x2ac4] ss:$8 sps:$4 sm:$0xff]   ;;  %v23597_v60 = vld [vmem:[%s36414_s1 + $0x1c0] ss:$8 sps:$4 sm:$0xff]  }
  0x39   :  { %18292 = vmatprep.subr.bf16.mxu0 %v23511_v61  ;;  %v23600_v61 = vld [vmem:[%s36414_s1 + $0x2ac0] ss:$8 sps:$4 sm:$0xff]  }
  0x3b   :  { %16612 = vmatpush1.bf16.msra.mxu1 %v23513_v62  ;;  %v23605_v62 = vld [vmem:[%s36414_s1 + $0x1d4] ss:$8 sps:$4 sm:$0xff]  }
  0x3c   :  { %18293 = vmatpush1.bf16.msra.mxu0 %v23514_v63  ;;  %16613 = vmatprep.subr.bf16.mxu1 %v23515_v0  ;;  %v23608_v63 = vld [vmem:[%s36414_s1 + $0x2ad4] ss:$8 sps:$4 sm:$0xff]   ;;  %v23603_v0 = vld [vmem:[%s36414_s1 + $0x1d0] ss:$8 sps:$4 sm:$0xff]  }
  0x3d   :  { %18294 = vmatprep.subr.bf16.mxu0 %v23517_v1  ;;  %v23606_v1 = vld [vmem:[%s36414_s1 + $0x2ad0] ss:$8 sps:$4 sm:$0xff]  }
  0x3f   :  { %16614 = vmatpush1.bf16.msra.mxu1 %v23519_v2  ;;  %v23611_v2 = vld [vmem:[%s36414_s1 + $0x1e4] ss:$8 sps:$4 sm:$0xff]  }
  0x40   :  { %18295 = vmatpush1.bf16.msra.mxu0 %v23520_v3  ;;  %16624 = vmatprep.subr.bf16.mxu1 %v23525_v4  ;;  %v23614_v3 = vld [vmem:[%s36414_s1 + $0x2ae4] ss:$8 sps:$4 sm:$0xff]   ;;  %v23609_v4 = vld [vmem:[%s36414_s1 + $0x1e0] ss:$8 sps:$4 sm:$0xff]  }
  0x41   :  { %18305 = vmatprep.subr.bf16.mxu0 %v23530_v5  ;;  %v23612_v5 = vld [vmem:[%s36414_s1 + $0x2ae0] ss:$8 sps:$4 sm:$0xff]  }
  0x42   :  { %16616 = vmatmul.mubr.bf16.vlgmr.msra.gmra.mrb[0].mxu1 %v20213_v6  ;;  %v23617_v6 = vld [vmem:[%s36414_s1 + $0x1f4] ss:$8 sps:$4 sm:$0xff]  }
  0x43   :  { %18297 = vmatmul.mubr.bf16.vlgmr.msra.gmra.mrb[0].mxu0 %v20295_v7  ;;  %16625 = vmatpush1.bf16.msra.mxu1 %v23523_v8  ;;  %v23620_v7 = vld [vmem:[%s36414_s1 + $0x2af4] ss:$8 sps:$4 sm:$0xff]   ;;  %v23615_v8 = vld [vmem:[%s36414_s1 + $0x1f0] ss:$8 sps:$4 sm:$0xff]  }
  0x44   :  { %18306 = vmatpush1.bf16.msra.mxu0 %v23528_v9  ;;  %16626 = vmatprep.subr.bf16.mxu1 %v23533_v10  ;;  %v23618_v9 = vld [vmem:[%s36414_s1 + $0x2af0] ss:$8 sps:$4 sm:$0xff]   ;;  %v23625_v10 = vld [vmem:[%s36414_s1 + $0x204] ss:$8 sps:$4 sm:$0xff]  }
  0x45   :  { %18307 = vmatprep.subr.bf16.mxu0 %v23536_v11  ;;  %16656 = vmatprep.mubr.bf16.mxu1 %v20216_v35  ;;  %v23630_v11 = vld [vmem:[%s36414_s1 + $0x2b04] ss:$8 sps:$4 sm:$0xff]   ;;  %v23652_v35 = vld [vmem:[%s36414_s1 + $0x2b40] ss:$8 sps:$4 sm:$0xff]  }
  0x46   :  { %18337 = vmatprep.mubr.bf16.mxu0 %v20298_v38  ;;  %v23655_v38 = vld [vmem:[%s36414_s1 + $0x250] ss:$8 sps:$4 sm:$0xff]  }
  0x47   :  { %16627 = vmatpush1.bf16.msra.mxu1 %v23531_v12  ;;  %v20215_v12 = vcombine.low %v27911_v32, %v27911_v32  ;;  %v23651_v32 = vld [vmem:[%s36414_s1 + $0x244] ss:$8 sps:$4 sm:$0xff]  }
  0x48   :  { %18308 = vmatpush1.bf16.msra.mxu0 %v23534_v13  ;;  %16628 = vmatprep.subr.bf16.mxu1 %v23539_v14  ;;  %v23623_v13 = vld [vmem:[%s36414_s1 + $0x200] ss:$8 sps:$4 sm:$0xff]   ;;  %v20297_v14 = vcombine.low %v27924_v36, %v27924_v36  ;;  %v23657_v36 = vld [vmem:[%s36414_s1 + $0x254] ss:$8 sps:$4 sm:$0xff]  }
  0x49   :  { %18309 = vmatprep.subr.bf16.mxu0 %v23542_v15  ;;  %v23628_v15 = vld [vmem:[%s36414_s1 + $0x2b00] ss:$8 sps:$4 sm:$0xff]  }
  0x4b   :  { %16629 = vmatpush1.bf16.msra.mxu1 %v23537_v16  ;;  %v23633_v16 = vld [vmem:[%s36414_s1 + $0x214] ss:$8 sps:$4 sm:$0xff]  }
  0x4c   :  { %18310 = vmatpush1.bf16.msra.mxu0 %v23540_v17  ;;  %16630 = vmatprep.subr.bf16.mxu1 %v23545_v18  ;;  %v23636_v17 = vld [vmem:[%s36414_s1 + $0x2b14] ss:$8 sps:$4 sm:$0xff]  }
  0x4d   :  { %18311 = vmatprep.subr.bf16.mxu0 %v23548_v19  ;;  %v28061_v18 = vld [vmem:[%s36413_s0 + $0x10] sm:$0xff] }
  0x4e   :  { %v20218_v19 = vcombine.high %v28061_v18, %v28061_v18 }
  0x4f   :  { %16631 = vmatpush1.bf16.msra.mxu1 %v23543_v20  ;;  %v28068_v20 = vld [vmem:[%s36413_s0 + $0x158] sm:$0xff] }
  0x50   :  { %18312 = vmatpush1.bf16.msra.mxu0 %v23546_v21  ;;  %16632 = vmatprep.subr.bf16.mxu1 %v23551_v22  ;;  %v23631_v21 = vld [vmem:[%s36414_s1 + $0x210] ss:$8 sps:$4 sm:$0xff]  }
  0x51   :  { %18313 = vmatprep.subr.bf16.mxu0 %v23554_v23  ;;  %v23634_v22 = vld [vmem:[%s36414_s1 + $0x2b10] ss:$8 sps:$4 sm:$0xff]   ;;  %v20300_v23 = vcombine.high %v28068_v20, %v28068_v20 }
  0x53   :  { %16633 = vmatpush1.bf16.msra.mxu1 %v23549_v24  ;;  %v23639_v24 = vld [vmem:[%s36414_s1 + $0x224] ss:$8 sps:$4 sm:$0xff]  }
  0x54   :  { %18314 = vmatpush1.bf16.msra.mxu0 %v23552_v25  ;;  %16634 = vmatprep.subr.bf16.mxu1 %v23557_v26  ;;  %v23642_v25 = vld [vmem:[%s36414_s1 + $0x2b24] ss:$8 sps:$4 sm:$0xff]   ;;  %v23637_v26 = vld [vmem:[%s36414_s1 + $0x220] ss:$8 sps:$4 sm:$0xff]  }
  0x55   :  { %18315 = vmatprep.subr.bf16.mxu0 %v23560_v27  ;;  %v23640_v27 = vld [vmem:[%s36414_s1 + $0x2b20] ss:$8 sps:$4 sm:$0xff]  }
  0x57   :  { %16635 = vmatpush1.bf16.msra.mxu1 %v23555_v28  ;;  %v23645_v28 = vld [vmem:[%s36414_s1 + $0x234] ss:$8 sps:$4 sm:$0xff]  }
  0x58   :  { %18316 = vmatpush1.bf16.msra.mxu0 %v23558_v29  ;;  %16636 = vmatprep.subr.bf16.mxu1 %v23563_v30  ;;  %v23648_v29 = vld [vmem:[%s36414_s1 + $0x2b34] ss:$8 sps:$4 sm:$0xff]   ;;  %v23643_v30 = vld [vmem:[%s36414_s1 + $0x230] ss:$8 sps:$4 sm:$0xff]  }
  0x59   :  { %18317 = vmatprep.subr.bf16.mxu0 %v23566_v31  ;;  %v23646_v31 = vld [vmem:[%s36414_s1 + $0x2b30] ss:$8 sps:$4 sm:$0xff]  }
  0x5b   :  { %16637 = vmatpush1.bf16.msra.mxu1 %v23561_v33  ;;  %v23654_v33 = vld [vmem:[%s36414_s1 + $0x2b44] ss:$8 sps:$4 sm:$0xff]  }
  0x5c   :  { %18318 = vmatpush1.bf16.msra.mxu0 %v23564_v34  ;;  %16638 = vmatprep.subr.bf16.mxu1 %v23569_v37  ;;  %v23649_v34 = vld [vmem:[%s36414_s1 + $0x240] ss:$8 sps:$4 sm:$0xff]   ;;  %v23660_v37 = vld [vmem:[%s36414_s1 + $0x2b54] ss:$8 sps:$4 sm:$0xff]  }
  0x5d   :  { %18319 = vmatprep.subr.bf16.mxu0 %v23572_v39  ;;  %v23658_v39 = vld [vmem:[%s36414_s1 + $0x2b50] ss:$8 sps:$4 sm:$0xff]  }
  0x5f   :  { %16639 = vmatpush1.bf16.msra.mxu1 %v23567_v40  ;;  %v23663_v40 = vld [vmem:[%s36414_s1 + $0x264] ss:$8 sps:$4 sm:$0xff]  }
  0x60   :  { %18320 = vmatpush1.bf16.msra.mxu0 %v23570_v41  ;;  %16640 = vmatprep.subr.bf16.mxu1 %v23575_v42  ;;  %v23666_v41 = vld [vmem:[%s36414_s1 + $0x2b64] ss:$8 sps:$4 sm:$0xff]   ;;  %v23661_v42 = vld [vmem:[%s36414_s1 + $0x260] ss:$8 sps:$4 sm:$0xff]  }
  0x61   :  { %18321 = vmatprep.subr.bf16.mxu0 %v23578_v43  ;;  %v23664_v43 = vld [vmem:[%s36414_s1 + $0x2b60] ss:$8 sps:$4 sm:$0xff]  }
  0x63   :  { %16641 = vmatpush1.bf16.msra.mxu1 %v23573_v44  ;;  %v23669_v44 = vld [vmem:[%s36414_s1 + $0x274] ss:$8 sps:$4 sm:$0xff]  }
  0x64   :  { %18322 = vmatpush1.bf16.msra.mxu0 %v23576_v45  ;;  %16642 = vmatprep.subr.bf16.mxu1 %v23581_v46  ;;  %v23672_v45 = vld [vmem:[%s36414_s1 + $0x2b74] ss:$8 sps:$4 sm:$0xff]   ;;  %v23667_v46 = vld [vmem:[%s36414_s1 + $0x270] ss:$8 sps:$4 sm:$0xff]  }
  0x65   :  { %18323 = vmatprep.subr.bf16.mxu0 %v23584_v47  ;;  %v23670_v47 = vld [vmem:[%s36414_s1 + $0x2b70] ss:$8 sps:$4 sm:$0xff]  }
  0x67   :  { %16643 = vmatpush1.bf16.msra.mxu1 %v23579_v48  ;;  %v23675_v48 = vld [vmem:[%s36414_s1 + $0x284] ss:$8 sps:$4 sm:$0xff]  }
  0x68   :  { %18324 = vmatpush1.bf16.msra.mxu0 %v23582_v49  ;;  %16644 = vmatprep.subr.bf16.mxu1 %v23587_v50  ;;  %v23678_v49 = vld [vmem:[%s36414_s1 + $0x2b84] ss:$8 sps:$4 sm:$0xff]   ;;  %v23673_v50 = vld [vmem:[%s36414_s1 + $0x280] ss:$8 sps:$4 sm:$0xff]  }
  0x69   :  { %18325 = vmatprep.subr.bf16.mxu0 %v23590_v51  ;;  %v23676_v51 = vld [vmem:[%s36414_s1 + $0x2b80] ss:$8 sps:$4 sm:$0xff]  }
  0x6b   :  { %16645 = vmatpush1.bf16.msra.mxu1 %v23585_v52  ;;  %v23681_v52 = vld [vmem:[%s36414_s1 + $0x294] ss:$8 sps:$4 sm:$0xff]  }
  0x6c   :  { %18326 = vmatpush1.bf16.msra.mxu0 %v23588_v53  ;;  %16646 = vmatprep.subr.bf16.mxu1 %v23593_v54  ;;  %v23684_v53 = vld [vmem:[%s36414_s1 + $0x2b94] ss:$8 sps:$4 sm:$0xff]   ;;  %v23679_v54 = vld [vmem:[%s36414_s1 + $0x290] ss:$8 sps:$4 sm:$0xff]  }
  0x6d   :  { %18327 = vmatprep.subr.bf16.mxu0 %v23596_v55  ;;  %v23682_v55 = vld [vmem:[%s36414_s1 + $0x2b90] ss:$8 sps:$4 sm:$0xff]  }
  0x6f   :  { %16647 = vmatpush1.bf16.msra.mxu1 %v23591_v56  ;;  %v23687_v56 = vld [vmem:[%s36414_s1 + $0x2a4] ss:$8 sps:$4 sm:$0xff]  }
  0x70   :  { %18328 = vmatpush1.bf16.msra.mxu0 %v23594_v57  ;;  %16648 = vmatprep.subr.bf16.mxu1 %v23599_v58  ;;  %v23690_v57 = vld [vmem:[%s36414_s1 + $0x2ba4] ss:$8 sps:$4 sm:$0xff]   ;;  %v23685_v58 = vld [vmem:[%s36414_s1 + $0x2a0] ss:$8 sps:$4 sm:$0xff]  }
  0x71   :  { %18329 = vmatprep.subr.bf16.mxu0 %v23602_v59  ;;  %v23688_v59 = vld [vmem:[%s36414_s1 + $0x2ba0] ss:$8 sps:$4 sm:$0xff]  }
  0x73   :  { %16649 = vmatpush1.bf16.msra.mxu1 %v23597_v60  ;;  %v23693_v60 = vld [vmem:[%s36414_s1 + $0x2b4] ss:$8 sps:$4 sm:$0xff]  }
  0x74   :  { %18330 = vmatpush1.bf16.msra.mxu0 %v23600_v61  ;;  %16650 = vmatprep.subr.bf16.mxu1 %v23605_v62  ;;  %v23696_v61 = vld [vmem:[%s36414_s1 + $0x2bb4] ss:$8 sps:$4 sm:$0xff]   ;;  %v23691_v62 = vld [vmem:[%s36414_s1 + $0x2b0] ss:$8 sps:$4 sm:$0xff]  }
  0x75   :  { %18331 = vmatprep.subr.bf16.mxu0 %v23608_v63  ;;  %v23694_v63 = vld [vmem:[%s36414_s1 + $0x2bb0] ss:$8 sps:$4 sm:$0xff]  }
  0x77   :  { %16651 = vmatpush1.bf16.msra.mxu1 %v23603_v0  ;;  %v23699_v0 = vld [vmem:[%s36414_s1 + $0x2c4] ss:$8 sps:$4 sm:$0xff]  }
  0x78   :  { %18332 = vmatpush1.bf16.msra.mxu0 %v23606_v1  ;;  %16652 = vmatprep.subr.bf16.mxu1 %v23611_v2  ;;  %v23702_v1 = vld [vmem:[%s36414_s1 + $0x2bc4] ss:$8 sps:$4 sm:$0xff]   ;;  %v23697_v2 = vld [vmem:[%s36414_s1 + $0x2c0] ss:$8 sps:$4 sm:$0xff]  }
  0x79   :  { %18333 = vmatprep.subr.bf16.mxu0 %v23614_v3  ;;  %v23700_v3 = vld [vmem:[%s36414_s1 + $0x2bc0] ss:$8 sps:$4 sm:$0xff]  }
  0x7b   :  { %16653 = vmatpush1.bf16.msra.mxu1 %v23609_v4  ;;  %v23705_v4 = vld [vmem:[%s36414_s1 + $0x2d4] ss:$8 sps:$4 sm:$0xff]  }
  0x7c   :  { %18334 = vmatpush1.bf16.msra.mxu0 %v23612_v5  ;;  %16654 = vmatprep.subr.bf16.mxu1 %v23617_v6  ;;  %v23708_v5 = vld [vmem:[%s36414_s1 + $0x2bd4] ss:$8 sps:$4 sm:$0xff]   ;;  %v23703_v6 = vld [vmem:[%s36414_s1 + $0x2d0] ss:$8 sps:$4 sm:$0xff]  }
  0x7d   :  { %18335 = vmatprep.subr.bf16.mxu0 %v23620_v7  ;;  %v23706_v7 = vld [vmem:[%s36414_s1 + $0x2bd0] ss:$8 sps:$4 sm:$0xff]  }
  0x7f   :  { %16655 = vmatpush1.bf16.msra.mxu1 %v23615_v8  ;;  %v23711_v8 = vld [vmem:[%s36414_s1 + $0x2e4] ss:$8 sps:$4 sm:$0xff]  }
  0x80   :  { %18336 = vmatpush1.bf16.msra.mxu0 %v23618_v9  ;;  %16665 = vmatprep.subr.bf16.mxu1 %v23625_v10  ;;  %v23714_v9 = vld [vmem:[%s36414_s1 + $0x2be4] ss:$8 sps:$4 sm:$0xff]   ;;  %v23709_v10 = vld [vmem:[%s36414_s1 + $0x2e0] ss:$8 sps:$4 sm:$0xff]  }
  0x81   :  { %18346 = vmatprep.subr.bf16.mxu0 %v23630_v11  ;;  %v23712_v11 = vld [vmem:[%s36414_s1 + $0x2be0] ss:$8 sps:$4 sm:$0xff]  }
  0x82   :  { %16657 = vmatmul.mubr.bf16.vlgmr.msra.gmra.mrb[0].mxu1 %v20215_v12  ;;  %v23717_v12 = vld [vmem:[%s36414_s1 + $0x2f4] ss:$8 sps:$4 sm:$0xff]  }
  0x83   :  { %18338 = vmatmul.mubr.bf16.vlgmr.msra.gmra.mrb[0].mxu0 %v20297_v14  ;;  %16666 = vmatpush1.bf16.msra.mxu1 %v23623_v13  ;;  %v23720_v13 = vld [vmem:[%s36414_s1 + $0x2bf4] ss:$8 sps:$4 sm:$0xff]   ;;  %v23715_v14 = vld [vmem:[%s36414_s1 + $0x2f0] ss:$8 sps:$4 sm:$0xff]  }
  0x84   :  { %18347 = vmatpush1.bf16.msra.mxu0 %v23628_v15  ;;  %16667 = vmatprep.subr.bf16.mxu1 %v23633_v16  ;;  %v23718_v15 = vld [vmem:[%s36414_s1 + $0x2bf0] ss:$8 sps:$4 sm:$0xff]   ;;  %v23725_v16 = vld [vmem:[%s36414_s1 + $0x304] ss:$8 sps:$4 sm:$0xff]  }
  0x85   :  { %18348 = vmatprep.subr.bf16.mxu0 %v23636_v17  ;;  %16697 = vmatprep.mubr.bf16.mxu1 %v20218_v19  ;;  %v23730_v17 = vld [vmem:[%s36414_s1 + $0x2c04] ss:$8 sps:$4 sm:$0xff]   ;;  %v23723_v19 = vld [vmem:[%s36414_s1 + $0x300] ss:$8 sps:$4 sm:$0xff]  }
  0x86   :  { %18378 = vmatprep.mubr.bf16.mxu0 %v20300_v23  ;;  %v20299_v23 = vcombine.low %v28068_v20, %v28068_v20 }
  0x87   :  { %16668 = vmatpush1.bf16.msra.mxu1 %v23631_v21  ;;  %v23728_v21 = vld [vmem:[%s36414_s1 + $0x2c00] ss:$8 sps:$4 sm:$0xff]  }
  0x88   :  { %18349 = vmatpush1.bf16.msra.mxu0 %v23634_v22  ;;  %16669 = vmatprep.subr.bf16.mxu1 %v23639_v24  ;;  %v20217_v22 = vcombine.low %v28061_v18, %v28061_v18  ;;  %v28265_v24 = vld [vmem:[%s36413_s0 + $0x18] sm:$0xff] }
  0x89   :  { %18350 = vmatprep.subr.bf16.mxu0 %v23642_v25  ;;  %v28270_v25 = vld [vmem:[%s36413_s0 + $0x160] sm:$0xff]  ;;  %v23736_v18 = vld [vmem:[%s36414_s1 + $0x2c14] ss:$8 sps:$4 sm:$0xff]   ;;  %v20220_v20 = vcombine.high %v28265_v24, %v28265_v24 }
  0x8b   :  { %16670 = vmatpush1.bf16.msra.mxu1 %v23637_v26  ;;  %v23733_v26 = vld [vmem:[%s36414_s1 + $0x314] ss:$8 sps:$4 sm:$0xff]  }
  0x8c   :  { %18351 = vmatpush1.bf16.msra.mxu0 %v23640_v27  ;;  %16671 = vmatprep.subr.bf16.mxu1 %v23645_v28  ;;  %v20302_v27 = vcombine.high %v28270_v25, %v28270_v25  ;;  %v23731_v28 = vld [vmem:[%s36414_s1 + $0x310] ss:$8 sps:$4 sm:$0xff]  }
  0x8d   :  { %18352 = vmatprep.subr.bf16.mxu0 %v23648_v29  ;;  %v23734_v29 = vld [vmem:[%s36414_s1 + $0x2c10] ss:$8 sps:$4 sm:$0xff]  }
  0x8f   :  { %16672 = vmatpush1.bf16.msra.mxu1 %v23643_v30  ;;  %v23739_v30 = vld [vmem:[%s36414_s1 + $0x324] ss:$8 sps:$4 sm:$0xff]  }
  0x90   :  { %18353 = vmatpush1.bf16.msra.mxu0 %v23646_v31  ;;  %16673 = vmatprep.subr.bf16.mxu1 %v23651_v32  ;;  %v23742_v31 = vld [vmem:[%s36414_s1 + $0x2c24] ss:$8 sps:$4 sm:$0xff]   ;;  %v23737_v32 = vld [vmem:[%s36414_s1 + $0x320] ss:$8 sps:$4 sm:$0xff]  }
  0x91   :  { %18354 = vmatprep.subr.bf16.mxu0 %v23654_v33  ;;  %v23740_v33 = vld [vmem:[%s36414_s1 + $0x2c20] ss:$8 sps:$4 sm:$0xff]  }
  0x93   :  { %16674 = vmatpush1.bf16.msra.mxu1 %v23649_v34  ;;  %v23745_v34 = vld [vmem:[%s36414_s1 + $0x334] ss:$8 sps:$4 sm:$0xff]  }
  0x94   :  { %18355 = vmatpush1.bf16.msra.mxu0 %v23652_v35  ;;  %16675 = vmatprep.subr.bf16.mxu1 %v23657_v36  ;;  %v23748_v35 = vld [vmem:[%s36414_s1 + $0x2c34] ss:$8 sps:$4 sm:$0xff]   ;;  %v23743_v36 = vld [vmem:[%s36414_s1 + $0x330] ss:$8 sps:$4 sm:$0xff]  }
  0x95   :  { %18356 = vmatprep.subr.bf16.mxu0 %v23660_v37  ;;  %v23746_v37 = vld [vmem:[%s36414_s1 + $0x2c30] ss:$8 sps:$4 sm:$0xff]  }
  0x97   :  { %16676 = vmatpush1.bf16.msra.mxu1 %v23655_v38  ;;  %v23751_v38 = vld [vmem:[%s36414_s1 + $0x344] ss:$8 sps:$4 sm:$0xff]  }
  0x98   :  { %18357 = vmatpush1.bf16.msra.mxu0 %v23658_v39  ;;  %16677 = vmatprep.subr.bf16.mxu1 %v23663_v40  ;;  %v23754_v39 = vld [vmem:[%s36414_s1 + $0x2c44] ss:$8 sps:$4 sm:$0xff]   ;;  %v23749_v40 = vld [vmem:[%s36414_s1 + $0x340] ss:$8 sps:$4 sm:$0xff]  }
  0x99   :  { %18358 = vmatprep.subr.bf16.mxu0 %v23666_v41  ;;  %v23752_v41 = vld [vmem:[%s36414_s1 + $0x2c40] ss:$8 sps:$4 sm:$0xff]  }
  0x9b   :  { %16678 = vmatpush1.bf16.msra.mxu1 %v23661_v42  ;;  %v23757_v42 = vld [vmem:[%s36414_s1 + $0x354] ss:$8 sps:$4 sm:$0xff]  }
  0x9c   :  { %18359 = vmatpush1.bf16.msra.mxu0 %v23664_v43  ;;  %16679 = vmatprep.subr.bf16.mxu1 %v23669_v44  ;;  %v23760_v43 = vld [vmem:[%s36414_s1 + $0x2c54] ss:$8 sps:$4 sm:$0xff]   ;;  %v23755_v44 = vld [vmem:[%s36414_s1 + $0x350] ss:$8 sps:$4 sm:$0xff]  }
  0x9d   :  { %18360 = vmatprep.subr.bf16.mxu0 %v23672_v45  ;;  %v23758_v45 = vld [vmem:[%s36414_s1 + $0x2c50] ss:$8 sps:$4 sm:$0xff]  }
  0x9f   :  { %16680 = vmatpush1.bf16.msra.mxu1 %v23667_v46  ;;  %v23763_v46 = vld [vmem:[%s36414_s1 + $0x364] ss:$8 sps:$4 sm:$0xff]  }
  0xa0   :  { %18361 = vmatpush1.bf16.msra.mxu0 %v23670_v47  ;;  %16681 = vmatprep.subr.bf16.mxu1 %v23675_v48  ;;  %v23766_v47 = vld [vmem:[%s36414_s1 + $0x2c64] ss:$8 sps:$4 sm:$0xff]   ;;  %v23761_v48 = vld [vmem:[%s36414_s1 + $0x360] ss:$8 sps:$4 sm:$0xff]  }
  0xa1   :  { %18362 = vmatprep.subr.bf16.mxu0 %v23678_v49  ;;  %v23764_v49 = vld [vmem:[%s36414_s1 + $0x2c60] ss:$8 sps:$4 sm:$0xff]  }
  0xa3   :  { %16682 = vmatpush1.bf16.msra.mxu1 %v23673_v50  ;;  %v23769_v50 = vld [vmem:[%s36414_s1 + $0x374] ss:$8 sps:$4 sm:$0xff]  }
  0xa4   :  { %18363 = vmatpush1.bf16.msra.mxu0 %v23676_v51  ;;  %16683 = vmatprep.subr.bf16.mxu1 %v23681_v52  ;;  %v23772_v51 = vld [vmem:[%s36414_s1 + $0x2c74] ss:$8 sps:$4 sm:$0xff]   ;;  %v23767_v52 = vld [vmem:[%s36414_s1 + $0x370] ss:$8 sps:$4 sm:$0xff]  }
  0xa5   :  { %18364 = vmatprep.subr.bf16.mxu0 %v23684_v53  ;;  %v23770_v53 = vld [vmem:[%s36414_s1 + $0x2c70] ss:$8 sps:$4 sm:$0xff]  }
  0xa7   :  { %16684 = vmatpush1.bf16.msra.mxu1 %v23679_v54  ;;  %v23775_v54 = vld [vmem:[%s36414_s1 + $0x384] ss:$8 sps:$4 sm:$0xff]  }
  0xa8   :  { %18365 = vmatpush1.bf16.msra.mxu0 %v23682_v55  ;;  %16685 = vmatprep.subr.bf16.mxu1 %v23687_v56  ;;  %v23778_v55 = vld [vmem:[%s36414_s1 + $0x2c84] ss:$8 sps:$4 sm:$0xff]   ;;  %v23773_v56 = vld [vmem:[%s36414_s1 + $0x380] ss:$8 sps:$4 sm:$0xff]  }
  0xa9   :  { %18366 = vmatprep.subr.bf16.mxu0 %v23690_v57  ;;  %v23776_v57 = vld [vmem:[%s36414_s1 + $0x2c80] ss:$8 sps:$4 sm:$0xff]  }
  0xab   :  { %16686 = vmatpush1.bf16.msra.mxu1 %v23685_v58  ;;  %v23781_v58 = vld [vmem:[%s36414_s1 + $0x394] ss:$8 sps:$4 sm:$0xff]  }
  0xac   :  { %18367 = vmatpush1.bf16.msra.mxu0 %v23688_v59  ;;  %16687 = vmatprep.subr.bf16.mxu1 %v23693_v60  ;;  %v23784_v59 = vld [vmem:[%s36414_s1 + $0x2c94] ss:$8 sps:$4 sm:$0xff]   ;;  %v23779_v60 = vld [vmem:[%s36414_s1 + $0x390] ss:$8 sps:$4 sm:$0xff]  }
  0xad   :  { %18368 = vmatprep.subr.bf16.mxu0 %v23696_v61  ;;  %v23782_v61 = vld [vmem:[%s36414_s1 + $0x2c90] ss:$8 sps:$4 sm:$0xff]  }
  0xaf   :  { %16688 = vmatpush1.bf16.msra.mxu1 %v23691_v62  ;;  %v23787_v62 = vld [vmem:[%s36414_s1 + $0x3a4] ss:$8 sps:$4 sm:$0xff]  }
  0xb0   :  { %18369 = vmatpush1.bf16.msra.mxu0 %v23694_v63  ;;  %16689 = vmatprep.subr.bf16.mxu1 %v23699_v0  ;;  %v23790_v63 = vld [vmem:[%s36414_s1 + $0x2ca4] ss:$8 sps:$4 sm:$0xff]   ;;  %v23785_v0 = vld [vmem:[%s36414_s1 + $0x3a0] ss:$8 sps:$4 sm:$0xff]  }
  0xb1   :  { %18370 = vmatprep.subr.bf16.mxu0 %v23702_v1  ;;  %v23788_v1 = vld [vmem:[%s36414_s1 + $0x2ca0] ss:$8 sps:$4 sm:$0xff]  }
  0xb3   :  { %16690 = vmatpush1.bf16.msra.mxu1 %v23697_v2  ;;  %v23793_v2 = vld [vmem:[%s36414_s1 + $0x3b4] ss:$8 sps:$4 sm:$0xff]  }
  0xb4   :  { %18371 = vmatpush1.bf16.msra.mxu0 %v23700_v3  ;;  %16691 = vmatprep.subr.bf16.mxu1 %v23705_v4  ;;  %v23796_v3 = vld [vmem:[%s36414_s1 + $0x2cb4] ss:$8 sps:$4 sm:$0xff]   ;;  %v23791_v4 = vld [vmem:[%s36414_s1 + $0x3b0] ss:$8 sps:$4 sm:$0xff]  }
  0xb5   :  { %18372 = vmatprep.subr.bf16.mxu0 %v23708_v5  ;;  %v23794_v5 = vld [vmem:[%s36414_s1 + $0x2cb0] ss:$8 sps:$4 sm:$0xff]  }
  0xb7   :  { %16692 = vmatpush1.bf16.msra.mxu1 %v23703_v6  ;;  %v23799_v6 = vld [vmem:[%s36414_s1 + $0x3c4] ss:$8 sps:$4 sm:$0xff]  }
  0xb8   :  { %18373 = vmatpush1.bf16.msra.mxu0 %v23706_v7  ;;  %16693 = vmatprep.subr.bf16.mxu1 %v23711_v8  ;;  %v23802_v7 = vld [vmem:[%s36414_s1 + $0x2cc4] ss:$8 sps:$4 sm:$0xff]   ;;  %v23797_v8 = vld [vmem:[%s36414_s1 + $0x3c0] ss:$8 sps:$4 sm:$0xff]  }
  0xb9   :  { %18374 = vmatprep.subr.bf16.mxu0 %v23714_v9  ;;  %v23800_v9 = vld [vmem:[%s36414_s1 + $0x2cc0] ss:$8 sps:$4 sm:$0xff]  }
  0xbb   :  { %16694 = vmatpush1.bf16.msra.mxu1 %v23709_v10  ;;  %v23805_v10 = vld [vmem:[%s36414_s1 + $0x3d4] ss:$8 sps:$4 sm:$0xff]  }
  0xbc   :  { %18375 = vmatpush1.bf16.msra.mxu0 %v23712_v11  ;;  %16695 = vmatprep.subr.bf16.mxu1 %v23717_v12  ;;  %v23808_v11 = vld [vmem:[%s36414_s1 + $0x2cd4] ss:$8 sps:$4 sm:$0xff]   ;;  %v23803_v12 = vld [vmem:[%s36414_s1 + $0x3d0] ss:$8 sps:$4 sm:$0xff]  }
  0xbd   :  { %18376 = vmatprep.subr.bf16.mxu0 %v23720_v13  ;;  %v23806_v13 = vld [vmem:[%s36414_s1 + $0x2cd0] ss:$8 sps:$4 sm:$0xff]  }
  0xbf   :  { %16696 = vmatpush1.bf16.msra.mxu1 %v23715_v14  ;;  %v23811_v14 = vld [vmem:[%s36414_s1 + $0x3e4] ss:$8 sps:$4 sm:$0xff]  }
  0xc0   :  { %18377 = vmatpush1.bf16.msra.mxu0 %v23718_v15  ;;  %16706 = vmatprep.subr.bf16.mxu1 %v23725_v16  ;;  %v23814_v15 = vld [vmem:[%s36414_s1 + $0x2ce4] ss:$8 sps:$4 sm:$0xff]   ;;  %v23809_v16 = vld [vmem:[%s36414_s1 + $0x3e0] ss:$8 sps:$4 sm:$0xff]  }
  0xc1   :  { %18387 = vmatprep.subr.bf16.mxu0 %v23730_v17  ;;  %v23812_v17 = vld [vmem:[%s36414_s1 + $0x2ce0] ss:$8 sps:$4 sm:$0xff]  }
  0xc2   :  { %16698 = vmatmul.mubr.bf16.vlgmr.msra.gmra.mrb[0].mxu1 %v20217_v22  ;;  %v23815_v22 = vld [vmem:[%s36414_s1 + $0x3f0] ss:$8 sps:$4 sm:$0xff]  }
  0xc3   :  { %18379 = vmatmul.mubr.bf16.vlgmr.msra.gmra.mrb[0].mxu0 %v20299_v23  ;;  %16707 = vmatpush1.bf16.msra.mxu1 %v23723_v19  ;;  %v23817_v19 = vld [vmem:[%s36414_s1 + $0x3f4] ss:$8 sps:$4 sm:$0xff]   ;;  %v23818_v23 = vld [vmem:[%s36414_s1 + $0x2cf0] ss:$8 sps:$4 sm:$0xff]  }
  0xc4   :  { %18388 = vmatpush1.bf16.msra.mxu0 %v23728_v21  ;;  %16708 = vmatprep.subr.bf16.mxu1 %v23733_v26  ;;  %v23820_v21 = vld [vmem:[%s36414_s1 + $0x2cf4] ss:$8 sps:$4 sm:$0xff]   ;;  %v23825_v26 = vld [vmem:[%s36414_s1 + $0x404] ss:$8 sps:$4 sm:$0xff]  }
  0xc5   :  { %18389 = vmatprep.subr.bf16.mxu0 %v23736_v18  ;;  %16738 = vmatprep.mubr.bf16.mxu1 %v20220_v20  ;;  %v23830_v18 = vld [vmem:[%s36414_s1 + $0x2d04] ss:$8 sps:$4 sm:$0xff]  }
  0xc6   :  { %18419 = vmatprep.mubr.bf16.mxu0 %v20302_v27  ;;  %v28465_v20 = vld [vmem:[%s36413_s0 + $0x20] sm:$0xff]  ;;  %v20219_v27 = vcombine.low %v28265_v24, %v28265_v24  ;;  %v23833_v24 = vld [vmem:[%s36414_s1 + $0x414] ss:$8 sps:$4 sm:$0xff]  }
  0xc7   :  { %16709 = vmatpush1.bf16.msra.mxu1 %v23731_v28  ;;  %v20301_v28 = vcombine.low %v28270_v25, %v28270_v25  ;;  %v23836_v25 = vld [vmem:[%s36414_s1 + $0x2d14] ss:$8 sps:$4 sm:$0xff]  }
  0xc8   :  { %18390 = vmatpush1.bf16.msra.mxu0 %v23734_v29  ;;  %16710 = vmatprep.subr.bf16.mxu1 %v23739_v30  ;;  %v28474_v29 = vld [vmem:[%s36413_s0 + $0x168] sm:$0xff] }
  0xc9   :  { %18391 = vmatprep.subr.bf16.mxu0 %v23742_v31  ;;  %v23823_v30 = vld [vmem:[%s36414_s1 + $0x400] ss:$8 sps:$4 sm:$0xff]  }
  0xca   :  { %v23828_v31 = vld [vmem:[%s36414_s1 + $0x2d00] ss:$8 sps:$4 sm:$0xff]  }
  0xcb   :  { %16711 = vmatpush1.bf16.msra.mxu1 %v23737_v32  ;;  %v20222_v32 = vcombine.high %v28465_v20, %v28465_v20 }
  0xcc   :  { %18392 = vmatpush1.bf16.msra.mxu0 %v23740_v33  ;;  %16712 = vmatprep.subr.bf16.mxu1 %v23745_v34  ;;  %v20304_v33 = vcombine.high %v28474_v29, %v28474_v29  ;;  %v23831_v34 = vld [vmem:[%s36414_s1 + $0x410] ss:$8 sps:$4 sm:$0xff]  }
  0xcd   :  { %18393 = vmatprep.subr.bf16.mxu0 %v23748_v35  ;;  %v23834_v35 = vld [vmem:[%s36414_s1 + $0x2d10] ss:$8 sps:$4 sm:$0xff]  }
  0xcf   :  { %16713 = vmatpush1.bf16.msra.mxu1 %v23743_v36  ;;  %v23839_v36 = vld [vmem:[%s36414_s1 + $0x424] ss:$8 sps:$4 sm:$0xff]  }
  0xd0   :  { %18394 = vmatpush1.bf16.msra.mxu0 %v23746_v37  ;;  %16714 = vmatprep.subr.bf16.mxu1 %v23751_v38  ;;  %v23842_v37 = vld [vmem:[%s36414_s1 + $0x2d24] ss:$8 sps:$4 sm:$0xff]   ;;  %v23837_v38 = vld [vmem:[%s36414_s1 + $0x420] ss:$8 sps:$4 sm:$0xff]  }
  0xd1   :  { %18395 = vmatprep.subr.bf16.mxu0 %v23754_v39  ;;  %v23840_v39 = vld [vmem:[%s36414_s1 + $0x2d20] ss:$8 sps:$4 sm:$0xff]  }
  0xd3   :  { %16715 = vmatpush1.bf16.msra.mxu1 %v23749_v40  ;;  %v23845_v40 = vld [vmem:[%s36414_s1 + $0x434] ss:$8 sps:$4 sm:$0xff]  }
  0xd4   :  { %18396 = vmatpush1.bf16.msra.mxu0 %v23752_v41  ;;  %16716 = vmatprep.subr.bf16.mxu1 %v23757_v42  ;;  %v23848_v41 = vld [vmem:[%s36414_s1 + $0x2d34] ss:$8 sps:$4 sm:$0xff]   ;;  %v23843_v42 = vld [vmem:[%s36414_s1 + $0x430] ss:$8 sps:$4 sm:$0xff]  }
  0xd5   :  { %18397 = vmatprep.subr.bf16.mxu0 %v23760_v43  ;;  %v23846_v43 = vld [vmem:[%s36414_s1 + $0x2d30] ss:$8 sps:$4 sm:$0xff]  }
  0xd7   :  { %16717 = vmatpush1.bf16.msra.mxu1 %v23755_v44  ;;  %v23851_v44 = vld [vmem:[%s36414_s1 + $0x444] ss:$8 sps:$4 sm:$0xff]  }
  0xd8   :  { %18398 = vmatpush1.bf16.msra.mxu0 %v23758_v45  ;;  %16718 = vmatprep.subr.bf16.mxu1 %v23763_v46  ;;  %v23854_v45 = vld [vmem:[%s36414_s1 + $0x2d44] ss:$8 sps:$4 sm:$0xff]   ;;  %v23849_v46 = vld [vmem:[%s36414_s1 + $0x440] ss:$8 sps:$4 sm:$0xff]  }
  0xd9   :  { %18399 = vmatprep.subr.bf16.mxu0 %v23766_v47  ;;  %v23852_v47 = vld [vmem:[%s36414_s1 + $0x2d40] ss:$8 sps:$4 sm:$0xff]  }
  0xdb   :  { %16719 = vmatpush1.bf16.msra.mxu1 %v23761_v48  ;;  %v23857_v48 = vld [vmem:[%s36414_s1 + $0x454] ss:$8 sps:$4 sm:$0xff]  }
  0xdc   :  { %18400 = vmatpush1.bf16.msra.mxu0 %v23764_v49  ;;  %16720 = vmatprep.subr.bf16.mxu1 %v23769_v50  ;;  %v23860_v49 = vld [vmem:[%s36414_s1 + $0x2d54] ss:$8 sps:$4 sm:$0xff]   ;;  %v23855_v50 = vld [vmem:[%s36414_s1 + $0x450] ss:$8 sps:$4 sm:$0xff]  }
  0xdd   :  { %18401 = vmatprep.subr.bf16.mxu0 %v23772_v51  ;;  %v23858_v51 = vld [vmem:[%s36414_s1 + $0x2d50] ss:$8 sps:$4 sm:$0xff]  }
  0xdf   :  { %16721 = vmatpush1.bf16.msra.mxu1 %v23767_v52  ;;  %v23863_v52 = vld [vmem:[%s36414_s1 + $0x464] ss:$8 sps:$4 sm:$0xff]  }
  0xe0   :  { %18402 = vmatpush1.bf16.msra.mxu0 %v23770_v53  ;;  %16722 = vmatprep.subr.bf16.mxu1 %v23775_v54  ;;  %v23866_v53 = vld [vmem:[%s36414_s1 + $0x2d64] ss:$8 sps:$4 sm:$0xff]   ;;  %v23861_v54 = vld [vmem:[%s36414_s1 + $0x460] ss:$8 sps:$4 sm:$0xff]  }
  0xe1   :  { %18403 = vmatprep.subr.bf16.mxu0 %v23778_v55  ;;  %v23864_v55 = vld [vmem:[%s36414_s1 + $0x2d60] ss:$8 sps:$4 sm:$0xff]  }
  0xe3   :  { %16723 = vmatpush1.bf16.msra.mxu1 %v23773_v56  ;;  %v23869_v56 = vld [vmem:[%s36414_s1 + $0x474] ss:$8 sps:$4 sm:$0xff]  }
  0xe4   :  { %18404 = vmatpush1.bf16.msra.mxu0 %v23776_v57  ;;  %16724 = vmatprep.subr.bf16.mxu1 %v23781_v58  ;;  %v23872_v57 = vld [vmem:[%s36414_s1 + $0x2d74] ss:$8 sps:$4 sm:$0xff]   ;;  %v23867_v58 = vld [vmem:[%s36414_s1 + $0x470] ss:$8 sps:$4 sm:$0xff]  }
  0xe5   :  { %18405 = vmatprep.subr.bf16.mxu0 %v23784_v59  ;;  %v23870_v59 = vld [vmem:[%s36414_s1 + $0x2d70] ss:$8 sps:$4 sm:$0xff]  }
  0xe7   :  { %16725 = vmatpush1.bf16.msra.mxu1 %v23779_v60  ;;  %v23875_v60 = vld [vmem:[%s36414_s1 + $0x484] ss:$8 sps:$4 sm:$0xff]  }
  0xe8   :  { %18406 = vmatpush1.bf16.msra.mxu0 %v23782_v61  ;;  %16726 = vmatprep.subr.bf16.mxu1 %v23787_v62  ;;  %v23878_v61 = vld [vmem:[%s36414_s1 + $0x2d84] ss:$8 sps:$4 sm:$0xff]   ;;  %v23873_v62 = vld [vmem:[%s36414_s1 + $0x480] ss:$8 sps:$4 sm:$0xff]  }
  0xe9   :  { %18407 = vmatprep.subr.bf16.mxu0 %v23790_v63  ;;  %v23876_v63 = vld [vmem:[%s36414_s1 + $0x2d80] ss:$8 sps:$4 sm:$0xff]  }
  0xeb   :  { %16727 = vmatpush1.bf16.msra.mxu1 %v23785_v0  ;;  %v23881_v0 = vld [vmem:[%s36414_s1 + $0x494] ss:$8 sps:$4 sm:$0xff]  }
  0xec   :  { %18408 = vmatpush1.bf16.msra.mxu0 %v23788_v1  ;;  %16728 = vmatprep.subr.bf16.mxu1 %v23793_v2  ;;  %v23884_v1 = vld [vmem:[%s36414_s1 + $0x2d94] ss:$8 sps:$4 sm:$0xff]   ;;  %v23879_v2 = vld [vmem:[%s36414_s1 + $0x490] ss:$8 sps:$4 sm:$0xff]  }
  0xed   :  { %18409 = vmatprep.subr.bf16.mxu0 %v23796_v3  ;;  %v23882_v3 = vld [vmem:[%s36414_s1 + $0x2d90] ss:$8 sps:$4 sm:$0xff]  }
  0xef   :  { %16729 = vmatpush1.bf16.msra.mxu1 %v23791_v4  ;;  %v23887_v4 = vld [vmem:[%s36414_s1 + $0x4a4] ss:$8 sps:$4 sm:$0xff]  }
  0xf0   :  { %18410 = vmatpush1.bf16.msra.mxu0 %v23794_v5  ;;  %16730 = vmatprep.subr.bf16.mxu1 %v23799_v6  ;;  %v23890_v5 = vld [vmem:[%s36414_s1 + $0x2da4] ss:$8 sps:$4 sm:$0xff]   ;;  %v23885_v6 = vld [vmem:[%s36414_s1 + $0x4a0] ss:$8 sps:$4 sm:$0xff]  }
  0xf1   :  { %18411 = vmatprep.subr.bf16.mxu0 %v23802_v7  ;;  %v23888_v7 = vld [vmem:[%s36414_s1 + $0x2da0] ss:$8 sps:$4 sm:$0xff]  }
  0xf3   :  { %16731 = vmatpush1.bf16.msra.mxu1 %v23797_v8  ;;  %v23893_v8 = vld [vmem:[%s36414_s1 + $0x4b4] ss:$8 sps:$4 sm:$0xff]  }
  0xf4   :  { %18412 = vmatpush1.bf16.msra.mxu0 %v23800_v9  ;;  %16732 = vmatprep.subr.bf16.mxu1 %v23805_v10  ;;  %v23896_v9 = vld [vmem:[%s36414_s1 + $0x2db4] ss:$8 sps:$4 sm:$0xff]   ;;  %v23891_v10 = vld [vmem:[%s36414_s1 + $0x4b0] ss:$8 sps:$4 sm:$0xff]  }
  0xf5   :  { %18413 = vmatprep.subr.bf16.mxu0 %v23808_v11  ;;  %v23894_v11 = vld [vmem:[%s36414_s1 + $0x2db0] ss:$8 sps:$4 sm:$0xff]  }
  0xf7   :  { %16733 = vmatpush1.bf16.msra.mxu1 %v23803_v12  ;;  %v23899_v12 = vld [vmem:[%s36414_s1 + $0x4c4] ss:$8 sps:$4 sm:$0xff]  }
  0xf8   :  { %18414 = vmatpush1.bf16.msra.mxu0 %v23806_v13  ;;  %16734 = vmatprep.subr.bf16.mxu1 %v23811_v14  ;;  %v23902_v13 = vld [vmem:[%s36414_s1 + $0x2dc4] ss:$8 sps:$4 sm:$0xff]   ;;  %v23897_v14 = vld [vmem:[%s36414_s1 + $0x4c0] ss:$8 sps:$4 sm:$0xff]  }
  0xf9   :  { %18415 = vmatprep.subr.bf16.mxu0 %v23814_v15  ;;  %v23900_v15 = vld [vmem:[%s36414_s1 + $0x2dc0] ss:$8 sps:$4 sm:$0xff]  }
  0xfb   :  { %16735 = vmatpush1.bf16.msra.mxu1 %v23809_v16  ;;  %v23905_v16 = vld [vmem:[%s36414_s1 + $0x4d4] ss:$8 sps:$4 sm:$0xff]  }
  0xfc   :  { %18416 = vmatpush1.bf16.msra.mxu0 %v23812_v17  ;;  %16736 = vmatprep.subr.bf16.mxu1 %v23817_v19  ;;  %v23908_v17 = vld [vmem:[%s36414_s1 + $0x2dd4] ss:$8 sps:$4 sm:$0xff]   ;;  %v23903_v19 = vld [vmem:[%s36414_s1 + $0x4d0] ss:$8 sps:$4 sm:$0xff]  }
  0xfd   :  { %18417 = vmatprep.subr.bf16.mxu0 %v23820_v21  ;;  %v23906_v21 = vld [vmem:[%s36414_s1 + $0x2dd0] ss:$8 sps:$4 sm:$0xff]  }
  0xff   :  { %16737 = vmatpush1.bf16.msra.mxu1 %v23815_v22  ;;  %v23911_v22 = vld [vmem:[%s36414_s1 + $0x4e4] ss:$8 sps:$4 sm:$0xff]  }
 0x100   :  { %18418 = vmatpush1.bf16.msra.mxu0 %v23818_v23  ;;  %16747 = vmatprep.subr.bf16.mxu1 %v23825_v26  ;;  %v23914_v23 = vld [vmem:[%s36414_s1 + $0x2de4] ss:$8 sps:$4 sm:$0xff]   ;;  %v23909_v26 = vld [vmem:[%s36414_s1 + $0x4e0] ss:$8 sps:$4 sm:$0xff]  }
 0x101   :  { %18428 = vmatprep.subr.bf16.mxu0 %v23830_v18  ;;  %v23912_v18 = vld [vmem:[%s36414_s1 + $0x2de0] ss:$8 sps:$4 sm:$0xff]  }
 0x102   :  { %16739 = vmatmul.mubr.bf16.vlgmr.msra.gmra.mrb[0].mxu1 %v20219_v27  ;;  %v23917_v27 = vld [vmem:[%s36414_s1 + $0x4f4] ss:$8 sps:$4 sm:$0xff]  }
 0x103   :  { %18420 = vmatmul.mubr.bf16.vlgmr.msra.gmra.mrb[0].mxu0 %v20301_v28  ;;  %16748 = vmatpush1.bf16.msra.mxu1 %v23823_v30  ;;  %v23920_v28 = vld [vmem:[%s36414_s1 + $0x2df4] ss:$8 sps:$4 sm:$0xff]   ;;  %v23915_v30 = vld [vmem:[%s36414_s1 + $0x4f0] ss:$8 sps:$4 sm:$0xff]  }
 0x104   :  { %18429 = vmatpush1.bf16.msra.mxu0 %v23828_v31  ;;  %16749 = vmatprep.subr.bf16.mxu1 %v23833_v24  ;;  %v23918_v31 = vld [vmem:[%s36414_s1 + $0x2df0] ss:$8 sps:$4 sm:$0xff]   ;;  %v23925_v24 = vld [vmem:[%s36414_s1 + $0x504] ss:$8 sps:$4 sm:$0xff]  }
 0x105   :  { %18430 = vmatprep.subr.bf16.mxu0 %v23836_v25  ;;  %16779 = vmatprep.mubr.bf16.mxu1 %v20222_v32  ;;  %v23930_v25 = vld [vmem:[%s36414_s1 + $0x2e04] ss:$8 sps:$4 sm:$0xff]  }
 0x106   :  { %18460 = vmatprep.mubr.bf16.mxu0 %v20304_v33  ;;  %v28675_v32 = vld [vmem:[%s36413_s0 + $0x28] sm:$0xff]  ;;  %v28680_v33 = vld [vmem:[%s36413_s0 + $0x170] sm:$0xff] }
 0x107   :  { %16750 = vmatpush1.bf16.msra.mxu1 %v23831_v34  ;;  %v20221_v34 = vcombine.low %v28465_v20, %v28465_v20  ;;  %v23936_v20 = vld [vmem:[%s36414_s1 + $0x2e14] ss:$8 sps:$4 sm:$0xff]  }
 0x108   :  { %18431 = vmatpush1.bf16.msra.mxu0 %v23834_v35  ;;  %16751 = vmatprep.subr.bf16.mxu1 %v23839_v36  ;;  %v20303_v35 = vcombine.low %v28474_v29, %v28474_v29  ;;  %v23923_v36 = vld [vmem:[%s36414_s1 + $0x500] ss:$8 sps:$4 sm:$0xff]   ;;  %v20224_v29 = vcombine.high %v28675_v32, %v28675_v32 }
 0x109   :  { %18432 = vmatprep.subr.bf16.mxu0 %v23842_v37  ;;  %v23928_v37 = vld [vmem:[%s36414_s1 + $0x2e00] ss:$8 sps:$4 sm:$0xff]  }
 0x10b   :  { %16752 = vmatpush1.bf16.msra.mxu1 %v23837_v38  ;;  %v23933_v38 = vld [vmem:[%s36414_s1 + $0x514] ss:$8 sps:$4 sm:$0xff]  }
 0x10c   :  { %18433 = vmatpush1.bf16.msra.mxu0 %v23840_v39  ;;  %16753 = vmatprep.subr.bf16.mxu1 %v23845_v40  ;;  %v20306_v39 = vcombine.high %v28680_v33, %v28680_v33  ;;  %v23931_v40 = vld [vmem:[%s36414_s1 + $0x510] ss:$8 sps:$4 sm:$0xff]  }
 0x10d   :  { %18434 = vmatprep.subr.bf16.mxu0 %v23848_v41  ;;  %v23934_v41 = vld [vmem:[%s36414_s1 + $0x2e10] ss:$8 sps:$4 sm:$0xff]  }
 0x10f   :  { %16754 = vmatpush1.bf16.msra.mxu1 %v23843_v42  ;;  %v23939_v42 = vld [vmem:[%s36414_s1 + $0x524] ss:$8 sps:$4 sm:$0xff]  }
 0x110   :  { %18435 = vmatpush1.bf16.msra.mxu0 %v23846_v43  ;;  %16755 = vmatprep.subr.bf16.mxu1 %v23851_v44  ;;  %v23942_v43 = vld [vmem:[%s36414_s1 + $0x2e24] ss:$8 sps:$4 sm:$0xff]   ;;  %v23937_v44 = vld [vmem:[%s36414_s1 + $0x520] ss:$8 sps:$4 sm:$0xff]  }
 0x111   :  { %18436 = vmatprep.subr.bf16.mxu0 %v23854_v45  ;;  %v23940_v45 = vld [vmem:[%s36414_s1 + $0x2e20] ss:$8 sps:$4 sm:$0xff]  }
 0x113   :  { %16756 = vmatpush1.bf16.msra.mxu1 %v23849_v46  ;;  %v23945_v46 = vld [vmem:[%s36414_s1 + $0x534] ss:$8 sps:$4 sm:$0xff]  }
 0x114   :  { %18437 = vmatpush1.bf16.msra.mxu0 %v23852_v47  ;;  %16757 = vmatprep.subr.bf16.mxu1 %v23857_v48  ;;  %v23948_v47 = vld [vmem:[%s36414_s1 + $0x2e34] ss:$8 sps:$4 sm:$0xff]   ;;  %v23943_v48 = vld [vmem:[%s36414_s1 + $0x530] ss:$8 sps:$4 sm:$0xff]  }
 0x115   :  { %18438 = vmatprep.subr.bf16.mxu0 %v23860_v49  ;;  %v23946_v49 = vld [vmem:[%s36414_s1 + $0x2e30] ss:$8 sps:$4 sm:$0xff]  }
 0x117   :  { %16758 = vmatpush1.bf16.msra.mxu1 %v23855_v50  ;;  %v23951_v50 = vld [vmem:[%s36414_s1 + $0x544] ss:$8 sps:$4 sm:$0xff]  }
 0x118   :  { %18439 = vmatpush1.bf16.msra.mxu0 %v23858_v51  ;;  %16759 = vmatprep.subr.bf16.mxu1 %v23863_v52  ;;  %v23954_v51 = vld [vmem:[%s36414_s1 + $0x2e44] ss:$8 sps:$4 sm:$0xff]   ;;  %v23949_v52 = vld [vmem:[%s36414_s1 + $0x540] ss:$8 sps:$4 sm:$0xff]  }
 0x119   :  { %18440 = vmatprep.subr.bf16.mxu0 %v23866_v53  ;;  %v23952_v53 = vld [vmem:[%s36414_s1 + $0x2e40] ss:$8 sps:$4 sm:$0xff]  }
 0x11b   :  { %16760 = vmatpush1.bf16.msra.mxu1 %v23861_v54  ;;  %v23957_v54 = vld [vmem:[%s36414_s1 + $0x554] ss:$8 sps:$4 sm:$0xff]  }
 0x11c   :  { %18441 = vmatpush1.bf16.msra.mxu0 %v23864_v55  ;;  %16761 = vmatprep.subr.bf16.mxu1 %v23869_v56  ;;  %v23960_v55 = vld [vmem:[%s36414_s1 + $0x2e54] ss:$8 sps:$4 sm:$0xff]   ;;  %v23955_v56 = vld [vmem:[%s36414_s1 + $0x550] ss:$8 sps:$4 sm:$0xff]  }
 0x11d   :  { %18442 = vmatprep.subr.bf16.mxu0 %v23872_v57  ;;  %v23958_v57 = vld [vmem:[%s36414_s1 + $0x2e50] ss:$8 sps:$4 sm:$0xff]  }
 0x11f   :  { %16762 = vmatpush1.bf16.msra.mxu1 %v23867_v58  ;;  %v23963_v58 = vld [vmem:[%s36414_s1 + $0x564] ss:$8 sps:$4 sm:$0xff]  }
 0x120   :  { %18443 = vmatpush1.bf16.msra.mxu0 %v23870_v59  ;;  %16763 = vmatprep.subr.bf16.mxu1 %v23875_v60  ;;  %v23966_v59 = vld [vmem:[%s36414_s1 + $0x2e64] ss:$8 sps:$4 sm:$0xff]   ;;  %v23961_v60 = vld [vmem:[%s36414_s1 + $0x560] ss:$8 sps:$4 sm:$0xff]  }
 0x121   :  { %18444 = vmatprep.subr.bf16.mxu0 %v23878_v61  ;;  %v23964_v61 = vld [vmem:[%s36414_s1 + $0x2e60] ss:$8 sps:$4 sm:$0xff]  }
 0x123   :  { %16764 = vmatpush1.bf16.msra.mxu1 %v23873_v62  ;;  %v23969_v62 = vld [vmem:[%s36414_s1 + $0x574] ss:$8 sps:$4 sm:$0xff]  }
 0x124   :  { %18445 = vmatpush1.bf16.msra.mxu0 %v23876_v63  ;;  %16765 = vmatprep.subr.bf16.mxu1 %v23881_v0  ;;  %v23972_v63 = vld [vmem:[%s36414_s1 + $0x2e74] ss:$8 sps:$4 sm:$0xff]   ;;  %v23967_v0 = vld [vmem:[%s36414_s1 + $0x570] ss:$8 sps:$4 sm:$0xff]  }
 0x125   :  { %18446 = vmatprep.subr.bf16.mxu0 %v23884_v1  ;;  %v23970_v1 = vld [vmem:[%s36414_s1 + $0x2e70] ss:$8 sps:$4 sm:$0xff]  }
 0x127   :  { %16766 = vmatpush1.bf16.msra.mxu1 %v23879_v2  ;;  %v23975_v2 = vld [vmem:[%s36414_s1 + $0x584] ss:$8 sps:$4 sm:$0xff]  }
 0x128   :  { %18447 = vmatpush1.bf16.msra.mxu0 %v23882_v3  ;;  %16767 = vmatprep.subr.bf16.mxu1 %v23887_v4  ;;  %v23978_v3 = vld [vmem:[%s36414_s1 + $0x2e84] ss:$8 sps:$4 sm:$0xff]   ;;  %v23973_v4 = vld [vmem:[%s36414_s1 + $0x580] ss:$8 sps:$4 sm:$0xff]  }
 0x129   :  { %18448 = vmatprep.subr.bf16.mxu0 %v23890_v5  ;;  %v23976_v5 = vld [vmem:[%s36414_s1 + $0x2e80] ss:$8 sps:$4 sm:$0xff]  }
 0x12b   :  { %16768 = vmatpush1.bf16.msra.mxu1 %v23885_v6  ;;  %v23981_v6 = vld [vmem:[%s36414_s1 + $0x594] ss:$8 sps:$4 sm:$0xff]  }
 0x12c   :  { %18449 = vmatpush1.bf16.msra.mxu0 %v23888_v7  ;;  %16769 = vmatprep.subr.bf16.mxu1 %v23893_v8  ;;  %v23984_v7 = vld [vmem:[%s36414_s1 + $0x2e94] ss:$8 sps:$4 sm:$0xff]   ;;  %v23979_v8 = vld [vmem:[%s36414_s1 + $0x590] ss:$8 sps:$4 sm:$0xff]  }
 0x12d   :  { %18450 = vmatprep.subr.bf16.mxu0 %v23896_v9  ;;  %v23982_v9 = vld [vmem:[%s36414_s1 + $0x2e90] ss:$8 sps:$4 sm:$0xff]  }
 0x12f   :  { %16770 = vmatpush1.bf16.msra.mxu1 %v23891_v10  ;;  %v23987_v10 = vld [vmem:[%s36414_s1 + $0x5a4] ss:$8 sps:$4 sm:$0xff]  }
 0x130   :  { %18451 = vmatpush1.bf16.msra.mxu0 %v23894_v11  ;;  %16771 = vmatprep.subr.bf16.mxu1 %v23899_v12  ;;  %v23990_v11 = vld [vmem:[%s36414_s1 + $0x2ea4] ss:$8 sps:$4 sm:$0xff]   ;;  %v23985_v12 = vld [vmem:[%s36414_s1 + $0x5a0] ss:$8 sps:$4 sm:$0xff]  }
 0x131   :  { %18452 = vmatprep.subr.bf16.mxu0 %v23902_v13  ;;  %v23988_v13 = vld [vmem:[%s36414_s1 + $0x2ea0] ss:$8 sps:$4 sm:$0xff]  }
 0x133   :  { %16772 = vmatpush1.bf16.msra.mxu1 %v23897_v14  ;;  %v23993_v14 = vld [vmem:[%s36414_s1 + $0x5b4] ss:$8 sps:$4 sm:$0xff]  }
 0x134   :  { %18453 = vmatpush1.bf16.msra.mxu0 %v23900_v15  ;;  %16773 = vmatprep.subr.bf16.mxu1 %v23905_v16  ;;  %v23996_v15 = vld [vmem:[%s36414_s1 + $0x2eb4] ss:$8 sps:$4 sm:$0xff]   ;;  %v23991_v16 = vld [vmem:[%s36414_s1 + $0x5b0] ss:$8 sps:$4 sm:$0xff]  }
 0x135   :  { %18454 = vmatprep.subr.bf16.mxu0 %v23908_v17  ;;  %v23994_v17 = vld [vmem:[%s36414_s1 + $0x2eb0] ss:$8 sps:$4 sm:$0xff]  }
 0x137   :  { %16774 = vmatpush1.bf16.msra.mxu1 %v23903_v19  ;;  %v23999_v19 = vld [vmem:[%s36414_s1 + $0x5c4] ss:$8 sps:$4 sm:$0xff]  }
 0x138   :  { %18455 = vmatpush1.bf16.msra.mxu0 %v23906_v21  ;;  %16775 = vmatprep.subr.bf16.mxu1 %v23911_v22  ;;  %v24002_v21 = vld [vmem:[%s36414_s1 + $0x2ec4] ss:$8 sps:$4 sm:$0xff]   ;;  %v23997_v22 = vld [vmem:[%s36414_s1 + $0x5c0] ss:$8 sps:$4 sm:$0xff]  }
 0x139   :  { %18456 = vmatprep.subr.bf16.mxu0 %v23914_v23  ;;  %v24000_v23 = vld [vmem:[%s36414_s1 + $0x2ec0] ss:$8 sps:$4 sm:$0xff]  }
 0x13b   :  { %16776 = vmatpush1.bf16.msra.mxu1 %v23909_v26  ;;  %v24005_v26 = vld [vmem:[%s36414_s1 + $0x5d4] ss:$8 sps:$4 sm:$0xff]  }
 0x13c   :  { %18457 = vmatpush1.bf16.msra.mxu0 %v23912_v18  ;;  %16777 = vmatprep.subr.bf16.mxu1 %v23917_v27  ;;  %v24008_v18 = vld [vmem:[%s36414_s1 + $0x2ed4] ss:$8 sps:$4 sm:$0xff]   ;;  %v24003_v27 = vld [vmem:[%s36414_s1 + $0x5d0] ss:$8 sps:$4 sm:$0xff]  }
 0x13d   :  { %18458 = vmatprep.subr.bf16.mxu0 %v23920_v28  ;;  %v24006_v28 = vld [vmem:[%s36414_s1 + $0x2ed0] ss:$8 sps:$4 sm:$0xff]  }
 0x13f   :  { %16778 = vmatpush1.bf16.msra.mxu1 %v23915_v30  ;;  %v24011_v30 = vld [vmem:[%s36414_s1 + $0x5e4] ss:$8 sps:$4 sm:$0xff]  }
 0x140   :  { %18459 = vmatpush1.bf16.msra.mxu0 %v23918_v31  ;;  %16788 = vmatprep.subr.bf16.mxu1 %v23925_v24  ;;  %v24014_v31 = vld [vmem:[%s36414_s1 + $0x2ee4] ss:$8 sps:$4 sm:$0xff]   ;;  %v24009_v24 = vld [vmem:[%s36414_s1 + $0x5e0] ss:$8 sps:$4 sm:$0xff]  }
 0x141   :  { %18469 = vmatprep.subr.bf16.mxu0 %v23930_v25  ;;  %v24012_v25 = vld [vmem:[%s36414_s1 + $0x2ee0] ss:$8 sps:$4 sm:$0xff]  }
 0x142   :  { %16780 = vmatmul.mubr.bf16.vlgmr.msra.gmra.mrb[0].mxu1 %v20221_v34  ;;  %v24017_v34 = vld [vmem:[%s36414_s1 + $0x5f4] ss:$8 sps:$4 sm:$0xff]  }
 0x143   :  { %18461 = vmatmul.mubr.bf16.vlgmr.msra.gmra.mrb[0].mxu0 %v20303_v35  ;;  %16789 = vmatpush1.bf16.msra.mxu1 %v23923_v36  ;;  %v24020_v35 = vld [vmem:[%s36414_s1 + $0x2ef4] ss:$8 sps:$4 sm:$0xff]   ;;  %v24015_v36 = vld [vmem:[%s36414_s1 + $0x5f0] ss:$8 sps:$4 sm:$0xff]  }
 0x144   :  { %18470 = vmatpush1.bf16.msra.mxu0 %v23928_v37  ;;  %16790 = vmatprep.subr.bf16.mxu1 %v23933_v38  ;;  %v24018_v37 = vld [vmem:[%s36414_s1 + $0x2ef0] ss:$8 sps:$4 sm:$0xff]   ;;  %v24025_v38 = vld [vmem:[%s36414_s1 + $0x604] ss:$8 sps:$4 sm:$0xff]  }
 0x145   :  { %18471 = vmatprep.subr.bf16.mxu0 %v23936_v20  ;;  %16820 = vmatprep.mubr.bf16.mxu1 %v20224_v29  ;;  %v24030_v20 = vld [vmem:[%s36414_s1 + $0x2f04] ss:$8 sps:$4 sm:$0xff]   ;;  %v28885_v29 = vld [vmem:[%s36413_s0 + $0x30] sm:$0xff] }
 0x146   :  { %18501 = vmatprep.mubr.bf16.mxu0 %v20306_v39  ;;  %v28890_v39 = vld [vmem:[%s36413_s0 + $0x178] sm:$0xff] }
 0x147   :  { %16791 = vmatpush1.bf16.msra.mxu1 %v23931_v40  ;;  %v20223_v40 = vcombine.low %v28675_v32, %v28675_v32  ;;  %v24036_v32 = vld [vmem:[%s36414_s1 + $0x2f14] ss:$8 sps:$4 sm:$0xff]  }
 0x148   :  { %18472 = vmatpush1.bf16.msra.mxu0 %v23934_v41  ;;  %16792 = vmatprep.subr.bf16.mxu1 %v23939_v42  ;;  %v20305_v41 = vcombine.low %v28680_v33, %v28680_v33  ;;  %v24023_v42 = vld [vmem:[%s36414_s1 + $0x600] ss:$8 sps:$4 sm:$0xff]   ;;  %v20226_v33 = vcombine.high %v28885_v29, %v28885_v29 }
 0x149   :  { %18473 = vmatprep.subr.bf16.mxu0 %v23942_v43  ;;  %v24028_v43 = vld [vmem:[%s36414_s1 + $0x2f00] ss:$8 sps:$4 sm:$0xff]  }
 0x14b   :  { %16793 = vmatpush1.bf16.msra.mxu1 %v23937_v44  ;;  %v24033_v44 = vld [vmem:[%s36414_s1 + $0x614] ss:$8 sps:$4 sm:$0xff]  }
 0x14c   :  { %18474 = vmatpush1.bf16.msra.mxu0 %v23940_v45  ;;  %16794 = vmatprep.subr.bf16.mxu1 %v23945_v46  ;;  %v20308_v45 = vcombine.high %v28890_v39, %v28890_v39  ;;  %v24031_v46 = vld [vmem:[%s36414_s1 + $0x610] ss:$8 sps:$4 sm:$0xff]  }
 0x14d   :  { %18475 = vmatprep.subr.bf16.mxu0 %v23948_v47  ;;  %v24034_v47 = vld [vmem:[%s36414_s1 + $0x2f10] ss:$8 sps:$4 sm:$0xff]  }
 0x14f   :  { %16795 = vmatpush1.bf16.msra.mxu1 %v23943_v48  ;;  %v24039_v48 = vld [vmem:[%s36414_s1 + $0x624] ss:$8 sps:$4 sm:$0xff]  }
 0x150   :  { %18476 = vmatpush1.bf16.msra.mxu0 %v23946_v49  ;;  %16796 = vmatprep.subr.bf16.mxu1 %v23951_v50  ;;  %v24042_v49 = vld [vmem:[%s36414_s1 + $0x2f24] ss:$8 sps:$4 sm:$0xff]   ;;  %v24037_v50 = vld [vmem:[%s36414_s1 + $0x620] ss:$8 sps:$4 sm:$0xff]  }
 0x151   :  { %18477 = vmatprep.subr.bf16.mxu0 %v23954_v51  ;;  %v24040_v51 = vld [vmem:[%s36414_s1 + $0x2f20] ss:$8 sps:$4 sm:$0xff]  }
 0x153   :  { %16797 = vmatpush1.bf16.msra.mxu1 %v23949_v52  ;;  %v24045_v52 = vld [vmem:[%s36414_s1 + $0x634] ss:$8 sps:$4 sm:$0xff]  }
 0x154   :  { %18478 = vmatpush1.bf16.msra.mxu0 %v23952_v53  ;;  %16798 = vmatprep.subr.bf16.mxu1 %v23957_v54  ;;  %v24048_v53 = vld [vmem:[%s36414_s1 + $0x2f34] ss:$8 sps:$4 sm:$0xff]   ;;  %v24043_v54 = vld [vmem:[%s36414_s1 + $0x630] ss:$8 sps:$4 sm:$0xff]  }
 0x155   :  { %18479 = vmatprep.subr.bf16.mxu0 %v23960_v55  ;;  %v24046_v55 = vld [vmem:[%s36414_s1 + $0x2f30] ss:$8 sps:$4 sm:$0xff]  }
 0x157   :  { %16799 = vmatpush1.bf16.msra.mxu1 %v23955_v56  ;;  %v24051_v56 = vld [vmem:[%s36414_s1 + $0x644] ss:$8 sps:$4 sm:$0xff]  }
 0x158   :  { %18480 = vmatpush1.bf16.msra.mxu0 %v23958_v57  ;;  %16800 = vmatprep.subr.bf16.mxu1 %v23963_v58  ;;  %v24054_v57 = vld [vmem:[%s36414_s1 + $0x2f44] ss:$8 sps:$4 sm:$0xff]   ;;  %v24049_v58 = vld [vmem:[%s36414_s1 + $0x640] ss:$8 sps:$4 sm:$0xff]  }
 0x159   :  { %18481 = vmatprep.subr.bf16.mxu0 %v23966_v59  ;;  %v24052_v59 = vld [vmem:[%s36414_s1 + $0x2f40] ss:$8 sps:$4 sm:$0xff]  }
 0x15b   :  { %16801 = vmatpush1.bf16.msra.mxu1 %v23961_v60  ;;  %v24057_v60 = vld [vmem:[%s36414_s1 + $0x654] ss:$8 sps:$4 sm:$0xff]  }
 0x15c   :  { %18482 = vmatpush1.bf16.msra.mxu0 %v23964_v61  ;;  %16802 = vmatprep.subr.bf16.mxu1 %v23969_v62  ;;  %v24060_v61 = vld [vmem:[%s36414_s1 + $0x2f54] ss:$8 sps:$4 sm:$0xff]   ;;  %v24055_v62 = vld [vmem:[%s36414_s1 + $0x650] ss:$8 sps:$4 sm:$0xff]  }
 0x15d   :  { %18483 = vmatprep.subr.bf16.mxu0 %v23972_v63  ;;  %v24058_v63 = vld [vmem:[%s36414_s1 + $0x2f50] ss:$8 sps:$4 sm:$0xff]  }
 0x15f   :  { %16803 = vmatpush1.bf16.msra.mxu1 %v23967_v0  ;;  %v24063_v0 = vld [vmem:[%s36414_s1 + $0x664] ss:$8 sps:$4 sm:$0xff]  }
 0x160   :  { %18484 = vmatpush1.bf16.msra.mxu0 %v23970_v1  ;;  %16804 = vmatprep.subr.bf16.mxu1 %v23975_v2  ;;  %v24066_v1 = vld [vmem:[%s36414_s1 + $0x2f64] ss:$8 sps:$4 sm:$0xff]   ;;  %v24061_v2 = vld [vmem:[%s36414_s1 + $0x660] ss:$8 sps:$4 sm:$0xff]  }
 0x161   :  { %18485 = vmatprep.subr.bf16.mxu0 %v23978_v3  ;;  %v24064_v3 = vld [vmem:[%s36414_s1 + $0x2f60] ss:$8 sps:$4 sm:$0xff]  }
 0x163   :  { %16805 = vmatpush1.bf16.msra.mxu1 %v23973_v4  ;;  %v24069_v4 = vld [vmem:[%s36414_s1 + $0x674] ss:$8 sps:$4 sm:$0xff]  }
 0x164   :  { %18486 = vmatpush1.bf16.msra.mxu0 %v23976_v5  ;;  %16806 = vmatprep.subr.bf16.mxu1 %v23981_v6  ;;  %v24072_v5 = vld [vmem:[%s36414_s1 + $0x2f74] ss:$8 sps:$4 sm:$0xff]   ;;  %v24067_v6 = vld [vmem:[%s36414_s1 + $0x670] ss:$8 sps:$4 sm:$0xff]  }
 0x165   :  { %18487 = vmatprep.subr.bf16.mxu0 %v23984_v7  ;;  %v24070_v7 = vld [vmem:[%s36414_s1 + $0x2f70] ss:$8 sps:$4 sm:$0xff]  }
 0x167   :  { %16807 = vmatpush1.bf16.msra.mxu1 %v23979_v8  ;;  %v24075_v8 = vld [vmem:[%s36414_s1 + $0x684] ss:$8 sps:$4 sm:$0xff]  }
 0x168   :  { %18488 = vmatpush1.bf16.msra.mxu0 %v23982_v9  ;;  %16808 = vmatprep.subr.bf16.mxu1 %v23987_v10  ;;  %v24078_v9 = vld [vmem:[%s36414_s1 + $0x2f84] ss:$8 sps:$4 sm:$0xff]   ;;  %v24073_v10 = vld [vmem:[%s36414_s1 + $0x680] ss:$8 sps:$4 sm:$0xff]  }
 0x169   :  { %18489 = vmatprep.subr.bf16.mxu0 %v23990_v11  ;;  %v24076_v11 = vld [vmem:[%s36414_s1 + $0x2f80] ss:$8 sps:$4 sm:$0xff]  }
 0x16b   :  { %16809 = vmatpush1.bf16.msra.mxu1 %v23985_v12  ;;  %v24081_v12 = vld [vmem:[%s36414_s1 + $0x694] ss:$8 sps:$4 sm:$0xff]  }
 0x16c   :  { %18490 = vmatpush1.bf16.msra.mxu0 %v23988_v13  ;;  %16810 = vmatprep.subr.bf16.mxu1 %v23993_v14  ;;  %v24084_v13 = vld [vmem:[%s36414_s1 + $0x2f94] ss:$8 sps:$4 sm:$0xff]   ;;  %v24079_v14 = vld [vmem:[%s36414_s1 + $0x690] ss:$8 sps:$4 sm:$0xff]  }
 0x16d   :  { %18491 = vmatprep.subr.bf16.mxu0 %v23996_v15  ;;  %v24082_v15 = vld [vmem:[%s36414_s1 + $0x2f90] ss:$8 sps:$4 sm:$0xff]  }
 0x16f   :  { %16811 = vmatpush1.bf16.msra.mxu1 %v23991_v16  ;;  %v24087_v16 = vld [vmem:[%s36414_s1 + $0x6a4] ss:$8 sps:$4 sm:$0xff]  }
 0x170   :  { %18492 = vmatpush1.bf16.msra.mxu0 %v23994_v17  ;;  %16812 = vmatprep.subr.bf16.mxu1 %v23999_v19  ;;  %v24090_v17 = vld [vmem:[%s36414_s1 + $0x2fa4] ss:$8 sps:$4 sm:$0xff]   ;;  %v24085_v19 = vld [vmem:[%s36414_s1 + $0x6a0] ss:$8 sps:$4 sm:$0xff]  }
 0x171   :  { %18493 = vmatprep.subr.bf16.mxu0 %v24002_v21  ;;  %v24088_v21 = vld [vmem:[%s36414_s1 + $0x2fa0] ss:$8 sps:$4 sm:$0xff]  }
 0x173   :  { %16813 = vmatpush1.bf16.msra.mxu1 %v23997_v22  ;;  %v24093_v22 = vld [vmem:[%s36414_s1 + $0x6b4] ss:$8 sps:$4 sm:$0xff]  }
 0x174   :  { %18494 = vmatpush1.bf16.msra.mxu0 %v24000_v23  ;;  %16814 = vmatprep.subr.bf16.mxu1 %v24005_v26  ;;  %v24096_v23 = vld [vmem:[%s36414_s1 + $0x2fb4] ss:$8 sps:$4 sm:$0xff]   ;;  %v24091_v26 = vld [vmem:[%s36414_s1 + $0x6b0] ss:$8 sps:$4 sm:$0xff]  }
 0x175   :  { %18495 = vmatprep.subr.bf16.mxu0 %v24008_v18  ;;  %v24094_v18 = vld [vmem:[%s36414_s1 + $0x2fb0] ss:$8 sps:$4 sm:$0xff]  }
 0x177   :  { %16815 = vmatpush1.bf16.msra.mxu1 %v24003_v27  ;;  %v24099_v27 = vld [vmem:[%s36414_s1 + $0x6c4] ss:$8 sps:$4 sm:$0xff]  }
 0x178   :  { %18496 = vmatpush1.bf16.msra.mxu0 %v24006_v28  ;;  %16816 = vmatprep.subr.bf16.mxu1 %v24011_v30  ;;  %v24102_v28 = vld [vmem:[%s36414_s1 + $0x2fc4] ss:$8 sps:$4 sm:$0xff]   ;;  %v24097_v30 = vld [vmem:[%s36414_s1 + $0x6c0] ss:$8 sps:$4 sm:$0xff]  }
 0x179   :  { %18497 = vmatprep.subr.bf16.mxu0 %v24014_v31  ;;  %v24100_v31 = vld [vmem:[%s36414_s1 + $0x2fc0] ss:$8 sps:$4 sm:$0xff]  }
 0x17b   :  { %16817 = vmatpush1.bf16.msra.mxu1 %v24009_v24  ;;  %v24105_v24 = vld [vmem:[%s36414_s1 + $0x6d4] ss:$8 sps:$4 sm:$0xff]  }
 0x17c   :  { %18498 = vmatpush1.bf16.msra.mxu0 %v24012_v25  ;;  %16818 = vmatprep.subr.bf16.mxu1 %v24017_v34  ;;  %v24108_v25 = vld [vmem:[%s36414_s1 + $0x2fd4] ss:$8 sps:$4 sm:$0xff]   ;;  %v24103_v34 = vld [vmem:[%s36414_s1 + $0x6d0] ss:$8 sps:$4 sm:$0xff]  }
 0x17d   :  { %18499 = vmatprep.subr.bf16.mxu0 %v24020_v35  ;;  %v24106_v35 = vld [vmem:[%s36414_s1 + $0x2fd0] ss:$8 sps:$4 sm:$0xff]  }
 0x17f   :  { %16819 = vmatpush1.bf16.msra.mxu1 %v24015_v36  ;;  %v24111_v36 = vld [vmem:[%s36414_s1 + $0x6e4] ss:$8 sps:$4 sm:$0xff]  }
 0x180   :  { %18500 = vmatpush1.bf16.msra.mxu0 %v24018_v37  ;;  %16829 = vmatprep.subr.bf16.mxu1 %v24025_v38  ;;  %v24114_v37 = vld [vmem:[%s36414_s1 + $0x2fe4] ss:$8 sps:$4 sm:$0xff]   ;;  %v24109_v38 = vld [vmem:[%s36414_s1 + $0x6e0] ss:$8 sps:$4 sm:$0xff]  }
 0x181   :  { %18510 = vmatprep.subr.bf16.mxu0 %v24030_v20  ;;  %v24112_v20 = vld [vmem:[%s36414_s1 + $0x2fe0] ss:$8 sps:$4 sm:$0xff]  }
 0x182   :  { %16821 = vmatmul.mubr.bf16.vlgmr.msra.gmra.mrb[0].mxu1 %v20223_v40  ;;  %v24117_v40 = vld [vmem:[%s36414_s1 + $0x6f4] ss:$8 sps:$4 sm:$0xff]  }
 0x183   :  { %18502 = vmatmul.mubr.bf16.vlgmr.msra.gmra.mrb[0].mxu0 %v20305_v41  ;;  %16830 = vmatpush1.bf16.msra.mxu1 %v24023_v42  ;;  %v24120_v41 = vld [vmem:[%s36414_s1 + $0x2ff4] ss:$8 sps:$4 sm:$0xff]   ;;  %v24115_v42 = vld [vmem:[%s36414_s1 + $0x6f0] ss:$8 sps:$4 sm:$0xff]  }
 0x184   :  { %18511 = vmatpush1.bf16.msra.mxu0 %v24028_v43  ;;  %16831 = vmatprep.subr.bf16.mxu1 %v24033_v44  ;;  %v24118_v43 = vld [vmem:[%s36414_s1 + $0x2ff0] ss:$8 sps:$4 sm:$0xff]   ;;  %v24125_v44 = vld [vmem:[%s36414_s1 + $0x704] ss:$8 sps:$4 sm:$0xff]  }
 0x185   :  { %18512 = vmatprep.subr.bf16.mxu0 %v24036_v32  ;;  %16861 = vmatprep.mubr.bf16.mxu1 %v20226_v33  ;;  %v24130_v32 = vld [vmem:[%s36414_s1 + $0x3004] ss:$8 sps:$4 sm:$0xff]   ;;  %v29095_v33 = vld [vmem:[%s36413_s0 + $0x38] sm:$0xff] }
 0x186   :  { %18542 = vmatprep.mubr.bf16.mxu0 %v20308_v45  ;;  %v29100_v45 = vld [vmem:[%s36413_s0 + $0x180] sm:$0xff] }
 0x187   :  { %16832 = vmatpush1.bf16.msra.mxu1 %v24031_v46  ;;  %v20225_v46 = vcombine.low %v28885_v29, %v28885_v29  ;;  %v24136_v29 = vld [vmem:[%s36414_s1 + $0x3014] ss:$8 sps:$4 sm:$0xff]  }
 0x188   :  { %18513 = vmatpush1.bf16.msra.mxu0 %v24034_v47  ;;  %16833 = vmatprep.subr.bf16.mxu1 %v24039_v48  ;;  %v20307_v47 = vcombine.low %v28890_v39, %v28890_v39  ;;  %v24123_v48 = vld [vmem:[%s36414_s1 + $0x700] ss:$8 sps:$4 sm:$0xff]   ;;  %v20228_v39 = vcombine.high %v29095_v33, %v29095_v33 }
 0x189   :  { %18514 = vmatprep.subr.bf16.mxu0 %v24042_v49  ;;  %v24128_v49 = vld [vmem:[%s36414_s1 + $0x3000] ss:$8 sps:$4 sm:$0xff]  }
 0x18b   :  { %16834 = vmatpush1.bf16.msra.mxu1 %v24037_v50  ;;  %v24133_v50 = vld [vmem:[%s36414_s1 + $0x714] ss:$8 sps:$4 sm:$0xff]  }
 0x18c   :  { %18515 = vmatpush1.bf16.msra.mxu0 %v24040_v51  ;;  %16835 = vmatprep.subr.bf16.mxu1 %v24045_v52  ;;  %v20310_v51 = vcombine.high %v29100_v45, %v29100_v45  ;;  %v24131_v52 = vld [vmem:[%s36414_s1 + $0x710] ss:$8 sps:$4 sm:$0xff]  }
 0x18d   :  { %18516 = vmatprep.subr.bf16.mxu0 %v24048_v53  ;;  %v24134_v53 = vld [vmem:[%s36414_s1 + $0x3010] ss:$8 sps:$4 sm:$0xff]  }
 0x18f   :  { %16836 = vmatpush1.bf16.msra.mxu1 %v24043_v54  ;;  %v24139_v54 = vld [vmem:[%s36414_s1 + $0x724] ss:$8 sps:$4 sm:$0xff]  }
 0x190   :  { %18517 = vmatpush1.bf16.msra.mxu0 %v24046_v55  ;;  %16837 = vmatprep.subr.bf16.mxu1 %v24051_v56  ;;  %v24142_v55 = vld [vmem:[%s36414_s1 + $0x3024] ss:$8 sps:$4 sm:$0xff]   ;;  %v24137_v56 = vld [vmem:[%s36414_s1 + $0x720] ss:$8 sps:$4 sm:$0xff]  }
 0x191   :  { %18518 = vmatprep.subr.bf16.mxu0 %v24054_v57  ;;  %v24140_v57 = vld [vmem:[%s36414_s1 + $0x3020] ss:$8 sps:$4 sm:$0xff]  }
 0x193   :  { %16838 = vmatpush1.bf16.msra.mxu1 %v24049_v58  ;;  %v24145_v58 = vld [vmem:[%s36414_s1 + $0x734] ss:$8 sps:$4 sm:$0xff]  }
 0x194   :  { %18519 = vmatpush1.bf16.msra.mxu0 %v24052_v59  ;;  %16839 = vmatprep.subr.bf16.mxu1 %v24057_v60  ;;  %v24148_v59 = vld [vmem:[%s36414_s1 + $0x3034] ss:$8 sps:$4 sm:$0xff]   ;;  %v24143_v60 = vld [vmem:[%s36414_s1 + $0x730] ss:$8 sps:$4 sm:$0xff]  }
 0x195   :  { %18520 = vmatprep.subr.bf16.mxu0 %v24060_v61  ;;  %v24146_v61 = vld [vmem:[%s36414_s1 + $0x3030] ss:$8 sps:$4 sm:$0xff]  }
 0x197   :  { %16840 = vmatpush1.bf16.msra.mxu1 %v24055_v62  ;;  %v24151_v62 = vld [vmem:[%s36414_s1 + $0x744] ss:$8 sps:$4 sm:$0xff]  }
 0x198   :  { %18521 = vmatpush1.bf16.msra.mxu0 %v24058_v63  ;;  %16841 = vmatprep.subr.bf16.mxu1 %v24063_v0  ;;  %v24154_v63 = vld [vmem:[%s36414_s1 + $0x3044] ss:$8 sps:$4 sm:$0xff]   ;;  %v24149_v0 = vld [vmem:[%s36414_s1 + $0x740] ss:$8 sps:$4 sm:$0xff]  }
 0x199   :  { %18522 = vmatprep.subr.bf16.mxu0 %v24066_v1  ;;  %v24152_v1 = vld [vmem:[%s36414_s1 + $0x3040] ss:$8 sps:$4 sm:$0xff]  }
 0x19b   :  { %16842 = vmatpush1.bf16.msra.mxu1 %v24061_v2  ;;  %v24157_v2 = vld [vmem:[%s36414_s1 + $0x754] ss:$8 sps:$4 sm:$0xff]  }
 0x19c   :  { %18523 = vmatpush1.bf16.msra.mxu0 %v24064_v3  ;;  %16843 = vmatprep.subr.bf16.mxu1 %v24069_v4  ;;  %v24160_v3 = vld [vmem:[%s36414_s1 + $0x3054] ss:$8 sps:$4 sm:$0xff]   ;;  %v24155_v4 = vld [vmem:[%s36414_s1 + $0x750] ss:$8 sps:$4 sm:$0xff]  }
 0x19d   :  { %18524 = vmatprep.subr.bf16.mxu0 %v24072_v5  ;;  %v24158_v5 = vld [vmem:[%s36414_s1 + $0x3050] ss:$8 sps:$4 sm:$0xff]  }
 0x19f   :  { %16844 = vmatpush1.bf16.msra.mxu1 %v24067_v6  ;;  %v24163_v6 = vld [vmem:[%s36414_s1 + $0x764] ss:$8 sps:$4 sm:$0xff]  }
 0x1a0   :  { %18525 = vmatpush1.bf16.msra.mxu0 %v24070_v7  ;;  %16845 = vmatprep.subr.bf16.mxu1 %v24075_v8  ;;  %v24166_v7 = vld [vmem:[%s36414_s1 + $0x3064] ss:$8 sps:$4 sm:$0xff]   ;;  %v24161_v8 = vld [vmem:[%s36414_s1 + $0x760] ss:$8 sps:$4 sm:$0xff]  }
 0x1a1   :  { %18526 = vmatprep.subr.bf16.mxu0 %v24078_v9  ;;  %v24164_v9 = vld [vmem:[%s36414_s1 + $0x3060] ss:$8 sps:$4 sm:$0xff]  }
 0x1a3   :  { %16846 = vmatpush1.bf16.msra.mxu1 %v24073_v10  ;;  %v24169_v10 = vld [vmem:[%s36414_s1 + $0x774] ss:$8 sps:$4 sm:$0xff]  }
 0x1a4   :  { %18527 = vmatpush1.bf16.msra.mxu0 %v24076_v11  ;;  %16847 = vmatprep.subr.bf16.mxu1 %v24081_v12  ;;  %v24172_v11 = vld [vmem:[%s36414_s1 + $0x3074] ss:$8 sps:$4 sm:$0xff]   ;;  %v24167_v12 = vld [vmem:[%s36414_s1 + $0x770] ss:$8 sps:$4 sm:$0xff]  }
 0x1a5   :  { %18528 = vmatprep.subr.bf16.mxu0 %v24084_v13  ;;  %v24170_v13 = vld [vmem:[%s36414_s1 + $0x3070] ss:$8 sps:$4 sm:$0xff]  }
 0x1a7   :  { %16848 = vmatpush1.bf16.msra.mxu1 %v24079_v14  ;;  %v24175_v14 = vld [vmem:[%s36414_s1 + $0x784] ss:$8 sps:$4 sm:$0xff]  }
 0x1a8   :  { %18529 = vmatpush1.bf16.msra.mxu0 %v24082_v15  ;;  %16849 = vmatprep.subr.bf16.mxu1 %v24087_v16  ;;  %v24178_v15 = vld [vmem:[%s36414_s1 + $0x3084] ss:$8 sps:$4 sm:$0xff]   ;;  %v24173_v16 = vld [vmem:[%s36414_s1 + $0x780] ss:$8 sps:$4 sm:$0xff]  }
 0x1a9   :  { %18530 = vmatprep.subr.bf16.mxu0 %v24090_v17  ;;  %v24176_v17 = vld [vmem:[%s36414_s1 + $0x3080] ss:$8 sps:$4 sm:$0xff]  }
 0x1ab   :  { %16850 = vmatpush1.bf16.msra.mxu1 %v24085_v19  ;;  %v24181_v19 = vld [vmem:[%s36414_s1 + $0x794] ss:$8 sps:$4 sm:$0xff]  }
 0x1ac   :  { %18531 = vmatpush1.bf16.msra.mxu0 %v24088_v21  ;;  %16851 = vmatprep.subr.bf16.mxu1 %v24093_v22  ;;  %v24184_v21 = vld [vmem:[%s36414_s1 + $0x3094] ss:$8 sps:$4 sm:$0xff]   ;;  %v24179_v22 = vld [vmem:[%s36414_s1 + $0x790] ss:$8 sps:$4 sm:$0xff]  }
 0x1ad   :  { %18532 = vmatprep.subr.bf16.mxu0 %v24096_v23  ;;  %v24182_v23 = vld [vmem:[%s36414_s1 + $0x3090] ss:$8 sps:$4 sm:$0xff]  }
 0x1af   :  { %16852 = vmatpush1.bf16.msra.mxu1 %v24091_v26  ;;  %v24187_v26 = vld [vmem:[%s36414_s1 + $0x7a4] ss:$8 sps:$4 sm:$0xff]  }
 0x1b0   :  { %18533 = vmatpush1.bf16.msra.mxu0 %v24094_v18  ;;  %16853 = vmatprep.subr.bf16.mxu1 %v24099_v27  ;;  %v24190_v18 = vld [vmem:[%s36414_s1 + $0x30a4] ss:$8 sps:$4 sm:$0xff]   ;;  %v24185_v27 = vld [vmem:[%s36414_s1 + $0x7a0] ss:$8 sps:$4 sm:$0xff]  }
 0x1b1   :  { %18534 = vmatprep.subr.bf16.mxu0 %v24102_v28  ;;  %v24188_v28 = vld [vmem:[%s36414_s1 + $0x30a0] ss:$8 sps:$4 sm:$0xff]  }
 0x1b3   :  { %16854 = vmatpush1.bf16.msra.mxu1 %v24097_v30  ;;  %v24193_v30 = vld [vmem:[%s36414_s1 + $0x7b4] ss:$8 sps:$4 sm:$0xff]  }
 0x1b4   :  { %18535 = vmatpush1.bf16.msra.mxu0 %v24100_v31  ;;  %16855 = vmatprep.subr.bf16.mxu1 %v24105_v24  ;;  %v24196_v31 = vld [vmem:[%s36414_s1 + $0x30b4] ss:$8 sps:$4 sm:$0xff]   ;;  %v24191_v24 = vld [vmem:[%s36414_s1 + $0x7b0] ss:$8 sps:$4 sm:$0xff]  }
 0x1b5   :  { %18536 = vmatprep.subr.bf16.mxu0 %v24108_v25  ;;  %v24194_v25 = vld [vmem:[%s36414_s1 + $0x30b0] ss:$8 sps:$4 sm:$0xff]  }
 0x1b7   :  { %16856 = vmatpush1.bf16.msra.mxu1 %v24103_v34  ;;  %v24199_v34 = vld [vmem:[%s36414_s1 + $0x7c4] ss:$8 sps:$4 sm:$0xff]  }
 0x1b8   :  { %18537 = vmatpush1.bf16.msra.mxu0 %v24106_v35  ;;  %16857 = vmatprep.subr.bf16.mxu1 %v24111_v36  ;;  %v24202_v35 = vld [vmem:[%s36414_s1 + $0x30c4] ss:$8 sps:$4 sm:$0xff]   ;;  %v24197_v36 = vld [vmem:[%s36414_s1 + $0x7c0] ss:$8 sps:$4 sm:$0xff]  }
 0x1b9   :  { %18538 = vmatprep.subr.bf16.mxu0 %v24114_v37  ;;  %v24200_v37 = vld [vmem:[%s36414_s1 + $0x30c0] ss:$8 sps:$4 sm:$0xff]  }
 0x1bb   :  { %16858 = vmatpush1.bf16.msra.mxu1 %v24109_v38  ;;  %v24205_v38 = vld [vmem:[%s36414_s1 + $0x7d4] ss:$8 sps:$4 sm:$0xff]  }
 0x1bc   :  { %18539 = vmatpush1.bf16.msra.mxu0 %v24112_v20  ;;  %16859 = vmatprep.subr.bf16.mxu1 %v24117_v40  ;;  %v24208_v20 = vld [vmem:[%s36414_s1 + $0x30d4] ss:$8 sps:$4 sm:$0xff]   ;;  %v24203_v40 = vld [vmem:[%s36414_s1 + $0x7d0] ss:$8 sps:$4 sm:$0xff]  }
 0x1bd   :  { %18540 = vmatprep.subr.bf16.mxu0 %v24120_v41  ;;  %v24206_v41 = vld [vmem:[%s36414_s1 + $0x30d0] ss:$8 sps:$4 sm:$0xff]  }
 0x1bf   :  { %16860 = vmatpush1.bf16.msra.mxu1 %v24115_v42  ;;  %v24211_v42 = vld [vmem:[%s36414_s1 + $0x7e4] ss:$8 sps:$4 sm:$0xff]  }
 0x1c0   :  { %18541 = vmatpush1.bf16.msra.mxu0 %v24118_v43  ;;  %16870 = vmatprep.subr.bf16.mxu1 %v24125_v44  ;;  %v24214_v43 = vld [vmem:[%s36414_s1 + $0x30e4] ss:$8 sps:$4 sm:$0xff]   ;;  %v24209_v44 = vld [vmem:[%s36414_s1 + $0x7e0] ss:$8 sps:$4 sm:$0xff]  }
 0x1c1   :  { %18551 = vmatprep.subr.bf16.mxu0 %v24130_v32  ;;  %v24212_v32 = vld [vmem:[%s36414_s1 + $0x30e0] ss:$8 sps:$4 sm:$0xff]  }
 0x1c2   :  { %16862 = vmatmul.mubr.bf16.vlgmr.msra.gmra.mrb[0].mxu1 %v20225_v46  ;;  %v24217_v46 = vld [vmem:[%s36414_s1 + $0x7f4] ss:$8 sps:$4 sm:$0xff]  }
 0x1c3   :  { %18543 = vmatmul.mubr.bf16.vlgmr.msra.gmra.mrb[0].mxu0 %v20307_v47  ;;  %16871 = vmatpush1.bf16.msra.mxu1 %v24123_v48  ;;  %v24220_v47 = vld [vmem:[%s36414_s1 + $0x30f4] ss:$8 sps:$4 sm:$0xff]   ;;  %v24215_v48 = vld [vmem:[%s36414_s1 + $0x7f0] ss:$8 sps:$4 sm:$0xff]  }
 0x1c4   :  { %18552 = vmatpush1.bf16.msra.mxu0 %v24128_v49  ;;  %16872 = vmatprep.subr.bf16.mxu1 %v24133_v50  ;;  %v24218_v49 = vld [vmem:[%s36414_s1 + $0x30f0] ss:$8 sps:$4 sm:$0xff]   ;;  %v24225_v50 = vld [vmem:[%s36414_s1 + $0x804] ss:$8 sps:$4 sm:$0xff]  }
 0x1c5   :  { %18553 = vmatprep.subr.bf16.mxu0 %v24136_v29  ;;  %16902 = vmatprep.mubr.bf16.mxu1 %v20228_v39  ;;  %v24230_v29 = vld [vmem:[%s36414_s1 + $0x3104] ss:$8 sps:$4 sm:$0xff]  }
 0x1c6   :  { %18583 = vmatprep.mubr.bf16.mxu0 %v20310_v51  ;;  %v29305_v39 = vld [vmem:[%s36413_s0 + $0x40] sm:$0xff]  ;;  %v29310_v51 = vld [vmem:[%s36413_s0 + $0x188] sm:$0xff] }
 0x1c7   :  { %16873 = vmatpush1.bf16.msra.mxu1 %v24131_v52  ;;  %v20227_v52 = vcombine.low %v29095_v33, %v29095_v33  ;;  %v24236_v33 = vld [vmem:[%s36414_s1 + $0x3114] ss:$8 sps:$4 sm:$0xff]  }
 0x1c8   :  { %18554 = vmatpush1.bf16.msra.mxu0 %v24134_v53  ;;  %16874 = vmatprep.subr.bf16.mxu1 %v24139_v54  ;;  %v20309_v53 = vcombine.low %v29100_v45, %v29100_v45  ;;  %v24223_v54 = vld [vmem:[%s36414_s1 + $0x800] ss:$8 sps:$4 sm:$0xff]   ;;  %v20230_v45 = vcombine.high %v29305_v39, %v29305_v39 }
 0x1c9   :  { %18555 = vmatprep.subr.bf16.mxu0 %v24142_v55  ;;  %v24228_v55 = vld [vmem:[%s36414_s1 + $0x3100] ss:$8 sps:$4 sm:$0xff]  }
 0x1cb   :  { %16875 = vmatpush1.bf16.msra.mxu1 %v24137_v56  ;;  %v24233_v56 = vld [vmem:[%s36414_s1 + $0x814] ss:$8 sps:$4 sm:$0xff]  }
 0x1cc   :  { %18556 = vmatpush1.bf16.msra.mxu0 %v24140_v57  ;;  %16876 = vmatprep.subr.bf16.mxu1 %v24145_v58  ;;  %v20312_v57 = vcombine.high %v29310_v51, %v29310_v51  ;;  %v24231_v58 = vld [vmem:[%s36414_s1 + $0x810] ss:$8 sps:$4 sm:$0xff]  }
 0x1cd   :  { %18557 = vmatprep.subr.bf16.mxu0 %v24148_v59  ;;  %v24234_v59 = vld [vmem:[%s36414_s1 + $0x3110] ss:$8 sps:$4 sm:$0xff]  }
 0x1cf   :  { %16877 = vmatpush1.bf16.msra.mxu1 %v24143_v60  ;;  %v24239_v60 = vld [vmem:[%s36414_s1 + $0x824] ss:$8 sps:$4 sm:$0xff]  }
 0x1d0   :  { %18558 = vmatpush1.bf16.msra.mxu0 %v24146_v61  ;;  %16878 = vmatprep.subr.bf16.mxu1 %v24151_v62  ;;  %v24242_v61 = vld [vmem:[%s36414_s1 + $0x3124] ss:$8 sps:$4 sm:$0xff]   ;;  %v24237_v62 = vld [vmem:[%s36414_s1 + $0x820] ss:$8 sps:$4 sm:$0xff]  }
 0x1d1   :  { %18559 = vmatprep.subr.bf16.mxu0 %v24154_v63  ;;  %v24240_v63 = vld [vmem:[%s36414_s1 + $0x3120] ss:$8 sps:$4 sm:$0xff]  }
 0x1d3   :  { %16879 = vmatpush1.bf16.msra.mxu1 %v24149_v0  ;;  %v24245_v0 = vld [vmem:[%s36414_s1 + $0x834] ss:$8 sps:$4 sm:$0xff]  }
 0x1d4   :  { %18560 = vmatpush1.bf16.msra.mxu0 %v24152_v1  ;;  %16880 = vmatprep.subr.bf16.mxu1 %v24157_v2  ;;  %v24248_v1 = vld [vmem:[%s36414_s1 + $0x3134] ss:$8 sps:$4 sm:$0xff]   ;;  %v24243_v2 = vld [vmem:[%s36414_s1 + $0x830] ss:$8 sps:$4 sm:$0xff]  }
 0x1d5   :  { %18561 = vmatprep.subr.bf16.mxu0 %v24160_v3  ;;  %v24246_v3 = vld [vmem:[%s36414_s1 + $0x3130] ss:$8 sps:$4 sm:$0xff]  }
 0x1d7   :  { %16881 = vmatpush1.bf16.msra.mxu1 %v24155_v4  ;;  %v24251_v4 = vld [vmem:[%s36414_s1 + $0x844] ss:$8 sps:$4 sm:$0xff]  }
 0x1d8   :  { %18562 = vmatpush1.bf16.msra.mxu0 %v24158_v5  ;;  %16882 = vmatprep.subr.bf16.mxu1 %v24163_v6  ;;  %v24254_v5 = vld [vmem:[%s36414_s1 + $0x3144] ss:$8 sps:$4 sm:$0xff]   ;;  %v24249_v6 = vld [vmem:[%s36414_s1 + $0x840] ss:$8 sps:$4 sm:$0xff]  }
 0x1d9   :  { %18563 = vmatprep.subr.bf16.mxu0 %v24166_v7  ;;  %v24252_v7 = vld [vmem:[%s36414_s1 + $0x3140] ss:$8 sps:$4 sm:$0xff]  }
 0x1db   :  { %16883 = vmatpush1.bf16.msra.mxu1 %v24161_v8  ;;  %v24257_v8 = vld [vmem:[%s36414_s1 + $0x854] ss:$8 sps:$4 sm:$0xff]  }
 0x1dc   :  { %18564 = vmatpush1.bf16.msra.mxu0 %v24164_v9  ;;  %16884 = vmatprep.subr.bf16.mxu1 %v24169_v10  ;;  %v24260_v9 = vld [vmem:[%s36414_s1 + $0x3154] ss:$8 sps:$4 sm:$0xff]   ;;  %v24255_v10 = vld [vmem:[%s36414_s1 + $0x850] ss:$8 sps:$4 sm:$0xff]  }
 0x1dd   :  { %18565 = vmatprep.subr.bf16.mxu0 %v24172_v11  ;;  %v24258_v11 = vld [vmem:[%s36414_s1 + $0x3150] ss:$8 sps:$4 sm:$0xff]  }
 0x1df   :  { %16885 = vmatpush1.bf16.msra.mxu1 %v24167_v12  ;;  %v24263_v12 = vld [vmem:[%s36414_s1 + $0x864] ss:$8 sps:$4 sm:$0xff]  }
 0x1e0   :  { %18566 = vmatpush1.bf16.msra.mxu0 %v24170_v13  ;;  %16886 = vmatprep.subr.bf16.mxu1 %v24175_v14  ;;  %v24266_v13 = vld [vmem:[%s36414_s1 + $0x3164] ss:$8 sps:$4 sm:$0xff]   ;;  %v24261_v14 = vld [vmem:[%s36414_s1 + $0x860] ss:$8 sps:$4 sm:$0xff]  }
 0x1e1   :  { %18567 = vmatprep.subr.bf16.mxu0 %v24178_v15  ;;  %v24264_v15 = vld [vmem:[%s36414_s1 + $0x3160] ss:$8 sps:$4 sm:$0xff]  }
 0x1e3   :  { %16887 = vmatpush1.bf16.msra.mxu1 %v24173_v16  ;;  %v24269_v16 = vld [vmem:[%s36414_s1 + $0x874] ss:$8 sps:$4 sm:$0xff]  }
 0x1e4   :  { %18568 = vmatpush1.bf16.msra.mxu0 %v24176_v17  ;;  %16888 = vmatprep.subr.bf16.mxu1 %v24181_v19  ;;  %v24272_v17 = vld [vmem:[%s36414_s1 + $0x3174] ss:$8 sps:$4 sm:$0xff]   ;;  %v24267_v19 = vld [vmem:[%s36414_s1 + $0x870] ss:$8 sps:$4 sm:$0xff]  }
 0x1e5   :  { %18569 = vmatprep.subr.bf16.mxu0 %v24184_v21  ;;  %v24270_v21 = vld [vmem:[%s36414_s1 + $0x3170] ss:$8 sps:$4 sm:$0xff]  }
 0x1e7   :  { %16889 = vmatpush1.bf16.msra.mxu1 %v24179_v22  ;;  %v24275_v22 = vld [vmem:[%s36414_s1 + $0x884] ss:$8 sps:$4 sm:$0xff]  }
 0x1e8   :  { %18570 = vmatpush1.bf16.msra.mxu0 %v24182_v23  ;;  %16890 = vmatprep.subr.bf16.mxu1 %v24187_v26  ;;  %v24278_v23 = vld [vmem:[%s36414_s1 + $0x3184] ss:$8 sps:$4 sm:$0xff]   ;;  %v24273_v26 = vld [vmem:[%s36414_s1 + $0x880] ss:$8 sps:$4 sm:$0xff]  }
 0x1e9   :  { %18571 = vmatprep.subr.bf16.mxu0 %v24190_v18  ;;  %v24276_v18 = vld [vmem:[%s36414_s1 + $0x3180] ss:$8 sps:$4 sm:$0xff]  }
 0x1eb   :  { %16891 = vmatpush1.bf16.msra.mxu1 %v24185_v27  ;;  %v24281_v27 = vld [vmem:[%s36414_s1 + $0x894] ss:$8 sps:$4 sm:$0xff]  }
 0x1ec   :  { %18572 = vmatpush1.bf16.msra.mxu0 %v24188_v28  ;;  %16892 = vmatprep.subr.bf16.mxu1 %v24193_v30  ;;  %v24284_v28 = vld [vmem:[%s36414_s1 + $0x3194] ss:$8 sps:$4 sm:$0xff]   ;;  %v24279_v30 = vld [vmem:[%s36414_s1 + $0x890] ss:$8 sps:$4 sm:$0xff]  }
 0x1ed   :  { %18573 = vmatprep.subr.bf16.mxu0 %v24196_v31  ;;  %v24282_v31 = vld [vmem:[%s36414_s1 + $0x3190] ss:$8 sps:$4 sm:$0xff]  }
 0x1ef   :  { %16893 = vmatpush1.bf16.msra.mxu1 %v24191_v24  ;;  %v24287_v24 = vld [vmem:[%s36414_s1 + $0x8a4] ss:$8 sps:$4 sm:$0xff]  }
 0x1f0   :  { %18574 = vmatpush1.bf16.msra.mxu0 %v24194_v25  ;;  %16894 = vmatprep.subr.bf16.mxu1 %v24199_v34  ;;  %v24290_v25 = vld [vmem:[%s36414_s1 + $0x31a4] ss:$8 sps:$4 sm:$0xff]   ;;  %v24285_v34 = vld [vmem:[%s36414_s1 + $0x8a0] ss:$8 sps:$4 sm:$0xff]  }
 0x1f1   :  { %18575 = vmatprep.subr.bf16.mxu0 %v24202_v35  ;;  %v24288_v35 = vld [vmem:[%s36414_s1 + $0x31a0] ss:$8 sps:$4 sm:$0xff]  }
 0x1f3   :  { %16895 = vmatpush1.bf16.msra.mxu1 %v24197_v36  ;;  %v24293_v36 = vld [vmem:[%s36414_s1 + $0x8b4] ss:$8 sps:$4 sm:$0xff]  }
 0x1f4   :  { %18576 = vmatpush1.bf16.msra.mxu0 %v24200_v37  ;;  %16896 = vmatprep.subr.bf16.mxu1 %v24205_v38  ;;  %v24296_v37 = vld [vmem:[%s36414_s1 + $0x31b4] ss:$8 sps:$4 sm:$0xff]   ;;  %v24291_v38 = vld [vmem:[%s36414_s1 + $0x8b0] ss:$8 sps:$4 sm:$0xff]  }
 0x1f5   :  { %18577 = vmatprep.subr.bf16.mxu0 %v24208_v20  ;;  %v24294_v20 = vld [vmem:[%s36414_s1 + $0x31b0] ss:$8 sps:$4 sm:$0xff]  }
 0x1f7   :  { %16897 = vmatpush1.bf16.msra.mxu1 %v24203_v40  ;;  %v24299_v40 = vld [vmem:[%s36414_s1 + $0x8c4] ss:$8 sps:$4 sm:$0xff]  }
 0x1f8   :  { %18578 = vmatpush1.bf16.msra.mxu0 %v24206_v41  ;;  %16898 = vmatprep.subr.bf16.mxu1 %v24211_v42  ;;  %v24302_v41 = vld [vmem:[%s36414_s1 + $0x31c4] ss:$8 sps:$4 sm:$0xff]   ;;  %v24297_v42 = vld [vmem:[%s36414_s1 + $0x8c0] ss:$8 sps:$4 sm:$0xff]  }
 0x1f9   :  { %18579 = vmatprep.subr.bf16.mxu0 %v24214_v43  ;;  %v24300_v43 = vld [vmem:[%s36414_s1 + $0x31c0] ss:$8 sps:$4 sm:$0xff]  }
 0x1fb   :  { %16899 = vmatpush1.bf16.msra.mxu1 %v24209_v44  ;;  %v24305_v44 = vld [vmem:[%s36414_s1 + $0x8d4] ss:$8 sps:$4 sm:$0xff]  }
 0x1fc   :  { %18580 = vmatpush1.bf16.msra.mxu0 %v24212_v32  ;;  %16900 = vmatprep.subr.bf16.mxu1 %v24217_v46  ;;  %v24308_v32 = vld [vmem:[%s36414_s1 + $0x31d4] ss:$8 sps:$4 sm:$0xff]   ;;  %v24303_v46 = vld [vmem:[%s36414_s1 + $0x8d0] ss:$8 sps:$4 sm:$0xff]  }
 0x1fd   :  { %18581 = vmatprep.subr.bf16.mxu0 %v24220_v47  ;;  %v24306_v47 = vld [vmem:[%s36414_s1 + $0x31d0] ss:$8 sps:$4 sm:$0xff]  }
 0x1ff   :  { %16901 = vmatpush1.bf16.msra.mxu1 %v24215_v48  ;;  %v24311_v48 = vld [vmem:[%s36414_s1 + $0x8e4] ss:$8 sps:$4 sm:$0xff]  }
 0x200   :  { %18582 = vmatpush1.bf16.msra.mxu0 %v24218_v49  ;;  %16911 = vmatprep.subr.bf16.mxu1 %v24225_v50  ;;  %v24314_v49 = vld [vmem:[%s36414_s1 + $0x31e4] ss:$8 sps:$4 sm:$0xff]   ;;  %v24309_v50 = vld [vmem:[%s36414_s1 + $0x8e0] ss:$8 sps:$4 sm:$0xff]  }
 0x201   :  { %18592 = vmatprep.subr.bf16.mxu0 %v24230_v29  ;;  %v24312_v29 = vld [vmem:[%s36414_s1 + $0x31e0] ss:$8 sps:$4 sm:$0xff]  }
 0x202   :  { %16903 = vmatmul.mubr.bf16.vlgmr.msra.gmra.mrb[0].mxu1 %v20227_v52  ;;  %v24317_v52 = vld [vmem:[%s36414_s1 + $0x8f4] ss:$8 sps:$4 sm:$0xff]  }
 0x203   :  { %18584 = vmatmul.mubr.bf16.vlgmr.msra.gmra.mrb[0].mxu0 %v20309_v53  ;;  %16912 = vmatpush1.bf16.msra.mxu1 %v24223_v54  ;;  %v24320_v53 = vld [vmem:[%s36414_s1 + $0x31f4] ss:$8 sps:$4 sm:$0xff]   ;;  %v24315_v54 = vld [vmem:[%s36414_s1 + $0x8f0] ss:$8 sps:$4 sm:$0xff]  }
 0x204   :  { %18593 = vmatpush1.bf16.msra.mxu0 %v24228_v55  ;;  %16913 = vmatprep.subr.bf16.mxu1 %v24233_v56  ;;  %v24318_v55 = vld [vmem:[%s36414_s1 + $0x31f0] ss:$8 sps:$4 sm:$0xff]   ;;  %v24325_v56 = vld [vmem:[%s36414_s1 + $0x904] ss:$8 sps:$4 sm:$0xff]  }
 0x205   :  { %18594 = vmatprep.subr.bf16.mxu0 %v24236_v33  ;;  %16943 = vmatprep.mubr.bf16.mxu1 %v20230_v45  ;;  %v24330_v33 = vld [vmem:[%s36414_s1 + $0x3204] ss:$8 sps:$4 sm:$0xff]  }
 0x206   :  { %18624 = vmatprep.mubr.bf16.mxu0 %v20312_v57  ;;  %v29515_v45 = vld [vmem:[%s36413_s0 + $0x48] sm:$0xff]  ;;  %v29520_v57 = vld [vmem:[%s36413_s0 + $0x190] sm:$0xff] }
 0x207   :  { %16914 = vmatpush1.bf16.msra.mxu1 %v24231_v58  ;;  %v20229_v58 = vcombine.low %v29305_v39, %v29305_v39  ;;  %v24336_v39 = vld [vmem:[%s36414_s1 + $0x3214] ss:$8 sps:$4 sm:$0xff]  }
 0x208   :  { %18595 = vmatpush1.bf16.msra.mxu0 %v24234_v59  ;;  %16915 = vmatprep.subr.bf16.mxu1 %v24239_v60  ;;  %v20311_v59 = vcombine.low %v29310_v51, %v29310_v51  ;;  %v24323_v60 = vld [vmem:[%s36414_s1 + $0x900] ss:$8 sps:$4 sm:$0xff]   ;;  %v20232_v51 = vcombine.high %v29515_v45, %v29515_v45 }
 0x209   :  { %18596 = vmatprep.subr.bf16.mxu0 %v24242_v61  ;;  %v24328_v61 = vld [vmem:[%s36414_s1 + $0x3200] ss:$8 sps:$4 sm:$0xff]  }
 0x20b   :  { %16916 = vmatpush1.bf16.msra.mxu1 %v24237_v62  ;;  %v24333_v62 = vld [vmem:[%s36414_s1 + $0x914] ss:$8 sps:$4 sm:$0xff]  }
 0x20c   :  { %18597 = vmatpush1.bf16.msra.mxu0 %v24240_v63  ;;  %16917 = vmatprep.subr.bf16.mxu1 %v24245_v0  ;;  %v20314_v63 = vcombine.high %v29520_v57, %v29520_v57  ;;  %v24331_v0 = vld [vmem:[%s36414_s1 + $0x910] ss:$8 sps:$4 sm:$0xff]  }
 0x20d   :  { %18598 = vmatprep.subr.bf16.mxu0 %v24248_v1  ;;  %v24334_v1 = vld [vmem:[%s36414_s1 + $0x3210] ss:$8 sps:$4 sm:$0xff]  }
 0x20f   :  { %16918 = vmatpush1.bf16.msra.mxu1 %v24243_v2  ;;  %v24339_v2 = vld [vmem:[%s36414_s1 + $0x924] ss:$8 sps:$4 sm:$0xff]  }
 0x210   :  { %18599 = vmatpush1.bf16.msra.mxu0 %v24246_v3  ;;  %16919 = vmatprep.subr.bf16.mxu1 %v24251_v4  ;;  %v24342_v3 = vld [vmem:[%s36414_s1 + $0x3224] ss:$8 sps:$4 sm:$0xff]   ;;  %v24337_v4 = vld [vmem:[%s36414_s1 + $0x920] ss:$8 sps:$4 sm:$0xff]  }
 0x211   :  { %18600 = vmatprep.subr.bf16.mxu0 %v24254_v5  ;;  %v24340_v5 = vld [vmem:[%s36414_s1 + $0x3220] ss:$8 sps:$4 sm:$0xff]  }
 0x213   :  { %16920 = vmatpush1.bf16.msra.mxu1 %v24249_v6  ;;  %v24345_v6 = vld [vmem:[%s36414_s1 + $0x934] ss:$8 sps:$4 sm:$0xff]  }
 0x214   :  { %18601 = vmatpush1.bf16.msra.mxu0 %v24252_v7  ;;  %16921 = vmatprep.subr.bf16.mxu1 %v24257_v8  ;;  %v24348_v7 = vld [vmem:[%s36414_s1 + $0x3234] ss:$8 sps:$4 sm:$0xff]   ;;  %v24343_v8 = vld [vmem:[%s36414_s1 + $0x930] ss:$8 sps:$4 sm:$0xff]  }
 0x215   :  { %18602 = vmatprep.subr.bf16.mxu0 %v24260_v9  ;;  %v24346_v9 = vld [vmem:[%s36414_s1 + $0x3230] ss:$8 sps:$4 sm:$0xff]  }
 0x217   :  { %16922 = vmatpush1.bf16.msra.mxu1 %v24255_v10  ;;  %v24351_v10 = vld [vmem:[%s36414_s1 + $0x944] ss:$8 sps:$4 sm:$0xff]  }
 0x218   :  { %18603 = vmatpush1.bf16.msra.mxu0 %v24258_v11  ;;  %16923 = vmatprep.subr.bf16.mxu1 %v24263_v12  ;;  %v24354_v11 = vld [vmem:[%s36414_s1 + $0x3244] ss:$8 sps:$4 sm:$0xff]   ;;  %v24349_v12 = vld [vmem:[%s36414_s1 + $0x940] ss:$8 sps:$4 sm:$0xff]  }
 0x219   :  { %18604 = vmatprep.subr.bf16.mxu0 %v24266_v13  ;;  %v24352_v13 = vld [vmem:[%s36414_s1 + $0x3240] ss:$8 sps:$4 sm:$0xff]  }
 0x21b   :  { %16924 = vmatpush1.bf16.msra.mxu1 %v24261_v14  ;;  %v24357_v14 = vld [vmem:[%s36414_s1 + $0x954] ss:$8 sps:$4 sm:$0xff]  }
 0x21c   :  { %18605 = vmatpush1.bf16.msra.mxu0 %v24264_v15  ;;  %16925 = vmatprep.subr.bf16.mxu1 %v24269_v16  ;;  %v24360_v15 = vld [vmem:[%s36414_s1 + $0x3254] ss:$8 sps:$4 sm:$0xff]   ;;  %v24355_v16 = vld [vmem:[%s36414_s1 + $0x950] ss:$8 sps:$4 sm:$0xff]  }
 0x21d   :  { %18606 = vmatprep.subr.bf16.mxu0 %v24272_v17  ;;  %v24358_v17 = vld [vmem:[%s36414_s1 + $0x3250] ss:$8 sps:$4 sm:$0xff]  }
 0x21f   :  { %16926 = vmatpush1.bf16.msra.mxu1 %v24267_v19  ;;  %v24363_v19 = vld [vmem:[%s36414_s1 + $0x964] ss:$8 sps:$4 sm:$0xff]  }
 0x220   :  { %18607 = vmatpush1.bf16.msra.mxu0 %v24270_v21  ;;  %16927 = vmatprep.subr.bf16.mxu1 %v24275_v22  ;;  %v24366_v21 = vld [vmem:[%s36414_s1 + $0x3264] ss:$8 sps:$4 sm:$0xff]   ;;  %v24361_v22 = vld [vmem:[%s36414_s1 + $0x960] ss:$8 sps:$4 sm:$0xff]  }
 0x221   :  { %18608 = vmatprep.subr.bf16.mxu0 %v24278_v23  ;;  %v24364_v23 = vld [vmem:[%s36414_s1 + $0x3260] ss:$8 sps:$4 sm:$0xff]  }
 0x223   :  { %16928 = vmatpush1.bf16.msra.mxu1 %v24273_v26  ;;  %v24369_v26 = vld [vmem:[%s36414_s1 + $0x974] ss:$8 sps:$4 sm:$0xff]  }
 0x224   :  { %18609 = vmatpush1.bf16.msra.mxu0 %v24276_v18  ;;  %16929 = vmatprep.subr.bf16.mxu1 %v24281_v27  ;;  %v24372_v18 = vld [vmem:[%s36414_s1 + $0x3274] ss:$8 sps:$4 sm:$0xff]   ;;  %v24367_v27 = vld [vmem:[%s36414_s1 + $0x970] ss:$8 sps:$4 sm:$0xff]  }
 0x225   :  { %18610 = vmatprep.subr.bf16.mxu0 %v24284_v28  ;;  %v24370_v28 = vld [vmem:[%s36414_s1 + $0x3270] ss:$8 sps:$4 sm:$0xff]  }
 0x227   :  { %16930 = vmatpush1.bf16.msra.mxu1 %v24279_v30  ;;  %v24375_v30 = vld [vmem:[%s36414_s1 + $0x984] ss:$8 sps:$4 sm:$0xff]  }
 0x228   :  { %18611 = vmatpush1.bf16.msra.mxu0 %v24282_v31  ;;  %16931 = vmatprep.subr.bf16.mxu1 %v24287_v24  ;;  %v24378_v31 = vld [vmem:[%s36414_s1 + $0x3284] ss:$8 sps:$4 sm:$0xff]   ;;  %v24373_v24 = vld [vmem:[%s36414_s1 + $0x980] ss:$8 sps:$4 sm:$0xff]  }
 0x229   :  { %18612 = vmatprep.subr.bf16.mxu0 %v24290_v25  ;;  %v24376_v25 = vld [vmem:[%s36414_s1 + $0x3280] ss:$8 sps:$4 sm:$0xff]  }
 0x22b   :  { %16932 = vmatpush1.bf16.msra.mxu1 %v24285_v34  ;;  %v24381_v34 = vld [vmem:[%s36414_s1 + $0x994] ss:$8 sps:$4 sm:$0xff]  }
 0x22c   :  { %18613 = vmatpush1.bf16.msra.mxu0 %v24288_v35  ;;  %16933 = vmatprep.subr.bf16.mxu1 %v24293_v36  ;;  %v24384_v35 = vld [vmem:[%s36414_s1 + $0x3294] ss:$8 sps:$4 sm:$0xff]   ;;  %v24379_v36 = vld [vmem:[%s36414_s1 + $0x990] ss:$8 sps:$4 sm:$0xff]  }
 0x22d   :  { %18614 = vmatprep.subr.bf16.mxu0 %v24296_v37  ;;  %v24382_v37 = vld [vmem:[%s36414_s1 + $0x3290] ss:$8 sps:$4 sm:$0xff]  }
 0x22f   :  { %16934 = vmatpush1.bf16.msra.mxu1 %v24291_v38  ;;  %v24387_v38 = vld [vmem:[%s36414_s1 + $0x9a4] ss:$8 sps:$4 sm:$0xff]  }
 0x230   :  { %18615 = vmatpush1.bf16.msra.mxu0 %v24294_v20  ;;  %16935 = vmatprep.subr.bf16.mxu1 %v24299_v40  ;;  %v24390_v20 = vld [vmem:[%s36414_s1 + $0x32a4] ss:$8 sps:$4 sm:$0xff]   ;;  %v24385_v40 = vld [vmem:[%s36414_s1 + $0x9a0] ss:$8 sps:$4 sm:$0xff]  }
 0x231   :  { %18616 = vmatprep.subr.bf16.mxu0 %v24302_v41  ;;  %v24388_v41 = vld [vmem:[%s36414_s1 + $0x32a0] ss:$8 sps:$4 sm:$0xff]  }
 0x233   :  { %16936 = vmatpush1.bf16.msra.mxu1 %v24297_v42  ;;  %v24393_v42 = vld [vmem:[%s36414_s1 + $0x9b4] ss:$8 sps:$4 sm:$0xff]  }
 0x234   :  { %18617 = vmatpush1.bf16.msra.mxu0 %v24300_v43  ;;  %16937 = vmatprep.subr.bf16.mxu1 %v24305_v44  ;;  %v24396_v43 = vld [vmem:[%s36414_s1 + $0x32b4] ss:$8 sps:$4 sm:$0xff]   ;;  %v24391_v44 = vld [vmem:[%s36414_s1 + $0x9b0] ss:$8 sps:$4 sm:$0xff]  }
 0x235   :  { %18618 = vmatprep.subr.bf16.mxu0 %v24308_v32  ;;  %v24394_v32 = vld [vmem:[%s36414_s1 + $0x32b0] ss:$8 sps:$4 sm:$0xff]  }
 0x237   :  { %16938 = vmatpush1.bf16.msra.mxu1 %v24303_v46  ;;  %v24399_v46 = vld [vmem:[%s36414_s1 + $0x9c4] ss:$8 sps:$4 sm:$0xff]  }
 0x238   :  { %18619 = vmatpush1.bf16.msra.mxu0 %v24306_v47  ;;  %16939 = vmatprep.subr.bf16.mxu1 %v24311_v48  ;;  %v24402_v47 = vld [vmem:[%s36414_s1 + $0x32c4] ss:$8 sps:$4 sm:$0xff]   ;;  %v24397_v48 = vld [vmem:[%s36414_s1 + $0x9c0] ss:$8 sps:$4 sm:$0xff]  }
 0x239   :  { %18620 = vmatprep.subr.bf16.mxu0 %v24314_v49  ;;  %v24400_v49 = vld [vmem:[%s36414_s1 + $0x32c0] ss:$8 sps:$4 sm:$0xff]  }
 0x23b   :  { %16940 = vmatpush1.bf16.msra.mxu1 %v24309_v50  ;;  %v24405_v50 = vld [vmem:[%s36414_s1 + $0x9d4] ss:$8 sps:$4 sm:$0xff]  }
 0x23c   :  { %18621 = vmatpush1.bf16.msra.mxu0 %v24312_v29  ;;  %16941 = vmatprep.subr.bf16.mxu1 %v24317_v52  ;;  %v24408_v29 = vld [vmem:[%s36414_s1 + $0x32d4] ss:$8 sps:$4 sm:$0xff]   ;;  %v24403_v52 = vld [vmem:[%s36414_s1 + $0x9d0] ss:$8 sps:$4 sm:$0xff]  }
 0x23d   :  { %18622 = vmatprep.subr.bf16.mxu0 %v24320_v53  ;;  %v24406_v53 = vld [vmem:[%s36414_s1 + $0x32d0] ss:$8 sps:$4 sm:$0xff]  }
 0x23f   :  { %16942 = vmatpush1.bf16.msra.mxu1 %v24315_v54  ;;  %v24411_v54 = vld [vmem:[%s36414_s1 + $0x9e4] ss:$8 sps:$4 sm:$0xff]  }
 0x240   :  { %18623 = vmatpush1.bf16.msra.mxu0 %v24318_v55  ;;  %16952 = vmatprep.subr.bf16.mxu1 %v24325_v56  ;;  %v24414_v55 = vld [vmem:[%s36414_s1 + $0x32e4] ss:$8 sps:$4 sm:$0xff]   ;;  %v24409_v56 = vld [vmem:[%s36414_s1 + $0x9e0] ss:$8 sps:$4 sm:$0xff]  }
 0x241   :  { %18633 = vmatprep.subr.bf16.mxu0 %v24330_v33  ;;  %v24412_v33 = vld [vmem:[%s36414_s1 + $0x32e0] ss:$8 sps:$4 sm:$0xff]  }
 0x242   :  { %16944 = vmatmul.mubr.bf16.vlgmr.msra.gmra.mrb[0].mxu1 %v20229_v58  ;;  %v24417_v58 = vld [vmem:[%s36414_s1 + $0x9f4] ss:$8 sps:$4 sm:$0xff]  }
 0x243   :  { %18625 = vmatmul.mubr.bf16.vlgmr.msra.gmra.mrb[0].mxu0 %v20311_v59  ;;  %16953 = vmatpush1.bf16.msra.mxu1 %v24323_v60  ;;  %v24420_v59 = vld [vmem:[%s36414_s1 + $0x32f4] ss:$8 sps:$4 sm:$0xff]   ;;  %v24415_v60 = vld [vmem:[%s36414_s1 + $0x9f0] ss:$8 sps:$4 sm:$0xff]  }
 0x244   :  { %18634 = vmatpush1.bf16.msra.mxu0 %v24328_v61  ;;  %16954 = vmatprep.subr.bf16.mxu1 %v24333_v62  ;;  %v24418_v61 = vld [vmem:[%s36414_s1 + $0x32f0] ss:$8 sps:$4 sm:$0xff]   ;;  %v24425_v62 = vld [vmem:[%s36414_s1 + $0xa04] ss:$8 sps:$4 sm:$0xff]  }
 0x245   :  { %18635 = vmatprep.subr.bf16.mxu0 %v24336_v39  ;;  %16984 = vmatprep.mubr.bf16.mxu1 %v20232_v51  ;;  %v24430_v39 = vld [vmem:[%s36414_s1 + $0x3304] ss:$8 sps:$4 sm:$0xff]   ;;  %v29725_v51 = vld [vmem:[%s36413_s0 + $0x50] sm:$0xff] }
 0x246   :  { %18665 = vmatprep.mubr.bf16.mxu0 %v20314_v63  ;;  %v29730_v63 = vld [vmem:[%s36413_s0 + $0x198] sm:$0xff] }
 0x247   :  { %16955 = vmatpush1.bf16.msra.mxu1 %v24331_v0  ;;  %v20231_v0 = vcombine.low %v29515_v45, %v29515_v45  ;;  %v24436_v45 = vld [vmem:[%s36414_s1 + $0x3314] ss:$8 sps:$4 sm:$0xff]  }
 0x248   :  { %18636 = vmatpush1.bf16.msra.mxu0 %v24334_v1  ;;  %16956 = vmatprep.subr.bf16.mxu1 %v24339_v2  ;;  %v20313_v1 = vcombine.low %v29520_v57, %v29520_v57  ;;  %v24423_v2 = vld [vmem:[%s36414_s1 + $0xa00] ss:$8 sps:$4 sm:$0xff]   ;;  %v20234_v57 = vcombine.high %v29725_v51, %v29725_v51 }
 0x249   :  { %18637 = vmatprep.subr.bf16.mxu0 %v24342_v3  ;;  %v24428_v3 = vld [vmem:[%s36414_s1 + $0x3300] ss:$8 sps:$4 sm:$0xff]  }
 0x24b   :  { %16957 = vmatpush1.bf16.msra.mxu1 %v24337_v4  ;;  %v24433_v4 = vld [vmem:[%s36414_s1 + $0xa14] ss:$8 sps:$4 sm:$0xff]  }
 0x24c   :  { %18638 = vmatpush1.bf16.msra.mxu0 %v24340_v5  ;;  %16958 = vmatprep.subr.bf16.mxu1 %v24345_v6  ;;  %v20316_v5 = vcombine.high %v29730_v63, %v29730_v63  ;;  %v24431_v6 = vld [vmem:[%s36414_s1 + $0xa10] ss:$8 sps:$4 sm:$0xff]  }
 0x24d   :  { %18639 = vmatprep.subr.bf16.mxu0 %v24348_v7  ;;  %v24434_v7 = vld [vmem:[%s36414_s1 + $0x3310] ss:$8 sps:$4 sm:$0xff]  }
 0x24f   :  { %16959 = vmatpush1.bf16.msra.mxu1 %v24343_v8  ;;  %v24439_v8 = vld [vmem:[%s36414_s1 + $0xa24] ss:$8 sps:$4 sm:$0xff]  }
 0x250   :  { %18640 = vmatpush1.bf16.msra.mxu0 %v24346_v9  ;;  %16960 = vmatprep.subr.bf16.mxu1 %v24351_v10  ;;  %v24442_v9 = vld [vmem:[%s36414_s1 + $0x3324] ss:$8 sps:$4 sm:$0xff]   ;;  %v24437_v10 = vld [vmem:[%s36414_s1 + $0xa20] ss:$8 sps:$4 sm:$0xff]  }
 0x251   :  { %18641 = vmatprep.subr.bf16.mxu0 %v24354_v11  ;;  %v24440_v11 = vld [vmem:[%s36414_s1 + $0x3320] ss:$8 sps:$4 sm:$0xff]  }
 0x253   :  { %16961 = vmatpush1.bf16.msra.mxu1 %v24349_v12  ;;  %v24445_v12 = vld [vmem:[%s36414_s1 + $0xa34] ss:$8 sps:$4 sm:$0xff]  }
 0x254   :  { %18642 = vmatpush1.bf16.msra.mxu0 %v24352_v13  ;;  %16962 = vmatprep.subr.bf16.mxu1 %v24357_v14  ;;  %v24448_v13 = vld [vmem:[%s36414_s1 + $0x3334] ss:$8 sps:$4 sm:$0xff]   ;;  %v24443_v14 = vld [vmem:[%s36414_s1 + $0xa30] ss:$8 sps:$4 sm:$0xff]  }
 0x255   :  { %18643 = vmatprep.subr.bf16.mxu0 %v24360_v15  ;;  %v24446_v15 = vld [vmem:[%s36414_s1 + $0x3330] ss:$8 sps:$4 sm:$0xff]  }
 0x257   :  { %16963 = vmatpush1.bf16.msra.mxu1 %v24355_v16  ;;  %v24451_v16 = vld [vmem:[%s36414_s1 + $0xa44] ss:$8 sps:$4 sm:$0xff]  }
 0x258   :  { %18644 = vmatpush1.bf16.msra.mxu0 %v24358_v17  ;;  %16964 = vmatprep.subr.bf16.mxu1 %v24363_v19  ;;  %v24454_v17 = vld [vmem:[%s36414_s1 + $0x3344] ss:$8 sps:$4 sm:$0xff]   ;;  %v24449_v19 = vld [vmem:[%s36414_s1 + $0xa40] ss:$8 sps:$4 sm:$0xff]  }
 0x259   :  { %18645 = vmatprep.subr.bf16.mxu0 %v24366_v21  ;;  %v24452_v21 = vld [vmem:[%s36414_s1 + $0x3340] ss:$8 sps:$4 sm:$0xff]  }
 0x25b   :  { %16965 = vmatpush1.bf16.msra.mxu1 %v24361_v22  ;;  %v24457_v22 = vld [vmem:[%s36414_s1 + $0xa54] ss:$8 sps:$4 sm:$0xff]  }
 0x25c   :  { %18646 = vmatpush1.bf16.msra.mxu0 %v24364_v23  ;;  %16966 = vmatprep.subr.bf16.mxu1 %v24369_v26  ;;  %v24460_v23 = vld [vmem:[%s36414_s1 + $0x3354] ss:$8 sps:$4 sm:$0xff]   ;;  %v24455_v26 = vld [vmem:[%s36414_s1 + $0xa50] ss:$8 sps:$4 sm:$0xff]  }
 0x25d   :  { %18647 = vmatprep.subr.bf16.mxu0 %v24372_v18  ;;  %v24458_v18 = vld [vmem:[%s36414_s1 + $0x3350] ss:$8 sps:$4 sm:$0xff]  }
 0x25f   :  { %16967 = vmatpush1.bf16.msra.mxu1 %v24367_v27  ;;  %v24463_v27 = vld [vmem:[%s36414_s1 + $0xa64] ss:$8 sps:$4 sm:$0xff]  }
 0x260   :  { %18648 = vmatpush1.bf16.msra.mxu0 %v24370_v28  ;;  %16968 = vmatprep.subr.bf16.mxu1 %v24375_v30  ;;  %v24466_v28 = vld [vmem:[%s36414_s1 + $0x3364] ss:$8 sps:$4 sm:$0xff]   ;;  %v24461_v30 = vld [vmem:[%s36414_s1 + $0xa60] ss:$8 sps:$4 sm:$0xff]  }
 0x261   :  { %18649 = vmatprep.subr.bf16.mxu0 %v24378_v31  ;;  %v24464_v31 = vld [vmem:[%s36414_s1 + $0x3360] ss:$8 sps:$4 sm:$0xff]  }
 0x263   :  { %16969 = vmatpush1.bf16.msra.mxu1 %v24373_v24  ;;  %v24469_v24 = vld [vmem:[%s36414_s1 + $0xa74] ss:$8 sps:$4 sm:$0xff]  }
 0x264   :  { %18650 = vmatpush1.bf16.msra.mxu0 %v24376_v25  ;;  %16970 = vmatprep.subr.bf16.mxu1 %v24381_v34  ;;  %v24472_v25 = vld [vmem:[%s36414_s1 + $0x3374] ss:$8 sps:$4 sm:$0xff]   ;;  %v24467_v34 = vld [vmem:[%s36414_s1 + $0xa70] ss:$8 sps:$4 sm:$0xff]  }
 0x265   :  { %18651 = vmatprep.subr.bf16.mxu0 %v24384_v35  ;;  %v24470_v35 = vld [vmem:[%s36414_s1 + $0x3370] ss:$8 sps:$4 sm:$0xff]  }
 0x267   :  { %16971 = vmatpush1.bf16.msra.mxu1 %v24379_v36  ;;  %v24475_v36 = vld [vmem:[%s36414_s1 + $0xa84] ss:$8 sps:$4 sm:$0xff]  }
 0x268   :  { %18652 = vmatpush1.bf16.msra.mxu0 %v24382_v37  ;;  %16972 = vmatprep.subr.bf16.mxu1 %v24387_v38  ;;  %v24478_v37 = vld [vmem:[%s36414_s1 + $0x3384] ss:$8 sps:$4 sm:$0xff]   ;;  %v24473_v38 = vld [vmem:[%s36414_s1 + $0xa80] ss:$8 sps:$4 sm:$0xff]  }
 0x269   :  { %18653 = vmatprep.subr.bf16.mxu0 %v24390_v20  ;;  %v24476_v20 = vld [vmem:[%s36414_s1 + $0x3380] ss:$8 sps:$4 sm:$0xff]  }
 0x26b   :  { %16973 = vmatpush1.bf16.msra.mxu1 %v24385_v40  ;;  %v24481_v40 = vld [vmem:[%s36414_s1 + $0xa94] ss:$8 sps:$4 sm:$0xff]  }
 0x26c   :  { %18654 = vmatpush1.bf16.msra.mxu0 %v24388_v41  ;;  %16974 = vmatprep.subr.bf16.mxu1 %v24393_v42  ;;  %v24484_v41 = vld [vmem:[%s36414_s1 + $0x3394] ss:$8 sps:$4 sm:$0xff]   ;;  %v24479_v42 = vld [vmem:[%s36414_s1 + $0xa90] ss:$8 sps:$4 sm:$0xff]  }
 0x26d   :  { %18655 = vmatprep.subr.bf16.mxu0 %v24396_v43  ;;  %v24482_v43 = vld [vmem:[%s36414_s1 + $0x3390] ss:$8 sps:$4 sm:$0xff]  }
 0x26f   :  { %16975 = vmatpush1.bf16.msra.mxu1 %v24391_v44  ;;  %v24487_v44 = vld [vmem:[%s36414_s1 + $0xaa4] ss:$8 sps:$4 sm:$0xff]  }
 0x270   :  { %18656 = vmatpush1.bf16.msra.mxu0 %v24394_v32  ;;  %16976 = vmatprep.subr.bf16.mxu1 %v24399_v46  ;;  %v24490_v32 = vld [vmem:[%s36414_s1 + $0x33a4] ss:$8 sps:$4 sm:$0xff]   ;;  %v24485_v46 = vld [vmem:[%s36414_s1 + $0xaa0] ss:$8 sps:$4 sm:$0xff]  }
 0x271   :  { %18657 = vmatprep.subr.bf16.mxu0 %v24402_v47  ;;  %v24488_v47 = vld [vmem:[%s36414_s1 + $0x33a0] ss:$8 sps:$4 sm:$0xff]  }
 0x273   :  { %16977 = vmatpush1.bf16.msra.mxu1 %v24397_v48  ;;  %v24493_v48 = vld [vmem:[%s36414_s1 + $0xab4] ss:$8 sps:$4 sm:$0xff]  }
 0x274   :  { %18658 = vmatpush1.bf16.msra.mxu0 %v24400_v49  ;;  %16978 = vmatprep.subr.bf16.mxu1 %v24405_v50  ;;  %v24496_v49 = vld [vmem:[%s36414_s1 + $0x33b4] ss:$8 sps:$4 sm:$0xff]   ;;  %v24491_v50 = vld [vmem:[%s36414_s1 + $0xab0] ss:$8 sps:$4 sm:$0xff]  }
 0x275   :  { %18659 = vmatprep.subr.bf16.mxu0 %v24408_v29  ;;  %v24494_v29 = vld [vmem:[%s36414_s1 + $0x33b0] ss:$8 sps:$4 sm:$0xff]  }
 0x277   :  { %16979 = vmatpush1.bf16.msra.mxu1 %v24403_v52  ;;  %v24499_v52 = vld [vmem:[%s36414_s1 + $0xac4] ss:$8 sps:$4 sm:$0xff]  }
 0x278   :  { %18660 = vmatpush1.bf16.msra.mxu0 %v24406_v53  ;;  %16980 = vmatprep.subr.bf16.mxu1 %v24411_v54  ;;  %v24502_v53 = vld [vmem:[%s36414_s1 + $0x33c4] ss:$8 sps:$4 sm:$0xff]   ;;  %v24497_v54 = vld [vmem:[%s36414_s1 + $0xac0] ss:$8 sps:$4 sm:$0xff]  }
 0x279   :  { %18661 = vmatprep.subr.bf16.mxu0 %v24414_v55  ;;  %v24500_v55 = vld [vmem:[%s36414_s1 + $0x33c0] ss:$8 sps:$4 sm:$0xff]  }
 0x27b   :  { %16981 = vmatpush1.bf16.msra.mxu1 %v24409_v56  ;;  %v24505_v56 = vld [vmem:[%s36414_s1 + $0xad4] ss:$8 sps:$4 sm:$0xff]  }
 0x27c   :  { %18662 = vmatpush1.bf16.msra.mxu0 %v24412_v33  ;;  %16982 = vmatprep.subr.bf16.mxu1 %v24417_v58  ;;  %v24508_v33 = vld [vmem:[%s36414_s1 + $0x33d4] ss:$8 sps:$4 sm:$0xff]   ;;  %v24503_v58 = vld [vmem:[%s36414_s1 + $0xad0] ss:$8 sps:$4 sm:$0xff]  }
 0x27d   :  { %18663 = vmatprep.subr.bf16.mxu0 %v24420_v59  ;;  %v24506_v59 = vld [vmem:[%s36414_s1 + $0x33d0] ss:$8 sps:$4 sm:$0xff]  }
 0x27f   :  { %16983 = vmatpush1.bf16.msra.mxu1 %v24415_v60  ;;  %v24511_v60 = vld [vmem:[%s36414_s1 + $0xae4] ss:$8 sps:$4 sm:$0xff]  }
 0x280   :  { %18664 = vmatpush1.bf16.msra.mxu0 %v24418_v61  ;;  %16993 = vmatprep.subr.bf16.mxu1 %v24425_v62  ;;  %v24514_v61 = vld [vmem:[%s36414_s1 + $0x33e4] ss:$8 sps:$4 sm:$0xff]   ;;  %v24509_v62 = vld [vmem:[%s36414_s1 + $0xae0] ss:$8 sps:$4 sm:$0xff]  }
 0x281   :  { %18674 = vmatprep.subr.bf16.mxu0 %v24430_v39  ;;  %v24512_v39 = vld [vmem:[%s36414_s1 + $0x33e0] ss:$8 sps:$4 sm:$0xff]  }
 0x282   :  { %16985 = vmatmul.mubr.bf16.vlgmr.msra.gmra.mrb[0].mxu1 %v20231_v0  ;;  %v24517_v0 = vld [vmem:[%s36414_s1 + $0xaf4] ss:$8 sps:$4 sm:$0xff]  }
 0x283   :  { %18666 = vmatmul.mubr.bf16.vlgmr.msra.gmra.mrb[0].mxu0 %v20313_v1  ;;  %16994 = vmatpush1.bf16.msra.mxu1 %v24423_v2  ;;  %v24520_v1 = vld [vmem:[%s36414_s1 + $0x33f4] ss:$8 sps:$4 sm:$0xff]   ;;  %v24515_v2 = vld [vmem:[%s36414_s1 + $0xaf0] ss:$8 sps:$4 sm:$0xff]  }
 0x284   :  { %18675 = vmatpush1.bf16.msra.mxu0 %v24428_v3  ;;  %16995 = vmatprep.subr.bf16.mxu1 %v24433_v4  ;;  %v24518_v3 = vld [vmem:[%s36414_s1 + $0x33f0] ss:$8 sps:$4 sm:$0xff]   ;;  %v24525_v4 = vld [vmem:[%s36414_s1 + $0xb04] ss:$8 sps:$4 sm:$0xff]  }
 0x285   :  { %18676 = vmatprep.subr.bf16.mxu0 %v24436_v45  ;;  %17025 = vmatprep.mubr.bf16.mxu1 %v20234_v57  ;;  %v24530_v45 = vld [vmem:[%s36414_s1 + $0x3404] ss:$8 sps:$4 sm:$0xff]   ;;  %v29935_v57 = vld [vmem:[%s36413_s0 + $0x58] sm:$0xff] }
 0x286   :  { %18706 = vmatprep.mubr.bf16.mxu0 %v20316_v5  ;;  %v29940_v5 = vld [vmem:[%s36413_s0 + $0x1a0] sm:$0xff] }
 0x287   :  { %16996 = vmatpush1.bf16.msra.mxu1 %v24431_v6  ;;  %v20233_v6 = vcombine.low %v29725_v51, %v29725_v51  ;;  %v24536_v51 = vld [vmem:[%s36414_s1 + $0x3414] ss:$8 sps:$4 sm:$0xff]  }
 0x288   :  { %18677 = vmatpush1.bf16.msra.mxu0 %v24434_v7  ;;  %16997 = vmatprep.subr.bf16.mxu1 %v24439_v8  ;;  %v20315_v7 = vcombine.low %v29730_v63, %v29730_v63  ;;  %v24523_v8 = vld [vmem:[%s36414_s1 + $0xb00] ss:$8 sps:$4 sm:$0xff]   ;;  %v20236_v63 = vcombine.high %v29935_v57, %v29935_v57 }
 0x289   :  { %18678 = vmatprep.subr.bf16.mxu0 %v24442_v9  ;;  %v24528_v9 = vld [vmem:[%s36414_s1 + $0x3400] ss:$8 sps:$4 sm:$0xff]  }
 0x28b   :  { %16998 = vmatpush1.bf16.msra.mxu1 %v24437_v10  ;;  %v24533_v10 = vld [vmem:[%s36414_s1 + $0xb14] ss:$8 sps:$4 sm:$0xff]  }
 0x28c   :  { %18679 = vmatpush1.bf16.msra.mxu0 %v24440_v11  ;;  %16999 = vmatprep.subr.bf16.mxu1 %v24445_v12  ;;  %v20318_v11 = vcombine.high %v29940_v5, %v29940_v5  ;;  %v24531_v12 = vld [vmem:[%s36414_s1 + $0xb10] ss:$8 sps:$4 sm:$0xff]  }
 0x28d   :  { %18680 = vmatprep.subr.bf16.mxu0 %v24448_v13  ;;  %v24534_v13 = vld [vmem:[%s36414_s1 + $0x3410] ss:$8 sps:$4 sm:$0xff]  }
 0x28f   :  { %17000 = vmatpush1.bf16.msra.mxu1 %v24443_v14  ;;  %v24539_v14 = vld [vmem:[%s36414_s1 + $0xb24] ss:$8 sps:$4 sm:$0xff]  }
 0x290   :  { %18681 = vmatpush1.bf16.msra.mxu0 %v24446_v15  ;;  %17001 = vmatprep.subr.bf16.mxu1 %v24451_v16  ;;  %v24542_v15 = vld [vmem:[%s36414_s1 + $0x3424] ss:$8 sps:$4 sm:$0xff]   ;;  %v24537_v16 = vld [vmem:[%s36414_s1 + $0xb20] ss:$8 sps:$4 sm:$0xff]  }
 0x291   :  { %18682 = vmatprep.subr.bf16.mxu0 %v24454_v17  ;;  %v24540_v17 = vld [vmem:[%s36414_s1 + $0x3420] ss:$8 sps:$4 sm:$0xff]  }
 0x293   :  { %17002 = vmatpush1.bf16.msra.mxu1 %v24449_v19  ;;  %v24545_v19 = vld [vmem:[%s36414_s1 + $0xb34] ss:$8 sps:$4 sm:$0xff]  }
 0x294   :  { %18683 = vmatpush1.bf16.msra.mxu0 %v24452_v21  ;;  %17003 = vmatprep.subr.bf16.mxu1 %v24457_v22  ;;  %v24548_v21 = vld [vmem:[%s36414_s1 + $0x3434] ss:$8 sps:$4 sm:$0xff]   ;;  %v24543_v22 = vld [vmem:[%s36414_s1 + $0xb30] ss:$8 sps:$4 sm:$0xff]  }
 0x295   :  { %18684 = vmatprep.subr.bf16.mxu0 %v24460_v23  ;;  %v24546_v23 = vld [vmem:[%s36414_s1 + $0x3430] ss:$8 sps:$4 sm:$0xff]  }
 0x297   :  { %17004 = vmatpush1.bf16.msra.mxu1 %v24455_v26  ;;  %v24551_v26 = vld [vmem:[%s36414_s1 + $0xb44] ss:$8 sps:$4 sm:$0xff]  }
 0x298   :  { %18685 = vmatpush1.bf16.msra.mxu0 %v24458_v18  ;;  %17005 = vmatprep.subr.bf16.mxu1 %v24463_v27  ;;  %v24554_v18 = vld [vmem:[%s36414_s1 + $0x3444] ss:$8 sps:$4 sm:$0xff]   ;;  %v24549_v27 = vld [vmem:[%s36414_s1 + $0xb40] ss:$8 sps:$4 sm:$0xff]  }
 0x299   :  { %18686 = vmatprep.subr.bf16.mxu0 %v24466_v28  ;;  %v24552_v28 = vld [vmem:[%s36414_s1 + $0x3440] ss:$8 sps:$4 sm:$0xff]  }
 0x29b   :  { %17006 = vmatpush1.bf16.msra.mxu1 %v24461_v30  ;;  %v24557_v30 = vld [vmem:[%s36414_s1 + $0xb54] ss:$8 sps:$4 sm:$0xff]  }
 0x29c   :  { %18687 = vmatpush1.bf16.msra.mxu0 %v24464_v31  ;;  %17007 = vmatprep.subr.bf16.mxu1 %v24469_v24  ;;  %v24560_v31 = vld [vmem:[%s36414_s1 + $0x3454] ss:$8 sps:$4 sm:$0xff]   ;;  %v24555_v24 = vld [vmem:[%s36414_s1 + $0xb50] ss:$8 sps:$4 sm:$0xff]  }
 0x29d   :  { %18688 = vmatprep.subr.bf16.mxu0 %v24472_v25  ;;  %v24558_v25 = vld [vmem:[%s36414_s1 + $0x3450] ss:$8 sps:$4 sm:$0xff]  }
 0x29f   :  { %17008 = vmatpush1.bf16.msra.mxu1 %v24467_v34  ;;  %v24563_v34 = vld [vmem:[%s36414_s1 + $0xb64] ss:$8 sps:$4 sm:$0xff]  }
 0x2a0   :  { %18689 = vmatpush1.bf16.msra.mxu0 %v24470_v35  ;;  %17009 = vmatprep.subr.bf16.mxu1 %v24475_v36  ;;  %v24566_v35 = vld [vmem:[%s36414_s1 + $0x3464] ss:$8 sps:$4 sm:$0xff]   ;;  %v24561_v36 = vld [vmem:[%s36414_s1 + $0xb60] ss:$8 sps:$4 sm:$0xff]  }
 0x2a1   :  { %18690 = vmatprep.subr.bf16.mxu0 %v24478_v37  ;;  %v24564_v37 = vld [vmem:[%s36414_s1 + $0x3460] ss:$8 sps:$4 sm:$0xff]  }
 0x2a3   :  { %17010 = vmatpush1.bf16.msra.mxu1 %v24473_v38  ;;  %v24569_v38 = vld [vmem:[%s36414_s1 + $0xb74] ss:$8 sps:$4 sm:$0xff]  }
 0x2a4   :  { %18691 = vmatpush1.bf16.msra.mxu0 %v24476_v20  ;;  %17011 = vmatprep.subr.bf16.mxu1 %v24481_v40  ;;  %v24572_v20 = vld [vmem:[%s36414_s1 + $0x3474] ss:$8 sps:$4 sm:$0xff]   ;;  %v24567_v40 = vld [vmem:[%s36414_s1 + $0xb70] ss:$8 sps:$4 sm:$0xff]  }
 0x2a5   :  { %18692 = vmatprep.subr.bf16.mxu0 %v24484_v41  ;;  %v24570_v41 = vld [vmem:[%s36414_s1 + $0x3470] ss:$8 sps:$4 sm:$0xff]  }
 0x2a7   :  { %17012 = vmatpush1.bf16.msra.mxu1 %v24479_v42  ;;  %v24575_v42 = vld [vmem:[%s36414_s1 + $0xb84] ss:$8 sps:$4 sm:$0xff]  }
 0x2a8   :  { %18693 = vmatpush1.bf16.msra.mxu0 %v24482_v43  ;;  %17013 = vmatprep.subr.bf16.mxu1 %v24487_v44  ;;  %v24578_v43 = vld [vmem:[%s36414_s1 + $0x3484] ss:$8 sps:$4 sm:$0xff]   ;;  %v24573_v44 = vld [vmem:[%s36414_s1 + $0xb80] ss:$8 sps:$4 sm:$0xff]  }
 0x2a9   :  { %18694 = vmatprep.subr.bf16.mxu0 %v24490_v32  ;;  %v24576_v32 = vld [vmem:[%s36414_s1 + $0x3480] ss:$8 sps:$4 sm:$0xff]  }
 0x2ab   :  { %17014 = vmatpush1.bf16.msra.mxu1 %v24485_v46  ;;  %v24581_v46 = vld [vmem:[%s36414_s1 + $0xb94] ss:$8 sps:$4 sm:$0xff]  }
 0x2ac   :  { %18695 = vmatpush1.bf16.msra.mxu0 %v24488_v47  ;;  %17015 = vmatprep.subr.bf16.mxu1 %v24493_v48  ;;  %v24584_v47 = vld [vmem:[%s36414_s1 + $0x3494] ss:$8 sps:$4 sm:$0xff]   ;;  %v24579_v48 = vld [vmem:[%s36414_s1 + $0xb90] ss:$8 sps:$4 sm:$0xff]  }
 0x2ad   :  { %18696 = vmatprep.subr.bf16.mxu0 %v24496_v49  ;;  %v24582_v49 = vld [vmem:[%s36414_s1 + $0x3490] ss:$8 sps:$4 sm:$0xff]  }
 0x2af   :  { %17016 = vmatpush1.bf16.msra.mxu1 %v24491_v50  ;;  %v24587_v50 = vld [vmem:[%s36414_s1 + $0xba4] ss:$8 sps:$4 sm:$0xff]  }
 0x2b0   :  { %18697 = vmatpush1.bf16.msra.mxu0 %v24494_v29  ;;  %17017 = vmatprep.subr.bf16.mxu1 %v24499_v52  ;;  %v24590_v29 = vld [vmem:[%s36414_s1 + $0x34a4] ss:$8 sps:$4 sm:$0xff]   ;;  %v24585_v52 = vld [vmem:[%s36414_s1 + $0xba0] ss:$8 sps:$4 sm:$0xff]  }
 0x2b1   :  { %18698 = vmatprep.subr.bf16.mxu0 %v24502_v53  ;;  %v24588_v53 = vld [vmem:[%s36414_s1 + $0x34a0] ss:$8 sps:$4 sm:$0xff]  }
 0x2b3   :  { %17018 = vmatpush1.bf16.msra.mxu1 %v24497_v54  ;;  %v24593_v54 = vld [vmem:[%s36414_s1 + $0xbb4] ss:$8 sps:$4 sm:$0xff]  }
 0x2b4   :  { %18699 = vmatpush1.bf16.msra.mxu0 %v24500_v55  ;;  %17019 = vmatprep.subr.bf16.mxu1 %v24505_v56  ;;  %v24596_v55 = vld [vmem:[%s36414_s1 + $0x34b4] ss:$8 sps:$4 sm:$0xff]   ;;  %v24591_v56 = vld [vmem:[%s36414_s1 + $0xbb0] ss:$8 sps:$4 sm:$0xff]  }
 0x2b5   :  { %18700 = vmatprep.subr.bf16.mxu0 %v24508_v33  ;;  %v24594_v33 = vld [vmem:[%s36414_s1 + $0x34b0] ss:$8 sps:$4 sm:$0xff]  }
 0x2b7   :  { %17020 = vmatpush1.bf16.msra.mxu1 %v24503_v58  ;;  %v24599_v58 = vld [vmem:[%s36414_s1 + $0xbc4] ss:$8 sps:$4 sm:$0xff]  }
 0x2b8   :  { %18701 = vmatpush1.bf16.msra.mxu0 %v24506_v59  ;;  %17021 = vmatprep.subr.bf16.mxu1 %v24511_v60  ;;  %v24602_v59 = vld [vmem:[%s36414_s1 + $0x34c4] ss:$8 sps:$4 sm:$0xff]   ;;  %v24597_v60 = vld [vmem:[%s36414_s1 + $0xbc0] ss:$8 sps:$4 sm:$0xff]  }
 0x2b9   :  { %18702 = vmatprep.subr.bf16.mxu0 %v24514_v61  ;;  %v24600_v61 = vld [vmem:[%s36414_s1 + $0x34c0] ss:$8 sps:$4 sm:$0xff]  }
 0x2bb   :  { %17022 = vmatpush1.bf16.msra.mxu1 %v24509_v62  ;;  %v24605_v62 = vld [vmem:[%s36414_s1 + $0xbd4] ss:$8 sps:$4 sm:$0xff]  }
 0x2bc   :  { %18703 = vmatpush1.bf16.msra.mxu0 %v24512_v39  ;;  %17023 = vmatprep.subr.bf16.mxu1 %v24517_v0  ;;  %v24608_v39 = vld [vmem:[%s36414_s1 + $0x34d4] ss:$8 sps:$4 sm:$0xff]   ;;  %v24603_v0 = vld [vmem:[%s36414_s1 + $0xbd0] ss:$8 sps:$4 sm:$0xff]  }
 0x2bd   :  { %18704 = vmatprep.subr.bf16.mxu0 %v24520_v1  ;;  %v24606_v1 = vld [vmem:[%s36414_s1 + $0x34d0] ss:$8 sps:$4 sm:$0xff]  }
 0x2bf   :  { %17024 = vmatpush1.bf16.msra.mxu1 %v24515_v2  ;;  %v24611_v2 = vld [vmem:[%s36414_s1 + $0xbe4] ss:$8 sps:$4 sm:$0xff]  }
 0x2c0   :  { %18705 = vmatpush1.bf16.msra.mxu0 %v24518_v3  ;;  %17034 = vmatprep.subr.bf16.mxu1 %v24525_v4  ;;  %v24614_v3 = vld [vmem:[%s36414_s1 + $0x34e4] ss:$8 sps:$4 sm:$0xff]   ;;  %v24609_v4 = vld [vmem:[%s36414_s1 + $0xbe0] ss:$8 sps:$4 sm:$0xff]  }
 0x2c1   :  { %18715 = vmatprep.subr.bf16.mxu0 %v24530_v45  ;;  %v24612_v45 = vld [vmem:[%s36414_s1 + $0x34e0] ss:$8 sps:$4 sm:$0xff]  }
 0x2c2   :  { %17026 = vmatmul.mubr.bf16.vlgmr.msra.gmra.mrb[0].mxu1 %v20233_v6  ;;  %v24617_v6 = vld [vmem:[%s36414_s1 + $0xbf4] ss:$8 sps:$4 sm:$0xff]  }
 0x2c3   :  { %18707 = vmatmul.mubr.bf16.vlgmr.msra.gmra.mrb[0].mxu0 %v20315_v7  ;;  %17035 = vmatpush1.bf16.msra.mxu1 %v24523_v8  ;;  %v24620_v7 = vld [vmem:[%s36414_s1 + $0x34f4] ss:$8 sps:$4 sm:$0xff]   ;;  %v24615_v8 = vld [vmem:[%s36414_s1 + $0xbf0] ss:$8 sps:$4 sm:$0xff]  }
 0x2c4   :  { %18716 = vmatpush1.bf16.msra.mxu0 %v24528_v9  ;;  %17036 = vmatprep.subr.bf16.mxu1 %v24533_v10  ;;  %v24618_v9 = vld [vmem:[%s36414_s1 + $0x34f0] ss:$8 sps:$4 sm:$0xff]   ;;  %v24625_v10 = vld [vmem:[%s36414_s1 + $0xc04] ss:$8 sps:$4 sm:$0xff]  }
 0x2c5   :  { %18717 = vmatprep.subr.bf16.mxu0 %v24536_v51  ;;  %17066 = vmatprep.mubr.bf16.mxu1 %v20236_v63  ;;  %v24630_v51 = vld [vmem:[%s36414_s1 + $0x3504] ss:$8 sps:$4 sm:$0xff]  }
 0x2c6   :  { %18747 = vmatprep.mubr.bf16.mxu0 %v20318_v11  ;;  %v30145_v63 = vld [vmem:[%s36413_s0 + $0x60] sm:$0xff]  ;;  %v30150_v11 = vld [vmem:[%s36413_s0 + $0x1a8] sm:$0xff] }
 0x2c7   :  { %17037 = vmatpush1.bf16.msra.mxu1 %v24531_v12  ;;  %v20235_v12 = vcombine.low %v29935_v57, %v29935_v57  ;;  %v24636_v57 = vld [vmem:[%s36414_s1 + $0x3514] ss:$8 sps:$4 sm:$0xff]  }
 0x2c8   :  { %18718 = vmatpush1.bf16.msra.mxu0 %v24534_v13  ;;  %17038 = vmatprep.subr.bf16.mxu1 %v24539_v14  ;;  %v20317_v13 = vcombine.low %v29940_v5, %v29940_v5  ;;  %v24623_v14 = vld [vmem:[%s36414_s1 + $0xc00] ss:$8 sps:$4 sm:$0xff]   ;;  %v20238_v5 = vcombine.high %v30145_v63, %v30145_v63 }
 0x2c9   :  { %18719 = vmatprep.subr.bf16.mxu0 %v24542_v15  ;;  %v24628_v15 = vld [vmem:[%s36414_s1 + $0x3500] ss:$8 sps:$4 sm:$0xff]  }
 0x2cb   :  { %17039 = vmatpush1.bf16.msra.mxu1 %v24537_v16  ;;  %v24633_v16 = vld [vmem:[%s36414_s1 + $0xc14] ss:$8 sps:$4 sm:$0xff]  }
 0x2cc   :  { %18720 = vmatpush1.bf16.msra.mxu0 %v24540_v17  ;;  %17040 = vmatprep.subr.bf16.mxu1 %v24545_v19  ;;  %v20320_v17 = vcombine.high %v30150_v11, %v30150_v11  ;;  %v24631_v19 = vld [vmem:[%s36414_s1 + $0xc10] ss:$8 sps:$4 sm:$0xff]  }
 0x2cd   :  { %18721 = vmatprep.subr.bf16.mxu0 %v24548_v21  ;;  %v24634_v21 = vld [vmem:[%s36414_s1 + $0x3510] ss:$8 sps:$4 sm:$0xff]  }
 0x2cf   :  { %17041 = vmatpush1.bf16.msra.mxu1 %v24543_v22  ;;  %v24639_v22 = vld [vmem:[%s36414_s1 + $0xc24] ss:$8 sps:$4 sm:$0xff]  }
 0x2d0   :  { %18722 = vmatpush1.bf16.msra.mxu0 %v24546_v23  ;;  %17042 = vmatprep.subr.bf16.mxu1 %v24551_v26  ;;  %v24642_v23 = vld [vmem:[%s36414_s1 + $0x3524] ss:$8 sps:$4 sm:$0xff]   ;;  %v24637_v26 = vld [vmem:[%s36414_s1 + $0xc20] ss:$8 sps:$4 sm:$0xff]  }
 0x2d1   :  { %18723 = vmatprep.subr.bf16.mxu0 %v24554_v18  ;;  %v24640_v18 = vld [vmem:[%s36414_s1 + $0x3520] ss:$8 sps:$4 sm:$0xff]  }
 0x2d3   :  { %17043 = vmatpush1.bf16.msra.mxu1 %v24549_v27  ;;  %v24645_v27 = vld [vmem:[%s36414_s1 + $0xc34] ss:$8 sps:$4 sm:$0xff]  }
 0x2d4   :  { %18724 = vmatpush1.bf16.msra.mxu0 %v24552_v28  ;;  %17044 = vmatprep.subr.bf16.mxu1 %v24557_v30  ;;  %v24648_v28 = vld [vmem:[%s36414_s1 + $0x3534] ss:$8 sps:$4 sm:$0xff]   ;;  %v24643_v30 = vld [vmem:[%s36414_s1 + $0xc30] ss:$8 sps:$4 sm:$0xff]  }
 0x2d5   :  { %18725 = vmatprep.subr.bf16.mxu0 %v24560_v31  ;;  %v24646_v31 = vld [vmem:[%s36414_s1 + $0x3530] ss:$8 sps:$4 sm:$0xff]  }
 0x2d7   :  { %17045 = vmatpush1.bf16.msra.mxu1 %v24555_v24  ;;  %v24651_v24 = vld [vmem:[%s36414_s1 + $0xc44] ss:$8 sps:$4 sm:$0xff]  }
 0x2d8   :  { %18726 = vmatpush1.bf16.msra.mxu0 %v24558_v25  ;;  %17046 = vmatprep.subr.bf16.mxu1 %v24563_v34  ;;  %v24654_v25 = vld [vmem:[%s36414_s1 + $0x3544] ss:$8 sps:$4 sm:$0xff]   ;;  %v24649_v34 = vld [vmem:[%s36414_s1 + $0xc40] ss:$8 sps:$4 sm:$0xff]  }
 0x2d9   :  { %18727 = vmatprep.subr.bf16.mxu0 %v24566_v35  ;;  %v24652_v35 = vld [vmem:[%s36414_s1 + $0x3540] ss:$8 sps:$4 sm:$0xff]  }
 0x2db   :  { %17047 = vmatpush1.bf16.msra.mxu1 %v24561_v36  ;;  %v24657_v36 = vld [vmem:[%s36414_s1 + $0xc54] ss:$8 sps:$4 sm:$0xff]  }
 0x2dc   :  { %18728 = vmatpush1.bf16.msra.mxu0 %v24564_v37  ;;  %17048 = vmatprep.subr.bf16.mxu1 %v24569_v38  ;;  %v24660_v37 = vld [vmem:[%s36414_s1 + $0x3554] ss:$8 sps:$4 sm:$0xff]   ;;  %v24655_v38 = vld [vmem:[%s36414_s1 + $0xc50] ss:$8 sps:$4 sm:$0xff]  }
 0x2dd   :  { %18729 = vmatprep.subr.bf16.mxu0 %v24572_v20  ;;  %v24658_v20 = vld [vmem:[%s36414_s1 + $0x3550] ss:$8 sps:$4 sm:$0xff]  }
 0x2df   :  { %17049 = vmatpush1.bf16.msra.mxu1 %v24567_v40  ;;  %v24663_v40 = vld [vmem:[%s36414_s1 + $0xc64] ss:$8 sps:$4 sm:$0xff]  }
 0x2e0   :  { %18730 = vmatpush1.bf16.msra.mxu0 %v24570_v41  ;;  %17050 = vmatprep.subr.bf16.mxu1 %v24575_v42  ;;  %v24666_v41 = vld [vmem:[%s36414_s1 + $0x3564] ss:$8 sps:$4 sm:$0xff]   ;;  %v24661_v42 = vld [vmem:[%s36414_s1 + $0xc60] ss:$8 sps:$4 sm:$0xff]  }
 0x2e1   :  { %18731 = vmatprep.subr.bf16.mxu0 %v24578_v43  ;;  %v24664_v43 = vld [vmem:[%s36414_s1 + $0x3560] ss:$8 sps:$4 sm:$0xff]  }
 0x2e3   :  { %17051 = vmatpush1.bf16.msra.mxu1 %v24573_v44  ;;  %v24669_v44 = vld [vmem:[%s36414_s1 + $0xc74] ss:$8 sps:$4 sm:$0xff]  }
 0x2e4   :  { %18732 = vmatpush1.bf16.msra.mxu0 %v24576_v32  ;;  %17052 = vmatprep.subr.bf16.mxu1 %v24581_v46  ;;  %v24672_v32 = vld [vmem:[%s36414_s1 + $0x3574] ss:$8 sps:$4 sm:$0xff]   ;;  %v24667_v46 = vld [vmem:[%s36414_s1 + $0xc70] ss:$8 sps:$4 sm:$0xff]  }
 0x2e5   :  { %18733 = vmatprep.subr.bf16.mxu0 %v24584_v47  ;;  %v24670_v47 = vld [vmem:[%s36414_s1 + $0x3570] ss:$8 sps:$4 sm:$0xff]  }
 0x2e7   :  { %17053 = vmatpush1.bf16.msra.mxu1 %v24579_v48  ;;  %v24675_v48 = vld [vmem:[%s36414_s1 + $0xc84] ss:$8 sps:$4 sm:$0xff]  }
 0x2e8   :  { %18734 = vmatpush1.bf16.msra.mxu0 %v24582_v49  ;;  %17054 = vmatprep.subr.bf16.mxu1 %v24587_v50  ;;  %v24678_v49 = vld [vmem:[%s36414_s1 + $0x3584] ss:$8 sps:$4 sm:$0xff]   ;;  %v24673_v50 = vld [vmem:[%s36414_s1 + $0xc80] ss:$8 sps:$4 sm:$0xff]  }
 0x2e9   :  { %18735 = vmatprep.subr.bf16.mxu0 %v24590_v29  ;;  %v24676_v29 = vld [vmem:[%s36414_s1 + $0x3580] ss:$8 sps:$4 sm:$0xff]  }
 0x2eb   :  { %17055 = vmatpush1.bf16.msra.mxu1 %v24585_v52  ;;  %v24681_v52 = vld [vmem:[%s36414_s1 + $0xc94] ss:$8 sps:$4 sm:$0xff]  }
 0x2ec   :  { %18736 = vmatpush1.bf16.msra.mxu0 %v24588_v53  ;;  %17056 = vmatprep.subr.bf16.mxu1 %v24593_v54  ;;  %v24684_v53 = vld [vmem:[%s36414_s1 + $0x3594] ss:$8 sps:$4 sm:$0xff]   ;;  %v24679_v54 = vld [vmem:[%s36414_s1 + $0xc90] ss:$8 sps:$4 sm:$0xff]  }
 0x2ed   :  { %18737 = vmatprep.subr.bf16.mxu0 %v24596_v55  ;;  %v24682_v55 = vld [vmem:[%s36414_s1 + $0x3590] ss:$8 sps:$4 sm:$0xff]  }
 0x2ef   :  { %17057 = vmatpush1.bf16.msra.mxu1 %v24591_v56  ;;  %v24687_v56 = vld [vmem:[%s36414_s1 + $0xca4] ss:$8 sps:$4 sm:$0xff]  }
 0x2f0   :  { %18738 = vmatpush1.bf16.msra.mxu0 %v24594_v33  ;;  %17058 = vmatprep.subr.bf16.mxu1 %v24599_v58  ;;  %v24690_v33 = vld [vmem:[%s36414_s1 + $0x35a4] ss:$8 sps:$4 sm:$0xff]   ;;  %v24685_v58 = vld [vmem:[%s36414_s1 + $0xca0] ss:$8 sps:$4 sm:$0xff]  }
 0x2f1   :  { %18739 = vmatprep.subr.bf16.mxu0 %v24602_v59  ;;  %v24688_v59 = vld [vmem:[%s36414_s1 + $0x35a0] ss:$8 sps:$4 sm:$0xff]  }
 0x2f3   :  { %17059 = vmatpush1.bf16.msra.mxu1 %v24597_v60  ;;  %v24693_v60 = vld [vmem:[%s36414_s1 + $0xcb4] ss:$8 sps:$4 sm:$0xff]  }
 0x2f4   :  { %18740 = vmatpush1.bf16.msra.mxu0 %v24600_v61  ;;  %17060 = vmatprep.subr.bf16.mxu1 %v24605_v62  ;;  %v24696_v61 = vld [vmem:[%s36414_s1 + $0x35b4] ss:$8 sps:$4 sm:$0xff]   ;;  %v24691_v62 = vld [vmem:[%s36414_s1 + $0xcb0] ss:$8 sps:$4 sm:$0xff]  }
 0x2f5   :  { %18741 = vmatprep.subr.bf16.mxu0 %v24608_v39  ;;  %v24694_v39 = vld [vmem:[%s36414_s1 + $0x35b0] ss:$8 sps:$4 sm:$0xff]  }
 0x2f7   :  { %17061 = vmatpush1.bf16.msra.mxu1 %v24603_v0  ;;  %v24699_v0 = vld [vmem:[%s36414_s1 + $0xcc4] ss:$8 sps:$4 sm:$0xff]  }
 0x2f8   :  { %18742 = vmatpush1.bf16.msra.mxu0 %v24606_v1  ;;  %17062 = vmatprep.subr.bf16.mxu1 %v24611_v2  ;;  %v24702_v1 = vld [vmem:[%s36414_s1 + $0x35c4] ss:$8 sps:$4 sm:$0xff]   ;;  %v24697_v2 = vld [vmem:[%s36414_s1 + $0xcc0] ss:$8 sps:$4 sm:$0xff]  }
 0x2f9   :  { %18743 = vmatprep.subr.bf16.mxu0 %v24614_v3  ;;  %v24700_v3 = vld [vmem:[%s36414_s1 + $0x35c0] ss:$8 sps:$4 sm:$0xff]  }
 0x2fb   :  { %17063 = vmatpush1.bf16.msra.mxu1 %v24609_v4  ;;  %v24705_v4 = vld [vmem:[%s36414_s1 + $0xcd4] ss:$8 sps:$4 sm:$0xff]  }
 0x2fc   :  { %18744 = vmatpush1.bf16.msra.mxu0 %v24612_v45  ;;  %17064 = vmatprep.subr.bf16.mxu1 %v24617_v6  ;;  %v24708_v45 = vld [vmem:[%s36414_s1 + $0x35d4] ss:$8 sps:$4 sm:$0xff]   ;;  %v24703_v6 = vld [vmem:[%s36414_s1 + $0xcd0] ss:$8 sps:$4 sm:$0xff]  }
 0x2fd   :  { %18745 = vmatprep.subr.bf16.mxu0 %v24620_v7  ;;  %v24706_v7 = vld [vmem:[%s36414_s1 + $0x35d0] ss:$8 sps:$4 sm:$0xff]  }
 0x2ff   :  { %17065 = vmatpush1.bf16.msra.mxu1 %v24615_v8  ;;  %v24711_v8 = vld [vmem:[%s36414_s1 + $0xce4] ss:$8 sps:$4 sm:$0xff]  }
 0x300   :  { %18746 = vmatpush1.bf16.msra.mxu0 %v24618_v9  ;;  %17075 = vmatprep.subr.bf16.mxu1 %v24625_v10  ;;  %v24714_v9 = vld [vmem:[%s36414_s1 + $0x35e4] ss:$8 sps:$4 sm:$0xff]   ;;  %v24709_v10 = vld [vmem:[%s36414_s1 + $0xce0] ss:$8 sps:$4 sm:$0xff]  }
 0x301   :  { %18756 = vmatprep.subr.bf16.mxu0 %v24630_v51  ;;  %v24712_v51 = vld [vmem:[%s36414_s1 + $0x35e0] ss:$8 sps:$4 sm:$0xff]  }
 0x302   :  { %17067 = vmatmul.mubr.bf16.vlgmr.msra.gmra.mrb[0].mxu1 %v20235_v12  ;;  %v24717_v12 = vld [vmem:[%s36414_s1 + $0xcf4] ss:$8 sps:$4 sm:$0xff]  }
 0x303   :  { %18748 = vmatmul.mubr.bf16.vlgmr.msra.gmra.mrb[0].mxu0 %v20317_v13  ;;  %17076 = vmatpush1.bf16.msra.mxu1 %v24623_v14  ;;  %v24720_v13 = vld [vmem:[%s36414_s1 + $0x35f4] ss:$8 sps:$4 sm:$0xff]   ;;  %v24715_v14 = vld [vmem:[%s36414_s1 + $0xcf0] ss:$8 sps:$4 sm:$0xff]  }
 0x304   :  { %18757 = vmatpush1.bf16.msra.mxu0 %v24628_v15  ;;  %17077 = vmatprep.subr.bf16.mxu1 %v24633_v16  ;;  %v24718_v15 = vld [vmem:[%s36414_s1 + $0x35f0] ss:$8 sps:$4 sm:$0xff]   ;;  %v24725_v16 = vld [vmem:[%s36414_s1 + $0xd04] ss:$8 sps:$4 sm:$0xff]  }
 0x305   :  { %18758 = vmatprep.subr.bf16.mxu0 %v24636_v57  ;;  %17107 = vmatprep.mubr.bf16.mxu1 %v20238_v5  ;;  %v24730_v57 = vld [vmem:[%s36414_s1 + $0x3604] ss:$8 sps:$4 sm:$0xff]  }
 0x306   :  { %18788 = vmatprep.mubr.bf16.mxu0 %v20320_v17  ;;  %v30355_v5 = vld [vmem:[%s36413_s0 + $0x68] sm:$0xff]  ;;  %v30360_v17 = vld [vmem:[%s36413_s0 + $0x1b0] sm:$0xff] }
 0x307   :  { %17078 = vmatpush1.bf16.msra.mxu1 %v24631_v19  ;;  %v20237_v19 = vcombine.low %v30145_v63, %v30145_v63  ;;  %v24736_v63 = vld [vmem:[%s36414_s1 + $0x3614] ss:$8 sps:$4 sm:$0xff]  }
 0x308   :  { %18759 = vmatpush1.bf16.msra.mxu0 %v24634_v21  ;;  %17079 = vmatprep.subr.bf16.mxu1 %v24639_v22  ;;  %v20319_v21 = vcombine.low %v30150_v11, %v30150_v11  ;;  %v24723_v22 = vld [vmem:[%s36414_s1 + $0xd00] ss:$8 sps:$4 sm:$0xff]   ;;  %v20240_v11 = vcombine.high %v30355_v5, %v30355_v5 }
 0x309   :  { %18760 = vmatprep.subr.bf16.mxu0 %v24642_v23  ;;  %v24728_v23 = vld [vmem:[%s36414_s1 + $0x3600] ss:$8 sps:$4 sm:$0xff]  }
 0x30b   :  { %17080 = vmatpush1.bf16.msra.mxu1 %v24637_v26  ;;  %v24733_v26 = vld [vmem:[%s36414_s1 + $0xd14] ss:$8 sps:$4 sm:$0xff]  }
 0x30c   :  { %18761 = vmatpush1.bf16.msra.mxu0 %v24640_v18  ;;  %17081 = vmatprep.subr.bf16.mxu1 %v24645_v27  ;;  %v20322_v18 = vcombine.high %v30360_v17, %v30360_v17  ;;  %v24731_v27 = vld [vmem:[%s36414_s1 + $0xd10] ss:$8 sps:$4 sm:$0xff]  }
 0x30d   :  { %18762 = vmatprep.subr.bf16.mxu0 %v24648_v28  ;;  %v24734_v28 = vld [vmem:[%s36414_s1 + $0x3610] ss:$8 sps:$4 sm:$0xff]  }
 0x30f   :  { %17082 = vmatpush1.bf16.msra.mxu1 %v24643_v30  ;;  %v24739_v30 = vld [vmem:[%s36414_s1 + $0xd24] ss:$8 sps:$4 sm:$0xff]  }
 0x310   :  { %18763 = vmatpush1.bf16.msra.mxu0 %v24646_v31  ;;  %17083 = vmatprep.subr.bf16.mxu1 %v24651_v24  ;;  %v24742_v31 = vld [vmem:[%s36414_s1 + $0x3624] ss:$8 sps:$4 sm:$0xff]   ;;  %v24737_v24 = vld [vmem:[%s36414_s1 + $0xd20] ss:$8 sps:$4 sm:$0xff]  }
 0x311   :  { %18764 = vmatprep.subr.bf16.mxu0 %v24654_v25  ;;  %v24740_v25 = vld [vmem:[%s36414_s1 + $0x3620] ss:$8 sps:$4 sm:$0xff]  }
 0x313   :  { %17084 = vmatpush1.bf16.msra.mxu1 %v24649_v34  ;;  %v24745_v34 = vld [vmem:[%s36414_s1 + $0xd34] ss:$8 sps:$4 sm:$0xff]  }
 0x314   :  { %18765 = vmatpush1.bf16.msra.mxu0 %v24652_v35  ;;  %17085 = vmatprep.subr.bf16.mxu1 %v24657_v36  ;;  %v24748_v35 = vld [vmem:[%s36414_s1 + $0x3634] ss:$8 sps:$4 sm:$0xff]   ;;  %v24743_v36 = vld [vmem:[%s36414_s1 + $0xd30] ss:$8 sps:$4 sm:$0xff]  }
 0x315   :  { %18766 = vmatprep.subr.bf16.mxu0 %v24660_v37  ;;  %v24746_v37 = vld [vmem:[%s36414_s1 + $0x3630] ss:$8 sps:$4 sm:$0xff]  }
 0x317   :  { %17086 = vmatpush1.bf16.msra.mxu1 %v24655_v38  ;;  %v24751_v38 = vld [vmem:[%s36414_s1 + $0xd44] ss:$8 sps:$4 sm:$0xff]  }
 0x318   :  { %18767 = vmatpush1.bf16.msra.mxu0 %v24658_v20  ;;  %17087 = vmatprep.subr.bf16.mxu1 %v24663_v40  ;;  %v24754_v20 = vld [vmem:[%s36414_s1 + $0x3644] ss:$8 sps:$4 sm:$0xff]   ;;  %v24749_v40 = vld [vmem:[%s36414_s1 + $0xd40] ss:$8 sps:$4 sm:$0xff]  }
 0x319   :  { %18768 = vmatprep.subr.bf16.mxu0 %v24666_v41  ;;  %v24752_v41 = vld [vmem:[%s36414_s1 + $0x3640] ss:$8 sps:$4 sm:$0xff]  }
 0x31b   :  { %17088 = vmatpush1.bf16.msra.mxu1 %v24661_v42  ;;  %v24757_v42 = vld [vmem:[%s36414_s1 + $0xd54] ss:$8 sps:$4 sm:$0xff]  }
 0x31c   :  { %18769 = vmatpush1.bf16.msra.mxu0 %v24664_v43  ;;  %17089 = vmatprep.subr.bf16.mxu1 %v24669_v44  ;;  %v24760_v43 = vld [vmem:[%s36414_s1 + $0x3654] ss:$8 sps:$4 sm:$0xff]   ;;  %v24755_v44 = vld [vmem:[%s36414_s1 + $0xd50] ss:$8 sps:$4 sm:$0xff]  }
 0x31d   :  { %18770 = vmatprep.subr.bf16.mxu0 %v24672_v32  ;;  %v24758_v32 = vld [vmem:[%s36414_s1 + $0x3650] ss:$8 sps:$4 sm:$0xff]  }
 0x31f   :  { %17090 = vmatpush1.bf16.msra.mxu1 %v24667_v46  ;;  %v24763_v46 = vld [vmem:[%s36414_s1 + $0xd64] ss:$8 sps:$4 sm:$0xff]  }
 0x320   :  { %18771 = vmatpush1.bf16.msra.mxu0 %v24670_v47  ;;  %17091 = vmatprep.subr.bf16.mxu1 %v24675_v48  ;;  %v24766_v47 = vld [vmem:[%s36414_s1 + $0x3664] ss:$8 sps:$4 sm:$0xff]   ;;  %v24761_v48 = vld [vmem:[%s36414_s1 + $0xd60] ss:$8 sps:$4 sm:$0xff]  }
 0x321   :  { %18772 = vmatprep.subr.bf16.mxu0 %v24678_v49  ;;  %v24764_v49 = vld [vmem:[%s36414_s1 + $0x3660] ss:$8 sps:$4 sm:$0xff]  }
 0x323   :  { %17092 = vmatpush1.bf16.msra.mxu1 %v24673_v50  ;;  %v24769_v50 = vld [vmem:[%s36414_s1 + $0xd74] ss:$8 sps:$4 sm:$0xff]  }
 0x324   :  { %18773 = vmatpush1.bf16.msra.mxu0 %v24676_v29  ;;  %17093 = vmatprep.subr.bf16.mxu1 %v24681_v52  ;;  %v24772_v29 = vld [vmem:[%s36414_s1 + $0x3674] ss:$8 sps:$4 sm:$0xff]   ;;  %v24767_v52 = vld [vmem:[%s36414_s1 + $0xd70] ss:$8 sps:$4 sm:$0xff]  }
 0x325   :  { %18774 = vmatprep.subr.bf16.mxu0 %v24684_v53  ;;  %v24770_v53 = vld [vmem:[%s36414_s1 + $0x3670] ss:$8 sps:$4 sm:$0xff]  }
 0x327   :  { %17094 = vmatpush1.bf16.msra.mxu1 %v24679_v54  ;;  %v24775_v54 = vld [vmem:[%s36414_s1 + $0xd84] ss:$8 sps:$4 sm:$0xff]  }
 0x328   :  { %18775 = vmatpush1.bf16.msra.mxu0 %v24682_v55  ;;  %17095 = vmatprep.subr.bf16.mxu1 %v24687_v56  ;;  %v24778_v55 = vld [vmem:[%s36414_s1 + $0x3684] ss:$8 sps:$4 sm:$0xff]   ;;  %v24773_v56 = vld [vmem:[%s36414_s1 + $0xd80] ss:$8 sps:$4 sm:$0xff]  }
 0x329   :  { %18776 = vmatprep.subr.bf16.mxu0 %v24690_v33  ;;  %v24776_v33 = vld [vmem:[%s36414_s1 + $0x3680] ss:$8 sps:$4 sm:$0xff]  }
 0x32b   :  { %17096 = vmatpush1.bf16.msra.mxu1 %v24685_v58  ;;  %v24781_v58 = vld [vmem:[%s36414_s1 + $0xd94] ss:$8 sps:$4 sm:$0xff]  }
 0x32c   :  { %18777 = vmatpush1.bf16.msra.mxu0 %v24688_v59  ;;  %17097 = vmatprep.subr.bf16.mxu1 %v24693_v60  ;;  %v24784_v59 = vld [vmem:[%s36414_s1 + $0x3694] ss:$8 sps:$4 sm:$0xff]   ;;  %v24779_v60 = vld [vmem:[%s36414_s1 + $0xd90] ss:$8 sps:$4 sm:$0xff]  }
 0x32d   :  { %18778 = vmatprep.subr.bf16.mxu0 %v24696_v61  ;;  %v24782_v61 = vld [vmem:[%s36414_s1 + $0x3690] ss:$8 sps:$4 sm:$0xff]  }
 0x32f   :  { %17098 = vmatpush1.bf16.msra.mxu1 %v24691_v62  ;;  %v24787_v62 = vld [vmem:[%s36414_s1 + $0xda4] ss:$8 sps:$4 sm:$0xff]  }
 0x330   :  { %18779 = vmatpush1.bf16.msra.mxu0 %v24694_v39  ;;  %17099 = vmatprep.subr.bf16.mxu1 %v24699_v0  ;;  %v24790_v39 = vld [vmem:[%s36414_s1 + $0x36a4] ss:$8 sps:$4 sm:$0xff]   ;;  %v24785_v0 = vld [vmem:[%s36414_s1 + $0xda0] ss:$8 sps:$4 sm:$0xff]  }
 0x331   :  { %18780 = vmatprep.subr.bf16.mxu0 %v24702_v1  ;;  %v24788_v1 = vld [vmem:[%s36414_s1 + $0x36a0] ss:$8 sps:$4 sm:$0xff]  }
 0x333   :  { %17100 = vmatpush1.bf16.msra.mxu1 %v24697_v2  ;;  %v24793_v2 = vld [vmem:[%s36414_s1 + $0xdb4] ss:$8 sps:$4 sm:$0xff]  }
 0x334   :  { %18781 = vmatpush1.bf16.msra.mxu0 %v24700_v3  ;;  %17101 = vmatprep.subr.bf16.mxu1 %v24705_v4  ;;  %v24796_v3 = vld [vmem:[%s36414_s1 + $0x36b4] ss:$8 sps:$4 sm:$0xff]   ;;  %v24791_v4 = vld [vmem:[%s36414_s1 + $0xdb0] ss:$8 sps:$4 sm:$0xff]  }
 0x335   :  { %18782 = vmatprep.subr.bf16.mxu0 %v24708_v45  ;;  %v24794_v45 = vld [vmem:[%s36414_s1 + $0x36b0] ss:$8 sps:$4 sm:$0xff]  }
 0x337   :  { %17102 = vmatpush1.bf16.msra.mxu1 %v24703_v6  ;;  %v24799_v6 = vld [vmem:[%s36414_s1 + $0xdc4] ss:$8 sps:$4 sm:$0xff]  }
 0x338   :  { %18783 = vmatpush1.bf16.msra.mxu0 %v24706_v7  ;;  %17103 = vmatprep.subr.bf16.mxu1 %v24711_v8  ;;  %v24802_v7 = vld [vmem:[%s36414_s1 + $0x36c4] ss:$8 sps:$4 sm:$0xff]   ;;  %v24797_v8 = vld [vmem:[%s36414_s1 + $0xdc0] ss:$8 sps:$4 sm:$0xff]  }
 0x339   :  { %18784 = vmatprep.subr.bf16.mxu0 %v24714_v9  ;;  %v24800_v9 = vld [vmem:[%s36414_s1 + $0x36c0] ss:$8 sps:$4 sm:$0xff]  }
 0x33b   :  { %17104 = vmatpush1.bf16.msra.mxu1 %v24709_v10  ;;  %v24805_v10 = vld [vmem:[%s36414_s1 + $0xdd4] ss:$8 sps:$4 sm:$0xff]  }
 0x33c   :  { %18785 = vmatpush1.bf16.msra.mxu0 %v24712_v51  ;;  %17105 = vmatprep.subr.bf16.mxu1 %v24717_v12  ;;  %v24808_v51 = vld [vmem:[%s36414_s1 + $0x36d4] ss:$8 sps:$4 sm:$0xff]   ;;  %v24803_v12 = vld [vmem:[%s36414_s1 + $0xdd0] ss:$8 sps:$4 sm:$0xff]  }
 0x33d   :  { %18786 = vmatprep.subr.bf16.mxu0 %v24720_v13  ;;  %v24806_v13 = vld [vmem:[%s36414_s1 + $0x36d0] ss:$8 sps:$4 sm:$0xff]  }
 0x33f   :  { %17106 = vmatpush1.bf16.msra.mxu1 %v24715_v14  ;;  %v24811_v14 = vld [vmem:[%s36414_s1 + $0xde4] ss:$8 sps:$4 sm:$0xff]  }
 0x340   :  { %18787 = vmatpush1.bf16.msra.mxu0 %v24718_v15  ;;  %17116 = vmatprep.subr.bf16.mxu1 %v24725_v16  ;;  %v24814_v15 = vld [vmem:[%s36414_s1 + $0x36e4] ss:$8 sps:$4 sm:$0xff]   ;;  %v24809_v16 = vld [vmem:[%s36414_s1 + $0xde0] ss:$8 sps:$4 sm:$0xff]  }
 0x341   :  { %18797 = vmatprep.subr.bf16.mxu0 %v24730_v57  ;;  %v24812_v57 = vld [vmem:[%s36414_s1 + $0x36e0] ss:$8 sps:$4 sm:$0xff]  }
 0x342   :  { %17108 = vmatmul.mubr.bf16.vlgmr.msra.gmra.mrb[0].mxu1 %v20237_v19  ;;  %v24817_v19 = vld [vmem:[%s36414_s1 + $0xdf4] ss:$8 sps:$4 sm:$0xff]  }
 0x343   :  { %18789 = vmatmul.mubr.bf16.vlgmr.msra.gmra.mrb[0].mxu0 %v20319_v21  ;;  %17117 = vmatpush1.bf16.msra.mxu1 %v24723_v22  ;;  %v24820_v21 = vld [vmem:[%s36414_s1 + $0x36f4] ss:$8 sps:$4 sm:$0xff]   ;;  %v24815_v22 = vld [vmem:[%s36414_s1 + $0xdf0] ss:$8 sps:$4 sm:$0xff]  }
 0x344   :  { %18798 = vmatpush1.bf16.msra.mxu0 %v24728_v23  ;;  %17118 = vmatprep.subr.bf16.mxu1 %v24733_v26  ;;  %v24818_v23 = vld [vmem:[%s36414_s1 + $0x36f0] ss:$8 sps:$4 sm:$0xff]   ;;  %v24825_v26 = vld [vmem:[%s36414_s1 + $0xe04] ss:$8 sps:$4 sm:$0xff]  }
 0x345   :  { %18799 = vmatprep.subr.bf16.mxu0 %v24736_v63  ;;  %17148 = vmatprep.mubr.bf16.mxu1 %v20240_v11  ;;  %v24830_v63 = vld [vmem:[%s36414_s1 + $0x3704] ss:$8 sps:$4 sm:$0xff]   ;;  %v30565_v11 = vld [vmem:[%s36413_s0 + $0x70] sm:$0xff] }
 0x346   :  { %18829 = vmatprep.mubr.bf16.mxu0 %v20322_v18  ;;  %v30570_v18 = vld [vmem:[%s36413_s0 + $0x1b8] sm:$0xff] }
 0x347   :  { %17119 = vmatpush1.bf16.msra.mxu1 %v24731_v27  ;;  %v20239_v27 = vcombine.low %v30355_v5, %v30355_v5  ;;  %v24836_v5 = vld [vmem:[%s36414_s1 + $0x3714] ss:$8 sps:$4 sm:$0xff]  }
 0x348   :  { %18800 = vmatpush1.bf16.msra.mxu0 %v24734_v28  ;;  %17120 = vmatprep.subr.bf16.mxu1 %v24739_v30  ;;  %v20321_v28 = vcombine.low %v30360_v17, %v30360_v17  ;;  %v24823_v30 = vld [vmem:[%s36414_s1 + $0xe00] ss:$8 sps:$4 sm:$0xff]   ;;  %v20242_v17 = vcombine.high %v30565_v11, %v30565_v11 }
 0x349   :  { %18801 = vmatprep.subr.bf16.mxu0 %v24742_v31  ;;  %v24828_v31 = vld [vmem:[%s36414_s1 + $0x3700] ss:$8 sps:$4 sm:$0xff]  }
 0x34b   :  { %17121 = vmatpush1.bf16.msra.mxu1 %v24737_v24  ;;  %v24833_v24 = vld [vmem:[%s36414_s1 + $0xe14] ss:$8 sps:$4 sm:$0xff]  }
 0x34c   :  { %18802 = vmatpush1.bf16.msra.mxu0 %v24740_v25  ;;  %17122 = vmatprep.subr.bf16.mxu1 %v24745_v34  ;;  %v20324_v25 = vcombine.high %v30570_v18, %v30570_v18  ;;  %v24831_v34 = vld [vmem:[%s36414_s1 + $0xe10] ss:$8 sps:$4 sm:$0xff]  }
 0x34d   :  { %18803 = vmatprep.subr.bf16.mxu0 %v24748_v35  ;;  %v24834_v35 = vld [vmem:[%s36414_s1 + $0x3710] ss:$8 sps:$4 sm:$0xff]  }
 0x34f   :  { %17123 = vmatpush1.bf16.msra.mxu1 %v24743_v36  ;;  %v24839_v36 = vld [vmem:[%s36414_s1 + $0xe24] ss:$8 sps:$4 sm:$0xff]  }
 0x350   :  { %18804 = vmatpush1.bf16.msra.mxu0 %v24746_v37  ;;  %17124 = vmatprep.subr.bf16.mxu1 %v24751_v38  ;;  %v24842_v37 = vld [vmem:[%s36414_s1 + $0x3724] ss:$8 sps:$4 sm:$0xff]   ;;  %v24837_v38 = vld [vmem:[%s36414_s1 + $0xe20] ss:$8 sps:$4 sm:$0xff]  }
 0x351   :  { %18805 = vmatprep.subr.bf16.mxu0 %v24754_v20  ;;  %v24840_v20 = vld [vmem:[%s36414_s1 + $0x3720] ss:$8 sps:$4 sm:$0xff]  }
 0x353   :  { %17125 = vmatpush1.bf16.msra.mxu1 %v24749_v40  ;;  %v24845_v40 = vld [vmem:[%s36414_s1 + $0xe34] ss:$8 sps:$4 sm:$0xff]  }
 0x354   :  { %18806 = vmatpush1.bf16.msra.mxu0 %v24752_v41  ;;  %17126 = vmatprep.subr.bf16.mxu1 %v24757_v42  ;;  %v24848_v41 = vld [vmem:[%s36414_s1 + $0x3734] ss:$8 sps:$4 sm:$0xff]   ;;  %v24843_v42 = vld [vmem:[%s36414_s1 + $0xe30] ss:$8 sps:$4 sm:$0xff]  }
 0x355   :  { %18807 = vmatprep.subr.bf16.mxu0 %v24760_v43  ;;  %v24846_v43 = vld [vmem:[%s36414_s1 + $0x3730] ss:$8 sps:$4 sm:$0xff]  }
 0x357   :  { %17127 = vmatpush1.bf16.msra.mxu1 %v24755_v44  ;;  %v24851_v44 = vld [vmem:[%s36414_s1 + $0xe44] ss:$8 sps:$4 sm:$0xff]  }
 0x358   :  { %18808 = vmatpush1.bf16.msra.mxu0 %v24758_v32  ;;  %17128 = vmatprep.subr.bf16.mxu1 %v24763_v46  ;;  %v24854_v32 = vld [vmem:[%s36414_s1 + $0x3744] ss:$8 sps:$4 sm:$0xff]   ;;  %v24849_v46 = vld [vmem:[%s36414_s1 + $0xe40] ss:$8 sps:$4 sm:$0xff]  }
 0x359   :  { %18809 = vmatprep.subr.bf16.mxu0 %v24766_v47  ;;  %v24852_v47 = vld [vmem:[%s36414_s1 + $0x3740] ss:$8 sps:$4 sm:$0xff]  }
 0x35b   :  { %17129 = vmatpush1.bf16.msra.mxu1 %v24761_v48  ;;  %v24857_v48 = vld [vmem:[%s36414_s1 + $0xe54] ss:$8 sps:$4 sm:$0xff]  }
 0x35c   :  { %18810 = vmatpush1.bf16.msra.mxu0 %v24764_v49  ;;  %17130 = vmatprep.subr.bf16.mxu1 %v24769_v50  ;;  %v24860_v49 = vld [vmem:[%s36414_s1 + $0x3754] ss:$8 sps:$4 sm:$0xff]   ;;  %v24855_v50 = vld [vmem:[%s36414_s1 + $0xe50] ss:$8 sps:$4 sm:$0xff]  }
 0x35d   :  { %18811 = vmatprep.subr.bf16.mxu0 %v24772_v29  ;;  %v24858_v29 = vld [vmem:[%s36414_s1 + $0x3750] ss:$8 sps:$4 sm:$0xff]  }
 0x35f   :  { %17131 = vmatpush1.bf16.msra.mxu1 %v24767_v52  ;;  %v24863_v52 = vld [vmem:[%s36414_s1 + $0xe64] ss:$8 sps:$4 sm:$0xff]  }
 0x360   :  { %18812 = vmatpush1.bf16.msra.mxu0 %v24770_v53  ;;  %17132 = vmatprep.subr.bf16.mxu1 %v24775_v54  ;;  %v24866_v53 = vld [vmem:[%s36414_s1 + $0x3764] ss:$8 sps:$4 sm:$0xff]   ;;  %v24861_v54 = vld [vmem:[%s36414_s1 + $0xe60] ss:$8 sps:$4 sm:$0xff]  }
 0x361   :  { %18813 = vmatprep.subr.bf16.mxu0 %v24778_v55  ;;  %v24864_v55 = vld [vmem:[%s36414_s1 + $0x3760] ss:$8 sps:$4 sm:$0xff]  }
 0x363   :  { %17133 = vmatpush1.bf16.msra.mxu1 %v24773_v56  ;;  %v24869_v56 = vld [vmem:[%s36414_s1 + $0xe74] ss:$8 sps:$4 sm:$0xff]  }
 0x364   :  { %18814 = vmatpush1.bf16.msra.mxu0 %v24776_v33  ;;  %17134 = vmatprep.subr.bf16.mxu1 %v24781_v58  ;;  %v24872_v33 = vld [vmem:[%s36414_s1 + $0x3774] ss:$8 sps:$4 sm:$0xff]   ;;  %v24867_v58 = vld [vmem:[%s36414_s1 + $0xe70] ss:$8 sps:$4 sm:$0xff]  }
 0x365   :  { %18815 = vmatprep.subr.bf16.mxu0 %v24784_v59  ;;  %v24870_v59 = vld [vmem:[%s36414_s1 + $0x3770] ss:$8 sps:$4 sm:$0xff]  }
 0x367   :  { %17135 = vmatpush1.bf16.msra.mxu1 %v24779_v60  ;;  %v24875_v60 = vld [vmem:[%s36414_s1 + $0xe84] ss:$8 sps:$4 sm:$0xff]  }
 0x368   :  { %18816 = vmatpush1.bf16.msra.mxu0 %v24782_v61  ;;  %17136 = vmatprep.subr.bf16.mxu1 %v24787_v62  ;;  %v24878_v61 = vld [vmem:[%s36414_s1 + $0x3784] ss:$8 sps:$4 sm:$0xff]   ;;  %v24873_v62 = vld [vmem:[%s36414_s1 + $0xe80] ss:$8 sps:$4 sm:$0xff]  }
 0x369   :  { %18817 = vmatprep.subr.bf16.mxu0 %v24790_v39  ;;  %v24876_v39 = vld [vmem:[%s36414_s1 + $0x3780] ss:$8 sps:$4 sm:$0xff]  }
 0x36b   :  { %17137 = vmatpush1.bf16.msra.mxu1 %v24785_v0  ;;  %v24881_v0 = vld [vmem:[%s36414_s1 + $0xe94] ss:$8 sps:$4 sm:$0xff]  }
 0x36c   :  { %18818 = vmatpush1.bf16.msra.mxu0 %v24788_v1  ;;  %17138 = vmatprep.subr.bf16.mxu1 %v24793_v2  ;;  %v24884_v1 = vld [vmem:[%s36414_s1 + $0x3794] ss:$8 sps:$4 sm:$0xff]   ;;  %v24879_v2 = vld [vmem:[%s36414_s1 + $0xe90] ss:$8 sps:$4 sm:$0xff]  }
 0x36d   :  { %18819 = vmatprep.subr.bf16.mxu0 %v24796_v3  ;;  %v24882_v3 = vld [vmem:[%s36414_s1 + $0x3790] ss:$8 sps:$4 sm:$0xff]  }
 0x36f   :  { %17139 = vmatpush1.bf16.msra.mxu1 %v24791_v4  ;;  %v24887_v4 = vld [vmem:[%s36414_s1 + $0xea4] ss:$8 sps:$4 sm:$0xff]  }
 0x370   :  { %18820 = vmatpush1.bf16.msra.mxu0 %v24794_v45  ;;  %17140 = vmatprep.subr.bf16.mxu1 %v24799_v6  ;;  %v24890_v45 = vld [vmem:[%s36414_s1 + $0x37a4] ss:$8 sps:$4 sm:$0xff]   ;;  %v24885_v6 = vld [vmem:[%s36414_s1 + $0xea0] ss:$8 sps:$4 sm:$0xff]  }
 0x371   :  { %18821 = vmatprep.subr.bf16.mxu0 %v24802_v7  ;;  %v24888_v7 = vld [vmem:[%s36414_s1 + $0x37a0] ss:$8 sps:$4 sm:$0xff]  }
 0x373   :  { %17141 = vmatpush1.bf16.msra.mxu1 %v24797_v8  ;;  %v24893_v8 = vld [vmem:[%s36414_s1 + $0xeb4] ss:$8 sps:$4 sm:$0xff]  }
 0x374   :  { %18822 = vmatpush1.bf16.msra.mxu0 %v24800_v9  ;;  %17142 = vmatprep.subr.bf16.mxu1 %v24805_v10  ;;  %v24896_v9 = vld [vmem:[%s36414_s1 + $0x37b4] ss:$8 sps:$4 sm:$0xff]   ;;  %v24891_v10 = vld [vmem:[%s36414_s1 + $0xeb0] ss:$8 sps:$4 sm:$0xff]  }
 0x375   :  { %18823 = vmatprep.subr.bf16.mxu0 %v24808_v51  ;;  %v24894_v51 = vld [vmem:[%s36414_s1 + $0x37b0] ss:$8 sps:$4 sm:$0xff]  }
 0x377   :  { %17143 = vmatpush1.bf16.msra.mxu1 %v24803_v12  ;;  %v24899_v12 = vld [vmem:[%s36414_s1 + $0xec4] ss:$8 sps:$4 sm:$0xff]  }
 0x378   :  { %18824 = vmatpush1.bf16.msra.mxu0 %v24806_v13  ;;  %17144 = vmatprep.subr.bf16.mxu1 %v24811_v14  ;;  %v24902_v13 = vld [vmem:[%s36414_s1 + $0x37c4] ss:$8 sps:$4 sm:$0xff]   ;;  %v24897_v14 = vld [vmem:[%s36414_s1 + $0xec0] ss:$8 sps:$4 sm:$0xff]  }
 0x379   :  { %18825 = vmatprep.subr.bf16.mxu0 %v24814_v15  ;;  %v24900_v15 = vld [vmem:[%s36414_s1 + $0x37c0] ss:$8 sps:$4 sm:$0xff]  }
 0x37b   :  { %17145 = vmatpush1.bf16.msra.mxu1 %v24809_v16  ;;  %v24905_v16 = vld [vmem:[%s36414_s1 + $0xed4] ss:$8 sps:$4 sm:$0xff]  }
 0x37c   :  { %18826 = vmatpush1.bf16.msra.mxu0 %v24812_v57  ;;  %17146 = vmatprep.subr.bf16.mxu1 %v24817_v19  ;;  %v24908_v57 = vld [vmem:[%s36414_s1 + $0x37d4] ss:$8 sps:$4 sm:$0xff]   ;;  %v24903_v19 = vld [vmem:[%s36414_s1 + $0xed0] ss:$8 sps:$4 sm:$0xff]  }
 0x37d   :  { %18827 = vmatprep.subr.bf16.mxu0 %v24820_v21  ;;  %v24906_v21 = vld [vmem:[%s36414_s1 + $0x37d0] ss:$8 sps:$4 sm:$0xff]  }
 0x37f   :  { %17147 = vmatpush1.bf16.msra.mxu1 %v24815_v22  ;;  %v24911_v22 = vld [vmem:[%s36414_s1 + $0xee4] ss:$8 sps:$4 sm:$0xff]  }
 0x380   :  { %18828 = vmatpush1.bf16.msra.mxu0 %v24818_v23  ;;  %17157 = vmatprep.subr.bf16.mxu1 %v24825_v26  ;;  %v24914_v23 = vld [vmem:[%s36414_s1 + $0x37e4] ss:$8 sps:$4 sm:$0xff]   ;;  %v24909_v26 = vld [vmem:[%s36414_s1 + $0xee0] ss:$8 sps:$4 sm:$0xff]  }
 0x381   :  { %18838 = vmatprep.subr.bf16.mxu0 %v24830_v63  ;;  %v24912_v63 = vld [vmem:[%s36414_s1 + $0x37e0] ss:$8 sps:$4 sm:$0xff]  }
 0x382   :  { %17149 = vmatmul.mubr.bf16.vlgmr.msra.gmra.mrb[0].mxu1 %v20239_v27  ;;  %v24917_v27 = vld [vmem:[%s36414_s1 + $0xef4] ss:$8 sps:$4 sm:$0xff]  }
 0x383   :  { %18830 = vmatmul.mubr.bf16.vlgmr.msra.gmra.mrb[0].mxu0 %v20321_v28  ;;  %17158 = vmatpush1.bf16.msra.mxu1 %v24823_v30  ;;  %v24920_v28 = vld [vmem:[%s36414_s1 + $0x37f4] ss:$8 sps:$4 sm:$0xff]   ;;  %v24915_v30 = vld [vmem:[%s36414_s1 + $0xef0] ss:$8 sps:$4 sm:$0xff]  }
 0x384   :  { %18839 = vmatpush1.bf16.msra.mxu0 %v24828_v31  ;;  %17159 = vmatprep.subr.bf16.mxu1 %v24833_v24  ;;  %v24918_v31 = vld [vmem:[%s36414_s1 + $0x37f0] ss:$8 sps:$4 sm:$0xff]   ;;  %v24925_v24 = vld [vmem:[%s36414_s1 + $0xf04] ss:$8 sps:$4 sm:$0xff]  }
 0x385   :  { %18840 = vmatprep.subr.bf16.mxu0 %v24836_v5  ;;  %17189 = vmatprep.mubr.bf16.mxu1 %v20242_v17  ;;  %v24930_v5 = vld [vmem:[%s36414_s1 + $0x3804] ss:$8 sps:$4 sm:$0xff]   ;;  %v30775_v17 = vld [vmem:[%s36413_s0 + $0x78] sm:$0xff] }
 0x386   :  { %18870 = vmatprep.mubr.bf16.mxu0 %v20324_v25  ;;  %v30780_v25 = vld [vmem:[%s36413_s0 + $0x1c0] sm:$0xff] }
 0x387   :  { %17160 = vmatpush1.bf16.msra.mxu1 %v24831_v34  ;;  %v20241_v34 = vcombine.low %v30565_v11, %v30565_v11  ;;  %v24936_v11 = vld [vmem:[%s36414_s1 + $0x3814] ss:$8 sps:$4 sm:$0xff]  }
 0x388   :  { %18841 = vmatpush1.bf16.msra.mxu0 %v24834_v35  ;;  %17161 = vmatprep.subr.bf16.mxu1 %v24839_v36  ;;  %v20323_v35 = vcombine.low %v30570_v18, %v30570_v18  ;;  %v24923_v36 = vld [vmem:[%s36414_s1 + $0xf00] ss:$8 sps:$4 sm:$0xff]   ;;  %v20244_v18 = vcombine.high %v30775_v17, %v30775_v17 }
 0x389   :  { %18842 = vmatprep.subr.bf16.mxu0 %v24842_v37  ;;  %v24928_v37 = vld [vmem:[%s36414_s1 + $0x3800] ss:$8 sps:$4 sm:$0xff]  }
 0x38b   :  { %17162 = vmatpush1.bf16.msra.mxu1 %v24837_v38  ;;  %v24933_v38 = vld [vmem:[%s36414_s1 + $0xf14] ss:$8 sps:$4 sm:$0xff]  }
 0x38c   :  { %18843 = vmatpush1.bf16.msra.mxu0 %v24840_v20  ;;  %17163 = vmatprep.subr.bf16.mxu1 %v24845_v40  ;;  %v20326_v20 = vcombine.high %v30780_v25, %v30780_v25  ;;  %v24931_v40 = vld [vmem:[%s36414_s1 + $0xf10] ss:$8 sps:$4 sm:$0xff]  }
 0x38d   :  { %18844 = vmatprep.subr.bf16.mxu0 %v24848_v41  ;;  %v24934_v41 = vld [vmem:[%s36414_s1 + $0x3810] ss:$8 sps:$4 sm:$0xff]  }
 0x38f   :  { %17164 = vmatpush1.bf16.msra.mxu1 %v24843_v42  ;;  %v24939_v42 = vld [vmem:[%s36414_s1 + $0xf24] ss:$8 sps:$4 sm:$0xff]  }
 0x390   :  { %18845 = vmatpush1.bf16.msra.mxu0 %v24846_v43  ;;  %17165 = vmatprep.subr.bf16.mxu1 %v24851_v44  ;;  %v24942_v43 = vld [vmem:[%s36414_s1 + $0x3824] ss:$8 sps:$4 sm:$0xff]   ;;  %v24937_v44 = vld [vmem:[%s36414_s1 + $0xf20] ss:$8 sps:$4 sm:$0xff]  }
 0x391   :  { %18846 = vmatprep.subr.bf16.mxu0 %v24854_v32  ;;  %v24940_v32 = vld [vmem:[%s36414_s1 + $0x3820] ss:$8 sps:$4 sm:$0xff]  }
 0x393   :  { %17166 = vmatpush1.bf16.msra.mxu1 %v24849_v46  ;;  %v24945_v46 = vld [vmem:[%s36414_s1 + $0xf34] ss:$8 sps:$4 sm:$0xff]  }
 0x394   :  { %18847 = vmatpush1.bf16.msra.mxu0 %v24852_v47  ;;  %17167 = vmatprep.subr.bf16.mxu1 %v24857_v48  ;;  %v24948_v47 = vld [vmem:[%s36414_s1 + $0x3834] ss:$8 sps:$4 sm:$0xff]   ;;  %v24943_v48 = vld [vmem:[%s36414_s1 + $0xf30] ss:$8 sps:$4 sm:$0xff]  }
 0x395   :  { %18848 = vmatprep.subr.bf16.mxu0 %v24860_v49  ;;  %v24946_v49 = vld [vmem:[%s36414_s1 + $0x3830] ss:$8 sps:$4 sm:$0xff]  }
 0x397   :  { %17168 = vmatpush1.bf16.msra.mxu1 %v24855_v50  ;;  %v24951_v50 = vld [vmem:[%s36414_s1 + $0xf44] ss:$8 sps:$4 sm:$0xff]  }
 0x398   :  { %18849 = vmatpush1.bf16.msra.mxu0 %v24858_v29  ;;  %17169 = vmatprep.subr.bf16.mxu1 %v24863_v52  ;;  %v24954_v29 = vld [vmem:[%s36414_s1 + $0x3844] ss:$8 sps:$4 sm:$0xff]   ;;  %v24949_v52 = vld [vmem:[%s36414_s1 + $0xf40] ss:$8 sps:$4 sm:$0xff]  }
 0x399   :  { %18850 = vmatprep.subr.bf16.mxu0 %v24866_v53  ;;  %v24952_v53 = vld [vmem:[%s36414_s1 + $0x3840] ss:$8 sps:$4 sm:$0xff]  }
 0x39b   :  { %17170 = vmatpush1.bf16.msra.mxu1 %v24861_v54  ;;  %v24957_v54 = vld [vmem:[%s36414_s1 + $0xf54] ss:$8 sps:$4 sm:$0xff]  }
 0x39c   :  { %18851 = vmatpush1.bf16.msra.mxu0 %v24864_v55  ;;  %17171 = vmatprep.subr.bf16.mxu1 %v24869_v56  ;;  %v24960_v55 = vld [vmem:[%s36414_s1 + $0x3854] ss:$8 sps:$4 sm:$0xff]   ;;  %v24955_v56 = vld [vmem:[%s36414_s1 + $0xf50] ss:$8 sps:$4 sm:$0xff]  }
 0x39d   :  { %18852 = vmatprep.subr.bf16.mxu0 %v24872_v33  ;;  %v24958_v33 = vld [vmem:[%s36414_s1 + $0x3850] ss:$8 sps:$4 sm:$0xff]  }
 0x39f   :  { %17172 = vmatpush1.bf16.msra.mxu1 %v24867_v58  ;;  %v24963_v58 = vld [vmem:[%s36414_s1 + $0xf64] ss:$8 sps:$4 sm:$0xff]  }
 0x3a0   :  { %18853 = vmatpush1.bf16.msra.mxu0 %v24870_v59  ;;  %17173 = vmatprep.subr.bf16.mxu1 %v24875_v60  ;;  %v24966_v59 = vld [vmem:[%s36414_s1 + $0x3864] ss:$8 sps:$4 sm:$0xff]   ;;  %v24961_v60 = vld [vmem:[%s36414_s1 + $0xf60] ss:$8 sps:$4 sm:$0xff]  }
 0x3a1   :  { %18854 = vmatprep.subr.bf16.mxu0 %v24878_v61  ;;  %v24964_v61 = vld [vmem:[%s36414_s1 + $0x3860] ss:$8 sps:$4 sm:$0xff]  }
 0x3a3   :  { %17174 = vmatpush1.bf16.msra.mxu1 %v24873_v62  ;;  %v24969_v62 = vld [vmem:[%s36414_s1 + $0xf74] ss:$8 sps:$4 sm:$0xff]  }
 0x3a4   :  { %18855 = vmatpush1.bf16.msra.mxu0 %v24876_v39  ;;  %17175 = vmatprep.subr.bf16.mxu1 %v24881_v0  ;;  %v24972_v39 = vld [vmem:[%s36414_s1 + $0x3874] ss:$8 sps:$4 sm:$0xff]   ;;  %v24967_v0 = vld [vmem:[%s36414_s1 + $0xf70] ss:$8 sps:$4 sm:$0xff]  }
 0x3a5   :  { %18856 = vmatprep.subr.bf16.mxu0 %v24884_v1  ;;  %v24970_v1 = vld [vmem:[%s36414_s1 + $0x3870] ss:$8 sps:$4 sm:$0xff]  }
 0x3a7   :  { %17176 = vmatpush1.bf16.msra.mxu1 %v24879_v2  ;;  %v24975_v2 = vld [vmem:[%s36414_s1 + $0xf84] ss:$8 sps:$4 sm:$0xff]  }
 0x3a8   :  { %18857 = vmatpush1.bf16.msra.mxu0 %v24882_v3  ;;  %17177 = vmatprep.subr.bf16.mxu1 %v24887_v4  ;;  %v24978_v3 = vld [vmem:[%s36414_s1 + $0x3884] ss:$8 sps:$4 sm:$0xff]   ;;  %v24973_v4 = vld [vmem:[%s36414_s1 + $0xf80] ss:$8 sps:$4 sm:$0xff]  }
 0x3a9   :  { %18858 = vmatprep.subr.bf16.mxu0 %v24890_v45  ;;  %v24976_v45 = vld [vmem:[%s36414_s1 + $0x3880] ss:$8 sps:$4 sm:$0xff]  }
 0x3ab   :  { %17178 = vmatpush1.bf16.msra.mxu1 %v24885_v6  ;;  %v24981_v6 = vld [vmem:[%s36414_s1 + $0xf94] ss:$8 sps:$4 sm:$0xff]  }
 0x3ac   :  { %18859 = vmatpush1.bf16.msra.mxu0 %v24888_v7  ;;  %17179 = vmatprep.subr.bf16.mxu1 %v24893_v8  ;;  %v24984_v7 = vld [vmem:[%s36414_s1 + $0x3894] ss:$8 sps:$4 sm:$0xff]   ;;  %v24979_v8 = vld [vmem:[%s36414_s1 + $0xf90] ss:$8 sps:$4 sm:$0xff]  }
 0x3ad   :  { %18860 = vmatprep.subr.bf16.mxu0 %v24896_v9  ;;  %v24982_v9 = vld [vmem:[%s36414_s1 + $0x3890] ss:$8 sps:$4 sm:$0xff]  }
 0x3af   :  { %17180 = vmatpush1.bf16.msra.mxu1 %v24891_v10  ;;  %v24987_v10 = vld [vmem:[%s36414_s1 + $0xfa4] ss:$8 sps:$4 sm:$0xff]  }
 0x3b0   :  { %18861 = vmatpush1.bf16.msra.mxu0 %v24894_v51  ;;  %17181 = vmatprep.subr.bf16.mxu1 %v24899_v12  ;;  %v24990_v51 = vld [vmem:[%s36414_s1 + $0x38a4] ss:$8 sps:$4 sm:$0xff]   ;;  %v24985_v12 = vld [vmem:[%s36414_s1 + $0xfa0] ss:$8 sps:$4 sm:$0xff]  }
 0x3b1   :  { %18862 = vmatprep.subr.bf16.mxu0 %v24902_v13  ;;  %v24988_v13 = vld [vmem:[%s36414_s1 + $0x38a0] ss:$8 sps:$4 sm:$0xff]  }
 0x3b3   :  { %17182 = vmatpush1.bf16.msra.mxu1 %v24897_v14  ;;  %v24993_v14 = vld [vmem:[%s36414_s1 + $0xfb4] ss:$8 sps:$4 sm:$0xff]  }
 0x3b4   :  { %18863 = vmatpush1.bf16.msra.mxu0 %v24900_v15  ;;  %17183 = vmatprep.subr.bf16.mxu1 %v24905_v16  ;;  %v24996_v15 = vld [vmem:[%s36414_s1 + $0x38b4] ss:$8 sps:$4 sm:$0xff]   ;;  %v24991_v16 = vld [vmem:[%s36414_s1 + $0xfb0] ss:$8 sps:$4 sm:$0xff]  }
 0x3b5   :  { %18864 = vmatprep.subr.bf16.mxu0 %v24908_v57  ;;  %v24994_v57 = vld [vmem:[%s36414_s1 + $0x38b0] ss:$8 sps:$4 sm:$0xff]  }
 0x3b7   :  { %17184 = vmatpush1.bf16.msra.mxu1 %v24903_v19  ;;  %v24999_v19 = vld [vmem:[%s36414_s1 + $0xfc4] ss:$8 sps:$4 sm:$0xff]  }
 0x3b8   :  { %18865 = vmatpush1.bf16.msra.mxu0 %v24906_v21  ;;  %17185 = vmatprep.subr.bf16.mxu1 %v24911_v22  ;;  %v25002_v21 = vld [vmem:[%s36414_s1 + $0x38c4] ss:$8 sps:$4 sm:$0xff]   ;;  %v24997_v22 = vld [vmem:[%s36414_s1 + $0xfc0] ss:$8 sps:$4 sm:$0xff]  }
 0x3b9   :  { %18866 = vmatprep.subr.bf16.mxu0 %v24914_v23  ;;  %v25000_v23 = vld [vmem:[%s36414_s1 + $0x38c0] ss:$8 sps:$4 sm:$0xff]  }
 0x3bb   :  { %17186 = vmatpush1.bf16.msra.mxu1 %v24909_v26  ;;  %v25005_v26 = vld [vmem:[%s36414_s1 + $0xfd4] ss:$8 sps:$4 sm:$0xff]  }
 0x3bc   :  { %18867 = vmatpush1.bf16.msra.mxu0 %v24912_v63  ;;  %17187 = vmatprep.subr.bf16.mxu1 %v24917_v27  ;;  %v25008_v63 = vld [vmem:[%s36414_s1 + $0x38d4] ss:$8 sps:$4 sm:$0xff]   ;;  %v25003_v27 = vld [vmem:[%s36414_s1 + $0xfd0] ss:$8 sps:$4 sm:$0xff]  }
 0x3bd   :  { %18868 = vmatprep.subr.bf16.mxu0 %v24920_v28  ;;  %v25006_v28 = vld [vmem:[%s36414_s1 + $0x38d0] ss:$8 sps:$4 sm:$0xff]  }
 0x3bf   :  { %17188 = vmatpush1.bf16.msra.mxu1 %v24915_v30  ;;  %v25011_v30 = vld [vmem:[%s36414_s1 + $0xfe4] ss:$8 sps:$4 sm:$0xff]  }
 0x3c0   :  { %18869 = vmatpush1.bf16.msra.mxu0 %v24918_v31  ;;  %17198 = vmatprep.subr.bf16.mxu1 %v24925_v24  ;;  %v25014_v31 = vld [vmem:[%s36414_s1 + $0x38e4] ss:$8 sps:$4 sm:$0xff]   ;;  %v25009_v24 = vld [vmem:[%s36414_s1 + $0xfe0] ss:$8 sps:$4 sm:$0xff]  }
 0x3c1   :  { %18879 = vmatprep.subr.bf16.mxu0 %v24930_v5  ;;  %v25012_v5 = vld [vmem:[%s36414_s1 + $0x38e0] ss:$8 sps:$4 sm:$0xff]  }
 0x3c2   :  { %17190 = vmatmul.mubr.bf16.vlgmr.msra.gmra.mrb[0].mxu1 %v20241_v34  ;;  %v25017_v34 = vld [vmem:[%s36414_s1 + $0xff4] ss:$8 sps:$4 sm:$0xff]  }
 0x3c3   :  { %18871 = vmatmul.mubr.bf16.vlgmr.msra.gmra.mrb[0].mxu0 %v20323_v35  ;;  %17199 = vmatpush1.bf16.msra.mxu1 %v24923_v36  ;;  %v25020_v35 = vld [vmem:[%s36414_s1 + $0x38f4] ss:$8 sps:$4 sm:$0xff]   ;;  %v25015_v36 = vld [vmem:[%s36414_s1 + $0xff0] ss:$8 sps:$4 sm:$0xff]  }
 0x3c4   :  { %18880 = vmatpush1.bf16.msra.mxu0 %v24928_v37  ;;  %17200 = vmatprep.subr.bf16.mxu1 %v24933_v38  ;;  %v25018_v37 = vld [vmem:[%s36414_s1 + $0x38f0] ss:$8 sps:$4 sm:$0xff]   ;;  %v25025_v38 = vld [vmem:[%s36414_s1 + $0x1004] ss:$8 sps:$4 sm:$0xff]  }
 0x3c5   :  { %18881 = vmatprep.subr.bf16.mxu0 %v24936_v11  ;;  %17230 = vmatprep.mubr.bf16.mxu1 %v20244_v18  ;;  %v25030_v11 = vld [vmem:[%s36414_s1 + $0x3904] ss:$8 sps:$4 sm:$0xff]  }
 0x3c6   :  { %18911 = vmatprep.mubr.bf16.mxu0 %v20326_v20  ;;  %v30985_v18 = vld [vmem:[%s36413_s0 + $0x80] sm:$0xff]  ;;  %v30990_v20 = vld [vmem:[%s36413_s0 + $0x1c8] sm:$0xff] }
 0x3c7   :  { %17201 = vmatpush1.bf16.msra.mxu1 %v24931_v40  ;;  %v20243_v40 = vcombine.low %v30775_v17, %v30775_v17  ;;  %v25036_v17 = vld [vmem:[%s36414_s1 + $0x3914] ss:$8 sps:$4 sm:$0xff]  }
 0x3c8   :  { %18882 = vmatpush1.bf16.msra.mxu0 %v24934_v41  ;;  %17202 = vmatprep.subr.bf16.mxu1 %v24939_v42  ;;  %v20325_v41 = vcombine.low %v30780_v25, %v30780_v25  ;;  %v25023_v42 = vld [vmem:[%s36414_s1 + $0x1000] ss:$8 sps:$4 sm:$0xff]   ;;  %v20246_v25 = vcombine.high %v30985_v18, %v30985_v18 }
 0x3c9   :  { %18883 = vmatprep.subr.bf16.mxu0 %v24942_v43  ;;  %v25028_v43 = vld [vmem:[%s36414_s1 + $0x3900] ss:$8 sps:$4 sm:$0xff]  }
 0x3cb   :  { %17203 = vmatpush1.bf16.msra.mxu1 %v24937_v44  ;;  %v25033_v44 = vld [vmem:[%s36414_s1 + $0x1014] ss:$8 sps:$4 sm:$0xff]  }
 0x3cc   :  { %18884 = vmatpush1.bf16.msra.mxu0 %v24940_v32  ;;  %17204 = vmatprep.subr.bf16.mxu1 %v24945_v46  ;;  %v20328_v32 = vcombine.high %v30990_v20, %v30990_v20  ;;  %v25031_v46 = vld [vmem:[%s36414_s1 + $0x1010] ss:$8 sps:$4 sm:$0xff]  }
 0x3cd   :  { %18885 = vmatprep.subr.bf16.mxu0 %v24948_v47  ;;  %v25034_v47 = vld [vmem:[%s36414_s1 + $0x3910] ss:$8 sps:$4 sm:$0xff]  }
 0x3cf   :  { %17205 = vmatpush1.bf16.msra.mxu1 %v24943_v48  ;;  %v25039_v48 = vld [vmem:[%s36414_s1 + $0x1024] ss:$8 sps:$4 sm:$0xff]  }
 0x3d0   :  { %18886 = vmatpush1.bf16.msra.mxu0 %v24946_v49  ;;  %17206 = vmatprep.subr.bf16.mxu1 %v24951_v50  ;;  %v25042_v49 = vld [vmem:[%s36414_s1 + $0x3924] ss:$8 sps:$4 sm:$0xff]   ;;  %v25037_v50 = vld [vmem:[%s36414_s1 + $0x1020] ss:$8 sps:$4 sm:$0xff]  }
 0x3d1   :  { %18887 = vmatprep.subr.bf16.mxu0 %v24954_v29  ;;  %v25040_v29 = vld [vmem:[%s36414_s1 + $0x3920] ss:$8 sps:$4 sm:$0xff]  }
 0x3d3   :  { %17207 = vmatpush1.bf16.msra.mxu1 %v24949_v52  ;;  %v25045_v52 = vld [vmem:[%s36414_s1 + $0x1034] ss:$8 sps:$4 sm:$0xff]  }
 0x3d4   :  { %18888 = vmatpush1.bf16.msra.mxu0 %v24952_v53  ;;  %17208 = vmatprep.subr.bf16.mxu1 %v24957_v54  ;;  %v25048_v53 = vld [vmem:[%s36414_s1 + $0x3934] ss:$8 sps:$4 sm:$0xff]   ;;  %v25043_v54 = vld [vmem:[%s36414_s1 + $0x1030] ss:$8 sps:$4 sm:$0xff]  }
 0x3d5   :  { %18889 = vmatprep.subr.bf16.mxu0 %v24960_v55  ;;  %v25046_v55 = vld [vmem:[%s36414_s1 + $0x3930] ss:$8 sps:$4 sm:$0xff]  }
 0x3d7   :  { %17209 = vmatpush1.bf16.msra.mxu1 %v24955_v56  ;;  %v25051_v56 = vld [vmem:[%s36414_s1 + $0x1044] ss:$8 sps:$4 sm:$0xff]  }
 0x3d8   :  { %18890 = vmatpush1.bf16.msra.mxu0 %v24958_v33  ;;  %17210 = vmatprep.subr.bf16.mxu1 %v24963_v58  ;;  %v25054_v33 = vld [vmem:[%s36414_s1 + $0x3944] ss:$8 sps:$4 sm:$0xff]   ;;  %v25049_v58 = vld [vmem:[%s36414_s1 + $0x1040] ss:$8 sps:$4 sm:$0xff]  }
 0x3d9   :  { %18891 = vmatprep.subr.bf16.mxu0 %v24966_v59  ;;  %v25052_v59 = vld [vmem:[%s36414_s1 + $0x3940] ss:$8 sps:$4 sm:$0xff]  }
 0x3db   :  { %17211 = vmatpush1.bf16.msra.mxu1 %v24961_v60  ;;  %v25057_v60 = vld [vmem:[%s36414_s1 + $0x1054] ss:$8 sps:$4 sm:$0xff]  }
 0x3dc   :  { %18892 = vmatpush1.bf16.msra.mxu0 %v24964_v61  ;;  %17212 = vmatprep.subr.bf16.mxu1 %v24969_v62  ;;  %v25060_v61 = vld [vmem:[%s36414_s1 + $0x3954] ss:$8 sps:$4 sm:$0xff]   ;;  %v25055_v62 = vld [vmem:[%s36414_s1 + $0x1050] ss:$8 sps:$4 sm:$0xff]  }
 0x3dd   :  { %18893 = vmatprep.subr.bf16.mxu0 %v24972_v39  ;;  %v25058_v39 = vld [vmem:[%s36414_s1 + $0x3950] ss:$8 sps:$4 sm:$0xff]  }
 0x3df   :  { %17213 = vmatpush1.bf16.msra.mxu1 %v24967_v0  ;;  %v25063_v0 = vld [vmem:[%s36414_s1 + $0x1064] ss:$8 sps:$4 sm:$0xff]  }
 0x3e0   :  { %18894 = vmatpush1.bf16.msra.mxu0 %v24970_v1  ;;  %17214 = vmatprep.subr.bf16.mxu1 %v24975_v2  ;;  %v25066_v1 = vld [vmem:[%s36414_s1 + $0x3964] ss:$8 sps:$4 sm:$0xff]   ;;  %v25061_v2 = vld [vmem:[%s36414_s1 + $0x1060] ss:$8 sps:$4 sm:$0xff]  }
 0x3e1   :  { %18895 = vmatprep.subr.bf16.mxu0 %v24978_v3  ;;  %v25064_v3 = vld [vmem:[%s36414_s1 + $0x3960] ss:$8 sps:$4 sm:$0xff]  }
 0x3e3   :  { %17215 = vmatpush1.bf16.msra.mxu1 %v24973_v4  ;;  %v25069_v4 = vld [vmem:[%s36414_s1 + $0x1074] ss:$8 sps:$4 sm:$0xff]  }
 0x3e4   :  { %18896 = vmatpush1.bf16.msra.mxu0 %v24976_v45  ;;  %17216 = vmatprep.subr.bf16.mxu1 %v24981_v6  ;;  %v25072_v45 = vld [vmem:[%s36414_s1 + $0x3974] ss:$8 sps:$4 sm:$0xff]   ;;  %v25067_v6 = vld [vmem:[%s36414_s1 + $0x1070] ss:$8 sps:$4 sm:$0xff]  }
 0x3e5   :  { %18897 = vmatprep.subr.bf16.mxu0 %v24984_v7  ;;  %v25070_v7 = vld [vmem:[%s36414_s1 + $0x3970] ss:$8 sps:$4 sm:$0xff]  }
 0x3e7   :  { %17217 = vmatpush1.bf16.msra.mxu1 %v24979_v8  ;;  %v25075_v8 = vld [vmem:[%s36414_s1 + $0x1084] ss:$8 sps:$4 sm:$0xff]  }
 0x3e8   :  { %18898 = vmatpush1.bf16.msra.mxu0 %v24982_v9  ;;  %17218 = vmatprep.subr.bf16.mxu1 %v24987_v10  ;;  %v25078_v9 = vld [vmem:[%s36414_s1 + $0x3984] ss:$8 sps:$4 sm:$0xff]   ;;  %v25073_v10 = vld [vmem:[%s36414_s1 + $0x1080] ss:$8 sps:$4 sm:$0xff]  }
 0x3e9   :  { %18899 = vmatprep.subr.bf16.mxu0 %v24990_v51  ;;  %v25076_v51 = vld [vmem:[%s36414_s1 + $0x3980] ss:$8 sps:$4 sm:$0xff]  }
 0x3eb   :  { %17219 = vmatpush1.bf16.msra.mxu1 %v24985_v12  ;;  %v25081_v12 = vld [vmem:[%s36414_s1 + $0x1094] ss:$8 sps:$4 sm:$0xff]  }
 0x3ec   :  { %18900 = vmatpush1.bf16.msra.mxu0 %v24988_v13  ;;  %17220 = vmatprep.subr.bf16.mxu1 %v24993_v14  ;;  %v25084_v13 = vld [vmem:[%s36414_s1 + $0x3994] ss:$8 sps:$4 sm:$0xff]   ;;  %v25079_v14 = vld [vmem:[%s36414_s1 + $0x1090] ss:$8 sps:$4 sm:$0xff]  }
 0x3ed   :  { %18901 = vmatprep.subr.bf16.mxu0 %v24996_v15  ;;  %v25082_v15 = vld [vmem:[%s36414_s1 + $0x3990] ss:$8 sps:$4 sm:$0xff]  }
 0x3ef   :  { %17221 = vmatpush1.bf16.msra.mxu1 %v24991_v16  ;;  %v25087_v16 = vld [vmem:[%s36414_s1 + $0x10a4] ss:$8 sps:$4 sm:$0xff]  }
 0x3f0   :  { %18902 = vmatpush1.bf16.msra.mxu0 %v24994_v57  ;;  %17222 = vmatprep.subr.bf16.mxu1 %v24999_v19  ;;  %v25090_v57 = vld [vmem:[%s36414_s1 + $0x39a4] ss:$8 sps:$4 sm:$0xff]   ;;  %v25085_v19 = vld [vmem:[%s36414_s1 + $0x10a0] ss:$8 sps:$4 sm:$0xff]  }
 0x3f1   :  { %18903 = vmatprep.subr.bf16.mxu0 %v25002_v21  ;;  %v25088_v21 = vld [vmem:[%s36414_s1 + $0x39a0] ss:$8 sps:$4 sm:$0xff]  }
 0x3f3   :  { %17223 = vmatpush1.bf16.msra.mxu1 %v24997_v22  ;;  %v25093_v22 = vld [vmem:[%s36414_s1 + $0x10b4] ss:$8 sps:$4 sm:$0xff]  }
 0x3f4   :  { %18904 = vmatpush1.bf16.msra.mxu0 %v25000_v23  ;;  %17224 = vmatprep.subr.bf16.mxu1 %v25005_v26  ;;  %v25096_v23 = vld [vmem:[%s36414_s1 + $0x39b4] ss:$8 sps:$4 sm:$0xff]   ;;  %v25091_v26 = vld [vmem:[%s36414_s1 + $0x10b0] ss:$8 sps:$4 sm:$0xff]  }
 0x3f5   :  { %18905 = vmatprep.subr.bf16.mxu0 %v25008_v63  ;;  %v25094_v63 = vld [vmem:[%s36414_s1 + $0x39b0] ss:$8 sps:$4 sm:$0xff]  }
 0x3f7   :  { %17225 = vmatpush1.bf16.msra.mxu1 %v25003_v27  ;;  %v25099_v27 = vld [vmem:[%s36414_s1 + $0x10c4] ss:$8 sps:$4 sm:$0xff]  }
 0x3f8   :  { %18906 = vmatpush1.bf16.msra.mxu0 %v25006_v28  ;;  %17226 = vmatprep.subr.bf16.mxu1 %v25011_v30  ;;  %v25102_v28 = vld [vmem:[%s36414_s1 + $0x39c4] ss:$8 sps:$4 sm:$0xff]   ;;  %v25097_v30 = vld [vmem:[%s36414_s1 + $0x10c0] ss:$8 sps:$4 sm:$0xff]  }
 0x3f9   :  { %18907 = vmatprep.subr.bf16.mxu0 %v25014_v31  ;;  %v25100_v31 = vld [vmem:[%s36414_s1 + $0x39c0] ss:$8 sps:$4 sm:$0xff]  }
 0x3fb   :  { %17227 = vmatpush1.bf16.msra.mxu1 %v25009_v24  ;;  %v25105_v24 = vld [vmem:[%s36414_s1 + $0x10d4] ss:$8 sps:$4 sm:$0xff]  }
 0x3fc   :  { %18908 = vmatpush1.bf16.msra.mxu0 %v25012_v5  ;;  %17228 = vmatprep.subr.bf16.mxu1 %v25017_v34  ;;  %v25108_v5 = vld [vmem:[%s36414_s1 + $0x39d4] ss:$8 sps:$4 sm:$0xff]   ;;  %v25103_v34 = vld [vmem:[%s36414_s1 + $0x10d0] ss:$8 sps:$4 sm:$0xff]  }
 0x3fd   :  { %18909 = vmatprep.subr.bf16.mxu0 %v25020_v35  ;;  %v25106_v35 = vld [vmem:[%s36414_s1 + $0x39d0] ss:$8 sps:$4 sm:$0xff]  }
 0x3ff   :  { %17229 = vmatpush1.bf16.msra.mxu1 %v25015_v36  ;;  %v25111_v36 = vld [vmem:[%s36414_s1 + $0x10e4] ss:$8 sps:$4 sm:$0xff]  }
 0x400   :  { %18910 = vmatpush1.bf16.msra.mxu0 %v25018_v37  ;;  %17239 = vmatprep.subr.bf16.mxu1 %v25025_v38  ;;  %v25114_v37 = vld [vmem:[%s36414_s1 + $0x39e4] ss:$8 sps:$4 sm:$0xff]   ;;  %v25109_v38 = vld [vmem:[%s36414_s1 + $0x10e0] ss:$8 sps:$4 sm:$0xff]  }
 0x401   :  { %18920 = vmatprep.subr.bf16.mxu0 %v25030_v11  ;;  %v25112_v11 = vld [vmem:[%s36414_s1 + $0x39e0] ss:$8 sps:$4 sm:$0xff]  }
 0x402   :  { %17231 = vmatmul.mubr.bf16.vlgmr.msra.gmra.mrb[0].mxu1 %v20243_v40  ;;  %v25117_v40 = vld [vmem:[%s36414_s1 + $0x10f4] ss:$8 sps:$4 sm:$0xff]  }
 0x403   :  { %18912 = vmatmul.mubr.bf16.vlgmr.msra.gmra.mrb[0].mxu0 %v20325_v41  ;;  %17240 = vmatpush1.bf16.msra.mxu1 %v25023_v42  ;;  %v25120_v41 = vld [vmem:[%s36414_s1 + $0x39f4] ss:$8 sps:$4 sm:$0xff]   ;;  %v25115_v42 = vld [vmem:[%s36414_s1 + $0x10f0] ss:$8 sps:$4 sm:$0xff]  }
 0x404   :  { %18921 = vmatpush1.bf16.msra.mxu0 %v25028_v43  ;;  %17241 = vmatprep.subr.bf16.mxu1 %v25033_v44  ;;  %v25118_v43 = vld [vmem:[%s36414_s1 + $0x39f0] ss:$8 sps:$4 sm:$0xff]   ;;  %v25125_v44 = vld [vmem:[%s36414_s1 + $0x1104] ss:$8 sps:$4 sm:$0xff]  }
 0x405   :  { %18922 = vmatprep.subr.bf16.mxu0 %v25036_v17  ;;  %17271 = vmatprep.mubr.bf16.mxu1 %v20246_v25  ;;  %v25130_v17 = vld [vmem:[%s36414_s1 + $0x3a04] ss:$8 sps:$4 sm:$0xff]  }
 0x406   :  { %18952 = vmatprep.mubr.bf16.mxu0 %v20328_v32  ;;  %v31195_v25 = vld [vmem:[%s36413_s0 + $0x88] sm:$0xff]  ;;  %v31200_v32 = vld [vmem:[%s36413_s0 + $0x1d0] sm:$0xff] }
 0x407   :  { %17242 = vmatpush1.bf16.msra.mxu1 %v25031_v46  ;;  %v20245_v46 = vcombine.low %v30985_v18, %v30985_v18  ;;  %v25136_v18 = vld [vmem:[%s36414_s1 + $0x3a14] ss:$8 sps:$4 sm:$0xff]  }
 0x408   :  { %18923 = vmatpush1.bf16.msra.mxu0 %v25034_v47  ;;  %17243 = vmatprep.subr.bf16.mxu1 %v25039_v48  ;;  %v20327_v47 = vcombine.low %v30990_v20, %v30990_v20  ;;  %v25123_v48 = vld [vmem:[%s36414_s1 + $0x1100] ss:$8 sps:$4 sm:$0xff]   ;;  %v20248_v20 = vcombine.high %v31195_v25, %v31195_v25 }
 0x409   :  { %18924 = vmatprep.subr.bf16.mxu0 %v25042_v49  ;;  %v25128_v49 = vld [vmem:[%s36414_s1 + $0x3a00] ss:$8 sps:$4 sm:$0xff]  }
 0x40b   :  { %17244 = vmatpush1.bf16.msra.mxu1 %v25037_v50  ;;  %v25133_v50 = vld [vmem:[%s36414_s1 + $0x1114] ss:$8 sps:$4 sm:$0xff]  }
 0x40c   :  { %18925 = vmatpush1.bf16.msra.mxu0 %v25040_v29  ;;  %17245 = vmatprep.subr.bf16.mxu1 %v25045_v52  ;;  %v20330_v29 = vcombine.high %v31200_v32, %v31200_v32  ;;  %v25131_v52 = vld [vmem:[%s36414_s1 + $0x1110] ss:$8 sps:$4 sm:$0xff]  }
 0x40d   :  { %18926 = vmatprep.subr.bf16.mxu0 %v25048_v53  ;;  %v25134_v53 = vld [vmem:[%s36414_s1 + $0x3a10] ss:$8 sps:$4 sm:$0xff]  }
 0x40f   :  { %17246 = vmatpush1.bf16.msra.mxu1 %v25043_v54  ;;  %v25139_v54 = vld [vmem:[%s36414_s1 + $0x1124] ss:$8 sps:$4 sm:$0xff]  }
 0x410   :  { %18927 = vmatpush1.bf16.msra.mxu0 %v25046_v55  ;;  %17247 = vmatprep.subr.bf16.mxu1 %v25051_v56  ;;  %v25142_v55 = vld [vmem:[%s36414_s1 + $0x3a24] ss:$8 sps:$4 sm:$0xff]   ;;  %v25137_v56 = vld [vmem:[%s36414_s1 + $0x1120] ss:$8 sps:$4 sm:$0xff]  }
 0x411   :  { %18928 = vmatprep.subr.bf16.mxu0 %v25054_v33  ;;  %v25140_v33 = vld [vmem:[%s36414_s1 + $0x3a20] ss:$8 sps:$4 sm:$0xff]  }
 0x413   :  { %17248 = vmatpush1.bf16.msra.mxu1 %v25049_v58  ;;  %v25145_v58 = vld [vmem:[%s36414_s1 + $0x1134] ss:$8 sps:$4 sm:$0xff]  }
 0x414   :  { %18929 = vmatpush1.bf16.msra.mxu0 %v25052_v59  ;;  %17249 = vmatprep.subr.bf16.mxu1 %v25057_v60  ;;  %v25148_v59 = vld [vmem:[%s36414_s1 + $0x3a34] ss:$8 sps:$4 sm:$0xff]   ;;  %v25143_v60 = vld [vmem:[%s36414_s1 + $0x1130] ss:$8 sps:$4 sm:$0xff]  }
 0x415   :  { %18930 = vmatprep.subr.bf16.mxu0 %v25060_v61  ;;  %v25146_v61 = vld [vmem:[%s36414_s1 + $0x3a30] ss:$8 sps:$4 sm:$0xff]  }
 0x417   :  { %17250 = vmatpush1.bf16.msra.mxu1 %v25055_v62  ;;  %v25151_v62 = vld [vmem:[%s36414_s1 + $0x1144] ss:$8 sps:$4 sm:$0xff]  }
 0x418   :  { %18931 = vmatpush1.bf16.msra.mxu0 %v25058_v39  ;;  %17251 = vmatprep.subr.bf16.mxu1 %v25063_v0  ;;  %v25154_v39 = vld [vmem:[%s36414_s1 + $0x3a44] ss:$8 sps:$4 sm:$0xff]   ;;  %v25149_v0 = vld [vmem:[%s36414_s1 + $0x1140] ss:$8 sps:$4 sm:$0xff]  }
 0x419   :  { %18932 = vmatprep.subr.bf16.mxu0 %v25066_v1  ;;  %v25152_v1 = vld [vmem:[%s36414_s1 + $0x3a40] ss:$8 sps:$4 sm:$0xff]  }
 0x41b   :  { %17252 = vmatpush1.bf16.msra.mxu1 %v25061_v2  ;;  %v25157_v2 = vld [vmem:[%s36414_s1 + $0x1154] ss:$8 sps:$4 sm:$0xff]  }
 0x41c   :  { %18933 = vmatpush1.bf16.msra.mxu0 %v25064_v3  ;;  %17253 = vmatprep.subr.bf16.mxu1 %v25069_v4  ;;  %v25160_v3 = vld [vmem:[%s36414_s1 + $0x3a54] ss:$8 sps:$4 sm:$0xff]   ;;  %v25155_v4 = vld [vmem:[%s36414_s1 + $0x1150] ss:$8 sps:$4 sm:$0xff]  }
 0x41d   :  { %18934 = vmatprep.subr.bf16.mxu0 %v25072_v45  ;;  %v25158_v45 = vld [vmem:[%s36414_s1 + $0x3a50] ss:$8 sps:$4 sm:$0xff]  }
 0x41f   :  { %17254 = vmatpush1.bf16.msra.mxu1 %v25067_v6  ;;  %v25163_v6 = vld [vmem:[%s36414_s1 + $0x1164] ss:$8 sps:$4 sm:$0xff]  }
 0x420   :  { %18935 = vmatpush1.bf16.msra.mxu0 %v25070_v7  ;;  %17255 = vmatprep.subr.bf16.mxu1 %v25075_v8  ;;  %v25166_v7 = vld [vmem:[%s36414_s1 + $0x3a64] ss:$8 sps:$4 sm:$0xff]   ;;  %v25161_v8 = vld [vmem:[%s36414_s1 + $0x1160] ss:$8 sps:$4 sm:$0xff]  }
 0x421   :  { %18936 = vmatprep.subr.bf16.mxu0 %v25078_v9  ;;  %v25164_v9 = vld [vmem:[%s36414_s1 + $0x3a60] ss:$8 sps:$4 sm:$0xff]  }
 0x423   :  { %17256 = vmatpush1.bf16.msra.mxu1 %v25073_v10  ;;  %v25169_v10 = vld [vmem:[%s36414_s1 + $0x1174] ss:$8 sps:$4 sm:$0xff]  }
 0x424   :  { %18937 = vmatpush1.bf16.msra.mxu0 %v25076_v51  ;;  %17257 = vmatprep.subr.bf16.mxu1 %v25081_v12  ;;  %v25172_v51 = vld [vmem:[%s36414_s1 + $0x3a74] ss:$8 sps:$4 sm:$0xff]   ;;  %v25167_v12 = vld [vmem:[%s36414_s1 + $0x1170] ss:$8 sps:$4 sm:$0xff]  }
 0x425   :  { %18938 = vmatprep.subr.bf16.mxu0 %v25084_v13  ;;  %v25170_v13 = vld [vmem:[%s36414_s1 + $0x3a70] ss:$8 sps:$4 sm:$0xff]  }
 0x427   :  { %17258 = vmatpush1.bf16.msra.mxu1 %v25079_v14  ;;  %v25175_v14 = vld [vmem:[%s36414_s1 + $0x1184] ss:$8 sps:$4 sm:$0xff]  }
 0x428   :  { %18939 = vmatpush1.bf16.msra.mxu0 %v25082_v15  ;;  %17259 = vmatprep.subr.bf16.mxu1 %v25087_v16  ;;  %v25178_v15 = vld [vmem:[%s36414_s1 + $0x3a84] ss:$8 sps:$4 sm:$0xff]   ;;  %v25173_v16 = vld [vmem:[%s36414_s1 + $0x1180] ss:$8 sps:$4 sm:$0xff]  }
 0x429   :  { %18940 = vmatprep.subr.bf16.mxu0 %v25090_v57  ;;  %v25176_v57 = vld [vmem:[%s36414_s1 + $0x3a80] ss:$8 sps:$4 sm:$0xff]  }
 0x42b   :  { %17260 = vmatpush1.bf16.msra.mxu1 %v25085_v19  ;;  %v25181_v19 = vld [vmem:[%s36414_s1 + $0x1194] ss:$8 sps:$4 sm:$0xff]  }
 0x42c   :  { %18941 = vmatpush1.bf16.msra.mxu0 %v25088_v21  ;;  %17261 = vmatprep.subr.bf16.mxu1 %v25093_v22  ;;  %v25184_v21 = vld [vmem:[%s36414_s1 + $0x3a94] ss:$8 sps:$4 sm:$0xff]   ;;  %v25179_v22 = vld [vmem:[%s36414_s1 + $0x1190] ss:$8 sps:$4 sm:$0xff]  }
 0x42d   :  { %18942 = vmatprep.subr.bf16.mxu0 %v25096_v23  ;;  %v25182_v23 = vld [vmem:[%s36414_s1 + $0x3a90] ss:$8 sps:$4 sm:$0xff]  }
 0x42f   :  { %17262 = vmatpush1.bf16.msra.mxu1 %v25091_v26  ;;  %v25187_v26 = vld [vmem:[%s36414_s1 + $0x11a4] ss:$8 sps:$4 sm:$0xff]  }
 0x430   :  { %18943 = vmatpush1.bf16.msra.mxu0 %v25094_v63  ;;  %17263 = vmatprep.subr.bf16.mxu1 %v25099_v27  ;;  %v25190_v63 = vld [vmem:[%s36414_s1 + $0x3aa4] ss:$8 sps:$4 sm:$0xff]   ;;  %v25185_v27 = vld [vmem:[%s36414_s1 + $0x11a0] ss:$8 sps:$4 sm:$0xff]  }
 0x431   :  { %18944 = vmatprep.subr.bf16.mxu0 %v25102_v28  ;;  %v25188_v28 = vld [vmem:[%s36414_s1 + $0x3aa0] ss:$8 sps:$4 sm:$0xff]  }
 0x433   :  { %17264 = vmatpush1.bf16.msra.mxu1 %v25097_v30  ;;  %v25193_v30 = vld [vmem:[%s36414_s1 + $0x11b4] ss:$8 sps:$4 sm:$0xff]  }
 0x434   :  { %18945 = vmatpush1.bf16.msra.mxu0 %v25100_v31  ;;  %17265 = vmatprep.subr.bf16.mxu1 %v25105_v24  ;;  %v25196_v31 = vld [vmem:[%s36414_s1 + $0x3ab4] ss:$8 sps:$4 sm:$0xff]   ;;  %v25191_v24 = vld [vmem:[%s36414_s1 + $0x11b0] ss:$8 sps:$4 sm:$0xff]  }
 0x435   :  { %18946 = vmatprep.subr.bf16.mxu0 %v25108_v5  ;;  %v25194_v5 = vld [vmem:[%s36414_s1 + $0x3ab0] ss:$8 sps:$4 sm:$0xff]  }
 0x437   :  { %17266 = vmatpush1.bf16.msra.mxu1 %v25103_v34  ;;  %v25199_v34 = vld [vmem:[%s36414_s1 + $0x11c4] ss:$8 sps:$4 sm:$0xff]  }
 0x438   :  { %18947 = vmatpush1.bf16.msra.mxu0 %v25106_v35  ;;  %17267 = vmatprep.subr.bf16.mxu1 %v25111_v36  ;;  %v25202_v35 = vld [vmem:[%s36414_s1 + $0x3ac4] ss:$8 sps:$4 sm:$0xff]   ;;  %v25197_v36 = vld [vmem:[%s36414_s1 + $0x11c0] ss:$8 sps:$4 sm:$0xff]  }
 0x439   :  { %18948 = vmatprep.subr.bf16.mxu0 %v25114_v37  ;;  %v25200_v37 = vld [vmem:[%s36414_s1 + $0x3ac0] ss:$8 sps:$4 sm:$0xff]  }
 0x43b   :  { %17268 = vmatpush1.bf16.msra.mxu1 %v25109_v38  ;;  %v25205_v38 = vld [vmem:[%s36414_s1 + $0x11d4] ss:$8 sps:$4 sm:$0xff]  }
 0x43c   :  { %18949 = vmatpush1.bf16.msra.mxu0 %v25112_v11  ;;  %17269 = vmatprep.subr.bf16.mxu1 %v25117_v40  ;;  %v25208_v11 = vld [vmem:[%s36414_s1 + $0x3ad4] ss:$8 sps:$4 sm:$0xff]   ;;  %v25203_v40 = vld [vmem:[%s36414_s1 + $0x11d0] ss:$8 sps:$4 sm:$0xff]  }
 0x43d   :  { %18950 = vmatprep.subr.bf16.mxu0 %v25120_v41  ;;  %v25206_v41 = vld [vmem:[%s36414_s1 + $0x3ad0] ss:$8 sps:$4 sm:$0xff]  }
 0x43f   :  { %17270 = vmatpush1.bf16.msra.mxu1 %v25115_v42  ;;  %v25211_v42 = vld [vmem:[%s36414_s1 + $0x11e4] ss:$8 sps:$4 sm:$0xff]  }
 0x440   :  { %18951 = vmatpush1.bf16.msra.mxu0 %v25118_v43  ;;  %17280 = vmatprep.subr.bf16.mxu1 %v25125_v44  ;;  %v25214_v43 = vld [vmem:[%s36414_s1 + $0x3ae4] ss:$8 sps:$4 sm:$0xff]   ;;  %v25209_v44 = vld [vmem:[%s36414_s1 + $0x11e0] ss:$8 sps:$4 sm:$0xff]  }
 0x441   :  { %18961 = vmatprep.subr.bf16.mxu0 %v25130_v17  ;;  %v25212_v17 = vld [vmem:[%s36414_s1 + $0x3ae0] ss:$8 sps:$4 sm:$0xff]  }
 0x442   :  { %17272 = vmatmul.mubr.bf16.vlgmr.msra.gmra.mrb[0].mxu1 %v20245_v46  ;;  %v25217_v46 = vld [vmem:[%s36414_s1 + $0x11f4] ss:$8 sps:$4 sm:$0xff]  }
 0x443   :  { %18953 = vmatmul.mubr.bf16.vlgmr.msra.gmra.mrb[0].mxu0 %v20327_v47  ;;  %17281 = vmatpush1.bf16.msra.mxu1 %v25123_v48  ;;  %v25220_v47 = vld [vmem:[%s36414_s1 + $0x3af4] ss:$8 sps:$4 sm:$0xff]   ;;  %v25215_v48 = vld [vmem:[%s36414_s1 + $0x11f0] ss:$8 sps:$4 sm:$0xff]  }
 0x444   :  { %18962 = vmatpush1.bf16.msra.mxu0 %v25128_v49  ;;  %17282 = vmatprep.subr.bf16.mxu1 %v25133_v50  ;;  %v25218_v49 = vld [vmem:[%s36414_s1 + $0x3af0] ss:$8 sps:$4 sm:$0xff]   ;;  %v25225_v50 = vld [vmem:[%s36414_s1 + $0x1204] ss:$8 sps:$4 sm:$0xff]  }
 0x445   :  { %18963 = vmatprep.subr.bf16.mxu0 %v25136_v18  ;;  %17312 = vmatprep.mubr.bf16.mxu1 %v20248_v20  ;;  %v25230_v18 = vld [vmem:[%s36414_s1 + $0x3b04] ss:$8 sps:$4 sm:$0xff]   ;;  %v31405_v20 = vld [vmem:[%s36413_s0 + $0x90] sm:$0xff] }
 0x446   :  { %18993 = vmatprep.mubr.bf16.mxu0 %v20330_v29  ;;  %v31410_v29 = vld [vmem:[%s36413_s0 + $0x1d8] sm:$0xff] }
 0x447   :  { %17283 = vmatpush1.bf16.msra.mxu1 %v25131_v52  ;;  %v20247_v52 = vcombine.low %v31195_v25, %v31195_v25  ;;  %v25236_v25 = vld [vmem:[%s36414_s1 + $0x3b14] ss:$8 sps:$4 sm:$0xff]  }
 0x448   :  { %18964 = vmatpush1.bf16.msra.mxu0 %v25134_v53  ;;  %17284 = vmatprep.subr.bf16.mxu1 %v25139_v54  ;;  %v20329_v53 = vcombine.low %v31200_v32, %v31200_v32  ;;  %v25223_v54 = vld [vmem:[%s36414_s1 + $0x1200] ss:$8 sps:$4 sm:$0xff]   ;;  %v20250_v32 = vcombine.high %v31405_v20, %v31405_v20 }
 0x449   :  { %18965 = vmatprep.subr.bf16.mxu0 %v25142_v55  ;;  %v25228_v55 = vld [vmem:[%s36414_s1 + $0x3b00] ss:$8 sps:$4 sm:$0xff]  }
 0x44b   :  { %17285 = vmatpush1.bf16.msra.mxu1 %v25137_v56  ;;  %v25233_v56 = vld [vmem:[%s36414_s1 + $0x1214] ss:$8 sps:$4 sm:$0xff]  }
 0x44c   :  { %18966 = vmatpush1.bf16.msra.mxu0 %v25140_v33  ;;  %17286 = vmatprep.subr.bf16.mxu1 %v25145_v58  ;;  %v20332_v33 = vcombine.high %v31410_v29, %v31410_v29  ;;  %v25231_v58 = vld [vmem:[%s36414_s1 + $0x1210] ss:$8 sps:$4 sm:$0xff]  }
 0x44d   :  { %18967 = vmatprep.subr.bf16.mxu0 %v25148_v59  ;;  %v25234_v59 = vld [vmem:[%s36414_s1 + $0x3b10] ss:$8 sps:$4 sm:$0xff]  }
 0x44f   :  { %17287 = vmatpush1.bf16.msra.mxu1 %v25143_v60  ;;  %v25239_v60 = vld [vmem:[%s36414_s1 + $0x1224] ss:$8 sps:$4 sm:$0xff]  }
 0x450   :  { %18968 = vmatpush1.bf16.msra.mxu0 %v25146_v61  ;;  %17288 = vmatprep.subr.bf16.mxu1 %v25151_v62  ;;  %v25242_v61 = vld [vmem:[%s36414_s1 + $0x3b24] ss:$8 sps:$4 sm:$0xff]   ;;  %v25237_v62 = vld [vmem:[%s36414_s1 + $0x1220] ss:$8 sps:$4 sm:$0xff]  }
 0x451   :  { %18969 = vmatprep.subr.bf16.mxu0 %v25154_v39  ;;  %v25240_v39 = vld [vmem:[%s36414_s1 + $0x3b20] ss:$8 sps:$4 sm:$0xff]  }
 0x453   :  { %17289 = vmatpush1.bf16.msra.mxu1 %v25149_v0  ;;  %v25245_v0 = vld [vmem:[%s36414_s1 + $0x1234] ss:$8 sps:$4 sm:$0xff]  }
 0x454   :  { %18970 = vmatpush1.bf16.msra.mxu0 %v25152_v1  ;;  %17290 = vmatprep.subr.bf16.mxu1 %v25157_v2  ;;  %v25248_v1 = vld [vmem:[%s36414_s1 + $0x3b34] ss:$8 sps:$4 sm:$0xff]   ;;  %v25243_v2 = vld [vmem:[%s36414_s1 + $0x1230] ss:$8 sps:$4 sm:$0xff]  }
 0x455   :  { %18971 = vmatprep.subr.bf16.mxu0 %v25160_v3  ;;  %v25246_v3 = vld [vmem:[%s36414_s1 + $0x3b30] ss:$8 sps:$4 sm:$0xff]  }
 0x457   :  { %17291 = vmatpush1.bf16.msra.mxu1 %v25155_v4  ;;  %v25251_v4 = vld [vmem:[%s36414_s1 + $0x1244] ss:$8 sps:$4 sm:$0xff]  }
 0x458   :  { %18972 = vmatpush1.bf16.msra.mxu0 %v25158_v45  ;;  %17292 = vmatprep.subr.bf16.mxu1 %v25163_v6  ;;  %v25254_v45 = vld [vmem:[%s36414_s1 + $0x3b44] ss:$8 sps:$4 sm:$0xff]   ;;  %v25249_v6 = vld [vmem:[%s36414_s1 + $0x1240] ss:$8 sps:$4 sm:$0xff]  }
 0x459   :  { %18973 = vmatprep.subr.bf16.mxu0 %v25166_v7  ;;  %v25252_v7 = vld [vmem:[%s36414_s1 + $0x3b40] ss:$8 sps:$4 sm:$0xff]  }
 0x45b   :  { %17293 = vmatpush1.bf16.msra.mxu1 %v25161_v8  ;;  %v25257_v8 = vld [vmem:[%s36414_s1 + $0x1254] ss:$8 sps:$4 sm:$0xff]  }
 0x45c   :  { %18974 = vmatpush1.bf16.msra.mxu0 %v25164_v9  ;;  %17294 = vmatprep.subr.bf16.mxu1 %v25169_v10  ;;  %v25260_v9 = vld [vmem:[%s36414_s1 + $0x3b54] ss:$8 sps:$4 sm:$0xff]   ;;  %v25255_v10 = vld [vmem:[%s36414_s1 + $0x1250] ss:$8 sps:$4 sm:$0xff]  }
 0x45d   :  { %18975 = vmatprep.subr.bf16.mxu0 %v25172_v51  ;;  %v25258_v51 = vld [vmem:[%s36414_s1 + $0x3b50] ss:$8 sps:$4 sm:$0xff]  }
 0x45f   :  { %17295 = vmatpush1.bf16.msra.mxu1 %v25167_v12  ;;  %v25263_v12 = vld [vmem:[%s36414_s1 + $0x1264] ss:$8 sps:$4 sm:$0xff]  }
 0x460   :  { %18976 = vmatpush1.bf16.msra.mxu0 %v25170_v13  ;;  %17296 = vmatprep.subr.bf16.mxu1 %v25175_v14  ;;  %v25266_v13 = vld [vmem:[%s36414_s1 + $0x3b64] ss:$8 sps:$4 sm:$0xff]   ;;  %v25261_v14 = vld [vmem:[%s36414_s1 + $0x1260] ss:$8 sps:$4 sm:$0xff]  }
 0x461   :  { %18977 = vmatprep.subr.bf16.mxu0 %v25178_v15  ;;  %v25264_v15 = vld [vmem:[%s36414_s1 + $0x3b60] ss:$8 sps:$4 sm:$0xff]  }
 0x463   :  { %17297 = vmatpush1.bf16.msra.mxu1 %v25173_v16  ;;  %v25269_v16 = vld [vmem:[%s36414_s1 + $0x1274] ss:$8 sps:$4 sm:$0xff]  }
 0x464   :  { %18978 = vmatpush1.bf16.msra.mxu0 %v25176_v57  ;;  %17298 = vmatprep.subr.bf16.mxu1 %v25181_v19  ;;  %v25272_v57 = vld [vmem:[%s36414_s1 + $0x3b74] ss:$8 sps:$4 sm:$0xff]   ;;  %v25267_v19 = vld [vmem:[%s36414_s1 + $0x1270] ss:$8 sps:$4 sm:$0xff]  }
 0x465   :  { %18979 = vmatprep.subr.bf16.mxu0 %v25184_v21  ;;  %v25270_v21 = vld [vmem:[%s36414_s1 + $0x3b70] ss:$8 sps:$4 sm:$0xff]  }
 0x467   :  { %17299 = vmatpush1.bf16.msra.mxu1 %v25179_v22  ;;  %v25275_v22 = vld [vmem:[%s36414_s1 + $0x1284] ss:$8 sps:$4 sm:$0xff]  }
 0x468   :  { %18980 = vmatpush1.bf16.msra.mxu0 %v25182_v23  ;;  %17300 = vmatprep.subr.bf16.mxu1 %v25187_v26  ;;  %v25278_v23 = vld [vmem:[%s36414_s1 + $0x3b84] ss:$8 sps:$4 sm:$0xff]   ;;  %v25273_v26 = vld [vmem:[%s36414_s1 + $0x1280] ss:$8 sps:$4 sm:$0xff]  }
 0x469   :  { %18981 = vmatprep.subr.bf16.mxu0 %v25190_v63  ;;  %v25276_v63 = vld [vmem:[%s36414_s1 + $0x3b80] ss:$8 sps:$4 sm:$0xff]  }
 0x46b   :  { %17301 = vmatpush1.bf16.msra.mxu1 %v25185_v27  ;;  %v25281_v27 = vld [vmem:[%s36414_s1 + $0x1294] ss:$8 sps:$4 sm:$0xff]  }
 0x46c   :  { %18982 = vmatpush1.bf16.msra.mxu0 %v25188_v28  ;;  %17302 = vmatprep.subr.bf16.mxu1 %v25193_v30  ;;  %v25284_v28 = vld [vmem:[%s36414_s1 + $0x3b94] ss:$8 sps:$4 sm:$0xff]   ;;  %v25279_v30 = vld [vmem:[%s36414_s1 + $0x1290] ss:$8 sps:$4 sm:$0xff]  }
 0x46d   :  { %18983 = vmatprep.subr.bf16.mxu0 %v25196_v31  ;;  %v25282_v31 = vld [vmem:[%s36414_s1 + $0x3b90] ss:$8 sps:$4 sm:$0xff]  }
 0x46f   :  { %17303 = vmatpush1.bf16.msra.mxu1 %v25191_v24  ;;  %v25287_v24 = vld [vmem:[%s36414_s1 + $0x12a4] ss:$8 sps:$4 sm:$0xff]  }
 0x470   :  { %18984 = vmatpush1.bf16.msra.mxu0 %v25194_v5  ;;  %17304 = vmatprep.subr.bf16.mxu1 %v25199_v34  ;;  %v25290_v5 = vld [vmem:[%s36414_s1 + $0x3ba4] ss:$8 sps:$4 sm:$0xff]   ;;  %v25285_v34 = vld [vmem:[%s36414_s1 + $0x12a0] ss:$8 sps:$4 sm:$0xff]  }
 0x471   :  { %18985 = vmatprep.subr.bf16.mxu0 %v25202_v35  ;;  %v25288_v35 = vld [vmem:[%s36414_s1 + $0x3ba0] ss:$8 sps:$4 sm:$0xff]  }
 0x473   :  { %17305 = vmatpush1.bf16.msra.mxu1 %v25197_v36  ;;  %v25293_v36 = vld [vmem:[%s36414_s1 + $0x12b4] ss:$8 sps:$4 sm:$0xff]  }
 0x474   :  { %18986 = vmatpush1.bf16.msra.mxu0 %v25200_v37  ;;  %17306 = vmatprep.subr.bf16.mxu1 %v25205_v38  ;;  %v25296_v37 = vld [vmem:[%s36414_s1 + $0x3bb4] ss:$8 sps:$4 sm:$0xff]   ;;  %v25291_v38 = vld [vmem:[%s36414_s1 + $0x12b0] ss:$8 sps:$4 sm:$0xff]  }
 0x475   :  { %18987 = vmatprep.subr.bf16.mxu0 %v25208_v11  ;;  %v25294_v11 = vld [vmem:[%s36414_s1 + $0x3bb0] ss:$8 sps:$4 sm:$0xff]  }
 0x477   :  { %17307 = vmatpush1.bf16.msra.mxu1 %v25203_v40  ;;  %v25299_v40 = vld [vmem:[%s36414_s1 + $0x12c4] ss:$8 sps:$4 sm:$0xff]  }
 0x478   :  { %18988 = vmatpush1.bf16.msra.mxu0 %v25206_v41  ;;  %17308 = vmatprep.subr.bf16.mxu1 %v25211_v42  ;;  %v25302_v41 = vld [vmem:[%s36414_s1 + $0x3bc4] ss:$8 sps:$4 sm:$0xff]   ;;  %v25297_v42 = vld [vmem:[%s36414_s1 + $0x12c0] ss:$8 sps:$4 sm:$0xff]  }
 0x479   :  { %18989 = vmatprep.subr.bf16.mxu0 %v25214_v43  ;;  %v25300_v43 = vld [vmem:[%s36414_s1 + $0x3bc0] ss:$8 sps:$4 sm:$0xff]  }
 0x47b   :  { %17309 = vmatpush1.bf16.msra.mxu1 %v25209_v44  ;;  %v25305_v44 = vld [vmem:[%s36414_s1 + $0x12d4] ss:$8 sps:$4 sm:$0xff]  }
 0x47c   :  { %18990 = vmatpush1.bf16.msra.mxu0 %v25212_v17  ;;  %17310 = vmatprep.subr.bf16.mxu1 %v25217_v46  ;;  %v25308_v17 = vld [vmem:[%s36414_s1 + $0x3bd4] ss:$8 sps:$4 sm:$0xff]   ;;  %v25303_v46 = vld [vmem:[%s36414_s1 + $0x12d0] ss:$8 sps:$4 sm:$0xff]  }
 0x47d   :  { %18991 = vmatprep.subr.bf16.mxu0 %v25220_v47  ;;  %v25306_v47 = vld [vmem:[%s36414_s1 + $0x3bd0] ss:$8 sps:$4 sm:$0xff]  }
 0x47f   :  { %17311 = vmatpush1.bf16.msra.mxu1 %v25215_v48  ;;  %v25311_v48 = vld [vmem:[%s36414_s1 + $0x12e4] ss:$8 sps:$4 sm:$0xff]  }
 0x480   :  { %18992 = vmatpush1.bf16.msra.mxu0 %v25218_v49  ;;  %17321 = vmatprep.subr.bf16.mxu1 %v25225_v50  ;;  %v25314_v49 = vld [vmem:[%s36414_s1 + $0x3be4] ss:$8 sps:$4 sm:$0xff]   ;;  %v25309_v50 = vld [vmem:[%s36414_s1 + $0x12e0] ss:$8 sps:$4 sm:$0xff]  }
 0x481   :  { %19002 = vmatprep.subr.bf16.mxu0 %v25230_v18  ;;  %v25312_v18 = vld [vmem:[%s36414_s1 + $0x3be0] ss:$8 sps:$4 sm:$0xff]  }
 0x482   :  { %17313 = vmatmul.mubr.bf16.vlgmr.msra.gmra.mrb[0].mxu1 %v20247_v52  ;;  %v25317_v52 = vld [vmem:[%s36414_s1 + $0x12f4] ss:$8 sps:$4 sm:$0xff]  }
 0x483   :  { %18994 = vmatmul.mubr.bf16.vlgmr.msra.gmra.mrb[0].mxu0 %v20329_v53  ;;  %17322 = vmatpush1.bf16.msra.mxu1 %v25223_v54  ;;  %v25320_v53 = vld [vmem:[%s36414_s1 + $0x3bf4] ss:$8 sps:$4 sm:$0xff]   ;;  %v25315_v54 = vld [vmem:[%s36414_s1 + $0x12f0] ss:$8 sps:$4 sm:$0xff]  }
 0x484   :  { %19003 = vmatpush1.bf16.msra.mxu0 %v25228_v55  ;;  %17323 = vmatprep.subr.bf16.mxu1 %v25233_v56  ;;  %v25318_v55 = vld [vmem:[%s36414_s1 + $0x3bf0] ss:$8 sps:$4 sm:$0xff]   ;;  %v25325_v56 = vld [vmem:[%s36414_s1 + $0x1304] ss:$8 sps:$4 sm:$0xff]  }
 0x485   :  { %19004 = vmatprep.subr.bf16.mxu0 %v25236_v25  ;;  %17353 = vmatprep.mubr.bf16.mxu1 %v20250_v32  ;;  %v25330_v25 = vld [vmem:[%s36414_s1 + $0x3c04] ss:$8 sps:$4 sm:$0xff]   ;;  %v31615_v32 = vld [vmem:[%s36413_s0 + $0x98] sm:$0xff] }
 0x486   :  { %19034 = vmatprep.mubr.bf16.mxu0 %v20332_v33  ;;  %v31620_v33 = vld [vmem:[%s36413_s0 + $0x1e0] sm:$0xff] }
 0x487   :  { %17324 = vmatpush1.bf16.msra.mxu1 %v25231_v58  ;;  %v20249_v58 = vcombine.low %v31405_v20, %v31405_v20  ;;  %v25336_v20 = vld [vmem:[%s36414_s1 + $0x3c14] ss:$8 sps:$4 sm:$0xff]  }
 0x488   :  { %19005 = vmatpush1.bf16.msra.mxu0 %v25234_v59  ;;  %17325 = vmatprep.subr.bf16.mxu1 %v25239_v60  ;;  %v20331_v59 = vcombine.low %v31410_v29, %v31410_v29  ;;  %v25323_v60 = vld [vmem:[%s36414_s1 + $0x1300] ss:$8 sps:$4 sm:$0xff]   ;;  %v20252_v29 = vcombine.high %v31615_v32, %v31615_v32 }
 0x489   :  { %19006 = vmatprep.subr.bf16.mxu0 %v25242_v61  ;;  %v25328_v61 = vld [vmem:[%s36414_s1 + $0x3c00] ss:$8 sps:$4 sm:$0xff]  }
 0x48b   :  { %17326 = vmatpush1.bf16.msra.mxu1 %v25237_v62  ;;  %v25333_v62 = vld [vmem:[%s36414_s1 + $0x1314] ss:$8 sps:$4 sm:$0xff]  }
 0x48c   :  { %19007 = vmatpush1.bf16.msra.mxu0 %v25240_v39  ;;  %17327 = vmatprep.subr.bf16.mxu1 %v25245_v0  ;;  %v20334_v39 = vcombine.high %v31620_v33, %v31620_v33  ;;  %v25331_v0 = vld [vmem:[%s36414_s1 + $0x1310] ss:$8 sps:$4 sm:$0xff]  }
 0x48d   :  { %19008 = vmatprep.subr.bf16.mxu0 %v25248_v1  ;;  %v25334_v1 = vld [vmem:[%s36414_s1 + $0x3c10] ss:$8 sps:$4 sm:$0xff]  }
 0x48f   :  { %17328 = vmatpush1.bf16.msra.mxu1 %v25243_v2  ;;  %v25339_v2 = vld [vmem:[%s36414_s1 + $0x1324] ss:$8 sps:$4 sm:$0xff]  }
 0x490   :  { %19009 = vmatpush1.bf16.msra.mxu0 %v25246_v3  ;;  %17329 = vmatprep.subr.bf16.mxu1 %v25251_v4  ;;  %v25342_v3 = vld [vmem:[%s36414_s1 + $0x3c24] ss:$8 sps:$4 sm:$0xff]   ;;  %v25337_v4 = vld [vmem:[%s36414_s1 + $0x1320] ss:$8 sps:$4 sm:$0xff]  }
 0x491   :  { %19010 = vmatprep.subr.bf16.mxu0 %v25254_v45  ;;  %v25340_v45 = vld [vmem:[%s36414_s1 + $0x3c20] ss:$8 sps:$4 sm:$0xff]  }
 0x493   :  { %17330 = vmatpush1.bf16.msra.mxu1 %v25249_v6  ;;  %v25345_v6 = vld [vmem:[%s36414_s1 + $0x1334] ss:$8 sps:$4 sm:$0xff]  }
 0x494   :  { %19011 = vmatpush1.bf16.msra.mxu0 %v25252_v7  ;;  %17331 = vmatprep.subr.bf16.mxu1 %v25257_v8  ;;  %v25348_v7 = vld [vmem:[%s36414_s1 + $0x3c34] ss:$8 sps:$4 sm:$0xff]   ;;  %v25343_v8 = vld [vmem:[%s36414_s1 + $0x1330] ss:$8 sps:$4 sm:$0xff]  }
 0x495   :  { %19012 = vmatprep.subr.bf16.mxu0 %v25260_v9  ;;  %v25346_v9 = vld [vmem:[%s36414_s1 + $0x3c30] ss:$8 sps:$4 sm:$0xff]  }
 0x497   :  { %17332 = vmatpush1.bf16.msra.mxu1 %v25255_v10  ;;  %v25351_v10 = vld [vmem:[%s36414_s1 + $0x1344] ss:$8 sps:$4 sm:$0xff]  }
 0x498   :  { %19013 = vmatpush1.bf16.msra.mxu0 %v25258_v51  ;;  %17333 = vmatprep.subr.bf16.mxu1 %v25263_v12  ;;  %v25354_v51 = vld [vmem:[%s36414_s1 + $0x3c44] ss:$8 sps:$4 sm:$0xff]   ;;  %v25349_v12 = vld [vmem:[%s36414_s1 + $0x1340] ss:$8 sps:$4 sm:$0xff]  }
 0x499   :  { %19014 = vmatprep.subr.bf16.mxu0 %v25266_v13  ;;  %v25352_v13 = vld [vmem:[%s36414_s1 + $0x3c40] ss:$8 sps:$4 sm:$0xff]  }
 0x49b   :  { %17334 = vmatpush1.bf16.msra.mxu1 %v25261_v14  ;;  %v25357_v14 = vld [vmem:[%s36414_s1 + $0x1354] ss:$8 sps:$4 sm:$0xff]  }
 0x49c   :  { %19015 = vmatpush1.bf16.msra.mxu0 %v25264_v15  ;;  %17335 = vmatprep.subr.bf16.mxu1 %v25269_v16  ;;  %v25360_v15 = vld [vmem:[%s36414_s1 + $0x3c54] ss:$8 sps:$4 sm:$0xff]   ;;  %v25355_v16 = vld [vmem:[%s36414_s1 + $0x1350] ss:$8 sps:$4 sm:$0xff]  }
 0x49d   :  { %19016 = vmatprep.subr.bf16.mxu0 %v25272_v57  ;;  %v25358_v57 = vld [vmem:[%s36414_s1 + $0x3c50] ss:$8 sps:$4 sm:$0xff]  }
 0x49f   :  { %17336 = vmatpush1.bf16.msra.mxu1 %v25267_v19  ;;  %v25363_v19 = vld [vmem:[%s36414_s1 + $0x1364] ss:$8 sps:$4 sm:$0xff]  }
 0x4a0   :  { %19017 = vmatpush1.bf16.msra.mxu0 %v25270_v21  ;;  %17337 = vmatprep.subr.bf16.mxu1 %v25275_v22  ;;  %v25366_v21 = vld [vmem:[%s36414_s1 + $0x3c64] ss:$8 sps:$4 sm:$0xff]   ;;  %v25361_v22 = vld [vmem:[%s36414_s1 + $0x1360] ss:$8 sps:$4 sm:$0xff]  }
 0x4a1   :  { %19018 = vmatprep.subr.bf16.mxu0 %v25278_v23  ;;  %v25364_v23 = vld [vmem:[%s36414_s1 + $0x3c60] ss:$8 sps:$4 sm:$0xff]  }
 0x4a3   :  { %17338 = vmatpush1.bf16.msra.mxu1 %v25273_v26  ;;  %v25369_v26 = vld [vmem:[%s36414_s1 + $0x1374] ss:$8 sps:$4 sm:$0xff]  }
 0x4a4   :  { %19019 = vmatpush1.bf16.msra.mxu0 %v25276_v63  ;;  %17339 = vmatprep.subr.bf16.mxu1 %v25281_v27  ;;  %v25372_v63 = vld [vmem:[%s36414_s1 + $0x3c74] ss:$8 sps:$4 sm:$0xff]   ;;  %v25367_v27 = vld [vmem:[%s36414_s1 + $0x1370] ss:$8 sps:$4 sm:$0xff]  }
 0x4a5   :  { %19020 = vmatprep.subr.bf16.mxu0 %v25284_v28  ;;  %v25370_v28 = vld [vmem:[%s36414_s1 + $0x3c70] ss:$8 sps:$4 sm:$0xff]  }
 0x4a7   :  { %17340 = vmatpush1.bf16.msra.mxu1 %v25279_v30  ;;  %v25375_v30 = vld [vmem:[%s36414_s1 + $0x1384] ss:$8 sps:$4 sm:$0xff]  }
 0x4a8   :  { %19021 = vmatpush1.bf16.msra.mxu0 %v25282_v31  ;;  %17341 = vmatprep.subr.bf16.mxu1 %v25287_v24  ;;  %v25378_v31 = vld [vmem:[%s36414_s1 + $0x3c84] ss:$8 sps:$4 sm:$0xff]   ;;  %v25373_v24 = vld [vmem:[%s36414_s1 + $0x1380] ss:$8 sps:$4 sm:$0xff]  }
 0x4a9   :  { %19022 = vmatprep.subr.bf16.mxu0 %v25290_v5  ;;  %v25376_v5 = vld [vmem:[%s36414_s1 + $0x3c80] ss:$8 sps:$4 sm:$0xff]  }
 0x4ab   :  { %17342 = vmatpush1.bf16.msra.mxu1 %v25285_v34  ;;  %v25381_v34 = vld [vmem:[%s36414_s1 + $0x1394] ss:$8 sps:$4 sm:$0xff]  }
 0x4ac   :  { %19023 = vmatpush1.bf16.msra.mxu0 %v25288_v35  ;;  %17343 = vmatprep.subr.bf16.mxu1 %v25293_v36  ;;  %v25384_v35 = vld [vmem:[%s36414_s1 + $0x3c94] ss:$8 sps:$4 sm:$0xff]   ;;  %v25379_v36 = vld [vmem:[%s36414_s1 + $0x1390] ss:$8 sps:$4 sm:$0xff]  }
 0x4ad   :  { %19024 = vmatprep.subr.bf16.mxu0 %v25296_v37  ;;  %v25382_v37 = vld [vmem:[%s36414_s1 + $0x3c90] ss:$8 sps:$4 sm:$0xff]  }
 0x4af   :  { %17344 = vmatpush1.bf16.msra.mxu1 %v25291_v38  ;;  %v25387_v38 = vld [vmem:[%s36414_s1 + $0x13a4] ss:$8 sps:$4 sm:$0xff]  }
 0x4b0   :  { %19025 = vmatpush1.bf16.msra.mxu0 %v25294_v11  ;;  %17345 = vmatprep.subr.bf16.mxu1 %v25299_v40  ;;  %v25390_v11 = vld [vmem:[%s36414_s1 + $0x3ca4] ss:$8 sps:$4 sm:$0xff]   ;;  %v25385_v40 = vld [vmem:[%s36414_s1 + $0x13a0] ss:$8 sps:$4 sm:$0xff]  }
 0x4b1   :  { %19026 = vmatprep.subr.bf16.mxu0 %v25302_v41  ;;  %v25388_v41 = vld [vmem:[%s36414_s1 + $0x3ca0] ss:$8 sps:$4 sm:$0xff]  }
 0x4b3   :  { %17346 = vmatpush1.bf16.msra.mxu1 %v25297_v42  ;;  %v25393_v42 = vld [vmem:[%s36414_s1 + $0x13b4] ss:$8 sps:$4 sm:$0xff]  }
 0x4b4   :  { %19027 = vmatpush1.bf16.msra.mxu0 %v25300_v43  ;;  %17347 = vmatprep.subr.bf16.mxu1 %v25305_v44  ;;  %v25396_v43 = vld [vmem:[%s36414_s1 + $0x3cb4] ss:$8 sps:$4 sm:$0xff]   ;;  %v25391_v44 = vld [vmem:[%s36414_s1 + $0x13b0] ss:$8 sps:$4 sm:$0xff]  }
 0x4b5   :  { %19028 = vmatprep.subr.bf16.mxu0 %v25308_v17  ;;  %v25394_v17 = vld [vmem:[%s36414_s1 + $0x3cb0] ss:$8 sps:$4 sm:$0xff]  }
 0x4b7   :  { %17348 = vmatpush1.bf16.msra.mxu1 %v25303_v46  ;;  %v25399_v46 = vld [vmem:[%s36414_s1 + $0x13c4] ss:$8 sps:$4 sm:$0xff]  }
 0x4b8   :  { %19029 = vmatpush1.bf16.msra.mxu0 %v25306_v47  ;;  %17349 = vmatprep.subr.bf16.mxu1 %v25311_v48  ;;  %v25402_v47 = vld [vmem:[%s36414_s1 + $0x3cc4] ss:$8 sps:$4 sm:$0xff]   ;;  %v25397_v48 = vld [vmem:[%s36414_s1 + $0x13c0] ss:$8 sps:$4 sm:$0xff]  }
 0x4b9   :  { %19030 = vmatprep.subr.bf16.mxu0 %v25314_v49  ;;  %v25400_v49 = vld [vmem:[%s36414_s1 + $0x3cc0] ss:$8 sps:$4 sm:$0xff]  }
 0x4bb   :  { %17350 = vmatpush1.bf16.msra.mxu1 %v25309_v50  ;;  %v25405_v50 = vld [vmem:[%s36414_s1 + $0x13d4] ss:$8 sps:$4 sm:$0xff]  }
 0x4bc   :  { %19031 = vmatpush1.bf16.msra.mxu0 %v25312_v18  ;;  %17351 = vmatprep.subr.bf16.mxu1 %v25317_v52  ;;  %v25408_v18 = vld [vmem:[%s36414_s1 + $0x3cd4] ss:$8 sps:$4 sm:$0xff]   ;;  %v25403_v52 = vld [vmem:[%s36414_s1 + $0x13d0] ss:$8 sps:$4 sm:$0xff]  }
 0x4bd   :  { %19032 = vmatprep.subr.bf16.mxu0 %v25320_v53  ;;  %v25406_v53 = vld [vmem:[%s36414_s1 + $0x3cd0] ss:$8 sps:$4 sm:$0xff]  }
 0x4bf   :  { %17352 = vmatpush1.bf16.msra.mxu1 %v25315_v54  ;;  %v25411_v54 = vld [vmem:[%s36414_s1 + $0x13e4] ss:$8 sps:$4 sm:$0xff]  }
 0x4c0   :  { %19033 = vmatpush1.bf16.msra.mxu0 %v25318_v55  ;;  %17362 = vmatprep.subr.bf16.mxu1 %v25325_v56  ;;  %v25414_v55 = vld [vmem:[%s36414_s1 + $0x3ce4] ss:$8 sps:$4 sm:$0xff]   ;;  %v25409_v56 = vld [vmem:[%s36414_s1 + $0x13e0] ss:$8 sps:$4 sm:$0xff]  }
 0x4c1   :  { %19043 = vmatprep.subr.bf16.mxu0 %v25330_v25  ;;  %v25412_v25 = vld [vmem:[%s36414_s1 + $0x3ce0] ss:$8 sps:$4 sm:$0xff]  }
 0x4c2   :  { %17354 = vmatmul.mubr.bf16.vlgmr.msra.gmra.mrb[0].mxu1 %v20249_v58  ;;  %v25417_v58 = vld [vmem:[%s36414_s1 + $0x13f4] ss:$8 sps:$4 sm:$0xff]  }
 0x4c3   :  { %19035 = vmatmul.mubr.bf16.vlgmr.msra.gmra.mrb[0].mxu0 %v20331_v59  ;;  %17363 = vmatpush1.bf16.msra.mxu1 %v25323_v60  ;;  %v25420_v59 = vld [vmem:[%s36414_s1 + $0x3cf4] ss:$8 sps:$4 sm:$0xff]   ;;  %v25415_v60 = vld [vmem:[%s36414_s1 + $0x13f0] ss:$8 sps:$4 sm:$0xff]  }
 0x4c4   :  { %19044 = vmatpush1.bf16.msra.mxu0 %v25328_v61  ;;  %17364 = vmatprep.subr.bf16.mxu1 %v25333_v62  ;;  %v25418_v61 = vld [vmem:[%s36414_s1 + $0x3cf0] ss:$8 sps:$4 sm:$0xff]   ;;  %v25425_v62 = vld [vmem:[%s36414_s1 + $0x1404] ss:$8 sps:$4 sm:$0xff]  }
 0x4c5   :  { %19045 = vmatprep.subr.bf16.mxu0 %v25336_v20  ;;  %17394 = vmatprep.mubr.bf16.mxu1 %v20252_v29  ;;  %v25430_v20 = vld [vmem:[%s36414_s1 + $0x3d04] ss:$8 sps:$4 sm:$0xff]  }
 0x4c6   :  { %19075 = vmatprep.mubr.bf16.mxu0 %v20334_v39  ;;  %v31825_v29 = vld [vmem:[%s36413_s0 + $0xa0] sm:$0xff]  ;;  %v31830_v39 = vld [vmem:[%s36413_s0 + $0x1e8] sm:$0xff] }
 0x4c7   :  { %17365 = vmatpush1.bf16.msra.mxu1 %v25331_v0  ;;  %v20251_v0 = vcombine.low %v31615_v32, %v31615_v32  ;;  %v25436_v32 = vld [vmem:[%s36414_s1 + $0x3d14] ss:$8 sps:$4 sm:$0xff]  }
 0x4c8   :  { %19046 = vmatpush1.bf16.msra.mxu0 %v25334_v1  ;;  %17366 = vmatprep.subr.bf16.mxu1 %v25339_v2  ;;  %v20333_v1 = vcombine.low %v31620_v33, %v31620_v33  ;;  %v25423_v2 = vld [vmem:[%s36414_s1 + $0x1400] ss:$8 sps:$4 sm:$0xff]   ;;  %v20254_v33 = vcombine.high %v31825_v29, %v31825_v29 }
 0x4c9   :  { %19047 = vmatprep.subr.bf16.mxu0 %v25342_v3  ;;  %v25428_v3 = vld [vmem:[%s36414_s1 + $0x3d00] ss:$8 sps:$4 sm:$0xff]  }
 0x4cb   :  { %17367 = vmatpush1.bf16.msra.mxu1 %v25337_v4  ;;  %v25433_v4 = vld [vmem:[%s36414_s1 + $0x1414] ss:$8 sps:$4 sm:$0xff]  }
 0x4cc   :  { %19048 = vmatpush1.bf16.msra.mxu0 %v25340_v45  ;;  %17368 = vmatprep.subr.bf16.mxu1 %v25345_v6  ;;  %v20336_v45 = vcombine.high %v31830_v39, %v31830_v39  ;;  %v25431_v6 = vld [vmem:[%s36414_s1 + $0x1410] ss:$8 sps:$4 sm:$0xff]  }
 0x4cd   :  { %19049 = vmatprep.subr.bf16.mxu0 %v25348_v7  ;;  %v25434_v7 = vld [vmem:[%s36414_s1 + $0x3d10] ss:$8 sps:$4 sm:$0xff]  }
 0x4cf   :  { %17369 = vmatpush1.bf16.msra.mxu1 %v25343_v8  ;;  %v25439_v8 = vld [vmem:[%s36414_s1 + $0x1424] ss:$8 sps:$4 sm:$0xff]  }
 0x4d0   :  { %19050 = vmatpush1.bf16.msra.mxu0 %v25346_v9  ;;  %17370 = vmatprep.subr.bf16.mxu1 %v25351_v10  ;;  %v25442_v9 = vld [vmem:[%s36414_s1 + $0x3d24] ss:$8 sps:$4 sm:$0xff]   ;;  %v25437_v10 = vld [vmem:[%s36414_s1 + $0x1420] ss:$8 sps:$4 sm:$0xff]  }
 0x4d1   :  { %19051 = vmatprep.subr.bf16.mxu0 %v25354_v51  ;;  %v25440_v51 = vld [vmem:[%s36414_s1 + $0x3d20] ss:$8 sps:$4 sm:$0xff]  }
 0x4d3   :  { %17371 = vmatpush1.bf16.msra.mxu1 %v25349_v12  ;;  %v25445_v12 = vld [vmem:[%s36414_s1 + $0x1434] ss:$8 sps:$4 sm:$0xff]  }
 0x4d4   :  { %19052 = vmatpush1.bf16.msra.mxu0 %v25352_v13  ;;  %17372 = vmatprep.subr.bf16.mxu1 %v25357_v14  ;;  %v25448_v13 = vld [vmem:[%s36414_s1 + $0x3d34] ss:$8 sps:$4 sm:$0xff]   ;;  %v25443_v14 = vld [vmem:[%s36414_s1 + $0x1430] ss:$8 sps:$4 sm:$0xff]  }
 0x4d5   :  { %19053 = vmatprep.subr.bf16.mxu0 %v25360_v15  ;;  %v25446_v15 = vld [vmem:[%s36414_s1 + $0x3d30] ss:$8 sps:$4 sm:$0xff]  }
 0x4d7   :  { %17373 = vmatpush1.bf16.msra.mxu1 %v25355_v16  ;;  %v25451_v16 = vld [vmem:[%s36414_s1 + $0x1444] ss:$8 sps:$4 sm:$0xff]  }
 0x4d8   :  { %19054 = vmatpush1.bf16.msra.mxu0 %v25358_v57  ;;  %17374 = vmatprep.subr.bf16.mxu1 %v25363_v19  ;;  %v25454_v57 = vld [vmem:[%s36414_s1 + $0x3d44] ss:$8 sps:$4 sm:$0xff]   ;;  %v25449_v19 = vld [vmem:[%s36414_s1 + $0x1440] ss:$8 sps:$4 sm:$0xff]  }
 0x4d9   :  { %19055 = vmatprep.subr.bf16.mxu0 %v25366_v21  ;;  %v25452_v21 = vld [vmem:[%s36414_s1 + $0x3d40] ss:$8 sps:$4 sm:$0xff]  }
 0x4db   :  { %17375 = vmatpush1.bf16.msra.mxu1 %v25361_v22  ;;  %v25457_v22 = vld [vmem:[%s36414_s1 + $0x1454] ss:$8 sps:$4 sm:$0xff]  }
 0x4dc   :  { %19056 = vmatpush1.bf16.msra.mxu0 %v25364_v23  ;;  %17376 = vmatprep.subr.bf16.mxu1 %v25369_v26  ;;  %v25460_v23 = vld [vmem:[%s36414_s1 + $0x3d54] ss:$8 sps:$4 sm:$0xff]   ;;  %v25455_v26 = vld [vmem:[%s36414_s1 + $0x1450] ss:$8 sps:$4 sm:$0xff]  }
 0x4dd   :  { %19057 = vmatprep.subr.bf16.mxu0 %v25372_v63  ;;  %v25458_v63 = vld [vmem:[%s36414_s1 + $0x3d50] ss:$8 sps:$4 sm:$0xff]  }
 0x4df   :  { %17377 = vmatpush1.bf16.msra.mxu1 %v25367_v27  ;;  %v25463_v27 = vld [vmem:[%s36414_s1 + $0x1464] ss:$8 sps:$4 sm:$0xff]  }
 0x4e0   :  { %19058 = vmatpush1.bf16.msra.mxu0 %v25370_v28  ;;  %17378 = vmatprep.subr.bf16.mxu1 %v25375_v30  ;;  %v25466_v28 = vld [vmem:[%s36414_s1 + $0x3d64] ss:$8 sps:$4 sm:$0xff]   ;;  %v25461_v30 = vld [vmem:[%s36414_s1 + $0x1460] ss:$8 sps:$4 sm:$0xff]  }
 0x4e1   :  { %19059 = vmatprep.subr.bf16.mxu0 %v25378_v31  ;;  %v25464_v31 = vld [vmem:[%s36414_s1 + $0x3d60] ss:$8 sps:$4 sm:$0xff]  }
 0x4e3   :  { %17379 = vmatpush1.bf16.msra.mxu1 %v25373_v24  ;;  %v25469_v24 = vld [vmem:[%s36414_s1 + $0x1474] ss:$8 sps:$4 sm:$0xff]  }
 0x4e4   :  { %19060 = vmatpush1.bf16.msra.mxu0 %v25376_v5  ;;  %17380 = vmatprep.subr.bf16.mxu1 %v25381_v34  ;;  %v25472_v5 = vld [vmem:[%s36414_s1 + $0x3d74] ss:$8 sps:$4 sm:$0xff]   ;;  %v25467_v34 = vld [vmem:[%s36414_s1 + $0x1470] ss:$8 sps:$4 sm:$0xff]  }
 0x4e5   :  { %19061 = vmatprep.subr.bf16.mxu0 %v25384_v35  ;;  %v25470_v35 = vld [vmem:[%s36414_s1 + $0x3d70] ss:$8 sps:$4 sm:$0xff]  }
 0x4e7   :  { %17381 = vmatpush1.bf16.msra.mxu1 %v25379_v36  ;;  %v25475_v36 = vld [vmem:[%s36414_s1 + $0x1484] ss:$8 sps:$4 sm:$0xff]  }
 0x4e8   :  { %19062 = vmatpush1.bf16.msra.mxu0 %v25382_v37  ;;  %17382 = vmatprep.subr.bf16.mxu1 %v25387_v38  ;;  %v25478_v37 = vld [vmem:[%s36414_s1 + $0x3d84] ss:$8 sps:$4 sm:$0xff]   ;;  %v25473_v38 = vld [vmem:[%s36414_s1 + $0x1480] ss:$8 sps:$4 sm:$0xff]  }
 0x4e9   :  { %19063 = vmatprep.subr.bf16.mxu0 %v25390_v11  ;;  %v25476_v11 = vld [vmem:[%s36414_s1 + $0x3d80] ss:$8 sps:$4 sm:$0xff]  }
 0x4eb   :  { %17383 = vmatpush1.bf16.msra.mxu1 %v25385_v40  ;;  %v25481_v40 = vld [vmem:[%s36414_s1 + $0x1494] ss:$8 sps:$4 sm:$0xff]  }
 0x4ec   :  { %19064 = vmatpush1.bf16.msra.mxu0 %v25388_v41  ;;  %17384 = vmatprep.subr.bf16.mxu1 %v25393_v42  ;;  %v25484_v41 = vld [vmem:[%s36414_s1 + $0x3d94] ss:$8 sps:$4 sm:$0xff]   ;;  %v25479_v42 = vld [vmem:[%s36414_s1 + $0x1490] ss:$8 sps:$4 sm:$0xff]  }
 0x4ed   :  { %19065 = vmatprep.subr.bf16.mxu0 %v25396_v43  ;;  %v25482_v43 = vld [vmem:[%s36414_s1 + $0x3d90] ss:$8 sps:$4 sm:$0xff]  }
 0x4ef   :  { %17385 = vmatpush1.bf16.msra.mxu1 %v25391_v44  ;;  %v25487_v44 = vld [vmem:[%s36414_s1 + $0x14a4] ss:$8 sps:$4 sm:$0xff]  }
 0x4f0   :  { %19066 = vmatpush1.bf16.msra.mxu0 %v25394_v17  ;;  %17386 = vmatprep.subr.bf16.mxu1 %v25399_v46  ;;  %v25490_v17 = vld [vmem:[%s36414_s1 + $0x3da4] ss:$8 sps:$4 sm:$0xff]   ;;  %v25485_v46 = vld [vmem:[%s36414_s1 + $0x14a0] ss:$8 sps:$4 sm:$0xff]  }
 0x4f1   :  { %19067 = vmatprep.subr.bf16.mxu0 %v25402_v47  ;;  %v25488_v47 = vld [vmem:[%s36414_s1 + $0x3da0] ss:$8 sps:$4 sm:$0xff]  }
 0x4f3   :  { %17387 = vmatpush1.bf16.msra.mxu1 %v25397_v48  ;;  %v25493_v48 = vld [vmem:[%s36414_s1 + $0x14b4] ss:$8 sps:$4 sm:$0xff]  }
 0x4f4   :  { %19068 = vmatpush1.bf16.msra.mxu0 %v25400_v49  ;;  %17388 = vmatprep.subr.bf16.mxu1 %v25405_v50  ;;  %v25496_v49 = vld [vmem:[%s36414_s1 + $0x3db4] ss:$8 sps:$4 sm:$0xff]   ;;  %v25491_v50 = vld [vmem:[%s36414_s1 + $0x14b0] ss:$8 sps:$4 sm:$0xff]  }
 0x4f5   :  { %19069 = vmatprep.subr.bf16.mxu0 %v25408_v18  ;;  %v25494_v18 = vld [vmem:[%s36414_s1 + $0x3db0] ss:$8 sps:$4 sm:$0xff]  }
 0x4f7   :  { %17389 = vmatpush1.bf16.msra.mxu1 %v25403_v52  ;;  %v25499_v52 = vld [vmem:[%s36414_s1 + $0x14c4] ss:$8 sps:$4 sm:$0xff]  }
 0x4f8   :  { %19070 = vmatpush1.bf16.msra.mxu0 %v25406_v53  ;;  %17390 = vmatprep.subr.bf16.mxu1 %v25411_v54  ;;  %v25502_v53 = vld [vmem:[%s36414_s1 + $0x3dc4] ss:$8 sps:$4 sm:$0xff]   ;;  %v25497_v54 = vld [vmem:[%s36414_s1 + $0x14c0] ss:$8 sps:$4 sm:$0xff]  }
 0x4f9   :  { %19071 = vmatprep.subr.bf16.mxu0 %v25414_v55  ;;  %v25500_v55 = vld [vmem:[%s36414_s1 + $0x3dc0] ss:$8 sps:$4 sm:$0xff]  }
 0x4fb   :  { %17391 = vmatpush1.bf16.msra.mxu1 %v25409_v56  ;;  %v25505_v56 = vld [vmem:[%s36414_s1 + $0x14d4] ss:$8 sps:$4 sm:$0xff]  }
 0x4fc   :  { %19072 = vmatpush1.bf16.msra.mxu0 %v25412_v25  ;;  %17392 = vmatprep.subr.bf16.mxu1 %v25417_v58  ;;  %v25508_v25 = vld [vmem:[%s36414_s1 + $0x3dd4] ss:$8 sps:$4 sm:$0xff]   ;;  %v25503_v58 = vld [vmem:[%s36414_s1 + $0x14d0] ss:$8 sps:$4 sm:$0xff]  }
 0x4fd   :  { %19073 = vmatprep.subr.bf16.mxu0 %v25420_v59  ;;  %v25506_v59 = vld [vmem:[%s36414_s1 + $0x3dd0] ss:$8 sps:$4 sm:$0xff]  }
 0x4ff   :  { %17393 = vmatpush1.bf16.msra.mxu1 %v25415_v60  ;;  %v25511_v60 = vld [vmem:[%s36414_s1 + $0x14e4] ss:$8 sps:$4 sm:$0xff]  }
 0x500   :  { %19074 = vmatpush1.bf16.msra.mxu0 %v25418_v61  ;;  %17403 = vmatprep.subr.bf16.mxu1 %v25425_v62  ;;  %v25514_v61 = vld [vmem:[%s36414_s1 + $0x3de4] ss:$8 sps:$4 sm:$0xff]   ;;  %v25509_v62 = vld [vmem:[%s36414_s1 + $0x14e0] ss:$8 sps:$4 sm:$0xff]  }
 0x501   :  { %19084 = vmatprep.subr.bf16.mxu0 %v25430_v20  ;;  %v25512_v20 = vld [vmem:[%s36414_s1 + $0x3de0] ss:$8 sps:$4 sm:$0xff]  }
 0x502   :  { %17395 = vmatmul.mubr.bf16.vlgmr.msra.gmra.mrb[0].mxu1 %v20251_v0  ;;  %v25517_v0 = vld [vmem:[%s36414_s1 + $0x14f4] ss:$8 sps:$4 sm:$0xff]  }
 0x503   :  { %19076 = vmatmul.mubr.bf16.vlgmr.msra.gmra.mrb[0].mxu0 %v20333_v1  ;;  %17404 = vmatpush1.bf16.msra.mxu1 %v25423_v2  ;;  %v25520_v1 = vld [vmem:[%s36414_s1 + $0x3df4] ss:$8 sps:$4 sm:$0xff]   ;;  %v25515_v2 = vld [vmem:[%s36414_s1 + $0x14f0] ss:$8 sps:$4 sm:$0xff]  }
 0x504   :  { %19085 = vmatpush1.bf16.msra.mxu0 %v25428_v3  ;;  %17405 = vmatprep.subr.bf16.mxu1 %v25433_v4  ;;  %v25518_v3 = vld [vmem:[%s36414_s1 + $0x3df0] ss:$8 sps:$4 sm:$0xff]   ;;  %v25525_v4 = vld [vmem:[%s36414_s1 + $0x1504] ss:$8 sps:$4 sm:$0xff]  }
 0x505   :  { %19086 = vmatprep.subr.bf16.mxu0 %v25436_v32  ;;  %17435 = vmatprep.mubr.bf16.mxu1 %v20254_v33  ;;  %v25530_v32 = vld [vmem:[%s36414_s1 + $0x3e04] ss:$8 sps:$4 sm:$0xff]  }
 0x506   :  { %19116 = vmatprep.mubr.bf16.mxu0 %v20336_v45  ;;  %v32035_v33 = vld [vmem:[%s36413_s0 + $0xa8] sm:$0xff]  ;;  %v32040_v45 = vld [vmem:[%s36413_s0 + $0x1f0] sm:$0xff] }
 0x507   :  { %17406 = vmatpush1.bf16.msra.mxu1 %v25431_v6  ;;  %v20253_v6 = vcombine.low %v31825_v29, %v31825_v29  ;;  %v25536_v29 = vld [vmem:[%s36414_s1 + $0x3e14] ss:$8 sps:$4 sm:$0xff]  }
 0x508   :  { %19087 = vmatpush1.bf16.msra.mxu0 %v25434_v7  ;;  %17407 = vmatprep.subr.bf16.mxu1 %v25439_v8  ;;  %v20335_v7 = vcombine.low %v31830_v39, %v31830_v39  ;;  %v25523_v8 = vld [vmem:[%s36414_s1 + $0x1500] ss:$8 sps:$4 sm:$0xff]   ;;  %v20256_v39 = vcombine.high %v32035_v33, %v32035_v33 }
 0x509   :  { %19088 = vmatprep.subr.bf16.mxu0 %v25442_v9  ;;  %v25528_v9 = vld [vmem:[%s36414_s1 + $0x3e00] ss:$8 sps:$4 sm:$0xff]  }
 0x50b   :  { %17408 = vmatpush1.bf16.msra.mxu1 %v25437_v10  ;;  %v25533_v10 = vld [vmem:[%s36414_s1 + $0x1514] ss:$8 sps:$4 sm:$0xff]  }
 0x50c   :  { %19089 = vmatpush1.bf16.msra.mxu0 %v25440_v51  ;;  %17409 = vmatprep.subr.bf16.mxu1 %v25445_v12  ;;  %v20338_v51 = vcombine.high %v32040_v45, %v32040_v45  ;;  %v25531_v12 = vld [vmem:[%s36414_s1 + $0x1510] ss:$8 sps:$4 sm:$0xff]  }
 0x50d   :  { %19090 = vmatprep.subr.bf16.mxu0 %v25448_v13  ;;  %v25534_v13 = vld [vmem:[%s36414_s1 + $0x3e10] ss:$8 sps:$4 sm:$0xff]  }
 0x50f   :  { %17410 = vmatpush1.bf16.msra.mxu1 %v25443_v14  ;;  %v25539_v14 = vld [vmem:[%s36414_s1 + $0x1524] ss:$8 sps:$4 sm:$0xff]  }
 0x510   :  { %19091 = vmatpush1.bf16.msra.mxu0 %v25446_v15  ;;  %17411 = vmatprep.subr.bf16.mxu1 %v25451_v16  ;;  %v25542_v15 = vld [vmem:[%s36414_s1 + $0x3e24] ss:$8 sps:$4 sm:$0xff]   ;;  %v25537_v16 = vld [vmem:[%s36414_s1 + $0x1520] ss:$8 sps:$4 sm:$0xff]  }
 0x511   :  { %19092 = vmatprep.subr.bf16.mxu0 %v25454_v57  ;;  %v25540_v57 = vld [vmem:[%s36414_s1 + $0x3e20] ss:$8 sps:$4 sm:$0xff]  }
 0x513   :  { %17412 = vmatpush1.bf16.msra.mxu1 %v25449_v19  ;;  %v25545_v19 = vld [vmem:[%s36414_s1 + $0x1534] ss:$8 sps:$4 sm:$0xff]  }
 0x514   :  { %19093 = vmatpush1.bf16.msra.mxu0 %v25452_v21  ;;  %17413 = vmatprep.subr.bf16.mxu1 %v25457_v22  ;;  %v25548_v21 = vld [vmem:[%s36414_s1 + $0x3e34] ss:$8 sps:$4 sm:$0xff]   ;;  %v25543_v22 = vld [vmem:[%s36414_s1 + $0x1530] ss:$8 sps:$4 sm:$0xff]  }
 0x515   :  { %19094 = vmatprep.subr.bf16.mxu0 %v25460_v23  ;;  %v25546_v23 = vld [vmem:[%s36414_s1 + $0x3e30] ss:$8 sps:$4 sm:$0xff]  }
 0x517   :  { %17414 = vmatpush1.bf16.msra.mxu1 %v25455_v26  ;;  %v25551_v26 = vld [vmem:[%s36414_s1 + $0x1544] ss:$8 sps:$4 sm:$0xff]  }
 0x518   :  { %19095 = vmatpush1.bf16.msra.mxu0 %v25458_v63  ;;  %17415 = vmatprep.subr.bf16.mxu1 %v25463_v27  ;;  %v25554_v63 = vld [vmem:[%s36414_s1 + $0x3e44] ss:$8 sps:$4 sm:$0xff]   ;;  %v25549_v27 = vld [vmem:[%s36414_s1 + $0x1540] ss:$8 sps:$4 sm:$0xff]  }
 0x519   :  { %19096 = vmatprep.subr.bf16.mxu0 %v25466_v28  ;;  %v25552_v28 = vld [vmem:[%s36414_s1 + $0x3e40] ss:$8 sps:$4 sm:$0xff]  }
 0x51b   :  { %17416 = vmatpush1.bf16.msra.mxu1 %v25461_v30  ;;  %v25557_v30 = vld [vmem:[%s36414_s1 + $0x1554] ss:$8 sps:$4 sm:$0xff]  }
 0x51c   :  { %19097 = vmatpush1.bf16.msra.mxu0 %v25464_v31  ;;  %17417 = vmatprep.subr.bf16.mxu1 %v25469_v24  ;;  %v25560_v31 = vld [vmem:[%s36414_s1 + $0x3e54] ss:$8 sps:$4 sm:$0xff]   ;;  %v25555_v24 = vld [vmem:[%s36414_s1 + $0x1550] ss:$8 sps:$4 sm:$0xff]  }
 0x51d   :  { %19098 = vmatprep.subr.bf16.mxu0 %v25472_v5  ;;  %v25558_v5 = vld [vmem:[%s36414_s1 + $0x3e50] ss:$8 sps:$4 sm:$0xff]  }
 0x51f   :  { %17418 = vmatpush1.bf16.msra.mxu1 %v25467_v34  ;;  %v25563_v34 = vld [vmem:[%s36414_s1 + $0x1564] ss:$8 sps:$4 sm:$0xff]  }
 0x520   :  { %19099 = vmatpush1.bf16.msra.mxu0 %v25470_v35  ;;  %17419 = vmatprep.subr.bf16.mxu1 %v25475_v36  ;;  %v25566_v35 = vld [vmem:[%s36414_s1 + $0x3e64] ss:$8 sps:$4 sm:$0xff]   ;;  %v25561_v36 = vld [vmem:[%s36414_s1 + $0x1560] ss:$8 sps:$4 sm:$0xff]  }
 0x521   :  { %19100 = vmatprep.subr.bf16.mxu0 %v25478_v37  ;;  %v25564_v37 = vld [vmem:[%s36414_s1 + $0x3e60] ss:$8 sps:$4 sm:$0xff]  }
 0x523   :  { %17420 = vmatpush1.bf16.msra.mxu1 %v25473_v38  ;;  %v25569_v38 = vld [vmem:[%s36414_s1 + $0x1574] ss:$8 sps:$4 sm:$0xff]  }
 0x524   :  { %19101 = vmatpush1.bf16.msra.mxu0 %v25476_v11  ;;  %17421 = vmatprep.subr.bf16.mxu1 %v25481_v40  ;;  %v25572_v11 = vld [vmem:[%s36414_s1 + $0x3e74] ss:$8 sps:$4 sm:$0xff]   ;;  %v25567_v40 = vld [vmem:[%s36414_s1 + $0x1570] ss:$8 sps:$4 sm:$0xff]  }
 0x525   :  { %19102 = vmatprep.subr.bf16.mxu0 %v25484_v41  ;;  %v25570_v41 = vld [vmem:[%s36414_s1 + $0x3e70] ss:$8 sps:$4 sm:$0xff]  }
 0x527   :  { %17422 = vmatpush1.bf16.msra.mxu1 %v25479_v42  ;;  %v25575_v42 = vld [vmem:[%s36414_s1 + $0x1584] ss:$8 sps:$4 sm:$0xff]  }
 0x528   :  { %19103 = vmatpush1.bf16.msra.mxu0 %v25482_v43  ;;  %17423 = vmatprep.subr.bf16.mxu1 %v25487_v44  ;;  %v25578_v43 = vld [vmem:[%s36414_s1 + $0x3e84] ss:$8 sps:$4 sm:$0xff]   ;;  %v25573_v44 = vld [vmem:[%s36414_s1 + $0x1580] ss:$8 sps:$4 sm:$0xff]  }
 0x529   :  { %19104 = vmatprep.subr.bf16.mxu0 %v25490_v17  ;;  %v25576_v17 = vld [vmem:[%s36414_s1 + $0x3e80] ss:$8 sps:$4 sm:$0xff]  }
 0x52b   :  { %17424 = vmatpush1.bf16.msra.mxu1 %v25485_v46  ;;  %v25581_v46 = vld [vmem:[%s36414_s1 + $0x1594] ss:$8 sps:$4 sm:$0xff]  }
 0x52c   :  { %19105 = vmatpush1.bf16.msra.mxu0 %v25488_v47  ;;  %17425 = vmatprep.subr.bf16.mxu1 %v25493_v48  ;;  %v25584_v47 = vld [vmem:[%s36414_s1 + $0x3e94] ss:$8 sps:$4 sm:$0xff]   ;;  %v25579_v48 = vld [vmem:[%s36414_s1 + $0x1590] ss:$8 sps:$4 sm:$0xff]  }
 0x52d   :  { %19106 = vmatprep.subr.bf16.mxu0 %v25496_v49  ;;  %v25582_v49 = vld [vmem:[%s36414_s1 + $0x3e90] ss:$8 sps:$4 sm:$0xff]  }
 0x52f   :  { %17426 = vmatpush1.bf16.msra.mxu1 %v25491_v50  ;;  %v25587_v50 = vld [vmem:[%s36414_s1 + $0x15a4] ss:$8 sps:$4 sm:$0xff]  }
 0x530   :  { %19107 = vmatpush1.bf16.msra.mxu0 %v25494_v18  ;;  %17427 = vmatprep.subr.bf16.mxu1 %v25499_v52  ;;  %v25590_v18 = vld [vmem:[%s36414_s1 + $0x3ea4] ss:$8 sps:$4 sm:$0xff]   ;;  %v25585_v52 = vld [vmem:[%s36414_s1 + $0x15a0] ss:$8 sps:$4 sm:$0xff]  }
 0x531   :  { %19108 = vmatprep.subr.bf16.mxu0 %v25502_v53  ;;  %v25588_v53 = vld [vmem:[%s36414_s1 + $0x3ea0] ss:$8 sps:$4 sm:$0xff]  }
 0x533   :  { %17428 = vmatpush1.bf16.msra.mxu1 %v25497_v54  ;;  %v25593_v54 = vld [vmem:[%s36414_s1 + $0x15b4] ss:$8 sps:$4 sm:$0xff]  }
 0x534   :  { %19109 = vmatpush1.bf16.msra.mxu0 %v25500_v55  ;;  %17429 = vmatprep.subr.bf16.mxu1 %v25505_v56  ;;  %v25596_v55 = vld [vmem:[%s36414_s1 + $0x3eb4] ss:$8 sps:$4 sm:$0xff]   ;;  %v25591_v56 = vld [vmem:[%s36414_s1 + $0x15b0] ss:$8 sps:$4 sm:$0xff]  }
 0x535   :  { %19110 = vmatprep.subr.bf16.mxu0 %v25508_v25  ;;  %v25594_v25 = vld [vmem:[%s36414_s1 + $0x3eb0] ss:$8 sps:$4 sm:$0xff]  }
 0x537   :  { %17430 = vmatpush1.bf16.msra.mxu1 %v25503_v58  ;;  %v25599_v58 = vld [vmem:[%s36414_s1 + $0x15c4] ss:$8 sps:$4 sm:$0xff]  }
 0x538   :  { %19111 = vmatpush1.bf16.msra.mxu0 %v25506_v59  ;;  %17431 = vmatprep.subr.bf16.mxu1 %v25511_v60  ;;  %v25602_v59 = vld [vmem:[%s36414_s1 + $0x3ec4] ss:$8 sps:$4 sm:$0xff]   ;;  %v25597_v60 = vld [vmem:[%s36414_s1 + $0x15c0] ss:$8 sps:$4 sm:$0xff]  }
 0x539   :  { %19112 = vmatprep.subr.bf16.mxu0 %v25514_v61  ;;  %v25600_v61 = vld [vmem:[%s36414_s1 + $0x3ec0] ss:$8 sps:$4 sm:$0xff]  }
 0x53b   :  { %17432 = vmatpush1.bf16.msra.mxu1 %v25509_v62  ;;  %v25605_v62 = vld [vmem:[%s36414_s1 + $0x15d4] ss:$8 sps:$4 sm:$0xff]  }
 0x53c   :  { %19113 = vmatpush1.bf16.msra.mxu0 %v25512_v20  ;;  %17433 = vmatprep.subr.bf16.mxu1 %v25517_v0  ;;  %v25608_v20 = vld [vmem:[%s36414_s1 + $0x3ed4] ss:$8 sps:$4 sm:$0xff]   ;;  %v25603_v0 = vld [vmem:[%s36414_s1 + $0x15d0] ss:$8 sps:$4 sm:$0xff]  }
 0x53d   :  { %19114 = vmatprep.subr.bf16.mxu0 %v25520_v1  ;;  %v25606_v1 = vld [vmem:[%s36414_s1 + $0x3ed0] ss:$8 sps:$4 sm:$0xff]  }
 0x53f   :  { %17434 = vmatpush1.bf16.msra.mxu1 %v25515_v2  ;;  %v25611_v2 = vld [vmem:[%s36414_s1 + $0x15e4] ss:$8 sps:$4 sm:$0xff]  }
 0x540   :  { %19115 = vmatpush1.bf16.msra.mxu0 %v25518_v3  ;;  %17444 = vmatprep.subr.bf16.mxu1 %v25525_v4  ;;  %v25614_v3 = vld [vmem:[%s36414_s1 + $0x3ee4] ss:$8 sps:$4 sm:$0xff]   ;;  %v25609_v4 = vld [vmem:[%s36414_s1 + $0x15e0] ss:$8 sps:$4 sm:$0xff]  }
 0x541   :  { %19125 = vmatprep.subr.bf16.mxu0 %v25530_v32  ;;  %v25612_v32 = vld [vmem:[%s36414_s1 + $0x3ee0] ss:$8 sps:$4 sm:$0xff]  }
 0x542   :  { %17436 = vmatmul.mubr.bf16.vlgmr.msra.gmra.mrb[0].mxu1 %v20253_v6  ;;  %v25617_v6 = vld [vmem:[%s36414_s1 + $0x15f4] ss:$8 sps:$4 sm:$0xff]  }
 0x543   :  { %19117 = vmatmul.mubr.bf16.vlgmr.msra.gmra.mrb[0].mxu0 %v20335_v7  ;;  %17445 = vmatpush1.bf16.msra.mxu1 %v25523_v8  ;;  %v25620_v7 = vld [vmem:[%s36414_s1 + $0x3ef4] ss:$8 sps:$4 sm:$0xff]   ;;  %v25615_v8 = vld [vmem:[%s36414_s1 + $0x15f0] ss:$8 sps:$4 sm:$0xff]  }
 0x544   :  { %19126 = vmatpush1.bf16.msra.mxu0 %v25528_v9  ;;  %17446 = vmatprep.subr.bf16.mxu1 %v25533_v10  ;;  %v25618_v9 = vld [vmem:[%s36414_s1 + $0x3ef0] ss:$8 sps:$4 sm:$0xff]   ;;  %v25625_v10 = vld [vmem:[%s36414_s1 + $0x1604] ss:$8 sps:$4 sm:$0xff]  }
 0x545   :  { %19127 = vmatprep.subr.bf16.mxu0 %v25536_v29  ;;  %17476 = vmatprep.mubr.bf16.mxu1 %v20256_v39  ;;  %v25630_v29 = vld [vmem:[%s36414_s1 + $0x3f04] ss:$8 sps:$4 sm:$0xff]   ;;  %v32245_v39 = vld [vmem:[%s36413_s0 + $0xb0] sm:$0xff] }
 0x546   :  { %19157 = vmatprep.mubr.bf16.mxu0 %v20338_v51  ;;  %v32250_v51 = vld [vmem:[%s36413_s0 + $0x1f8] sm:$0xff] }
 0x547   :  { %17447 = vmatpush1.bf16.msra.mxu1 %v25531_v12  ;;  %v20255_v12 = vcombine.low %v32035_v33, %v32035_v33  ;;  %v25636_v33 = vld [vmem:[%s36414_s1 + $0x3f14] ss:$8 sps:$4 sm:$0xff]  }
 0x548   :  { %19128 = vmatpush1.bf16.msra.mxu0 %v25534_v13  ;;  %17448 = vmatprep.subr.bf16.mxu1 %v25539_v14  ;;  %v20337_v13 = vcombine.low %v32040_v45, %v32040_v45  ;;  %v25623_v14 = vld [vmem:[%s36414_s1 + $0x1600] ss:$8 sps:$4 sm:$0xff]   ;;  %v20258_v45 = vcombine.high %v32245_v39, %v32245_v39 }
 0x549   :  { %19129 = vmatprep.subr.bf16.mxu0 %v25542_v15  ;;  %v25628_v15 = vld [vmem:[%s36414_s1 + $0x3f00] ss:$8 sps:$4 sm:$0xff]  }
 0x54b   :  { %17449 = vmatpush1.bf16.msra.mxu1 %v25537_v16  ;;  %v25633_v16 = vld [vmem:[%s36414_s1 + $0x1614] ss:$8 sps:$4 sm:$0xff]  }
 0x54c   :  { %19130 = vmatpush1.bf16.msra.mxu0 %v25540_v57  ;;  %17450 = vmatprep.subr.bf16.mxu1 %v25545_v19  ;;  %v20340_v57 = vcombine.high %v32250_v51, %v32250_v51 }
 0x54d   :  { %19131 = vmatprep.subr.bf16.mxu0 %v25548_v21 }
 0x54f   :  { %17451 = vmatpush1.bf16.msra.mxu1 %v25543_v22 }
 0x550   :  { %19132 = vmatpush1.bf16.msra.mxu0 %v25546_v23  ;;  %17452 = vmatprep.subr.bf16.mxu1 %v25551_v26 }
 0x551   :  { %19133 = vmatprep.subr.bf16.mxu0 %v25554_v63 }
 0x553   :  { %17453 = vmatpush1.bf16.msra.mxu1 %v25549_v27 }
 0x554   :  { %19134 = vmatpush1.bf16.msra.mxu0 %v25552_v28  ;;  %17454 = vmatprep.subr.bf16.mxu1 %v25557_v30 }
 0x555   :  { %19135 = vmatprep.subr.bf16.mxu0 %v25560_v31 }
 0x557   :  { %17455 = vmatpush1.bf16.msra.mxu1 %v25555_v24 }
 0x558   :  { %19136 = vmatpush1.bf16.msra.mxu0 %v25558_v5  ;;  %17456 = vmatprep.subr.bf16.mxu1 %v25563_v34 }
 0x559   :  { %19137 = vmatprep.subr.bf16.mxu0 %v25566_v35 }
 0x55b   :  { %17457 = vmatpush1.bf16.msra.mxu1 %v25561_v36 }
 0x55c   :  { %19138 = vmatpush1.bf16.msra.mxu0 %v25564_v37  ;;  %17458 = vmatprep.subr.bf16.mxu1 %v25569_v38 }
 0x55d   :  { %19139 = vmatprep.subr.bf16.mxu0 %v25572_v11 }
 0x55f   :  { %17459 = vmatpush1.bf16.msra.mxu1 %v25567_v40 }
 0x560   :  { %19140 = vmatpush1.bf16.msra.mxu0 %v25570_v41  ;;  %17460 = vmatprep.subr.bf16.mxu1 %v25575_v42 }
 0x561   :  { %19141 = vmatprep.subr.bf16.mxu0 %v25578_v43 }
 0x563   :  { %17461 = vmatpush1.bf16.msra.mxu1 %v25573_v44 }
 0x564   :  { %19142 = vmatpush1.bf16.msra.mxu0 %v25576_v17  ;;  %17462 = vmatprep.subr.bf16.mxu1 %v25581_v46 }
 0x565   :  { %19143 = vmatprep.subr.bf16.mxu0 %v25584_v47 }
 0x567   :  { %17463 = vmatpush1.bf16.msra.mxu1 %v25579_v48 }
 0x568   :  { %19144 = vmatpush1.bf16.msra.mxu0 %v25582_v49  ;;  %17464 = vmatprep.subr.bf16.mxu1 %v25587_v50 }
 0x569   :  { %19145 = vmatprep.subr.bf16.mxu0 %v25590_v18 }
 0x56b   :  { %17465 = vmatpush1.bf16.msra.mxu1 %v25585_v52 }
 0x56c   :  { %19146 = vmatpush1.bf16.msra.mxu0 %v25588_v53  ;;  %17466 = vmatprep.subr.bf16.mxu1 %v25593_v54 }
 0x56d   :  { %19147 = vmatprep.subr.bf16.mxu0 %v25596_v55 }
 0x56f   :  { %17467 = vmatpush1.bf16.msra.mxu1 %v25591_v56 }
 0x570   :  { %19148 = vmatpush1.bf16.msra.mxu0 %v25594_v25  ;;  %17468 = vmatprep.subr.bf16.mxu1 %v25599_v58 }
 0x571   :  { %19149 = vmatprep.subr.bf16.mxu0 %v25602_v59 }
 0x573   :  { %17469 = vmatpush1.bf16.msra.mxu1 %v25597_v60 }
 0x574   :  { %19150 = vmatpush1.bf16.msra.mxu0 %v25600_v61  ;;  %17470 = vmatprep.subr.bf16.mxu1 %v25605_v62 }
 0x575   :  { %19151 = vmatprep.subr.bf16.mxu0 %v25608_v20 }
 0x577   :  { %17471 = vmatpush1.bf16.msra.mxu1 %v25603_v0 }
 0x578   :  { %19152 = vmatpush1.bf16.msra.mxu0 %v25606_v1  ;;  %17472 = vmatprep.subr.bf16.mxu1 %v25611_v2 }
 0x579   :  { %19153 = vmatprep.subr.bf16.mxu0 %v25614_v3 }
 0x57b   :  { %17473 = vmatpush1.bf16.msra.mxu1 %v25609_v4 }
 0x57c   :  { %19154 = vmatpush1.bf16.msra.mxu0 %v25612_v32  ;;  %17474 = vmatprep.subr.bf16.mxu1 %v25617_v6 }
 0x57d   :  { %19155 = vmatprep.subr.bf16.mxu0 %v25620_v7 }
 0x57f   :  { %17475 = vmatpush1.bf16.msra.mxu1 %v25615_v8 }
 0x580   :  { %19156 = vmatpush1.bf16.msra.mxu0 %v25618_v9  ;;  %17485 = vmatprep.subr.bf16.mxu1 %v25625_v10 }
 0x581   :  { %19166 = vmatprep.subr.bf16.mxu0 %v25630_v29 }
 0x582   :  { %17477 = vmatmul.mubr.bf16.vlgmr.msra.gmra.mrb[0].mxu1 %v20255_v12 }
 0x583   :  { %19158 = vmatmul.mubr.bf16.vlgmr.msra.gmra.mrb[0].mxu0 %v20337_v13 }
 0x584   :  { %12 = vsyncpa [#allocation3], 0  ;;  %17486 = vmatpush1.bf16.msra.mxu1 %v25623_v14  ;;  %19167 = vmatpush1.bf16.msra.mxu0 %v25628_v15  ;;  %v25631_v19 = vld [vmem:[%s36414_s1 + $0x1610] ss:$8 sps:$4 sm:$0xff]   ;;  %v25639_v22 = vld [vmem:[%s36414_s1 + $0x1624] ss:$8 sps:$4 sm:$0xff]  }
 0x585   :  { %v25634_v21 = vld [vmem:[%s36414_s1 + $0x3f10] ss:$8 sps:$4 sm:$0xff]   ;;  %17487 = vmatprep.subr.bf16.mxu1 %v25633_v16  ;;  %19168 = vmatprep.subr.bf16.mxu0 %v25636_v33  ;;  %v25642_v23 = vld [vmem:[%s36414_s1 + $0x3f24] ss:$8 sps:$4 sm:$0xff]   ;;  %v25637_v26 = vld [vmem:[%s36414_s1 + $0x1620] ss:$8 sps:$4 sm:$0xff]  }
 0x586   :  { %17517 = vmatprep.mubr.bf16.mxu1 %v20258_v45  ;;  %19198 = vmatprep.mubr.bf16.mxu0 %v20340_v57  ;;  %v25640_v63 = vld [vmem:[%s36414_s1 + $0x3f20] ss:$8 sps:$4 sm:$0xff]   ;;  %v25645_v27 = vld [vmem:[%s36414_s1 + $0x1634] ss:$8 sps:$4 sm:$0xff]   ;;  %v25643_v30 = vld [vmem:[%s36414_s1 + $0x1630] ss:$8 sps:$4 sm:$0xff]   ;;  %v20257_v45 = vcombine.low %v32245_v39, %v32245_v39  ;;  %v20339_v57 = vcombine.low %v32250_v51, %v32250_v51 }
 0x587   :  { %v25648_v28 = vld [vmem:[%s36414_s1 + $0x3f34] ss:$8 sps:$4 sm:$0xff]   ;;  %v25646_v31 = vld [vmem:[%s36414_s1 + $0x3f30] ss:$8 sps:$4 sm:$0xff]   ;;  %v25651_v24 = vld [vmem:[%s36414_s1 + $0x1644] ss:$8 sps:$4 sm:$0xff]  }
 0x588   :  { %17488 = vmatpush1.bf16.msra.mxu1 %v25631_v19  ;;  %19169 = vmatpush1.bf16.msra.mxu0 %v25634_v21  ;;  %v25654_v5 = vld [vmem:[%s36414_s1 + $0x3f44] ss:$8 sps:$4 sm:$0xff]   ;;  %v25649_v34 = vld [vmem:[%s36414_s1 + $0x1640] ss:$8 sps:$4 sm:$0xff]   ;;  %v25657_v36 = vld [vmem:[%s36414_s1 + $0x1654] ss:$8 sps:$4 sm:$0xff]  }
 0x589   :  { %17489 = vmatprep.subr.bf16.mxu1 %v25639_v22  ;;  %19170 = vmatprep.subr.bf16.mxu0 %v25642_v23  ;;  %v25652_v35 = vld [vmem:[%s36414_s1 + $0x3f40] ss:$8 sps:$4 sm:$0xff]   ;;  %v25660_v37 = vld [vmem:[%s36414_s1 + $0x3f54] ss:$8 sps:$4 sm:$0xff]   ;;  %v25655_v38 = vld [vmem:[%s36414_s1 + $0x1650] ss:$8 sps:$4 sm:$0xff]  }
 0x58a   :  { %v25658_v11 = vld [vmem:[%s36414_s1 + $0x3f50] ss:$8 sps:$4 sm:$0xff]   ;;  %v25663_v40 = vld [vmem:[%s36414_s1 + $0x1664] ss:$8 sps:$4 sm:$0xff]   ;;  %v25661_v42 = vld [vmem:[%s36414_s1 + $0x1660] ss:$8 sps:$4 sm:$0xff]  }
 0x58b   :  { %v25666_v41 = vld [vmem:[%s36414_s1 + $0x3f64] ss:$8 sps:$4 sm:$0xff]   ;;  %v25664_v43 = vld [vmem:[%s36414_s1 + $0x3f60] ss:$8 sps:$4 sm:$0xff]   ;;  %v25669_v44 = vld [vmem:[%s36414_s1 + $0x1674] ss:$8 sps:$4 sm:$0xff]  }
 0x58c   :  { %17490 = vmatpush1.bf16.msra.mxu1 %v25637_v26  ;;  %19171 = vmatpush1.bf16.msra.mxu0 %v25640_v63  ;;  %v25672_v17 = vld [vmem:[%s36414_s1 + $0x3f74] ss:$8 sps:$4 sm:$0xff]   ;;  %v25667_v46 = vld [vmem:[%s36414_s1 + $0x1670] ss:$8 sps:$4 sm:$0xff]   ;;  %v25675_v48 = vld [vmem:[%s36414_s1 + $0x1684] ss:$8 sps:$4 sm:$0xff]  }
 0x58d   :  { %17491 = vmatprep.subr.bf16.mxu1 %v25645_v27  ;;  %19172 = vmatprep.subr.bf16.mxu0 %v25648_v28  ;;  %v25670_v47 = vld [vmem:[%s36414_s1 + $0x3f70] ss:$8 sps:$4 sm:$0xff]   ;;  %v25678_v49 = vld [vmem:[%s36414_s1 + $0x3f84] ss:$8 sps:$4 sm:$0xff]   ;;  %v25673_v50 = vld [vmem:[%s36414_s1 + $0x1680] ss:$8 sps:$4 sm:$0xff]  }
 0x58e   :  { %v25676_v18 = vld [vmem:[%s36414_s1 + $0x3f80] ss:$8 sps:$4 sm:$0xff]   ;;  %v25681_v52 = vld [vmem:[%s36414_s1 + $0x1694] ss:$8 sps:$4 sm:$0xff]   ;;  %v25679_v54 = vld [vmem:[%s36414_s1 + $0x1690] ss:$8 sps:$4 sm:$0xff]  }
 0x58f   :  { %v25684_v53 = vld [vmem:[%s36414_s1 + $0x3f94] ss:$8 sps:$4 sm:$0xff]   ;;  %v25682_v55 = vld [vmem:[%s36414_s1 + $0x3f90] ss:$8 sps:$4 sm:$0xff]   ;;  %v25687_v56 = vld [vmem:[%s36414_s1 + $0x16a4] ss:$8 sps:$4 sm:$0xff]  }
 0x590   :  { %17492 = vmatpush1.bf16.msra.mxu1 %v25643_v30  ;;  %19173 = vmatpush1.bf16.msra.mxu0 %v25646_v31  ;;  %v25690_v25 = vld [vmem:[%s36414_s1 + $0x3fa4] ss:$8 sps:$4 sm:$0xff]   ;;  %v25685_v58 = vld [vmem:[%s36414_s1 + $0x16a0] ss:$8 sps:$4 sm:$0xff]   ;;  %v25693_v60 = vld [vmem:[%s36414_s1 + $0x16b4] ss:$8 sps:$4 sm:$0xff]  }
 0x591   :  { %17493 = vmatprep.subr.bf16.mxu1 %v25651_v24  ;;  %19174 = vmatprep.subr.bf16.mxu0 %v25654_v5  ;;  %v25688_v59 = vld [vmem:[%s36414_s1 + $0x3fa0] ss:$8 sps:$4 sm:$0xff]   ;;  %v25696_v61 = vld [vmem:[%s36414_s1 + $0x3fb4] ss:$8 sps:$4 sm:$0xff]   ;;  %v25691_v62 = vld [vmem:[%s36414_s1 + $0x16b0] ss:$8 sps:$4 sm:$0xff]  }
 0x592   :  { %v25694_v20 = vld [vmem:[%s36414_s1 + $0x3fb0] ss:$8 sps:$4 sm:$0xff]   ;;  %v25699_v0 = vld [vmem:[%s36414_s1 + $0x16c4] ss:$8 sps:$4 sm:$0xff]   ;;  %v25697_v2 = vld [vmem:[%s36414_s1 + $0x16c0] ss:$8 sps:$4 sm:$0xff]  }
 0x593   :  { %v25702_v1 = vld [vmem:[%s36414_s1 + $0x3fc4] ss:$8 sps:$4 sm:$0xff]   ;;  %v25700_v3 = vld [vmem:[%s36414_s1 + $0x3fc0] ss:$8 sps:$4 sm:$0xff]   ;;  %v25705_v4 = vld [vmem:[%s36414_s1 + $0x16d4] ss:$8 sps:$4 sm:$0xff]  }
 0x594   :  { %17494 = vmatpush1.bf16.msra.mxu1 %v25649_v34  ;;  %19175 = vmatpush1.bf16.msra.mxu0 %v25652_v35  ;;  %v25708_v32 = vld [vmem:[%s36414_s1 + $0x3fd4] ss:$8 sps:$4 sm:$0xff]   ;;  %v25703_v6 = vld [vmem:[%s36414_s1 + $0x16d0] ss:$8 sps:$4 sm:$0xff]   ;;  %v25711_v8 = vld [vmem:[%s36414_s1 + $0x16e4] ss:$8 sps:$4 sm:$0xff]  }
 0x595   :  { %17495 = vmatprep.subr.bf16.mxu1 %v25657_v36  ;;  %19176 = vmatprep.subr.bf16.mxu0 %v25660_v37  ;;  %v25706_v7 = vld [vmem:[%s36414_s1 + $0x3fd0] ss:$8 sps:$4 sm:$0xff]   ;;  %v25714_v9 = vld [vmem:[%s36414_s1 + $0x3fe4] ss:$8 sps:$4 sm:$0xff]   ;;  %v25709_v10 = vld [vmem:[%s36414_s1 + $0x16e0] ss:$8 sps:$4 sm:$0xff]  }
 0x596   :  { %v25712_v29 = vld [vmem:[%s36414_s1 + $0x3fe0] ss:$8 sps:$4 sm:$0xff]   ;;  %v25717_v12 = vld [vmem:[%s36414_s1 + $0x16f4] ss:$8 sps:$4 sm:$0xff]   ;;  %v25715_v14 = vld [vmem:[%s36414_s1 + $0x16f0] ss:$8 sps:$4 sm:$0xff]  }
 0x597   :  { %v25720_v13 = vld [vmem:[%s36414_s1 + $0x3ff4] ss:$8 sps:$4 sm:$0xff]   ;;  %v25718_v15 = vld [vmem:[%s36414_s1 + $0x3ff0] ss:$8 sps:$4 sm:$0xff]   ;;  %v25725_v16 = vld [vmem:[%s36414_s1 + $0x1704] ss:$8 sps:$4 sm:$0xff]  }
 0x598   :  { %17496 = vmatpush1.bf16.msra.mxu1 %v25655_v38  ;;  %19177 = vmatpush1.bf16.msra.mxu0 %v25658_v11  ;;  %v25730_v33 = vld [vmem:[%s36414_s1 + $0x4004] ss:$8 sps:$4 sm:$0xff]   ;;  %v32459_v19 = vld [vmem:[%s36413_s0 + $0xb8] sm:$0xff]  ;;  %v25723_v22 = vld [vmem:[%s36414_s1 + $0x1700] ss:$8 sps:$4 sm:$0xff]   ;;  %vm16579_vm0 = vcmask 392192  }
 0x599   :  { %17497 = vmatprep.subr.bf16.mxu1 %v25663_v40  ;;  %19178 = vmatprep.subr.bf16.mxu0 %v25666_v41  ;;  %v32464_v21 = vld [vmem:[%s36413_s0 + $0x200] sm:$0xff]  ;;  %v25733_v51 = vld [vmem:[%s36414_s1 + $0x1714] ss:$8 sps:$4 sm:$0xff]   ;;  %v20260_v26 = vcombine.high %v32459_v19, %v32459_v19  ;;  %v25731_v27 = vld [vmem:[%s36414_s1 + $0x1710] ss:$8 sps:$4 sm:$0xff]   ;;  %vm20018_vm1 = vcmask 1045504  }
 0x59a   :  { %v25728_v39 = vld [vmem:[%s36414_s1 + $0x4000] ss:$8 sps:$4 sm:$0xff]   ;;  %v25736_v23 = vld [vmem:[%s36414_s1 + $0x4014] ss:$8 sps:$4 sm:$0xff]   ;;  %v20342_v63 = vcombine.high %v32464_v21, %v32464_v21  ;;  %v25734_v28 = vld [vmem:[%s36414_s1 + $0x4010] ss:$8 sps:$4 sm:$0xff]  }
 0x59b   :  { %v25739_v30 = vld [vmem:[%s36414_s1 + $0x1724] ss:$8 sps:$4 sm:$0xff]   ;;  %v25737_v24 = vld [vmem:[%s36414_s1 + $0x1720] ss:$8 sps:$4 sm:$0xff]   ;;  %v25745_v34 = vld [vmem:[%s36414_s1 + $0x1734] ss:$8 sps:$4 sm:$0xff]  }
 0x59c   :  { %17498 = vmatpush1.bf16.msra.mxu1 %v25661_v42  ;;  %19179 = vmatpush1.bf16.msra.mxu0 %v25664_v43  ;;  %v25742_v31 = vld [vmem:[%s36414_s1 + $0x4024] ss:$8 sps:$4 sm:$0xff]   ;;  %v25740_v5 = vld [vmem:[%s36414_s1 + $0x4020] ss:$8 sps:$4 sm:$0xff]   ;;  %v25748_v35 = vld [vmem:[%s36414_s1 + $0x4034] ss:$8 sps:$4 sm:$0xff]  }
 0x59d   :  { %17499 = vmatprep.subr.bf16.mxu1 %v25669_v44  ;;  %19180 = vmatprep.subr.bf16.mxu0 %v25672_v17  ;;  %v25743_v36 = vld [vmem:[%s36414_s1 + $0x1730] ss:$8 sps:$4 sm:$0xff]   ;;  %v25751_v38 = vld [vmem:[%s36414_s1 + $0x1744] ss:$8 sps:$4 sm:$0xff]   ;;  %v25749_v40 = vld [vmem:[%s36414_s1 + $0x1740] ss:$8 sps:$4 sm:$0xff]  }
 0x59e   :  { %v25746_v37 = vld [vmem:[%s36414_s1 + $0x4030] ss:$8 sps:$4 sm:$0xff]   ;;  %v25754_v11 = vld [vmem:[%s36414_s1 + $0x4044] ss:$8 sps:$4 sm:$0xff]   ;;  %v25752_v41 = vld [vmem:[%s36414_s1 + $0x4040] ss:$8 sps:$4 sm:$0xff]  }
 0x59f   :  { %v25757_v42 = vld [vmem:[%s36414_s1 + $0x1754] ss:$8 sps:$4 sm:$0xff]   ;;  %v25755_v44 = vld [vmem:[%s36414_s1 + $0x1750] ss:$8 sps:$4 sm:$0xff]   ;;  %vm20014_vm2 = vcmask 179200   ;;  %vm20111_vm3 = vcmask 1041408  }
 0x5a0   :  { %17500 = vmatpush1.bf16.msra.mxu1 %v25667_v46  ;;  %19181 = vmatpush1.bf16.msra.mxu0 %v25670_v47  ;;  %v25760_v43 = vld [vmem:[%s36414_s1 + $0x4054] ss:$8 sps:$4 sm:$0xff]   ;;  %v25758_v17 = vld [vmem:[%s36414_s1 + $0x4050] ss:$8 sps:$4 sm:$0xff]   ;;  %v25763_v46 = vld [vmem:[%s36414_s1 + $0x1764] ss:$8 sps:$4 sm:$0xff]  }
 0x5a1   :  { %17501 = vmatprep.subr.bf16.mxu1 %v25675_v48  ;;  %19182 = vmatprep.subr.bf16.mxu0 %v25678_v49  ;;  %v25766_v47 = vld [vmem:[%s36414_s1 + $0x4064] ss:$8 sps:$4 sm:$0xff]   ;;  %v25761_v48 = vld [vmem:[%s36414_s1 + $0x1760] ss:$8 sps:$4 sm:$0xff]   ;;  %vm27590_vm4 = vmmov 0   ;;  %vm20107_vm5 = vcmask 408576  }
 0x5a2   :  { %v25764_v49 = vld [vmem:[%s36414_s1 + $0x4060] ss:$8 sps:$4 sm:$0xff]   ;;  %vm20185_vm6 = vcmask 130048  }
 0x5a4   :  { %17502 = vmatpush1.bf16.msra.mxu1 %v25673_v50  ;;  %19183 = vmatpush1.bf16.msra.mxu0 %v25676_v18  ;;  %v25769_v50 = vld [vmem:[%s36414_s1 + $0x1774] ss:$8 sps:$4 sm:$0xff]  }
 0x5a5   :  { %17503 = vmatprep.subr.bf16.mxu1 %v25681_v52  ;;  %19184 = vmatprep.subr.bf16.mxu0 %v25684_v53  ;;  %v25772_v18 = vld [vmem:[%s36414_s1 + $0x4074] ss:$8 sps:$4 sm:$0xff]   ;;  %v25767_v52 = vld [vmem:[%s36414_s1 + $0x1770] ss:$8 sps:$4 sm:$0xff]  }
 0x5a6   :  { %v25770_v53 = vld [vmem:[%s36414_s1 + $0x4070] ss:$8 sps:$4 sm:$0xff]  }
 0x5a8   :  { %17504 = vmatpush1.bf16.msra.mxu1 %v25679_v54  ;;  %19185 = vmatpush1.bf16.msra.mxu0 %v25682_v55  ;;  %v25775_v54 = vld [vmem:[%s36414_s1 + $0x1784] ss:$8 sps:$4 sm:$0xff]  }
 0x5a9   :  { %17505 = vmatprep.subr.bf16.mxu1 %v25687_v56  ;;  %19186 = vmatprep.subr.bf16.mxu0 %v25690_v25  ;;  %v25778_v55 = vld [vmem:[%s36414_s1 + $0x4084] ss:$8 sps:$4 sm:$0xff]   ;;  %v25773_v56 = vld [vmem:[%s36414_s1 + $0x1780] ss:$8 sps:$4 sm:$0xff]  }
 0x5aa   :  { %v25776_v25 = vld [vmem:[%s36414_s1 + $0x4080] ss:$8 sps:$4 sm:$0xff]  }
 0x5ac   :  { %17506 = vmatpush1.bf16.msra.mxu1 %v25685_v58  ;;  %19187 = vmatpush1.bf16.msra.mxu0 %v25688_v59  ;;  %v25781_v58 = vld [vmem:[%s36414_s1 + $0x1794] ss:$8 sps:$4 sm:$0xff]  }
 0x5ad   :  { %17507 = vmatprep.subr.bf16.mxu1 %v25693_v60  ;;  %19188 = vmatprep.subr.bf16.mxu0 %v25696_v61  ;;  %v25784_v59 = vld [vmem:[%s36414_s1 + $0x4094] ss:$8 sps:$4 sm:$0xff]   ;;  %v25779_v60 = vld [vmem:[%s36414_s1 + $0x1790] ss:$8 sps:$4 sm:$0xff]  }
 0x5ae   :  { %v25782_v61 = vld [vmem:[%s36414_s1 + $0x4090] ss:$8 sps:$4 sm:$0xff]  }
 0x5b0   :  { %17508 = vmatpush1.bf16.msra.mxu1 %v25691_v62  ;;  %19189 = vmatpush1.bf16.msra.mxu0 %v25694_v20  ;;  %v25787_v62 = vld [vmem:[%s36414_s1 + $0x17a4] ss:$8 sps:$4 sm:$0xff]  }
 0x5b1   :  { %17509 = vmatprep.subr.bf16.mxu1 %v25699_v0  ;;  %19190 = vmatprep.subr.bf16.mxu0 %v25702_v1  ;;  %v25790_v20 = vld [vmem:[%s36414_s1 + $0x40a4] ss:$8 sps:$4 sm:$0xff]   ;;  %v25785_v0 = vld [vmem:[%s36414_s1 + $0x17a0] ss:$8 sps:$4 sm:$0xff]  }
 0x5b2   :  { %v25788_v1 = vld [vmem:[%s36414_s1 + $0x40a0] ss:$8 sps:$4 sm:$0xff]  }
 0x5b4   :  { %17510 = vmatpush1.bf16.msra.mxu1 %v25697_v2  ;;  %19191 = vmatpush1.bf16.msra.mxu0 %v25700_v3  ;;  %v25793_v2 = vld [vmem:[%s36414_s1 + $0x17b4] ss:$8 sps:$4 sm:$0xff]  }
 0x5b5   :  { %17511 = vmatprep.subr.bf16.mxu1 %v25705_v4  ;;  %19192 = vmatprep.subr.bf16.mxu0 %v25708_v32  ;;  %v25796_v3 = vld [vmem:[%s36414_s1 + $0x40b4] ss:$8 sps:$4 sm:$0xff]   ;;  %v25791_v4 = vld [vmem:[%s36414_s1 + $0x17b0] ss:$8 sps:$4 sm:$0xff]  }
 0x5b6   :  { %v25794_v32 = vld [vmem:[%s36414_s1 + $0x40b0] ss:$8 sps:$4 sm:$0xff]  }
 0x5b8   :  { %17512 = vmatpush1.bf16.msra.mxu1 %v25703_v6  ;;  %19193 = vmatpush1.bf16.msra.mxu0 %v25706_v7  ;;  %v25799_v6 = vld [vmem:[%s36414_s1 + $0x17c4] ss:$8 sps:$4 sm:$0xff]  }
 0x5b9   :  { %17513 = vmatprep.subr.bf16.mxu1 %v25711_v8  ;;  %19194 = vmatprep.subr.bf16.mxu0 %v25714_v9  ;;  %v25802_v7 = vld [vmem:[%s36414_s1 + $0x40c4] ss:$8 sps:$4 sm:$0xff]   ;;  %v25797_v8 = vld [vmem:[%s36414_s1 + $0x17c0] ss:$8 sps:$4 sm:$0xff]  }
 0x5ba   :  { %v25800_v9 = vld [vmem:[%s36414_s1 + $0x40c0] ss:$8 sps:$4 sm:$0xff]  }
 0x5bc   :  { %17514 = vmatpush1.bf16.msra.mxu1 %v25709_v10  ;;  %19195 = vmatpush1.bf16.msra.mxu0 %v25712_v29  ;;  %v25805_v10 = vld [vmem:[%s36414_s1 + $0x17d4] ss:$8 sps:$4 sm:$0xff]  }
 0x5bd   :  { %17515 = vmatprep.subr.bf16.mxu1 %v25717_v12  ;;  %19196 = vmatprep.subr.bf16.mxu0 %v25720_v13  ;;  %v25808_v29 = vld [vmem:[%s36414_s1 + $0x40d4] ss:$8 sps:$4 sm:$0xff]   ;;  %v25803_v12 = vld [vmem:[%s36414_s1 + $0x17d0] ss:$8 sps:$4 sm:$0xff]  }
 0x5be   :  { %v25806_v13 = vld [vmem:[%s36414_s1 + $0x40d0] ss:$8 sps:$4 sm:$0xff]  }
 0x5c0   :  { %17516 = vmatpush1.bf16.msra.mxu1 %v25715_v14  ;;  %19197 = vmatpush1.bf16.msra.mxu0 %v25718_v15  ;;  %v25811_v14 = vld [vmem:[%s36414_s1 + $0x17e4] ss:$8 sps:$4 sm:$0xff]  }
 0x5c1   :  { %17526 = vmatprep.subr.bf16.mxu1 %v25725_v16  ;;  %19207 = vmatprep.subr.bf16.mxu0 %v25730_v33  ;;  %v25814_v15 = vld [vmem:[%s36414_s1 + $0x40e4] ss:$8 sps:$4 sm:$0xff]   ;;  %v25809_v16 = vld [vmem:[%s36414_s1 + $0x17e0] ss:$8 sps:$4 sm:$0xff]  }
 0x5c2   :  { %v25812_v33 = vld [vmem:[%s36414_s1 + $0x40e0] ss:$8 sps:$4 sm:$0xff]  }
 0x5c3   :  { %17518 = vmatmul.mubr.bf16.vlgmr.msra.gmra.mrb[0].mxu1 %v20257_v45  ;;  %19199 = vmatmul.mubr.bf16.vlgmr.msra.gmra.mrb[0].mxu0 %v20339_v57  ;;  %v25817_v45 = vld [vmem:[%s36414_s1 + $0x17f4] ss:$8 sps:$4 sm:$0xff]  }
 0x5c4   :  { %17527 = vmatpush1.bf16.msra.mxu1 %v25723_v22  ;;  %19208 = vmatpush1.bf16.msra.mxu0 %v25728_v39  ;;  %v25820_v57 = vld [vmem:[%s36414_s1 + $0x40f4] ss:$8 sps:$4 sm:$0xff]   ;;  %v25815_v22 = vld [vmem:[%s36414_s1 + $0x17f0] ss:$8 sps:$4 sm:$0xff]  }
 0x5c5   :  { %17528 = vmatprep.subr.bf16.mxu1 %v25733_v51  ;;  %19209 = vmatprep.subr.bf16.mxu0 %v25736_v23  ;;  %v25818_v39 = vld [vmem:[%s36414_s1 + $0x40f0] ss:$8 sps:$4 sm:$0xff]   ;;  %v25825_v51 = vld [vmem:[%s36414_s1 + $0x1804] ss:$8 sps:$4 sm:$0xff]  }
 0x5c6   :  { %17558 = vmatprep.mubr.bf16.mxu1 %v20260_v26  ;;  %19239 = vmatprep.mubr.bf16.mxu0 %v20342_v63  ;;  %v25830_v23 = vld [vmem:[%s36414_s1 + $0x4104] ss:$8 sps:$4 sm:$0xff]   ;;  %v20259_v26 = vcombine.low %v32459_v19, %v32459_v19  ;;  %v20341_v63 = vcombine.low %v32464_v21, %v32464_v21  ;;  %v25828_v19 = vld [vmem:[%s36414_s1 + $0x4100] ss:$8 sps:$4 sm:$0xff]   ;;  %v25833_v21 = vld [vmem:[%s36414_s1 + $0x1814] ss:$8 sps:$4 sm:$0xff]  }
 0x5c8   :  { %17529 = vmatpush1.bf16.msra.mxu1 %v25731_v27  ;;  %19210 = vmatpush1.bf16.msra.mxu0 %v25734_v28  ;;  %v32669_v27 = vld [vmem:[%s36413_s0 + $0xc0] sm:$0xff]  ;;  %v32674_v28 = vld [vmem:[%s36413_s0 + $0x208] sm:$0xff] }
 0x5c9   :  { %17530 = vmatprep.subr.bf16.mxu1 %v25739_v30  ;;  %19211 = vmatprep.subr.bf16.mxu0 %v25742_v31  ;;  %v25823_v30 = vld [vmem:[%s36414_s1 + $0x1800] ss:$8 sps:$4 sm:$0xff]   ;;  %v25836_v31 = vld [vmem:[%s36414_s1 + $0x4114] ss:$8 sps:$4 sm:$0xff]  }
 0x5cc   :  { %17531 = vmatpush1.bf16.msra.mxu1 %v25737_v24  ;;  %19212 = vmatpush1.bf16.msra.mxu0 %v25740_v5  ;;  %v20262_v24 = vcombine.high %v32669_v27, %v32669_v27  ;;  %v20344_v5 = vcombine.high %v32674_v28, %v32674_v28 }
 0x5cd   :  { %17532 = vmatprep.subr.bf16.mxu1 %v25745_v34  ;;  %19213 = vmatprep.subr.bf16.mxu0 %v25748_v35  ;;  %v25831_v34 = vld [vmem:[%s36414_s1 + $0x1810] ss:$8 sps:$4 sm:$0xff]  }
 0x5ce   :  { %v25834_v35 = vld [vmem:[%s36414_s1 + $0x4110] ss:$8 sps:$4 sm:$0xff]  }
 0x5d0   :  { %17533 = vmatpush1.bf16.msra.mxu1 %v25743_v36  ;;  %19214 = vmatpush1.bf16.msra.mxu0 %v25746_v37  ;;  %v25839_v36 = vld [vmem:[%s36414_s1 + $0x1824] ss:$8 sps:$4 sm:$0xff]  }
 0x5d1   :  { %17534 = vmatprep.subr.bf16.mxu1 %v25751_v38  ;;  %19215 = vmatprep.subr.bf16.mxu0 %v25754_v11  ;;  %v25842_v37 = vld [vmem:[%s36414_s1 + $0x4124] ss:$8 sps:$4 sm:$0xff]   ;;  %v25837_v38 = vld [vmem:[%s36414_s1 + $0x1820] ss:$8 sps:$4 sm:$0xff]  }
 0x5d2   :  { %v25840_v11 = vld [vmem:[%s36414_s1 + $0x4120] ss:$8 sps:$4 sm:$0xff]  }
 0x5d4   :  { %17535 = vmatpush1.bf16.msra.mxu1 %v25749_v40  ;;  %19216 = vmatpush1.bf16.msra.mxu0 %v25752_v41  ;;  %v25845_v40 = vld [vmem:[%s36414_s1 + $0x1834] ss:$8 sps:$4 sm:$0xff]  }
 0x5d5   :  { %17536 = vmatprep.subr.bf16.mxu1 %v25757_v42  ;;  %19217 = vmatprep.subr.bf16.mxu0 %v25760_v43  ;;  %v25848_v41 = vld [vmem:[%s36414_s1 + $0x4134] ss:$8 sps:$4 sm:$0xff]   ;;  %v25843_v42 = vld [vmem:[%s36414_s1 + $0x1830] ss:$8 sps:$4 sm:$0xff]  }
 0x5d6   :  { %v25846_v43 = vld [vmem:[%s36414_s1 + $0x4130] ss:$8 sps:$4 sm:$0xff]  }
 0x5d8   :  { %17537 = vmatpush1.bf16.msra.mxu1 %v25755_v44  ;;  %19218 = vmatpush1.bf16.msra.mxu0 %v25758_v17  ;;  %v25851_v44 = vld [vmem:[%s36414_s1 + $0x1844] ss:$8 sps:$4 sm:$0xff]  }
 0x5d9   :  { %17538 = vmatprep.subr.bf16.mxu1 %v25763_v46  ;;  %19219 = vmatprep.subr.bf16.mxu0 %v25766_v47  ;;  %v25854_v17 = vld [vmem:[%s36414_s1 + $0x4144] ss:$8 sps:$4 sm:$0xff]   ;;  %v25849_v46 = vld [vmem:[%s36414_s1 + $0x1840] ss:$8 sps:$4 sm:$0xff]  }
 0x5da   :  { %v25852_v47 = vld [vmem:[%s36414_s1 + $0x4140] ss:$8 sps:$4 sm:$0xff]  }
 0x5dc   :  { %17539 = vmatpush1.bf16.msra.mxu1 %v25761_v48  ;;  %19220 = vmatpush1.bf16.msra.mxu0 %v25764_v49  ;;  %v25857_v48 = vld [vmem:[%s36414_s1 + $0x1854] ss:$8 sps:$4 sm:$0xff]  }
 0x5dd   :  { %17540 = vmatprep.subr.bf16.mxu1 %v25769_v50  ;;  %19221 = vmatprep.subr.bf16.mxu0 %v25772_v18  ;;  %v25860_v49 = vld [vmem:[%s36414_s1 + $0x4154] ss:$8 sps:$4 sm:$0xff]   ;;  %v25855_v50 = vld [vmem:[%s36414_s1 + $0x1850] ss:$8 sps:$4 sm:$0xff]  }
 0x5de   :  { %v25858_v18 = vld [vmem:[%s36414_s1 + $0x4150] ss:$8 sps:$4 sm:$0xff]  }
 0x5e0   :  { %17541 = vmatpush1.bf16.msra.mxu1 %v25767_v52  ;;  %19222 = vmatpush1.bf16.msra.mxu0 %v25770_v53  ;;  %v25863_v52 = vld [vmem:[%s36414_s1 + $0x1864] ss:$8 sps:$4 sm:$0xff]  }
 0x5e1   :  { %17542 = vmatprep.subr.bf16.mxu1 %v25775_v54  ;;  %19223 = vmatprep.subr.bf16.mxu0 %v25778_v55  ;;  %v25866_v53 = vld [vmem:[%s36414_s1 + $0x4164] ss:$8 sps:$4 sm:$0xff]   ;;  %v25861_v54 = vld [vmem:[%s36414_s1 + $0x1860] ss:$8 sps:$4 sm:$0xff]  }
 0x5e2   :  { %v25864_v55 = vld [vmem:[%s36414_s1 + $0x4160] ss:$8 sps:$4 sm:$0xff]  }
 0x5e4   :  { %17543 = vmatpush1.bf16.msra.mxu1 %v25773_v56  ;;  %19224 = vmatpush1.bf16.msra.mxu0 %v25776_v25  ;;  %v25869_v56 = vld [vmem:[%s36414_s1 + $0x1874] ss:$8 sps:$4 sm:$0xff]  }
 0x5e5   :  { %17544 = vmatprep.subr.bf16.mxu1 %v25781_v58  ;;  %19225 = vmatprep.subr.bf16.mxu0 %v25784_v59  ;;  %v25872_v25 = vld [vmem:[%s36414_s1 + $0x4174] ss:$8 sps:$4 sm:$0xff]   ;;  %v25867_v58 = vld [vmem:[%s36414_s1 + $0x1870] ss:$8 sps:$4 sm:$0xff]  }
 0x5e6   :  { %v25870_v59 = vld [vmem:[%s36414_s1 + $0x4170] ss:$8 sps:$4 sm:$0xff]  }
 0x5e8   :  { %17545 = vmatpush1.bf16.msra.mxu1 %v25779_v60  ;;  %19226 = vmatpush1.bf16.msra.mxu0 %v25782_v61  ;;  %v25875_v60 = vld [vmem:[%s36414_s1 + $0x1884] ss:$8 sps:$4 sm:$0xff]  }
 0x5e9   :  { %17546 = vmatprep.subr.bf16.mxu1 %v25787_v62  ;;  %19227 = vmatprep.subr.bf16.mxu0 %v25790_v20  ;;  %v25878_v61 = vld [vmem:[%s36414_s1 + $0x4184] ss:$8 sps:$4 sm:$0xff]   ;;  %v25873_v62 = vld [vmem:[%s36414_s1 + $0x1880] ss:$8 sps:$4 sm:$0xff]  }
 0x5ea   :  { %v25876_v20 = vld [vmem:[%s36414_s1 + $0x4180] ss:$8 sps:$4 sm:$0xff]  }
 0x5ec   :  { %17547 = vmatpush1.bf16.msra.mxu1 %v25785_v0  ;;  %19228 = vmatpush1.bf16.msra.mxu0 %v25788_v1  ;;  %v25881_v0 = vld [vmem:[%s36414_s1 + $0x1894] ss:$8 sps:$4 sm:$0xff]  }
 0x5ed   :  { %17548 = vmatprep.subr.bf16.mxu1 %v25793_v2  ;;  %19229 = vmatprep.subr.bf16.mxu0 %v25796_v3  ;;  %v25884_v1 = vld [vmem:[%s36414_s1 + $0x4194] ss:$8 sps:$4 sm:$0xff]   ;;  %v25879_v2 = vld [vmem:[%s36414_s1 + $0x1890] ss:$8 sps:$4 sm:$0xff]  }
 0x5ee   :  { %v25882_v3 = vld [vmem:[%s36414_s1 + $0x4190] ss:$8 sps:$4 sm:$0xff]  }
 0x5f0   :  { %17549 = vmatpush1.bf16.msra.mxu1 %v25791_v4  ;;  %19230 = vmatpush1.bf16.msra.mxu0 %v25794_v32  ;;  %v25887_v4 = vld [vmem:[%s36414_s1 + $0x18a4] ss:$8 sps:$4 sm:$0xff]  }
 0x5f1   :  { %17550 = vmatprep.subr.bf16.mxu1 %v25799_v6  ;;  %19231 = vmatprep.subr.bf16.mxu0 %v25802_v7  ;;  %v25890_v32 = vld [vmem:[%s36414_s1 + $0x41a4] ss:$8 sps:$4 sm:$0xff]   ;;  %v25885_v6 = vld [vmem:[%s36414_s1 + $0x18a0] ss:$8 sps:$4 sm:$0xff]  }
 0x5f2   :  { %v25888_v7 = vld [vmem:[%s36414_s1 + $0x41a0] ss:$8 sps:$4 sm:$0xff]  }
 0x5f4   :  { %17551 = vmatpush1.bf16.msra.mxu1 %v25797_v8  ;;  %19232 = vmatpush1.bf16.msra.mxu0 %v25800_v9  ;;  %v25893_v8 = vld [vmem:[%s36414_s1 + $0x18b4] ss:$8 sps:$4 sm:$0xff]  }
 0x5f5   :  { %17552 = vmatprep.subr.bf16.mxu1 %v25805_v10  ;;  %19233 = vmatprep.subr.bf16.mxu0 %v25808_v29  ;;  %v25896_v9 = vld [vmem:[%s36414_s1 + $0x41b4] ss:$8 sps:$4 sm:$0xff]   ;;  %v25891_v10 = vld [vmem:[%s36414_s1 + $0x18b0] ss:$8 sps:$4 sm:$0xff]  }
 0x5f6   :  { %v25894_v29 = vld [vmem:[%s36414_s1 + $0x41b0] ss:$8 sps:$4 sm:$0xff]  }
 0x5f8   :  { %17553 = vmatpush1.bf16.msra.mxu1 %v25803_v12  ;;  %19234 = vmatpush1.bf16.msra.mxu0 %v25806_v13  ;;  %v25899_v12 = vld [vmem:[%s36414_s1 + $0x18c4] ss:$8 sps:$4 sm:$0xff]  }
 0x5f9   :  { %17554 = vmatprep.subr.bf16.mxu1 %v25811_v14  ;;  %19235 = vmatprep.subr.bf16.mxu0 %v25814_v15  ;;  %v25902_v13 = vld [vmem:[%s36414_s1 + $0x41c4] ss:$8 sps:$4 sm:$0xff]   ;;  %v25897_v14 = vld [vmem:[%s36414_s1 + $0x18c0] ss:$8 sps:$4 sm:$0xff]  }
 0x5fa   :  { %v25900_v15 = vld [vmem:[%s36414_s1 + $0x41c0] ss:$8 sps:$4 sm:$0xff]  }
 0x5fc   :  { %17555 = vmatpush1.bf16.msra.mxu1 %v25809_v16  ;;  %19236 = vmatpush1.bf16.msra.mxu0 %v25812_v33  ;;  %v25905_v16 = vld [vmem:[%s36414_s1 + $0x18d4] ss:$8 sps:$4 sm:$0xff]  }
 0x5fd   :  { %17556 = vmatprep.subr.bf16.mxu1 %v25817_v45  ;;  %19237 = vmatprep.subr.bf16.mxu0 %v25820_v57  ;;  %v25908_v33 = vld [vmem:[%s36414_s1 + $0x41d4] ss:$8 sps:$4 sm:$0xff]   ;;  %v25903_v45 = vld [vmem:[%s36414_s1 + $0x18d0] ss:$8 sps:$4 sm:$0xff]  }
 0x5fe   :  { %v25906_v57 = vld [vmem:[%s36414_s1 + $0x41d0] ss:$8 sps:$4 sm:$0xff]  }
 0x600   :  { %17557 = vmatpush1.bf16.msra.mxu1 %v25815_v22  ;;  %19238 = vmatpush1.bf16.msra.mxu0 %v25818_v39  ;;  %v25911_v22 = vld [vmem:[%s36414_s1 + $0x18e4] ss:$8 sps:$4 sm:$0xff]  }
 0x601   :  { %17567 = vmatprep.subr.bf16.mxu1 %v25825_v51  ;;  %19248 = vmatprep.subr.bf16.mxu0 %v25830_v23  ;;  %v25914_v39 = vld [vmem:[%s36414_s1 + $0x41e4] ss:$8 sps:$4 sm:$0xff]   ;;  %v25909_v51 = vld [vmem:[%s36414_s1 + $0x18e0] ss:$8 sps:$4 sm:$0xff]  }
 0x602   :  { %v25912_v23 = vld [vmem:[%s36414_s1 + $0x41e0] ss:$8 sps:$4 sm:$0xff]  }
 0x603   :  { %17559 = vmatmul.mubr.bf16.vlgmr.msra.gmra.mrb[0].mxu1 %v20259_v26  ;;  %19240 = vmatmul.mubr.bf16.vlgmr.msra.gmra.mrb[0].mxu0 %v20341_v63  ;;  %v25917_v26 = vld [vmem:[%s36414_s1 + $0x18f4] ss:$8 sps:$4 sm:$0xff]  }
 0x604   :  { %17568 = vmatpush1.bf16.msra.mxu1 %v25823_v30  ;;  %19249 = vmatpush1.bf16.msra.mxu0 %v25828_v19  ;;  %v25920_v63 = vld [vmem:[%s36414_s1 + $0x41f4] ss:$8 sps:$4 sm:$0xff]   ;;  %v25915_v30 = vld [vmem:[%s36414_s1 + $0x18f0] ss:$8 sps:$4 sm:$0xff]  }
 0x605   :  { %17569 = vmatprep.subr.bf16.mxu1 %v25833_v21  ;;  %19250 = vmatprep.subr.bf16.mxu0 %v25836_v31  ;;  %v25918_v19 = vld [vmem:[%s36414_s1 + $0x41f0] ss:$8 sps:$4 sm:$0xff]   ;;  %v25925_v21 = vld [vmem:[%s36414_s1 + $0x1904] ss:$8 sps:$4 sm:$0xff]  }
 0x606   :  { %17599 = vmatprep.mubr.bf16.mxu1 %v20262_v24  ;;  %19280 = vmatprep.mubr.bf16.mxu0 %v20344_v5  ;;  %v25930_v31 = vld [vmem:[%s36414_s1 + $0x4204] ss:$8 sps:$4 sm:$0xff]   ;;  %v20261_v24 = vcombine.low %v32669_v27, %v32669_v27  ;;  %v20343_v5 = vcombine.low %v32674_v28, %v32674_v28  ;;  %v25928_v27 = vld [vmem:[%s36414_s1 + $0x4200] ss:$8 sps:$4 sm:$0xff]   ;;  %v25933_v28 = vld [vmem:[%s36414_s1 + $0x1914] ss:$8 sps:$4 sm:$0xff]  }
 0x608   :  { %17570 = vmatpush1.bf16.msra.mxu1 %v25831_v34  ;;  %19251 = vmatpush1.bf16.msra.mxu0 %v25834_v35  ;;  %v32879_v34 = vld [vmem:[%s36413_s0 + $0xc8] sm:$0xff]  ;;  %v32884_v35 = vld [vmem:[%s36413_s0 + $0x210] sm:$0xff] }
 0x609   :  { %17571 = vmatprep.subr.bf16.mxu1 %v25839_v36  ;;  %19252 = vmatprep.subr.bf16.mxu0 %v25842_v37  ;;  %v25923_v36 = vld [vmem:[%s36414_s1 + $0x1900] ss:$8 sps:$4 sm:$0xff]   ;;  %v25936_v37 = vld [vmem:[%s36414_s1 + $0x4214] ss:$8 sps:$4 sm:$0xff]  }
 0x60c   :  { %17572 = vmatpush1.bf16.msra.mxu1 %v25837_v38  ;;  %19253 = vmatpush1.bf16.msra.mxu0 %v25840_v11  ;;  %v20264_v38 = vcombine.high %v32879_v34, %v32879_v34  ;;  %v20346_v11 = vcombine.high %v32884_v35, %v32884_v35 }
 0x60d   :  { %17573 = vmatprep.subr.bf16.mxu1 %v25845_v40  ;;  %19254 = vmatprep.subr.bf16.mxu0 %v25848_v41  ;;  %v25931_v40 = vld [vmem:[%s36414_s1 + $0x1910] ss:$8 sps:$4 sm:$0xff]  }
 0x60e   :  { %v25934_v41 = vld [vmem:[%s36414_s1 + $0x4210] ss:$8 sps:$4 sm:$0xff]  }
 0x610   :  { %17574 = vmatpush1.bf16.msra.mxu1 %v25843_v42  ;;  %19255 = vmatpush1.bf16.msra.mxu0 %v25846_v43  ;;  %v25939_v42 = vld [vmem:[%s36414_s1 + $0x1924] ss:$8 sps:$4 sm:$0xff]  }
 0x611   :  { %17575 = vmatprep.subr.bf16.mxu1 %v25851_v44  ;;  %19256 = vmatprep.subr.bf16.mxu0 %v25854_v17  ;;  %v25942_v43 = vld [vmem:[%s36414_s1 + $0x4224] ss:$8 sps:$4 sm:$0xff]   ;;  %v25937_v44 = vld [vmem:[%s36414_s1 + $0x1920] ss:$8 sps:$4 sm:$0xff]  }
 0x612   :  { %v25940_v17 = vld [vmem:[%s36414_s1 + $0x4220] ss:$8 sps:$4 sm:$0xff]  }
 0x614   :  { %17576 = vmatpush1.bf16.msra.mxu1 %v25849_v46  ;;  %19257 = vmatpush1.bf16.msra.mxu0 %v25852_v47  ;;  %v25945_v46 = vld [vmem:[%s36414_s1 + $0x1934] ss:$8 sps:$4 sm:$0xff]  }
 0x615   :  { %17577 = vmatprep.subr.bf16.mxu1 %v25857_v48  ;;  %19258 = vmatprep.subr.bf16.mxu0 %v25860_v49  ;;  %v25948_v47 = vld [vmem:[%s36414_s1 + $0x4234] ss:$8 sps:$4 sm:$0xff]   ;;  %v25943_v48 = vld [vmem:[%s36414_s1 + $0x1930] ss:$8 sps:$4 sm:$0xff]  }
 0x616   :  { %v25946_v49 = vld [vmem:[%s36414_s1 + $0x4230] ss:$8 sps:$4 sm:$0xff]  }
 0x618   :  { %17578 = vmatpush1.bf16.msra.mxu1 %v25855_v50  ;;  %19259 = vmatpush1.bf16.msra.mxu0 %v25858_v18  ;;  %v25951_v50 = vld [vmem:[%s36414_s1 + $0x1944] ss:$8 sps:$4 sm:$0xff]  }
 0x619   :  { %17579 = vmatprep.subr.bf16.mxu1 %v25863_v52  ;;  %19260 = vmatprep.subr.bf16.mxu0 %v25866_v53  ;;  %v25954_v18 = vld [vmem:[%s36414_s1 + $0x4244] ss:$8 sps:$4 sm:$0xff]   ;;  %v25949_v52 = vld [vmem:[%s36414_s1 + $0x1940] ss:$8 sps:$4 sm:$0xff]  }
 0x61a   :  { %v25952_v53 = vld [vmem:[%s36414_s1 + $0x4240] ss:$8 sps:$4 sm:$0xff]  }
 0x61c   :  { %17580 = vmatpush1.bf16.msra.mxu1 %v25861_v54  ;;  %19261 = vmatpush1.bf16.msra.mxu0 %v25864_v55  ;;  %v25957_v54 = vld [vmem:[%s36414_s1 + $0x1954] ss:$8 sps:$4 sm:$0xff]  }
 0x61d   :  { %17581 = vmatprep.subr.bf16.mxu1 %v25869_v56  ;;  %19262 = vmatprep.subr.bf16.mxu0 %v25872_v25  ;;  %v25960_v55 = vld [vmem:[%s36414_s1 + $0x4254] ss:$8 sps:$4 sm:$0xff]   ;;  %v25955_v56 = vld [vmem:[%s36414_s1 + $0x1950] ss:$8 sps:$4 sm:$0xff]  }
 0x61e   :  { %v25958_v25 = vld [vmem:[%s36414_s1 + $0x4250] ss:$8 sps:$4 sm:$0xff]  }
 0x620   :  { %17582 = vmatpush1.bf16.msra.mxu1 %v25867_v58  ;;  %19263 = vmatpush1.bf16.msra.mxu0 %v25870_v59  ;;  %v25963_v58 = vld [vmem:[%s36414_s1 + $0x1964] ss:$8 sps:$4 sm:$0xff]  }
 0x621   :  { %17583 = vmatprep.subr.bf16.mxu1 %v25875_v60  ;;  %19264 = vmatprep.subr.bf16.mxu0 %v25878_v61  ;;  %v25966_v59 = vld [vmem:[%s36414_s1 + $0x4264] ss:$8 sps:$4 sm:$0xff]   ;;  %v25961_v60 = vld [vmem:[%s36414_s1 + $0x1960] ss:$8 sps:$4 sm:$0xff]  }
 0x622   :  { %v25964_v61 = vld [vmem:[%s36414_s1 + $0x4260] ss:$8 sps:$4 sm:$0xff]  }
 0x624   :  { %17584 = vmatpush1.bf16.msra.mxu1 %v25873_v62  ;;  %19265 = vmatpush1.bf16.msra.mxu0 %v25876_v20  ;;  %v25969_v62 = vld [vmem:[%s36414_s1 + $0x1974] ss:$8 sps:$4 sm:$0xff]  }
 0x625   :  { %17585 = vmatprep.subr.bf16.mxu1 %v25881_v0  ;;  %19266 = vmatprep.subr.bf16.mxu0 %v25884_v1  ;;  %v25972_v20 = vld [vmem:[%s36414_s1 + $0x4274] ss:$8 sps:$4 sm:$0xff]   ;;  %v25967_v0 = vld [vmem:[%s36414_s1 + $0x1970] ss:$8 sps:$4 sm:$0xff]  }
 0x626   :  { %v25970_v1 = vld [vmem:[%s36414_s1 + $0x4270] ss:$8 sps:$4 sm:$0xff]  }
 0x628   :  { %17586 = vmatpush1.bf16.msra.mxu1 %v25879_v2  ;;  %19267 = vmatpush1.bf16.msra.mxu0 %v25882_v3  ;;  %v25975_v2 = vld [vmem:[%s36414_s1 + $0x1984] ss:$8 sps:$4 sm:$0xff]  }
 0x629   :  { %17587 = vmatprep.subr.bf16.mxu1 %v25887_v4  ;;  %19268 = vmatprep.subr.bf16.mxu0 %v25890_v32  ;;  %v25978_v3 = vld [vmem:[%s36414_s1 + $0x4284] ss:$8 sps:$4 sm:$0xff]   ;;  %v25973_v4 = vld [vmem:[%s36414_s1 + $0x1980] ss:$8 sps:$4 sm:$0xff]  }
 0x62a   :  { %v25976_v32 = vld [vmem:[%s36414_s1 + $0x4280] ss:$8 sps:$4 sm:$0xff]  }
 0x62c   :  { %17588 = vmatpush1.bf16.msra.mxu1 %v25885_v6  ;;  %19269 = vmatpush1.bf16.msra.mxu0 %v25888_v7  ;;  %v25981_v6 = vld [vmem:[%s36414_s1 + $0x1994] ss:$8 sps:$4 sm:$0xff]  }
 0x62d   :  { %17589 = vmatprep.subr.bf16.mxu1 %v25893_v8  ;;  %19270 = vmatprep.subr.bf16.mxu0 %v25896_v9  ;;  %v25984_v7 = vld [vmem:[%s36414_s1 + $0x4294] ss:$8 sps:$4 sm:$0xff]   ;;  %v25979_v8 = vld [vmem:[%s36414_s1 + $0x1990] ss:$8 sps:$4 sm:$0xff]  }
 0x62e   :  { %v25982_v9 = vld [vmem:[%s36414_s1 + $0x4290] ss:$8 sps:$4 sm:$0xff]  }
 0x630   :  { %17590 = vmatpush1.bf16.msra.mxu1 %v25891_v10  ;;  %19271 = vmatpush1.bf16.msra.mxu0 %v25894_v29  ;;  %v25987_v10 = vld [vmem:[%s36414_s1 + $0x19a4] ss:$8 sps:$4 sm:$0xff]  }
 0x631   :  { %17591 = vmatprep.subr.bf16.mxu1 %v25899_v12  ;;  %19272 = vmatprep.subr.bf16.mxu0 %v25902_v13  ;;  %v25990_v29 = vld [vmem:[%s36414_s1 + $0x42a4] ss:$8 sps:$4 sm:$0xff]   ;;  %v25985_v12 = vld [vmem:[%s36414_s1 + $0x19a0] ss:$8 sps:$4 sm:$0xff]  }
 0x632   :  { %v25988_v13 = vld [vmem:[%s36414_s1 + $0x42a0] ss:$8 sps:$4 sm:$0xff]  }
 0x634   :  { %17592 = vmatpush1.bf16.msra.mxu1 %v25897_v14  ;;  %19273 = vmatpush1.bf16.msra.mxu0 %v25900_v15  ;;  %v25993_v14 = vld [vmem:[%s36414_s1 + $0x19b4] ss:$8 sps:$4 sm:$0xff]  }
 0x635   :  { %17593 = vmatprep.subr.bf16.mxu1 %v25905_v16  ;;  %19274 = vmatprep.subr.bf16.mxu0 %v25908_v33  ;;  %v25996_v15 = vld [vmem:[%s36414_s1 + $0x42b4] ss:$8 sps:$4 sm:$0xff]   ;;  %v25991_v16 = vld [vmem:[%s36414_s1 + $0x19b0] ss:$8 sps:$4 sm:$0xff]  }
 0x636   :  { %v25994_v33 = vld [vmem:[%s36414_s1 + $0x42b0] ss:$8 sps:$4 sm:$0xff]  }
 0x638   :  { %17594 = vmatpush1.bf16.msra.mxu1 %v25903_v45  ;;  %19275 = vmatpush1.bf16.msra.mxu0 %v25906_v57  ;;  %v25999_v45 = vld [vmem:[%s36414_s1 + $0x19c4] ss:$8 sps:$4 sm:$0xff]  }
 0x639   :  { %17595 = vmatprep.subr.bf16.mxu1 %v25911_v22  ;;  %19276 = vmatprep.subr.bf16.mxu0 %v25914_v39  ;;  %v26002_v57 = vld [vmem:[%s36414_s1 + $0x42c4] ss:$8 sps:$4 sm:$0xff]   ;;  %v25997_v22 = vld [vmem:[%s36414_s1 + $0x19c0] ss:$8 sps:$4 sm:$0xff]  }
 0x63a   :  { %v26000_v39 = vld [vmem:[%s36414_s1 + $0x42c0] ss:$8 sps:$4 sm:$0xff]  }
 0x63c   :  { %17596 = vmatpush1.bf16.msra.mxu1 %v25909_v51  ;;  %19277 = vmatpush1.bf16.msra.mxu0 %v25912_v23  ;;  %v26005_v51 = vld [vmem:[%s36414_s1 + $0x19d4] ss:$8 sps:$4 sm:$0xff]  }
 0x63d   :  { %17597 = vmatprep.subr.bf16.mxu1 %v25917_v26  ;;  %19278 = vmatprep.subr.bf16.mxu0 %v25920_v63  ;;  %v26008_v23 = vld [vmem:[%s36414_s1 + $0x42d4] ss:$8 sps:$4 sm:$0xff]   ;;  %v26003_v26 = vld [vmem:[%s36414_s1 + $0x19d0] ss:$8 sps:$4 sm:$0xff]  }
 0x63e   :  { %v26006_v63 = vld [vmem:[%s36414_s1 + $0x42d0] ss:$8 sps:$4 sm:$0xff]  }
 0x640   :  { %17598 = vmatpush1.bf16.msra.mxu1 %v25915_v30  ;;  %19279 = vmatpush1.bf16.msra.mxu0 %v25918_v19  ;;  %v26011_v30 = vld [vmem:[%s36414_s1 + $0x19e4] ss:$8 sps:$4 sm:$0xff]  }
 0x641   :  { %17608 = vmatprep.subr.bf16.mxu1 %v25925_v21  ;;  %19289 = vmatprep.subr.bf16.mxu0 %v25930_v31  ;;  %v26014_v19 = vld [vmem:[%s36414_s1 + $0x42e4] ss:$8 sps:$4 sm:$0xff]   ;;  %v26009_v21 = vld [vmem:[%s36414_s1 + $0x19e0] ss:$8 sps:$4 sm:$0xff]  }
 0x642   :  { %v26012_v31 = vld [vmem:[%s36414_s1 + $0x42e0] ss:$8 sps:$4 sm:$0xff]  }
 0x643   :  { %17600 = vmatmul.mubr.bf16.vlgmr.msra.gmra.mrb[0].mxu1 %v20261_v24  ;;  %19281 = vmatmul.mubr.bf16.vlgmr.msra.gmra.mrb[0].mxu0 %v20343_v5  ;;  %v26017_v24 = vld [vmem:[%s36414_s1 + $0x19f4] ss:$8 sps:$4 sm:$0xff]  }
 0x644   :  { %17609 = vmatpush1.bf16.msra.mxu1 %v25923_v36  ;;  %19290 = vmatpush1.bf16.msra.mxu0 %v25928_v27  ;;  %v26020_v5 = vld [vmem:[%s36414_s1 + $0x42f4] ss:$8 sps:$4 sm:$0xff]   ;;  %v26015_v36 = vld [vmem:[%s36414_s1 + $0x19f0] ss:$8 sps:$4 sm:$0xff]  }
 0x645   :  { %17610 = vmatprep.subr.bf16.mxu1 %v25933_v28  ;;  %19291 = vmatprep.subr.bf16.mxu0 %v25936_v37  ;;  %v26018_v27 = vld [vmem:[%s36414_s1 + $0x42f0] ss:$8 sps:$4 sm:$0xff]   ;;  %v26025_v28 = vld [vmem:[%s36414_s1 + $0x1a04] ss:$8 sps:$4 sm:$0xff]  }
 0x646   :  { %17640 = vmatprep.mubr.bf16.mxu1 %v20264_v38  ;;  %19321 = vmatprep.mubr.bf16.mxu0 %v20346_v11  ;;  %v26030_v37 = vld [vmem:[%s36414_s1 + $0x4304] ss:$8 sps:$4 sm:$0xff]   ;;  %v20263_v38 = vcombine.low %v32879_v34, %v32879_v34  ;;  %v20345_v11 = vcombine.low %v32884_v35, %v32884_v35  ;;  %v26028_v34 = vld [vmem:[%s36414_s1 + $0x4300] ss:$8 sps:$4 sm:$0xff]   ;;  %v26033_v35 = vld [vmem:[%s36414_s1 + $0x1a14] ss:$8 sps:$4 sm:$0xff]  }
 0x648   :  { %17611 = vmatpush1.bf16.msra.mxu1 %v25931_v40  ;;  %19292 = vmatpush1.bf16.msra.mxu0 %v25934_v41  ;;  %v33089_v40 = vld [vmem:[%s36413_s0 + $0xd0] sm:$0xff]  ;;  %v33094_v41 = vld [vmem:[%s36413_s0 + $0x218] sm:$0xff] }
 0x649   :  { %17612 = vmatprep.subr.bf16.mxu1 %v25939_v42  ;;  %19293 = vmatprep.subr.bf16.mxu0 %v25942_v43  ;;  %v26023_v42 = vld [vmem:[%s36414_s1 + $0x1a00] ss:$8 sps:$4 sm:$0xff]   ;;  %v26036_v43 = vld [vmem:[%s36414_s1 + $0x4314] ss:$8 sps:$4 sm:$0xff]  }
 0x64c   :  { %17613 = vmatpush1.bf16.msra.mxu1 %v25937_v44  ;;  %19294 = vmatpush1.bf16.msra.mxu0 %v25940_v17  ;;  %v20266_v44 = vcombine.high %v33089_v40, %v33089_v40  ;;  %v20348_v17 = vcombine.high %v33094_v41, %v33094_v41 }
 0x64d   :  { %17614 = vmatprep.subr.bf16.mxu1 %v25945_v46  ;;  %19295 = vmatprep.subr.bf16.mxu0 %v25948_v47  ;;  %v26031_v46 = vld [vmem:[%s36414_s1 + $0x1a10] ss:$8 sps:$4 sm:$0xff]  }
 0x64e   :  { %v26034_v47 = vld [vmem:[%s36414_s1 + $0x4310] ss:$8 sps:$4 sm:$0xff]  }
 0x650   :  { %17615 = vmatpush1.bf16.msra.mxu1 %v25943_v48  ;;  %19296 = vmatpush1.bf16.msra.mxu0 %v25946_v49  ;;  %v26039_v48 = vld [vmem:[%s36414_s1 + $0x1a24] ss:$8 sps:$4 sm:$0xff]  }
 0x651   :  { %17616 = vmatprep.subr.bf16.mxu1 %v25951_v50  ;;  %19297 = vmatprep.subr.bf16.mxu0 %v25954_v18  ;;  %v26042_v49 = vld [vmem:[%s36414_s1 + $0x4324] ss:$8 sps:$4 sm:$0xff]   ;;  %v26037_v50 = vld [vmem:[%s36414_s1 + $0x1a20] ss:$8 sps:$4 sm:$0xff]  }
 0x652   :  { %v26040_v18 = vld [vmem:[%s36414_s1 + $0x4320] ss:$8 sps:$4 sm:$0xff]  }
 0x654   :  { %17617 = vmatpush1.bf16.msra.mxu1 %v25949_v52  ;;  %19298 = vmatpush1.bf16.msra.mxu0 %v25952_v53  ;;  %v26045_v52 = vld [vmem:[%s36414_s1 + $0x1a34] ss:$8 sps:$4 sm:$0xff]  }
 0x655   :  { %17618 = vmatprep.subr.bf16.mxu1 %v25957_v54  ;;  %19299 = vmatprep.subr.bf16.mxu0 %v25960_v55  ;;  %v26048_v53 = vld [vmem:[%s36414_s1 + $0x4334] ss:$8 sps:$4 sm:$0xff]   ;;  %v26043_v54 = vld [vmem:[%s36414_s1 + $0x1a30] ss:$8 sps:$4 sm:$0xff]  }
 0x656   :  { %v26046_v55 = vld [vmem:[%s36414_s1 + $0x4330] ss:$8 sps:$4 sm:$0xff]  }
 0x658   :  { %17619 = vmatpush1.bf16.msra.mxu1 %v25955_v56  ;;  %19300 = vmatpush1.bf16.msra.mxu0 %v25958_v25  ;;  %v26051_v56 = vld [vmem:[%s36414_s1 + $0x1a44] ss:$8 sps:$4 sm:$0xff]  }
 0x659   :  { %17620 = vmatprep.subr.bf16.mxu1 %v25963_v58  ;;  %19301 = vmatprep.subr.bf16.mxu0 %v25966_v59  ;;  %v26054_v25 = vld [vmem:[%s36414_s1 + $0x4344] ss:$8 sps:$4 sm:$0xff]   ;;  %v26049_v58 = vld [vmem:[%s36414_s1 + $0x1a40] ss:$8 sps:$4 sm:$0xff]  }
 0x65a   :  { %v26052_v59 = vld [vmem:[%s36414_s1 + $0x4340] ss:$8 sps:$4 sm:$0xff]  }
 0x65c   :  { %17621 = vmatpush1.bf16.msra.mxu1 %v25961_v60  ;;  %19302 = vmatpush1.bf16.msra.mxu0 %v25964_v61  ;;  %v26057_v60 = vld [vmem:[%s36414_s1 + $0x1a54] ss:$8 sps:$4 sm:$0xff]  }
 0x65d   :  { %17622 = vmatprep.subr.bf16.mxu1 %v25969_v62  ;;  %19303 = vmatprep.subr.bf16.mxu0 %v25972_v20  ;;  %v26060_v61 = vld [vmem:[%s36414_s1 + $0x4354] ss:$8 sps:$4 sm:$0xff]   ;;  %v26055_v62 = vld [vmem:[%s36414_s1 + $0x1a50] ss:$8 sps:$4 sm:$0xff]  }
 0x65e   :  { %v26058_v20 = vld [vmem:[%s36414_s1 + $0x4350] ss:$8 sps:$4 sm:$0xff]  }
 0x660   :  { %17623 = vmatpush1.bf16.msra.mxu1 %v25967_v0  ;;  %19304 = vmatpush1.bf16.msra.mxu0 %v25970_v1  ;;  %v26063_v0 = vld [vmem:[%s36414_s1 + $0x1a64] ss:$8 sps:$4 sm:$0xff]  }
 0x661   :  { %17624 = vmatprep.subr.bf16.mxu1 %v25975_v2  ;;  %19305 = vmatprep.subr.bf16.mxu0 %v25978_v3  ;;  %v26066_v1 = vld [vmem:[%s36414_s1 + $0x4364] ss:$8 sps:$4 sm:$0xff]   ;;  %v26061_v2 = vld [vmem:[%s36414_s1 + $0x1a60] ss:$8 sps:$4 sm:$0xff]  }
 0x662   :  { %v26064_v3 = vld [vmem:[%s36414_s1 + $0x4360] ss:$8 sps:$4 sm:$0xff]  }
 0x664   :  { %17625 = vmatpush1.bf16.msra.mxu1 %v25973_v4  ;;  %19306 = vmatpush1.bf16.msra.mxu0 %v25976_v32  ;;  %v26069_v4 = vld [vmem:[%s36414_s1 + $0x1a74] ss:$8 sps:$4 sm:$0xff]  }
 0x665   :  { %17626 = vmatprep.subr.bf16.mxu1 %v25981_v6  ;;  %19307 = vmatprep.subr.bf16.mxu0 %v25984_v7  ;;  %v26072_v32 = vld [vmem:[%s36414_s1 + $0x4374] ss:$8 sps:$4 sm:$0xff]   ;;  %v26067_v6 = vld [vmem:[%s36414_s1 + $0x1a70] ss:$8 sps:$4 sm:$0xff]  }
 0x666   :  { %v26070_v7 = vld [vmem:[%s36414_s1 + $0x4370] ss:$8 sps:$4 sm:$0xff]  }
 0x668   :  { %17627 = vmatpush1.bf16.msra.mxu1 %v25979_v8  ;;  %19308 = vmatpush1.bf16.msra.mxu0 %v25982_v9  ;;  %v26075_v8 = vld [vmem:[%s36414_s1 + $0x1a84] ss:$8 sps:$4 sm:$0xff]  }
 0x669   :  { %17628 = vmatprep.subr.bf16.mxu1 %v25987_v10  ;;  %19309 = vmatprep.subr.bf16.mxu0 %v25990_v29  ;;  %v26078_v9 = vld [vmem:[%s36414_s1 + $0x4384] ss:$8 sps:$4 sm:$0xff]   ;;  %v26073_v10 = vld [vmem:[%s36414_s1 + $0x1a80] ss:$8 sps:$4 sm:$0xff]  }
 0x66a   :  { %v26076_v29 = vld [vmem:[%s36414_s1 + $0x4380] ss:$8 sps:$4 sm:$0xff]  }
 0x66c   :  { %17629 = vmatpush1.bf16.msra.mxu1 %v25985_v12  ;;  %19310 = vmatpush1.bf16.msra.mxu0 %v25988_v13  ;;  %v26081_v12 = vld [vmem:[%s36414_s1 + $0x1a94] ss:$8 sps:$4 sm:$0xff]  }
 0x66d   :  { %17630 = vmatprep.subr.bf16.mxu1 %v25993_v14  ;;  %19311 = vmatprep.subr.bf16.mxu0 %v25996_v15  ;;  %v26084_v13 = vld [vmem:[%s36414_s1 + $0x4394] ss:$8 sps:$4 sm:$0xff]   ;;  %v26079_v14 = vld [vmem:[%s36414_s1 + $0x1a90] ss:$8 sps:$4 sm:$0xff]  }
 0x66e   :  { %v26082_v15 = vld [vmem:[%s36414_s1 + $0x4390] ss:$8 sps:$4 sm:$0xff]  }
 0x670   :  { %17631 = vmatpush1.bf16.msra.mxu1 %v25991_v16  ;;  %19312 = vmatpush1.bf16.msra.mxu0 %v25994_v33  ;;  %v26087_v16 = vld [vmem:[%s36414_s1 + $0x1aa4] ss:$8 sps:$4 sm:$0xff]  }
 0x671   :  { %17632 = vmatprep.subr.bf16.mxu1 %v25999_v45  ;;  %19313 = vmatprep.subr.bf16.mxu0 %v26002_v57  ;;  %v26090_v33 = vld [vmem:[%s36414_s1 + $0x43a4] ss:$8 sps:$4 sm:$0xff]   ;;  %v26085_v45 = vld [vmem:[%s36414_s1 + $0x1aa0] ss:$8 sps:$4 sm:$0xff]  }
 0x672   :  { %v26088_v57 = vld [vmem:[%s36414_s1 + $0x43a0] ss:$8 sps:$4 sm:$0xff]  }
 0x674   :  { %17633 = vmatpush1.bf16.msra.mxu1 %v25997_v22  ;;  %19314 = vmatpush1.bf16.msra.mxu0 %v26000_v39  ;;  %v26093_v22 = vld [vmem:[%s36414_s1 + $0x1ab4] ss:$8 sps:$4 sm:$0xff]  }
 0x675   :  { %17634 = vmatprep.subr.bf16.mxu1 %v26005_v51  ;;  %19315 = vmatprep.subr.bf16.mxu0 %v26008_v23  ;;  %v26096_v39 = vld [vmem:[%s36414_s1 + $0x43b4] ss:$8 sps:$4 sm:$0xff]   ;;  %v26091_v51 = vld [vmem:[%s36414_s1 + $0x1ab0] ss:$8 sps:$4 sm:$0xff]  }
 0x676   :  { %v26094_v23 = vld [vmem:[%s36414_s1 + $0x43b0] ss:$8 sps:$4 sm:$0xff]  }
 0x678   :  { %17635 = vmatpush1.bf16.msra.mxu1 %v26003_v26  ;;  %19316 = vmatpush1.bf16.msra.mxu0 %v26006_v63  ;;  %v26099_v26 = vld [vmem:[%s36414_s1 + $0x1ac4] ss:$8 sps:$4 sm:$0xff]  }
 0x679   :  { %17636 = vmatprep.subr.bf16.mxu1 %v26011_v30  ;;  %19317 = vmatprep.subr.bf16.mxu0 %v26014_v19  ;;  %v26102_v63 = vld [vmem:[%s36414_s1 + $0x43c4] ss:$8 sps:$4 sm:$0xff]   ;;  %v26097_v30 = vld [vmem:[%s36414_s1 + $0x1ac0] ss:$8 sps:$4 sm:$0xff]  }
 0x67a   :  { %v26100_v19 = vld [vmem:[%s36414_s1 + $0x43c0] ss:$8 sps:$4 sm:$0xff]  }
 0x67c   :  { %17637 = vmatpush1.bf16.msra.mxu1 %v26009_v21  ;;  %19318 = vmatpush1.bf16.msra.mxu0 %v26012_v31  ;;  %v26105_v21 = vld [vmem:[%s36414_s1 + $0x1ad4] ss:$8 sps:$4 sm:$0xff]  }
 0x67d   :  { %17638 = vmatprep.subr.bf16.mxu1 %v26017_v24  ;;  %19319 = vmatprep.subr.bf16.mxu0 %v26020_v5  ;;  %v26108_v31 = vld [vmem:[%s36414_s1 + $0x43d4] ss:$8 sps:$4 sm:$0xff]   ;;  %v26103_v24 = vld [vmem:[%s36414_s1 + $0x1ad0] ss:$8 sps:$4 sm:$0xff]  }
 0x67e   :  { %v26106_v5 = vld [vmem:[%s36414_s1 + $0x43d0] ss:$8 sps:$4 sm:$0xff]  }
 0x680   :  { %17639 = vmatpush1.bf16.msra.mxu1 %v26015_v36  ;;  %19320 = vmatpush1.bf16.msra.mxu0 %v26018_v27  ;;  %v26111_v36 = vld [vmem:[%s36414_s1 + $0x1ae4] ss:$8 sps:$4 sm:$0xff]  }
 0x681   :  { %17649 = vmatprep.subr.bf16.mxu1 %v26025_v28  ;;  %19330 = vmatprep.subr.bf16.mxu0 %v26030_v37  ;;  %v26114_v27 = vld [vmem:[%s36414_s1 + $0x43e4] ss:$8 sps:$4 sm:$0xff]   ;;  %v26109_v28 = vld [vmem:[%s36414_s1 + $0x1ae0] ss:$8 sps:$4 sm:$0xff]  }
 0x682   :  { %v26112_v37 = vld [vmem:[%s36414_s1 + $0x43e0] ss:$8 sps:$4 sm:$0xff]  }
 0x683   :  { %17641 = vmatmul.mubr.bf16.vlgmr.msra.gmra.mrb[0].mxu1 %v20263_v38  ;;  %19322 = vmatmul.mubr.bf16.vlgmr.msra.gmra.mrb[0].mxu0 %v20345_v11  ;;  %v26117_v38 = vld [vmem:[%s36414_s1 + $0x1af4] ss:$8 sps:$4 sm:$0xff]  }
 0x684   :  { %17650 = vmatpush1.bf16.msra.mxu1 %v26023_v42  ;;  %19331 = vmatpush1.bf16.msra.mxu0 %v26028_v34  ;;  %v26120_v11 = vld [vmem:[%s36414_s1 + $0x43f4] ss:$8 sps:$4 sm:$0xff]   ;;  %v26115_v42 = vld [vmem:[%s36414_s1 + $0x1af0] ss:$8 sps:$4 sm:$0xff]  }
 0x685   :  { %17651 = vmatprep.subr.bf16.mxu1 %v26033_v35  ;;  %19332 = vmatprep.subr.bf16.mxu0 %v26036_v43  ;;  %v26118_v34 = vld [vmem:[%s36414_s1 + $0x43f0] ss:$8 sps:$4 sm:$0xff]   ;;  %v26125_v35 = vld [vmem:[%s36414_s1 + $0x1b04] ss:$8 sps:$4 sm:$0xff]  }
 0x686   :  { %17681 = vmatprep.mubr.bf16.mxu1 %v20266_v44  ;;  %19362 = vmatprep.mubr.bf16.mxu0 %v20348_v17  ;;  %v26130_v43 = vld [vmem:[%s36414_s1 + $0x4404] ss:$8 sps:$4 sm:$0xff]   ;;  %v20265_v44 = vcombine.low %v33089_v40, %v33089_v40  ;;  %v20347_v17 = vcombine.low %v33094_v41, %v33094_v41  ;;  %v26128_v40 = vld [vmem:[%s36414_s1 + $0x4400] ss:$8 sps:$4 sm:$0xff]   ;;  %v26133_v41 = vld [vmem:[%s36414_s1 + $0x1b14] ss:$8 sps:$4 sm:$0xff]  }
 0x688   :  { %17652 = vmatpush1.bf16.msra.mxu1 %v26031_v46  ;;  %19333 = vmatpush1.bf16.msra.mxu0 %v26034_v47  ;;  %v33299_v46 = vld [vmem:[%s36413_s0 + $0xd8] sm:$0xff]  ;;  %v33304_v47 = vld [vmem:[%s36413_s0 + $0x220] sm:$0xff] }
 0x689   :  { %17653 = vmatprep.subr.bf16.mxu1 %v26039_v48  ;;  %19334 = vmatprep.subr.bf16.mxu0 %v26042_v49  ;;  %v26123_v48 = vld [vmem:[%s36414_s1 + $0x1b00] ss:$8 sps:$4 sm:$0xff]   ;;  %v26136_v49 = vld [vmem:[%s36414_s1 + $0x4414] ss:$8 sps:$4 sm:$0xff]  }
 0x68c   :  { %17654 = vmatpush1.bf16.msra.mxu1 %v26037_v50  ;;  %19335 = vmatpush1.bf16.msra.mxu0 %v26040_v18  ;;  %v20268_v50 = vcombine.high %v33299_v46, %v33299_v46  ;;  %v20350_v18 = vcombine.high %v33304_v47, %v33304_v47 }
 0x68d   :  { %17655 = vmatprep.subr.bf16.mxu1 %v26045_v52  ;;  %19336 = vmatprep.subr.bf16.mxu0 %v26048_v53  ;;  %v26131_v52 = vld [vmem:[%s36414_s1 + $0x1b10] ss:$8 sps:$4 sm:$0xff]  }
 0x68e   :  { %v26134_v53 = vld [vmem:[%s36414_s1 + $0x4410] ss:$8 sps:$4 sm:$0xff]  }
 0x690   :  { %17656 = vmatpush1.bf16.msra.mxu1 %v26043_v54  ;;  %19337 = vmatpush1.bf16.msra.mxu0 %v26046_v55  ;;  %v26139_v54 = vld [vmem:[%s36414_s1 + $0x1b24] ss:$8 sps:$4 sm:$0xff]  }
 0x691   :  { %17657 = vmatprep.subr.bf16.mxu1 %v26051_v56  ;;  %19338 = vmatprep.subr.bf16.mxu0 %v26054_v25  ;;  %v26142_v55 = vld [vmem:[%s36414_s1 + $0x4424] ss:$8 sps:$4 sm:$0xff]   ;;  %v26137_v56 = vld [vmem:[%s36414_s1 + $0x1b20] ss:$8 sps:$4 sm:$0xff]  }
 0x692   :  { %v26140_v25 = vld [vmem:[%s36414_s1 + $0x4420] ss:$8 sps:$4 sm:$0xff]  }
 0x694   :  { %17658 = vmatpush1.bf16.msra.mxu1 %v26049_v58  ;;  %19339 = vmatpush1.bf16.msra.mxu0 %v26052_v59  ;;  %v26145_v58 = vld [vmem:[%s36414_s1 + $0x1b34] ss:$8 sps:$4 sm:$0xff]  }
 0x695   :  { %17659 = vmatprep.subr.bf16.mxu1 %v26057_v60  ;;  %19340 = vmatprep.subr.bf16.mxu0 %v26060_v61  ;;  %v26148_v59 = vld [vmem:[%s36414_s1 + $0x4434] ss:$8 sps:$4 sm:$0xff]   ;;  %v26143_v60 = vld [vmem:[%s36414_s1 + $0x1b30] ss:$8 sps:$4 sm:$0xff]  }
 0x696   :  { %v26146_v61 = vld [vmem:[%s36414_s1 + $0x4430] ss:$8 sps:$4 sm:$0xff]  }
 0x698   :  { %17660 = vmatpush1.bf16.msra.mxu1 %v26055_v62  ;;  %19341 = vmatpush1.bf16.msra.mxu0 %v26058_v20  ;;  %v26151_v62 = vld [vmem:[%s36414_s1 + $0x1b44] ss:$8 sps:$4 sm:$0xff]  }
 0x699   :  { %17661 = vmatprep.subr.bf16.mxu1 %v26063_v0  ;;  %19342 = vmatprep.subr.bf16.mxu0 %v26066_v1  ;;  %v26154_v20 = vld [vmem:[%s36414_s1 + $0x4444] ss:$8 sps:$4 sm:$0xff]   ;;  %v26149_v0 = vld [vmem:[%s36414_s1 + $0x1b40] ss:$8 sps:$4 sm:$0xff]  }
 0x69a   :  { %v26152_v1 = vld [vmem:[%s36414_s1 + $0x4440] ss:$8 sps:$4 sm:$0xff]  }
 0x69c   :  { %17662 = vmatpush1.bf16.msra.mxu1 %v26061_v2  ;;  %19343 = vmatpush1.bf16.msra.mxu0 %v26064_v3  ;;  %v26157_v2 = vld [vmem:[%s36414_s1 + $0x1b54] ss:$8 sps:$4 sm:$0xff]  }
 0x69d   :  { %17663 = vmatprep.subr.bf16.mxu1 %v26069_v4  ;;  %19344 = vmatprep.subr.bf16.mxu0 %v26072_v32  ;;  %v26160_v3 = vld [vmem:[%s36414_s1 + $0x4454] ss:$8 sps:$4 sm:$0xff]   ;;  %v26155_v4 = vld [vmem:[%s36414_s1 + $0x1b50] ss:$8 sps:$4 sm:$0xff]  }
 0x69e   :  { %v26158_v32 = vld [vmem:[%s36414_s1 + $0x4450] ss:$8 sps:$4 sm:$0xff]  }
 0x6a0   :  { %17664 = vmatpush1.bf16.msra.mxu1 %v26067_v6  ;;  %19345 = vmatpush1.bf16.msra.mxu0 %v26070_v7  ;;  %v26163_v6 = vld [vmem:[%s36414_s1 + $0x1b64] ss:$8 sps:$4 sm:$0xff]  }
 0x6a1   :  { %17665 = vmatprep.subr.bf16.mxu1 %v26075_v8  ;;  %19346 = vmatprep.subr.bf16.mxu0 %v26078_v9  ;;  %v26166_v7 = vld [vmem:[%s36414_s1 + $0x4464] ss:$8 sps:$4 sm:$0xff]   ;;  %v26161_v8 = vld [vmem:[%s36414_s1 + $0x1b60] ss:$8 sps:$4 sm:$0xff]  }
 0x6a2   :  { %v26164_v9 = vld [vmem:[%s36414_s1 + $0x4460] ss:$8 sps:$4 sm:$0xff]  }
 0x6a4   :  { %17666 = vmatpush1.bf16.msra.mxu1 %v26073_v10  ;;  %19347 = vmatpush1.bf16.msra.mxu0 %v26076_v29  ;;  %v26169_v10 = vld [vmem:[%s36414_s1 + $0x1b74] ss:$8 sps:$4 sm:$0xff]  }
 0x6a5   :  { %17667 = vmatprep.subr.bf16.mxu1 %v26081_v12  ;;  %19348 = vmatprep.subr.bf16.mxu0 %v26084_v13  ;;  %v26172_v29 = vld [vmem:[%s36414_s1 + $0x4474] ss:$8 sps:$4 sm:$0xff]   ;;  %v26167_v12 = vld [vmem:[%s36414_s1 + $0x1b70] ss:$8 sps:$4 sm:$0xff]  }
 0x6a6   :  { %v26170_v13 = vld [vmem:[%s36414_s1 + $0x4470] ss:$8 sps:$4 sm:$0xff]  }
 0x6a8   :  { %17668 = vmatpush1.bf16.msra.mxu1 %v26079_v14  ;;  %19349 = vmatpush1.bf16.msra.mxu0 %v26082_v15  ;;  %v26175_v14 = vld [vmem:[%s36414_s1 + $0x1b84] ss:$8 sps:$4 sm:$0xff]  }
 0x6a9   :  { %17669 = vmatprep.subr.bf16.mxu1 %v26087_v16  ;;  %19350 = vmatprep.subr.bf16.mxu0 %v26090_v33  ;;  %v26178_v15 = vld [vmem:[%s36414_s1 + $0x4484] ss:$8 sps:$4 sm:$0xff]   ;;  %v26173_v16 = vld [vmem:[%s36414_s1 + $0x1b80] ss:$8 sps:$4 sm:$0xff]  }
 0x6aa   :  { %v26176_v33 = vld [vmem:[%s36414_s1 + $0x4480] ss:$8 sps:$4 sm:$0xff]  }
 0x6ac   :  { %17670 = vmatpush1.bf16.msra.mxu1 %v26085_v45  ;;  %19351 = vmatpush1.bf16.msra.mxu0 %v26088_v57  ;;  %v26181_v45 = vld [vmem:[%s36414_s1 + $0x1b94] ss:$8 sps:$4 sm:$0xff]  }
 0x6ad   :  { %17671 = vmatprep.subr.bf16.mxu1 %v26093_v22  ;;  %19352 = vmatprep.subr.bf16.mxu0 %v26096_v39  ;;  %v26184_v57 = vld [vmem:[%s36414_s1 + $0x4494] ss:$8 sps:$4 sm:$0xff]   ;;  %v26179_v22 = vld [vmem:[%s36414_s1 + $0x1b90] ss:$8 sps:$4 sm:$0xff]  }
 0x6ae   :  { %v26182_v39 = vld [vmem:[%s36414_s1 + $0x4490] ss:$8 sps:$4 sm:$0xff]  }
 0x6b0   :  { %17672 = vmatpush1.bf16.msra.mxu1 %v26091_v51  ;;  %19353 = vmatpush1.bf16.msra.mxu0 %v26094_v23  ;;  %v26187_v51 = vld [vmem:[%s36414_s1 + $0x1ba4] ss:$8 sps:$4 sm:$0xff]  }
 0x6b1   :  { %17673 = vmatprep.subr.bf16.mxu1 %v26099_v26  ;;  %19354 = vmatprep.subr.bf16.mxu0 %v26102_v63  ;;  %v26190_v23 = vld [vmem:[%s36414_s1 + $0x44a4] ss:$8 sps:$4 sm:$0xff]   ;;  %v26185_v26 = vld [vmem:[%s36414_s1 + $0x1ba0] ss:$8 sps:$4 sm:$0xff]  }
 0x6b2   :  { %v26188_v63 = vld [vmem:[%s36414_s1 + $0x44a0] ss:$8 sps:$4 sm:$0xff]  }
 0x6b4   :  { %17674 = vmatpush1.bf16.msra.mxu1 %v26097_v30  ;;  %19355 = vmatpush1.bf16.msra.mxu0 %v26100_v19  ;;  %v26193_v30 = vld [vmem:[%s36414_s1 + $0x1bb4] ss:$8 sps:$4 sm:$0xff]  }
 0x6b5   :  { %17675 = vmatprep.subr.bf16.mxu1 %v26105_v21  ;;  %19356 = vmatprep.subr.bf16.mxu0 %v26108_v31  ;;  %v26196_v19 = vld [vmem:[%s36414_s1 + $0x44b4] ss:$8 sps:$4 sm:$0xff]   ;;  %v26191_v21 = vld [vmem:[%s36414_s1 + $0x1bb0] ss:$8 sps:$4 sm:$0xff]  }
 0x6b6   :  { %v26194_v31 = vld [vmem:[%s36414_s1 + $0x44b0] ss:$8 sps:$4 sm:$0xff]  }
 0x6b8   :  { %17676 = vmatpush1.bf16.msra.mxu1 %v26103_v24  ;;  %19357 = vmatpush1.bf16.msra.mxu0 %v26106_v5  ;;  %v26199_v24 = vld [vmem:[%s36414_s1 + $0x1bc4] ss:$8 sps:$4 sm:$0xff]  }
 0x6b9   :  { %17677 = vmatprep.subr.bf16.mxu1 %v26111_v36  ;;  %19358 = vmatprep.subr.bf16.mxu0 %v26114_v27  ;;  %v26202_v5 = vld [vmem:[%s36414_s1 + $0x44c4] ss:$8 sps:$4 sm:$0xff]   ;;  %v26197_v36 = vld [vmem:[%s36414_s1 + $0x1bc0] ss:$8 sps:$4 sm:$0xff]  }
 0x6ba   :  { %v26200_v27 = vld [vmem:[%s36414_s1 + $0x44c0] ss:$8 sps:$4 sm:$0xff]  }
 0x6bc   :  { %17678 = vmatpush1.bf16.msra.mxu1 %v26109_v28  ;;  %19359 = vmatpush1.bf16.msra.mxu0 %v26112_v37  ;;  %v26205_v28 = vld [vmem:[%s36414_s1 + $0x1bd4] ss:$8 sps:$4 sm:$0xff]  }
 0x6bd   :  { %17679 = vmatprep.subr.bf16.mxu1 %v26117_v38  ;;  %19360 = vmatprep.subr.bf16.mxu0 %v26120_v11  ;;  %v26208_v37 = vld [vmem:[%s36414_s1 + $0x44d4] ss:$8 sps:$4 sm:$0xff]   ;;  %v26203_v38 = vld [vmem:[%s36414_s1 + $0x1bd0] ss:$8 sps:$4 sm:$0xff]  }
 0x6be   :  { %v26206_v11 = vld [vmem:[%s36414_s1 + $0x44d0] ss:$8 sps:$4 sm:$0xff]  }
 0x6c0   :  { %17680 = vmatpush1.bf16.msra.mxu1 %v26115_v42  ;;  %19361 = vmatpush1.bf16.msra.mxu0 %v26118_v34  ;;  %v26211_v42 = vld [vmem:[%s36414_s1 + $0x1be4] ss:$8 sps:$4 sm:$0xff]  }
 0x6c1   :  { %17690 = vmatprep.subr.bf16.mxu1 %v26125_v35  ;;  %19371 = vmatprep.subr.bf16.mxu0 %v26130_v43  ;;  %v26214_v34 = vld [vmem:[%s36414_s1 + $0x44e4] ss:$8 sps:$4 sm:$0xff]   ;;  %v26209_v35 = vld [vmem:[%s36414_s1 + $0x1be0] ss:$8 sps:$4 sm:$0xff]  }
 0x6c2   :  { %v26212_v43 = vld [vmem:[%s36414_s1 + $0x44e0] ss:$8 sps:$4 sm:$0xff]  }
 0x6c3   :  { %17682 = vmatmul.mubr.bf16.vlgmr.msra.gmra.mrb[0].mxu1 %v20265_v44  ;;  %19363 = vmatmul.mubr.bf16.vlgmr.msra.gmra.mrb[0].mxu0 %v20347_v17  ;;  %v26217_v44 = vld [vmem:[%s36414_s1 + $0x1bf4] ss:$8 sps:$4 sm:$0xff]  }
 0x6c4   :  { %17691 = vmatpush1.bf16.msra.mxu1 %v26123_v48  ;;  %19372 = vmatpush1.bf16.msra.mxu0 %v26128_v40  ;;  %v26220_v17 = vld [vmem:[%s36414_s1 + $0x44f4] ss:$8 sps:$4 sm:$0xff]   ;;  %v26215_v48 = vld [vmem:[%s36414_s1 + $0x1bf0] ss:$8 sps:$4 sm:$0xff]  }
 0x6c5   :  { %17692 = vmatprep.subr.bf16.mxu1 %v26133_v41  ;;  %19373 = vmatprep.subr.bf16.mxu0 %v26136_v49  ;;  %v26218_v40 = vld [vmem:[%s36414_s1 + $0x44f0] ss:$8 sps:$4 sm:$0xff]   ;;  %v26225_v41 = vld [vmem:[%s36414_s1 + $0x1c04] ss:$8 sps:$4 sm:$0xff]  }
 0x6c6   :  { %17722 = vmatprep.mubr.bf16.mxu1 %v20268_v50  ;;  %19403 = vmatprep.mubr.bf16.mxu0 %v20350_v18  ;;  %v26230_v49 = vld [vmem:[%s36414_s1 + $0x4504] ss:$8 sps:$4 sm:$0xff]   ;;  %v20267_v50 = vcombine.low %v33299_v46, %v33299_v46  ;;  %v20349_v18 = vcombine.low %v33304_v47, %v33304_v47  ;;  %v26228_v46 = vld [vmem:[%s36414_s1 + $0x4500] ss:$8 sps:$4 sm:$0xff]   ;;  %v26233_v47 = vld [vmem:[%s36414_s1 + $0x1c14] ss:$8 sps:$4 sm:$0xff]  }
 0x6c8   :  { %17693 = vmatpush1.bf16.msra.mxu1 %v26131_v52  ;;  %19374 = vmatpush1.bf16.msra.mxu0 %v26134_v53  ;;  %v33509_v52 = vld [vmem:[%s36413_s0 + $0xe0] sm:$0xff]  ;;  %v33514_v53 = vld [vmem:[%s36413_s0 + $0x228] sm:$0xff] }
 0x6c9   :  { %17694 = vmatprep.subr.bf16.mxu1 %v26139_v54  ;;  %19375 = vmatprep.subr.bf16.mxu0 %v26142_v55  ;;  %v26223_v54 = vld [vmem:[%s36414_s1 + $0x1c00] ss:$8 sps:$4 sm:$0xff]   ;;  %v26236_v55 = vld [vmem:[%s36414_s1 + $0x4514] ss:$8 sps:$4 sm:$0xff]  }
 0x6cc   :  { %17695 = vmatpush1.bf16.msra.mxu1 %v26137_v56  ;;  %19376 = vmatpush1.bf16.msra.mxu0 %v26140_v25  ;;  %v20270_v56 = vcombine.high %v33509_v52, %v33509_v52  ;;  %v20352_v25 = vcombine.high %v33514_v53, %v33514_v53 }
 0x6cd   :  { %17696 = vmatprep.subr.bf16.mxu1 %v26145_v58  ;;  %19377 = vmatprep.subr.bf16.mxu0 %v26148_v59  ;;  %v26231_v58 = vld [vmem:[%s36414_s1 + $0x1c10] ss:$8 sps:$4 sm:$0xff]  }
 0x6ce   :  { %v26234_v59 = vld [vmem:[%s36414_s1 + $0x4510] ss:$8 sps:$4 sm:$0xff]  }
 0x6d0   :  { %17697 = vmatpush1.bf16.msra.mxu1 %v26143_v60  ;;  %19378 = vmatpush1.bf16.msra.mxu0 %v26146_v61  ;;  %v26239_v60 = vld [vmem:[%s36414_s1 + $0x1c24] ss:$8 sps:$4 sm:$0xff]  }
 0x6d1   :  { %17698 = vmatprep.subr.bf16.mxu1 %v26151_v62  ;;  %19379 = vmatprep.subr.bf16.mxu0 %v26154_v20  ;;  %v26242_v61 = vld [vmem:[%s36414_s1 + $0x4524] ss:$8 sps:$4 sm:$0xff]   ;;  %v26237_v62 = vld [vmem:[%s36414_s1 + $0x1c20] ss:$8 sps:$4 sm:$0xff]  }
 0x6d2   :  { %v26240_v20 = vld [vmem:[%s36414_s1 + $0x4520] ss:$8 sps:$4 sm:$0xff]  }
 0x6d4   :  { %17699 = vmatpush1.bf16.msra.mxu1 %v26149_v0  ;;  %19380 = vmatpush1.bf16.msra.mxu0 %v26152_v1  ;;  %v26245_v0 = vld [vmem:[%s36414_s1 + $0x1c34] ss:$8 sps:$4 sm:$0xff]  }
 0x6d5   :  { %17700 = vmatprep.subr.bf16.mxu1 %v26157_v2  ;;  %19381 = vmatprep.subr.bf16.mxu0 %v26160_v3  ;;  %v26248_v1 = vld [vmem:[%s36414_s1 + $0x4534] ss:$8 sps:$4 sm:$0xff]   ;;  %v26243_v2 = vld [vmem:[%s36414_s1 + $0x1c30] ss:$8 sps:$4 sm:$0xff]  }
 0x6d6   :  { %v26246_v3 = vld [vmem:[%s36414_s1 + $0x4530] ss:$8 sps:$4 sm:$0xff]  }
 0x6d8   :  { %17701 = vmatpush1.bf16.msra.mxu1 %v26155_v4  ;;  %19382 = vmatpush1.bf16.msra.mxu0 %v26158_v32  ;;  %v26251_v4 = vld [vmem:[%s36414_s1 + $0x1c44] ss:$8 sps:$4 sm:$0xff]  }
 0x6d9   :  { %17702 = vmatprep.subr.bf16.mxu1 %v26163_v6  ;;  %19383 = vmatprep.subr.bf16.mxu0 %v26166_v7  ;;  %v26254_v32 = vld [vmem:[%s36414_s1 + $0x4544] ss:$8 sps:$4 sm:$0xff]   ;;  %v26249_v6 = vld [vmem:[%s36414_s1 + $0x1c40] ss:$8 sps:$4 sm:$0xff]  }
 0x6da   :  { %v26252_v7 = vld [vmem:[%s36414_s1 + $0x4540] ss:$8 sps:$4 sm:$0xff]  }
 0x6dc   :  { %17703 = vmatpush1.bf16.msra.mxu1 %v26161_v8  ;;  %19384 = vmatpush1.bf16.msra.mxu0 %v26164_v9  ;;  %v26257_v8 = vld [vmem:[%s36414_s1 + $0x1c54] ss:$8 sps:$4 sm:$0xff]  }
 0x6dd   :  { %17704 = vmatprep.subr.bf16.mxu1 %v26169_v10  ;;  %19385 = vmatprep.subr.bf16.mxu0 %v26172_v29  ;;  %v26260_v9 = vld [vmem:[%s36414_s1 + $0x4554] ss:$8 sps:$4 sm:$0xff]   ;;  %v26255_v10 = vld [vmem:[%s36414_s1 + $0x1c50] ss:$8 sps:$4 sm:$0xff]  }
 0x6de   :  { %v26258_v29 = vld [vmem:[%s36414_s1 + $0x4550] ss:$8 sps:$4 sm:$0xff]  }
 0x6e0   :  { %17705 = vmatpush1.bf16.msra.mxu1 %v26167_v12  ;;  %19386 = vmatpush1.bf16.msra.mxu0 %v26170_v13  ;;  %v26263_v12 = vld [vmem:[%s36414_s1 + $0x1c64] ss:$8 sps:$4 sm:$0xff]  }
 0x6e1   :  { %17706 = vmatprep.subr.bf16.mxu1 %v26175_v14  ;;  %19387 = vmatprep.subr.bf16.mxu0 %v26178_v15  ;;  %v26266_v13 = vld [vmem:[%s36414_s1 + $0x4564] ss:$8 sps:$4 sm:$0xff]   ;;  %v26261_v14 = vld [vmem:[%s36414_s1 + $0x1c60] ss:$8 sps:$4 sm:$0xff]  }
 0x6e2   :  { %v26264_v15 = vld [vmem:[%s36414_s1 + $0x4560] ss:$8 sps:$4 sm:$0xff]  }
 0x6e4   :  { %17707 = vmatpush1.bf16.msra.mxu1 %v26173_v16  ;;  %19388 = vmatpush1.bf16.msra.mxu0 %v26176_v33  ;;  %v26269_v16 = vld [vmem:[%s36414_s1 + $0x1c74] ss:$8 sps:$4 sm:$0xff]  }
 0x6e5   :  { %17708 = vmatprep.subr.bf16.mxu1 %v26181_v45  ;;  %19389 = vmatprep.subr.bf16.mxu0 %v26184_v57  ;;  %v26272_v33 = vld [vmem:[%s36414_s1 + $0x4574] ss:$8 sps:$4 sm:$0xff]   ;;  %v26267_v45 = vld [vmem:[%s36414_s1 + $0x1c70] ss:$8 sps:$4 sm:$0xff]  }
 0x6e6   :  { %v26270_v57 = vld [vmem:[%s36414_s1 + $0x4570] ss:$8 sps:$4 sm:$0xff]  }
 0x6e8   :  { %17709 = vmatpush1.bf16.msra.mxu1 %v26179_v22  ;;  %19390 = vmatpush1.bf16.msra.mxu0 %v26182_v39  ;;  %v26275_v22 = vld [vmem:[%s36414_s1 + $0x1c84] ss:$8 sps:$4 sm:$0xff]  }
 0x6e9   :  { %17710 = vmatprep.subr.bf16.mxu1 %v26187_v51  ;;  %19391 = vmatprep.subr.bf16.mxu0 %v26190_v23  ;;  %v26278_v39 = vld [vmem:[%s36414_s1 + $0x4584] ss:$8 sps:$4 sm:$0xff]   ;;  %v26273_v51 = vld [vmem:[%s36414_s1 + $0x1c80] ss:$8 sps:$4 sm:$0xff]  }
 0x6ea   :  { %v26276_v23 = vld [vmem:[%s36414_s1 + $0x4580] ss:$8 sps:$4 sm:$0xff]  }
 0x6ec   :  { %17711 = vmatpush1.bf16.msra.mxu1 %v26185_v26  ;;  %19392 = vmatpush1.bf16.msra.mxu0 %v26188_v63  ;;  %v26281_v26 = vld [vmem:[%s36414_s1 + $0x1c94] ss:$8 sps:$4 sm:$0xff]  }
 0x6ed   :  { %17712 = vmatprep.subr.bf16.mxu1 %v26193_v30  ;;  %19393 = vmatprep.subr.bf16.mxu0 %v26196_v19  ;;  %v26284_v63 = vld [vmem:[%s36414_s1 + $0x4594] ss:$8 sps:$4 sm:$0xff]   ;;  %v26279_v30 = vld [vmem:[%s36414_s1 + $0x1c90] ss:$8 sps:$4 sm:$0xff]  }
 0x6ee   :  { %v26282_v19 = vld [vmem:[%s36414_s1 + $0x4590] ss:$8 sps:$4 sm:$0xff]  }
 0x6f0   :  { %17713 = vmatpush1.bf16.msra.mxu1 %v26191_v21  ;;  %19394 = vmatpush1.bf16.msra.mxu0 %v26194_v31  ;;  %v26287_v21 = vld [vmem:[%s36414_s1 + $0x1ca4] ss:$8 sps:$4 sm:$0xff]  }
 0x6f1   :  { %17714 = vmatprep.subr.bf16.mxu1 %v26199_v24  ;;  %19395 = vmatprep.subr.bf16.mxu0 %v26202_v5  ;;  %v26290_v31 = vld [vmem:[%s36414_s1 + $0x45a4] ss:$8 sps:$4 sm:$0xff]   ;;  %v26285_v24 = vld [vmem:[%s36414_s1 + $0x1ca0] ss:$8 sps:$4 sm:$0xff]  }
 0x6f2   :  { %v26288_v5 = vld [vmem:[%s36414_s1 + $0x45a0] ss:$8 sps:$4 sm:$0xff]  }
 0x6f4   :  { %17715 = vmatpush1.bf16.msra.mxu1 %v26197_v36  ;;  %19396 = vmatpush1.bf16.msra.mxu0 %v26200_v27  ;;  %v26293_v36 = vld [vmem:[%s36414_s1 + $0x1cb4] ss:$8 sps:$4 sm:$0xff]  }
 0x6f5   :  { %17716 = vmatprep.subr.bf16.mxu1 %v26205_v28  ;;  %19397 = vmatprep.subr.bf16.mxu0 %v26208_v37  ;;  %v26296_v27 = vld [vmem:[%s36414_s1 + $0x45b4] ss:$8 sps:$4 sm:$0xff]   ;;  %v26291_v28 = vld [vmem:[%s36414_s1 + $0x1cb0] ss:$8 sps:$4 sm:$0xff]  }
 0x6f6   :  { %v26294_v37 = vld [vmem:[%s36414_s1 + $0x45b0] ss:$8 sps:$4 sm:$0xff]  }
 0x6f8   :  { %17717 = vmatpush1.bf16.msra.mxu1 %v26203_v38  ;;  %19398 = vmatpush1.bf16.msra.mxu0 %v26206_v11  ;;  %v26299_v38 = vld [vmem:[%s36414_s1 + $0x1cc4] ss:$8 sps:$4 sm:$0xff]  }
 0x6f9   :  { %17718 = vmatprep.subr.bf16.mxu1 %v26211_v42  ;;  %19399 = vmatprep.subr.bf16.mxu0 %v26214_v34  ;;  %v26302_v11 = vld [vmem:[%s36414_s1 + $0x45c4] ss:$8 sps:$4 sm:$0xff]   ;;  %v26297_v42 = vld [vmem:[%s36414_s1 + $0x1cc0] ss:$8 sps:$4 sm:$0xff]  }
 0x6fa   :  { %v26300_v34 = vld [vmem:[%s36414_s1 + $0x45c0] ss:$8 sps:$4 sm:$0xff]  }
 0x6fc   :  { %17719 = vmatpush1.bf16.msra.mxu1 %v26209_v35  ;;  %19400 = vmatpush1.bf16.msra.mxu0 %v26212_v43  ;;  %v26305_v35 = vld [vmem:[%s36414_s1 + $0x1cd4] ss:$8 sps:$4 sm:$0xff]  }
 0x6fd   :  { %17720 = vmatprep.subr.bf16.mxu1 %v26217_v44  ;;  %19401 = vmatprep.subr.bf16.mxu0 %v26220_v17  ;;  %v26308_v43 = vld [vmem:[%s36414_s1 + $0x45d4] ss:$8 sps:$4 sm:$0xff]   ;;  %v26303_v44 = vld [vmem:[%s36414_s1 + $0x1cd0] ss:$8 sps:$4 sm:$0xff]  }
 0x6fe   :  { %v26306_v17 = vld [vmem:[%s36414_s1 + $0x45d0] ss:$8 sps:$4 sm:$0xff]  }
 0x700   :  { %17721 = vmatpush1.bf16.msra.mxu1 %v26215_v48  ;;  %19402 = vmatpush1.bf16.msra.mxu0 %v26218_v40  ;;  %v26311_v48 = vld [vmem:[%s36414_s1 + $0x1ce4] ss:$8 sps:$4 sm:$0xff]  }
 0x701   :  { %17731 = vmatprep.subr.bf16.mxu1 %v26225_v41  ;;  %19412 = vmatprep.subr.bf16.mxu0 %v26230_v49  ;;  %v26314_v40 = vld [vmem:[%s36414_s1 + $0x45e4] ss:$8 sps:$4 sm:$0xff]   ;;  %v26309_v41 = vld [vmem:[%s36414_s1 + $0x1ce0] ss:$8 sps:$4 sm:$0xff]  }
 0x702   :  { %v26312_v49 = vld [vmem:[%s36414_s1 + $0x45e0] ss:$8 sps:$4 sm:$0xff]  }
 0x703   :  { %17723 = vmatmul.mubr.bf16.vlgmr.msra.gmra.mrb[0].mxu1 %v20267_v50  ;;  %19404 = vmatmul.mubr.bf16.vlgmr.msra.gmra.mrb[0].mxu0 %v20349_v18  ;;  %v26317_v50 = vld [vmem:[%s36414_s1 + $0x1cf4] ss:$8 sps:$4 sm:$0xff]  }
 0x704   :  { %17732 = vmatpush1.bf16.msra.mxu1 %v26223_v54  ;;  %19413 = vmatpush1.bf16.msra.mxu0 %v26228_v46  ;;  %v26320_v18 = vld [vmem:[%s36414_s1 + $0x45f4] ss:$8 sps:$4 sm:$0xff]   ;;  %v26315_v54 = vld [vmem:[%s36414_s1 + $0x1cf0] ss:$8 sps:$4 sm:$0xff]  }
 0x705   :  { %17733 = vmatprep.subr.bf16.mxu1 %v26233_v47  ;;  %19414 = vmatprep.subr.bf16.mxu0 %v26236_v55  ;;  %v26318_v46 = vld [vmem:[%s36414_s1 + $0x45f0] ss:$8 sps:$4 sm:$0xff]   ;;  %v26325_v47 = vld [vmem:[%s36414_s1 + $0x1d04] ss:$8 sps:$4 sm:$0xff]  }
 0x706   :  { %17763 = vmatprep.mubr.bf16.mxu1 %v20270_v56  ;;  %19444 = vmatprep.mubr.bf16.mxu0 %v20352_v25  ;;  %v26330_v55 = vld [vmem:[%s36414_s1 + $0x4604] ss:$8 sps:$4 sm:$0xff]   ;;  %v20269_v56 = vcombine.low %v33509_v52, %v33509_v52  ;;  %v20351_v25 = vcombine.low %v33514_v53, %v33514_v53  ;;  %v26328_v52 = vld [vmem:[%s36414_s1 + $0x4600] ss:$8 sps:$4 sm:$0xff]   ;;  %v26333_v53 = vld [vmem:[%s36414_s1 + $0x1d14] ss:$8 sps:$4 sm:$0xff]  }
 0x708   :  { %17734 = vmatpush1.bf16.msra.mxu1 %v26231_v58  ;;  %19415 = vmatpush1.bf16.msra.mxu0 %v26234_v59  ;;  %v33719_v58 = vld [vmem:[%s36413_s0 + $0xe8] sm:$0xff]  ;;  %v33724_v59 = vld [vmem:[%s36413_s0 + $0x230] sm:$0xff] }
 0x709   :  { %17735 = vmatprep.subr.bf16.mxu1 %v26239_v60  ;;  %19416 = vmatprep.subr.bf16.mxu0 %v26242_v61  ;;  %v26323_v60 = vld [vmem:[%s36414_s1 + $0x1d00] ss:$8 sps:$4 sm:$0xff]   ;;  %v26336_v61 = vld [vmem:[%s36414_s1 + $0x4614] ss:$8 sps:$4 sm:$0xff]  }
 0x70c   :  { %17736 = vmatpush1.bf16.msra.mxu1 %v26237_v62  ;;  %19417 = vmatpush1.bf16.msra.mxu0 %v26240_v20  ;;  %v20272_v62 = vcombine.high %v33719_v58, %v33719_v58  ;;  %v20354_v20 = vcombine.high %v33724_v59, %v33724_v59 }
 0x70d   :  { %17737 = vmatprep.subr.bf16.mxu1 %v26245_v0  ;;  %19418 = vmatprep.subr.bf16.mxu0 %v26248_v1  ;;  %v26331_v0 = vld [vmem:[%s36414_s1 + $0x1d10] ss:$8 sps:$4 sm:$0xff]  }
 0x70e   :  { %v26334_v1 = vld [vmem:[%s36414_s1 + $0x4610] ss:$8 sps:$4 sm:$0xff]  }
 0x710   :  { %17738 = vmatpush1.bf16.msra.mxu1 %v26243_v2  ;;  %19419 = vmatpush1.bf16.msra.mxu0 %v26246_v3  ;;  %v26339_v2 = vld [vmem:[%s36414_s1 + $0x1d24] ss:$8 sps:$4 sm:$0xff]  }
 0x711   :  { %17739 = vmatprep.subr.bf16.mxu1 %v26251_v4  ;;  %19420 = vmatprep.subr.bf16.mxu0 %v26254_v32  ;;  %v26342_v3 = vld [vmem:[%s36414_s1 + $0x4624] ss:$8 sps:$4 sm:$0xff]   ;;  %v26337_v4 = vld [vmem:[%s36414_s1 + $0x1d20] ss:$8 sps:$4 sm:$0xff]  }
 0x712   :  { %v26340_v32 = vld [vmem:[%s36414_s1 + $0x4620] ss:$8 sps:$4 sm:$0xff]  }
 0x714   :  { %17740 = vmatpush1.bf16.msra.mxu1 %v26249_v6  ;;  %19421 = vmatpush1.bf16.msra.mxu0 %v26252_v7  ;;  %v26345_v6 = vld [vmem:[%s36414_s1 + $0x1d34] ss:$8 sps:$4 sm:$0xff]  }
 0x715   :  { %17741 = vmatprep.subr.bf16.mxu1 %v26257_v8  ;;  %19422 = vmatprep.subr.bf16.mxu0 %v26260_v9  ;;  %v26348_v7 = vld [vmem:[%s36414_s1 + $0x4634] ss:$8 sps:$4 sm:$0xff]   ;;  %v26343_v8 = vld [vmem:[%s36414_s1 + $0x1d30] ss:$8 sps:$4 sm:$0xff]  }
 0x716   :  { %v26346_v9 = vld [vmem:[%s36414_s1 + $0x4630] ss:$8 sps:$4 sm:$0xff]  }
 0x718   :  { %17742 = vmatpush1.bf16.msra.mxu1 %v26255_v10  ;;  %19423 = vmatpush1.bf16.msra.mxu0 %v26258_v29  ;;  %v26351_v10 = vld [vmem:[%s36414_s1 + $0x1d44] ss:$8 sps:$4 sm:$0xff]  }
 0x719   :  { %17743 = vmatprep.subr.bf16.mxu1 %v26263_v12  ;;  %19424 = vmatprep.subr.bf16.mxu0 %v26266_v13  ;;  %v26354_v29 = vld [vmem:[%s36414_s1 + $0x4644] ss:$8 sps:$4 sm:$0xff]   ;;  %v26349_v12 = vld [vmem:[%s36414_s1 + $0x1d40] ss:$8 sps:$4 sm:$0xff]  }
 0x71a   :  { %v26352_v13 = vld [vmem:[%s36414_s1 + $0x4640] ss:$8 sps:$4 sm:$0xff]  }
 0x71c   :  { %17744 = vmatpush1.bf16.msra.mxu1 %v26261_v14  ;;  %19425 = vmatpush1.bf16.msra.mxu0 %v26264_v15  ;;  %v26357_v14 = vld [vmem:[%s36414_s1 + $0x1d54] ss:$8 sps:$4 sm:$0xff]  }
 0x71d   :  { %17745 = vmatprep.subr.bf16.mxu1 %v26269_v16  ;;  %19426 = vmatprep.subr.bf16.mxu0 %v26272_v33  ;;  %v26360_v15 = vld [vmem:[%s36414_s1 + $0x4654] ss:$8 sps:$4 sm:$0xff]   ;;  %v26355_v16 = vld [vmem:[%s36414_s1 + $0x1d50] ss:$8 sps:$4 sm:$0xff]  }
 0x71e   :  { %v26358_v33 = vld [vmem:[%s36414_s1 + $0x4650] ss:$8 sps:$4 sm:$0xff]  }
 0x720   :  { %17746 = vmatpush1.bf16.msra.mxu1 %v26267_v45  ;;  %19427 = vmatpush1.bf16.msra.mxu0 %v26270_v57  ;;  %v26363_v45 = vld [vmem:[%s36414_s1 + $0x1d64] ss:$8 sps:$4 sm:$0xff]  }
 0x721   :  { %17747 = vmatprep.subr.bf16.mxu1 %v26275_v22  ;;  %19428 = vmatprep.subr.bf16.mxu0 %v26278_v39  ;;  %v26366_v57 = vld [vmem:[%s36414_s1 + $0x4664] ss:$8 sps:$4 sm:$0xff]   ;;  %v26361_v22 = vld [vmem:[%s36414_s1 + $0x1d60] ss:$8 sps:$4 sm:$0xff]  }
 0x722   :  { %v26364_v39 = vld [vmem:[%s36414_s1 + $0x4660] ss:$8 sps:$4 sm:$0xff]  }
 0x724   :  { %17748 = vmatpush1.bf16.msra.mxu1 %v26273_v51  ;;  %19429 = vmatpush1.bf16.msra.mxu0 %v26276_v23  ;;  %v26369_v51 = vld [vmem:[%s36414_s1 + $0x1d74] ss:$8 sps:$4 sm:$0xff]  }
 0x725   :  { %17749 = vmatprep.subr.bf16.mxu1 %v26281_v26  ;;  %19430 = vmatprep.subr.bf16.mxu0 %v26284_v63  ;;  %v26372_v23 = vld [vmem:[%s36414_s1 + $0x4674] ss:$8 sps:$4 sm:$0xff]   ;;  %v26367_v26 = vld [vmem:[%s36414_s1 + $0x1d70] ss:$8 sps:$4 sm:$0xff]  }
 0x726   :  { %v26370_v63 = vld [vmem:[%s36414_s1 + $0x4670] ss:$8 sps:$4 sm:$0xff]  }
 0x728   :  { %17750 = vmatpush1.bf16.msra.mxu1 %v26279_v30  ;;  %19431 = vmatpush1.bf16.msra.mxu0 %v26282_v19  ;;  %v26375_v30 = vld [vmem:[%s36414_s1 + $0x1d84] ss:$8 sps:$4 sm:$0xff]  }
 0x729   :  { %17751 = vmatprep.subr.bf16.mxu1 %v26287_v21  ;;  %19432 = vmatprep.subr.bf16.mxu0 %v26290_v31  ;;  %v26378_v19 = vld [vmem:[%s36414_s1 + $0x4684] ss:$8 sps:$4 sm:$0xff]   ;;  %v26373_v21 = vld [vmem:[%s36414_s1 + $0x1d80] ss:$8 sps:$4 sm:$0xff]  }
 0x72a   :  { %v26376_v31 = vld [vmem:[%s36414_s1 + $0x4680] ss:$8 sps:$4 sm:$0xff]  }
 0x72c   :  { %17752 = vmatpush1.bf16.msra.mxu1 %v26285_v24  ;;  %19433 = vmatpush1.bf16.msra.mxu0 %v26288_v5  ;;  %v26381_v24 = vld [vmem:[%s36414_s1 + $0x1d94] ss:$8 sps:$4 sm:$0xff]  }
 0x72d   :  { %17753 = vmatprep.subr.bf16.mxu1 %v26293_v36  ;;  %19434 = vmatprep.subr.bf16.mxu0 %v26296_v27  ;;  %v26384_v5 = vld [vmem:[%s36414_s1 + $0x4694] ss:$8 sps:$4 sm:$0xff]   ;;  %v26379_v36 = vld [vmem:[%s36414_s1 + $0x1d90] ss:$8 sps:$4 sm:$0xff]  }
 0x72e   :  { %v26382_v27 = vld [vmem:[%s36414_s1 + $0x4690] ss:$8 sps:$4 sm:$0xff]  }
 0x730   :  { %17754 = vmatpush1.bf16.msra.mxu1 %v26291_v28  ;;  %19435 = vmatpush1.bf16.msra.mxu0 %v26294_v37  ;;  %v26387_v28 = vld [vmem:[%s36414_s1 + $0x1da4] ss:$8 sps:$4 sm:$0xff]  }
 0x731   :  { %17755 = vmatprep.subr.bf16.mxu1 %v26299_v38  ;;  %19436 = vmatprep.subr.bf16.mxu0 %v26302_v11  ;;  %v26390_v37 = vld [vmem:[%s36414_s1 + $0x46a4] ss:$8 sps:$4 sm:$0xff]   ;;  %v26385_v38 = vld [vmem:[%s36414_s1 + $0x1da0] ss:$8 sps:$4 sm:$0xff]  }
 0x732   :  { %v26388_v11 = vld [vmem:[%s36414_s1 + $0x46a0] ss:$8 sps:$4 sm:$0xff]  }
 0x734   :  { %17756 = vmatpush1.bf16.msra.mxu1 %v26297_v42  ;;  %19437 = vmatpush1.bf16.msra.mxu0 %v26300_v34  ;;  %v26393_v42 = vld [vmem:[%s36414_s1 + $0x1db4] ss:$8 sps:$4 sm:$0xff]  }
 0x735   :  { %17757 = vmatprep.subr.bf16.mxu1 %v26305_v35  ;;  %19438 = vmatprep.subr.bf16.mxu0 %v26308_v43  ;;  %v26396_v34 = vld [vmem:[%s36414_s1 + $0x46b4] ss:$8 sps:$4 sm:$0xff]   ;;  %v26391_v35 = vld [vmem:[%s36414_s1 + $0x1db0] ss:$8 sps:$4 sm:$0xff]  }
 0x736   :  { %v26394_v43 = vld [vmem:[%s36414_s1 + $0x46b0] ss:$8 sps:$4 sm:$0xff]  }
 0x738   :  { %17758 = vmatpush1.bf16.msra.mxu1 %v26303_v44  ;;  %19439 = vmatpush1.bf16.msra.mxu0 %v26306_v17  ;;  %v26399_v44 = vld [vmem:[%s36414_s1 + $0x1dc4] ss:$8 sps:$4 sm:$0xff]  }
 0x739   :  { %17759 = vmatprep.subr.bf16.mxu1 %v26311_v48  ;;  %19440 = vmatprep.subr.bf16.mxu0 %v26314_v40  ;;  %v26402_v17 = vld [vmem:[%s36414_s1 + $0x46c4] ss:$8 sps:$4 sm:$0xff]   ;;  %v26397_v48 = vld [vmem:[%s36414_s1 + $0x1dc0] ss:$8 sps:$4 sm:$0xff]  }
 0x73a   :  { %v26400_v40 = vld [vmem:[%s36414_s1 + $0x46c0] ss:$8 sps:$4 sm:$0xff]  }
 0x73c   :  { %17760 = vmatpush1.bf16.msra.mxu1 %v26309_v41  ;;  %19441 = vmatpush1.bf16.msra.mxu0 %v26312_v49  ;;  %v26405_v41 = vld [vmem:[%s36414_s1 + $0x1dd4] ss:$8 sps:$4 sm:$0xff]  }
 0x73d   :  { %17761 = vmatprep.subr.bf16.mxu1 %v26317_v50  ;;  %19442 = vmatprep.subr.bf16.mxu0 %v26320_v18  ;;  %v26408_v49 = vld [vmem:[%s36414_s1 + $0x46d4] ss:$8 sps:$4 sm:$0xff]   ;;  %v26403_v50 = vld [vmem:[%s36414_s1 + $0x1dd0] ss:$8 sps:$4 sm:$0xff]  }
 0x73e   :  { %v26406_v18 = vld [vmem:[%s36414_s1 + $0x46d0] ss:$8 sps:$4 sm:$0xff]  }
 0x740   :  { %17762 = vmatpush1.bf16.msra.mxu1 %v26315_v54  ;;  %19443 = vmatpush1.bf16.msra.mxu0 %v26318_v46  ;;  %v26411_v54 = vld [vmem:[%s36414_s1 + $0x1de4] ss:$8 sps:$4 sm:$0xff]  }
 0x741   :  { %17772 = vmatprep.subr.bf16.mxu1 %v26325_v47  ;;  %19453 = vmatprep.subr.bf16.mxu0 %v26330_v55  ;;  %v26414_v46 = vld [vmem:[%s36414_s1 + $0x46e4] ss:$8 sps:$4 sm:$0xff]   ;;  %v26409_v47 = vld [vmem:[%s36414_s1 + $0x1de0] ss:$8 sps:$4 sm:$0xff]  }
 0x742   :  { %v26412_v55 = vld [vmem:[%s36414_s1 + $0x46e0] ss:$8 sps:$4 sm:$0xff]  }
 0x743   :  { %17764 = vmatmul.mubr.bf16.vlgmr.msra.gmra.mrb[0].mxu1 %v20269_v56  ;;  %19445 = vmatmul.mubr.bf16.vlgmr.msra.gmra.mrb[0].mxu0 %v20351_v25  ;;  %v26417_v56 = vld [vmem:[%s36414_s1 + $0x1df4] ss:$8 sps:$4 sm:$0xff]  }
 0x744   :  { %17773 = vmatpush1.bf16.msra.mxu1 %v26323_v60  ;;  %19454 = vmatpush1.bf16.msra.mxu0 %v26328_v52  ;;  %v26420_v25 = vld [vmem:[%s36414_s1 + $0x46f4] ss:$8 sps:$4 sm:$0xff]   ;;  %v26415_v60 = vld [vmem:[%s36414_s1 + $0x1df0] ss:$8 sps:$4 sm:$0xff]  }
 0x745   :  { %17774 = vmatprep.subr.bf16.mxu1 %v26333_v53  ;;  %19455 = vmatprep.subr.bf16.mxu0 %v26336_v61  ;;  %v26418_v52 = vld [vmem:[%s36414_s1 + $0x46f0] ss:$8 sps:$4 sm:$0xff]   ;;  %v26425_v53 = vld [vmem:[%s36414_s1 + $0x1e04] ss:$8 sps:$4 sm:$0xff]  }
 0x746   :  { %17804 = vmatprep.mubr.bf16.mxu1 %v20272_v62  ;;  %19485 = vmatprep.mubr.bf16.mxu0 %v20354_v20  ;;  %v26430_v61 = vld [vmem:[%s36414_s1 + $0x4704] ss:$8 sps:$4 sm:$0xff]   ;;  %v20271_v62 = vcombine.low %v33719_v58, %v33719_v58  ;;  %v20353_v20 = vcombine.low %v33724_v59, %v33724_v59  ;;  %v26428_v58 = vld [vmem:[%s36414_s1 + $0x4700] ss:$8 sps:$4 sm:$0xff]   ;;  %v26433_v59 = vld [vmem:[%s36414_s1 + $0x1e14] ss:$8 sps:$4 sm:$0xff]  }
 0x748   :  { %17775 = vmatpush1.bf16.msra.mxu1 %v26331_v0  ;;  %19456 = vmatpush1.bf16.msra.mxu0 %v26334_v1  ;;  %v33929_v0 = vld [vmem:[%s36413_s0 + $0xf0] sm:$0xff]  ;;  %v33934_v1 = vld [vmem:[%s36413_s0 + $0x238] sm:$0xff] }
 0x749   :  { %17776 = vmatprep.subr.bf16.mxu1 %v26339_v2  ;;  %19457 = vmatprep.subr.bf16.mxu0 %v26342_v3  ;;  %v26423_v2 = vld [vmem:[%s36414_s1 + $0x1e00] ss:$8 sps:$4 sm:$0xff]   ;;  %v26436_v3 = vld [vmem:[%s36414_s1 + $0x4714] ss:$8 sps:$4 sm:$0xff]  }
 0x74c   :  { %17777 = vmatpush1.bf16.msra.mxu1 %v26337_v4  ;;  %19458 = vmatpush1.bf16.msra.mxu0 %v26340_v32  ;;  %v20274_v4 = vcombine.high %v33929_v0, %v33929_v0  ;;  %v20356_v32 = vcombine.high %v33934_v1, %v33934_v1 }
 0x74d   :  { %17778 = vmatprep.subr.bf16.mxu1 %v26345_v6  ;;  %19459 = vmatprep.subr.bf16.mxu0 %v26348_v7  ;;  %v26431_v6 = vld [vmem:[%s36414_s1 + $0x1e10] ss:$8 sps:$4 sm:$0xff]  }
 0x74e   :  { %v26434_v7 = vld [vmem:[%s36414_s1 + $0x4710] ss:$8 sps:$4 sm:$0xff]  }
 0x750   :  { %17779 = vmatpush1.bf16.msra.mxu1 %v26343_v8  ;;  %19460 = vmatpush1.bf16.msra.mxu0 %v26346_v9  ;;  %v26439_v8 = vld [vmem:[%s36414_s1 + $0x1e24] ss:$8 sps:$4 sm:$0xff]  }
 0x751   :  { %17780 = vmatprep.subr.bf16.mxu1 %v26351_v10  ;;  %19461 = vmatprep.subr.bf16.mxu0 %v26354_v29  ;;  %v26442_v9 = vld [vmem:[%s36414_s1 + $0x4724] ss:$8 sps:$4 sm:$0xff]   ;;  %v26437_v10 = vld [vmem:[%s36414_s1 + $0x1e20] ss:$8 sps:$4 sm:$0xff]  }
 0x752   :  { %v26440_v29 = vld [vmem:[%s36414_s1 + $0x4720] ss:$8 sps:$4 sm:$0xff]  }
 0x754   :  { %17781 = vmatpush1.bf16.msra.mxu1 %v26349_v12  ;;  %19462 = vmatpush1.bf16.msra.mxu0 %v26352_v13  ;;  %v26445_v12 = vld [vmem:[%s36414_s1 + $0x1e34] ss:$8 sps:$4 sm:$0xff]  }
 0x755   :  { %17782 = vmatprep.subr.bf16.mxu1 %v26357_v14  ;;  %19463 = vmatprep.subr.bf16.mxu0 %v26360_v15  ;;  %v26448_v13 = vld [vmem:[%s36414_s1 + $0x4734] ss:$8 sps:$4 sm:$0xff]   ;;  %v26443_v14 = vld [vmem:[%s36414_s1 + $0x1e30] ss:$8 sps:$4 sm:$0xff]  }
 0x756   :  { %v26446_v15 = vld [vmem:[%s36414_s1 + $0x4730] ss:$8 sps:$4 sm:$0xff]  }
 0x758   :  { %17783 = vmatpush1.bf16.msra.mxu1 %v26355_v16  ;;  %19464 = vmatpush1.bf16.msra.mxu0 %v26358_v33  ;;  %v26451_v16 = vld [vmem:[%s36414_s1 + $0x1e44] ss:$8 sps:$4 sm:$0xff]  }
 0x759   :  { %17784 = vmatprep.subr.bf16.mxu1 %v26363_v45  ;;  %19465 = vmatprep.subr.bf16.mxu0 %v26366_v57  ;;  %v26454_v33 = vld [vmem:[%s36414_s1 + $0x4744] ss:$8 sps:$4 sm:$0xff]   ;;  %v26449_v45 = vld [vmem:[%s36414_s1 + $0x1e40] ss:$8 sps:$4 sm:$0xff]  }
 0x75a   :  { %v26452_v57 = vld [vmem:[%s36414_s1 + $0x4740] ss:$8 sps:$4 sm:$0xff]  }
 0x75c   :  { %17785 = vmatpush1.bf16.msra.mxu1 %v26361_v22  ;;  %19466 = vmatpush1.bf16.msra.mxu0 %v26364_v39  ;;  %v26457_v22 = vld [vmem:[%s36414_s1 + $0x1e54] ss:$8 sps:$4 sm:$0xff]  }
 0x75d   :  { %17786 = vmatprep.subr.bf16.mxu1 %v26369_v51  ;;  %19467 = vmatprep.subr.bf16.mxu0 %v26372_v23  ;;  %v26460_v39 = vld [vmem:[%s36414_s1 + $0x4754] ss:$8 sps:$4 sm:$0xff]   ;;  %v26455_v51 = vld [vmem:[%s36414_s1 + $0x1e50] ss:$8 sps:$4 sm:$0xff]  }
 0x75e   :  { %v26458_v23 = vld [vmem:[%s36414_s1 + $0x4750] ss:$8 sps:$4 sm:$0xff]  }
 0x760   :  { %17787 = vmatpush1.bf16.msra.mxu1 %v26367_v26  ;;  %19468 = vmatpush1.bf16.msra.mxu0 %v26370_v63  ;;  %v26463_v26 = vld [vmem:[%s36414_s1 + $0x1e64] ss:$8 sps:$4 sm:$0xff]  }
 0x761   :  { %17788 = vmatprep.subr.bf16.mxu1 %v26375_v30  ;;  %19469 = vmatprep.subr.bf16.mxu0 %v26378_v19  ;;  %v26466_v63 = vld [vmem:[%s36414_s1 + $0x4764] ss:$8 sps:$4 sm:$0xff]   ;;  %v26461_v30 = vld [vmem:[%s36414_s1 + $0x1e60] ss:$8 sps:$4 sm:$0xff]  }
 0x762   :  { %v26464_v19 = vld [vmem:[%s36414_s1 + $0x4760] ss:$8 sps:$4 sm:$0xff]  }
 0x764   :  { %17789 = vmatpush1.bf16.msra.mxu1 %v26373_v21  ;;  %19470 = vmatpush1.bf16.msra.mxu0 %v26376_v31  ;;  %v26469_v21 = vld [vmem:[%s36414_s1 + $0x1e74] ss:$8 sps:$4 sm:$0xff]  }
 0x765   :  { %17790 = vmatprep.subr.bf16.mxu1 %v26381_v24  ;;  %19471 = vmatprep.subr.bf16.mxu0 %v26384_v5  ;;  %v26472_v31 = vld [vmem:[%s36414_s1 + $0x4774] ss:$8 sps:$4 sm:$0xff]   ;;  %v26467_v24 = vld [vmem:[%s36414_s1 + $0x1e70] ss:$8 sps:$4 sm:$0xff]  }
 0x766   :  { %v26470_v5 = vld [vmem:[%s36414_s1 + $0x4770] ss:$8 sps:$4 sm:$0xff]  }
 0x768   :  { %17791 = vmatpush1.bf16.msra.mxu1 %v26379_v36  ;;  %19472 = vmatpush1.bf16.msra.mxu0 %v26382_v27  ;;  %v26475_v36 = vld [vmem:[%s36414_s1 + $0x1e84] ss:$8 sps:$4 sm:$0xff]  }
 0x769   :  { %17792 = vmatprep.subr.bf16.mxu1 %v26387_v28  ;;  %19473 = vmatprep.subr.bf16.mxu0 %v26390_v37  ;;  %v26478_v27 = vld [vmem:[%s36414_s1 + $0x4784] ss:$8 sps:$4 sm:$0xff]   ;;  %v26473_v28 = vld [vmem:[%s36414_s1 + $0x1e80] ss:$8 sps:$4 sm:$0xff]  }
 0x76a   :  { %v26476_v37 = vld [vmem:[%s36414_s1 + $0x4780] ss:$8 sps:$4 sm:$0xff]  }
 0x76c   :  { %17793 = vmatpush1.bf16.msra.mxu1 %v26385_v38  ;;  %19474 = vmatpush1.bf16.msra.mxu0 %v26388_v11  ;;  %v26481_v38 = vld [vmem:[%s36414_s1 + $0x1e94] ss:$8 sps:$4 sm:$0xff]  }
 0x76d   :  { %17794 = vmatprep.subr.bf16.mxu1 %v26393_v42  ;;  %19475 = vmatprep.subr.bf16.mxu0 %v26396_v34  ;;  %v26484_v11 = vld [vmem:[%s36414_s1 + $0x4794] ss:$8 sps:$4 sm:$0xff]   ;;  %v26479_v42 = vld [vmem:[%s36414_s1 + $0x1e90] ss:$8 sps:$4 sm:$0xff]  }
 0x76e   :  { %v26482_v34 = vld [vmem:[%s36414_s1 + $0x4790] ss:$8 sps:$4 sm:$0xff]  }
 0x770   :  { %17795 = vmatpush1.bf16.msra.mxu1 %v26391_v35  ;;  %19476 = vmatpush1.bf16.msra.mxu0 %v26394_v43  ;;  %v26487_v35 = vld [vmem:[%s36414_s1 + $0x1ea4] ss:$8 sps:$4 sm:$0xff]  }
 0x771   :  { %17796 = vmatprep.subr.bf16.mxu1 %v26399_v44  ;;  %19477 = vmatprep.subr.bf16.mxu0 %v26402_v17  ;;  %v26490_v43 = vld [vmem:[%s36414_s1 + $0x47a4] ss:$8 sps:$4 sm:$0xff]   ;;  %v26485_v44 = vld [vmem:[%s36414_s1 + $0x1ea0] ss:$8 sps:$4 sm:$0xff]  }
 0x772   :  { %v26488_v17 = vld [vmem:[%s36414_s1 + $0x47a0] ss:$8 sps:$4 sm:$0xff]  }
 0x774   :  { %17797 = vmatpush1.bf16.msra.mxu1 %v26397_v48  ;;  %19478 = vmatpush1.bf16.msra.mxu0 %v26400_v40  ;;  %v26493_v48 = vld [vmem:[%s36414_s1 + $0x1eb4] ss:$8 sps:$4 sm:$0xff]  }
 0x775   :  { %17798 = vmatprep.subr.bf16.mxu1 %v26405_v41  ;;  %19479 = vmatprep.subr.bf16.mxu0 %v26408_v49  ;;  %v26496_v40 = vld [vmem:[%s36414_s1 + $0x47b4] ss:$8 sps:$4 sm:$0xff]   ;;  %v26491_v41 = vld [vmem:[%s36414_s1 + $0x1eb0] ss:$8 sps:$4 sm:$0xff]  }
 0x776   :  { %v26494_v49 = vld [vmem:[%s36414_s1 + $0x47b0] ss:$8 sps:$4 sm:$0xff]  }
 0x778   :  { %17799 = vmatpush1.bf16.msra.mxu1 %v26403_v50  ;;  %19480 = vmatpush1.bf16.msra.mxu0 %v26406_v18  ;;  %v26499_v50 = vld [vmem:[%s36414_s1 + $0x1ec4] ss:$8 sps:$4 sm:$0xff]  }
 0x779   :  { %17800 = vmatprep.subr.bf16.mxu1 %v26411_v54  ;;  %19481 = vmatprep.subr.bf16.mxu0 %v26414_v46  ;;  %v26502_v18 = vld [vmem:[%s36414_s1 + $0x47c4] ss:$8 sps:$4 sm:$0xff]   ;;  %v26497_v54 = vld [vmem:[%s36414_s1 + $0x1ec0] ss:$8 sps:$4 sm:$0xff]  }
 0x77a   :  { %v26500_v46 = vld [vmem:[%s36414_s1 + $0x47c0] ss:$8 sps:$4 sm:$0xff]  }
 0x77c   :  { %17801 = vmatpush1.bf16.msra.mxu1 %v26409_v47  ;;  %19482 = vmatpush1.bf16.msra.mxu0 %v26412_v55  ;;  %v26505_v47 = vld [vmem:[%s36414_s1 + $0x1ed4] ss:$8 sps:$4 sm:$0xff]  }
 0x77d   :  { %17802 = vmatprep.subr.bf16.mxu1 %v26417_v56  ;;  %19483 = vmatprep.subr.bf16.mxu0 %v26420_v25  ;;  %v26508_v55 = vld [vmem:[%s36414_s1 + $0x47d4] ss:$8 sps:$4 sm:$0xff]   ;;  %v26503_v56 = vld [vmem:[%s36414_s1 + $0x1ed0] ss:$8 sps:$4 sm:$0xff]  }
 0x77e   :  { %v26506_v25 = vld [vmem:[%s36414_s1 + $0x47d0] ss:$8 sps:$4 sm:$0xff]  }
 0x780   :  { %17803 = vmatpush1.bf16.msra.mxu1 %v26415_v60  ;;  %19484 = vmatpush1.bf16.msra.mxu0 %v26418_v52  ;;  %v26511_v60 = vld [vmem:[%s36414_s1 + $0x1ee4] ss:$8 sps:$4 sm:$0xff]  }
 0x781   :  { %17813 = vmatprep.subr.bf16.mxu1 %v26425_v53  ;;  %19494 = vmatprep.subr.bf16.mxu0 %v26430_v61  ;;  %v26514_v52 = vld [vmem:[%s36414_s1 + $0x47e4] ss:$8 sps:$4 sm:$0xff]   ;;  %v26509_v53 = vld [vmem:[%s36414_s1 + $0x1ee0] ss:$8 sps:$4 sm:$0xff]  }
 0x782   :  { %v26512_v61 = vld [vmem:[%s36414_s1 + $0x47e0] ss:$8 sps:$4 sm:$0xff]  }
 0x783   :  { %17805 = vmatmul.mubr.bf16.vlgmr.msra.gmra.mrb[0].mxu1 %v20271_v62  ;;  %19486 = vmatmul.mubr.bf16.vlgmr.msra.gmra.mrb[0].mxu0 %v20353_v20  ;;  %v26517_v62 = vld [vmem:[%s36414_s1 + $0x1ef4] ss:$8 sps:$4 sm:$0xff]  }
 0x784   :  { %17814 = vmatpush1.bf16.msra.mxu1 %v26423_v2  ;;  %19495 = vmatpush1.bf16.msra.mxu0 %v26428_v58  ;;  %v26520_v20 = vld [vmem:[%s36414_s1 + $0x47f4] ss:$8 sps:$4 sm:$0xff]   ;;  %v26515_v2 = vld [vmem:[%s36414_s1 + $0x1ef0] ss:$8 sps:$4 sm:$0xff]  }
 0x785   :  { %17815 = vmatprep.subr.bf16.mxu1 %v26433_v59  ;;  %19496 = vmatprep.subr.bf16.mxu0 %v26436_v3  ;;  %v26518_v58 = vld [vmem:[%s36414_s1 + $0x47f0] ss:$8 sps:$4 sm:$0xff]   ;;  %v26525_v59 = vld [vmem:[%s36414_s1 + $0x1f04] ss:$8 sps:$4 sm:$0xff]  }
 0x786   :  { %17845 = vmatprep.mubr.bf16.mxu1 %v20274_v4  ;;  %19526 = vmatprep.mubr.bf16.mxu0 %v20356_v32  ;;  %v26530_v3 = vld [vmem:[%s36414_s1 + $0x4804] ss:$8 sps:$4 sm:$0xff]   ;;  %v20273_v4 = vcombine.low %v33929_v0, %v33929_v0  ;;  %v20355_v32 = vcombine.low %v33934_v1, %v33934_v1  ;;  %v26528_v0 = vld [vmem:[%s36414_s1 + $0x4800] ss:$8 sps:$4 sm:$0xff]   ;;  %v26533_v1 = vld [vmem:[%s36414_s1 + $0x1f14] ss:$8 sps:$4 sm:$0xff]  }
 0x788   :  { %17816 = vmatpush1.bf16.msra.mxu1 %v26431_v6  ;;  %19497 = vmatpush1.bf16.msra.mxu0 %v26434_v7  ;;  %v34139_v6 = vld [vmem:[%s36413_s0 + $0xf8] sm:$0xff]  ;;  %v34144_v7 = vld [vmem:[%s36413_s0 + $0x240] sm:$0xff] }
 0x789   :  { %17817 = vmatprep.subr.bf16.mxu1 %v26439_v8  ;;  %19498 = vmatprep.subr.bf16.mxu0 %v26442_v9  ;;  %v26523_v8 = vld [vmem:[%s36414_s1 + $0x1f00] ss:$8 sps:$4 sm:$0xff]   ;;  %v26536_v9 = vld [vmem:[%s36414_s1 + $0x4814] ss:$8 sps:$4 sm:$0xff]  }
 0x78c   :  { %17818 = vmatpush1.bf16.msra.mxu1 %v26437_v10  ;;  %19499 = vmatpush1.bf16.msra.mxu0 %v26440_v29  ;;  %v20276_v10 = vcombine.high %v34139_v6, %v34139_v6  ;;  %v20358_v29 = vcombine.high %v34144_v7, %v34144_v7 }
 0x78d   :  { %17819 = vmatprep.subr.bf16.mxu1 %v26445_v12  ;;  %19500 = vmatprep.subr.bf16.mxu0 %v26448_v13  ;;  %v26531_v12 = vld [vmem:[%s36414_s1 + $0x1f10] ss:$8 sps:$4 sm:$0xff]  }
 0x78e   :  { %v26534_v13 = vld [vmem:[%s36414_s1 + $0x4810] ss:$8 sps:$4 sm:$0xff]  }
 0x790   :  { %17820 = vmatpush1.bf16.msra.mxu1 %v26443_v14  ;;  %19501 = vmatpush1.bf16.msra.mxu0 %v26446_v15  ;;  %v26539_v14 = vld [vmem:[%s36414_s1 + $0x1f24] ss:$8 sps:$4 sm:$0xff]  }
 0x791   :  { %17821 = vmatprep.subr.bf16.mxu1 %v26451_v16  ;;  %19502 = vmatprep.subr.bf16.mxu0 %v26454_v33  ;;  %v26542_v15 = vld [vmem:[%s36414_s1 + $0x4824] ss:$8 sps:$4 sm:$0xff]   ;;  %v26537_v16 = vld [vmem:[%s36414_s1 + $0x1f20] ss:$8 sps:$4 sm:$0xff]  }
 0x792   :  { %v26540_v33 = vld [vmem:[%s36414_s1 + $0x4820] ss:$8 sps:$4 sm:$0xff]  }
 0x794   :  { %17822 = vmatpush1.bf16.msra.mxu1 %v26449_v45  ;;  %19503 = vmatpush1.bf16.msra.mxu0 %v26452_v57  ;;  %v26545_v45 = vld [vmem:[%s36414_s1 + $0x1f34] ss:$8 sps:$4 sm:$0xff]  }
 0x795   :  { %17823 = vmatprep.subr.bf16.mxu1 %v26457_v22  ;;  %19504 = vmatprep.subr.bf16.mxu0 %v26460_v39  ;;  %v26548_v57 = vld [vmem:[%s36414_s1 + $0x4834] ss:$8 sps:$4 sm:$0xff]   ;;  %v26543_v22 = vld [vmem:[%s36414_s1 + $0x1f30] ss:$8 sps:$4 sm:$0xff]  }
 0x796   :  { %v26546_v39 = vld [vmem:[%s36414_s1 + $0x4830] ss:$8 sps:$4 sm:$0xff]  }
 0x798   :  { %17824 = vmatpush1.bf16.msra.mxu1 %v26455_v51  ;;  %19505 = vmatpush1.bf16.msra.mxu0 %v26458_v23  ;;  %v26551_v51 = vld [vmem:[%s36414_s1 + $0x1f44] ss:$8 sps:$4 sm:$0xff]  }
 0x799   :  { %17825 = vmatprep.subr.bf16.mxu1 %v26463_v26  ;;  %19506 = vmatprep.subr.bf16.mxu0 %v26466_v63  ;;  %v26554_v23 = vld [vmem:[%s36414_s1 + $0x4844] ss:$8 sps:$4 sm:$0xff]   ;;  %v26549_v26 = vld [vmem:[%s36414_s1 + $0x1f40] ss:$8 sps:$4 sm:$0xff]  }
 0x79a   :  { %v26552_v63 = vld [vmem:[%s36414_s1 + $0x4840] ss:$8 sps:$4 sm:$0xff]  }
 0x79c   :  { %17826 = vmatpush1.bf16.msra.mxu1 %v26461_v30  ;;  %19507 = vmatpush1.bf16.msra.mxu0 %v26464_v19  ;;  %v26557_v30 = vld [vmem:[%s36414_s1 + $0x1f54] ss:$8 sps:$4 sm:$0xff]  }
 0x79d   :  { %17827 = vmatprep.subr.bf16.mxu1 %v26469_v21  ;;  %19508 = vmatprep.subr.bf16.mxu0 %v26472_v31  ;;  %v26560_v19 = vld [vmem:[%s36414_s1 + $0x4854] ss:$8 sps:$4 sm:$0xff]   ;;  %v26555_v21 = vld [vmem:[%s36414_s1 + $0x1f50] ss:$8 sps:$4 sm:$0xff]  }
 0x79e   :  { %v26558_v31 = vld [vmem:[%s36414_s1 + $0x4850] ss:$8 sps:$4 sm:$0xff]  }
 0x7a0   :  { %17828 = vmatpush1.bf16.msra.mxu1 %v26467_v24  ;;  %19509 = vmatpush1.bf16.msra.mxu0 %v26470_v5  ;;  %v26563_v24 = vld [vmem:[%s36414_s1 + $0x1f64] ss:$8 sps:$4 sm:$0xff]  }
 0x7a1   :  { %17829 = vmatprep.subr.bf16.mxu1 %v26475_v36  ;;  %19510 = vmatprep.subr.bf16.mxu0 %v26478_v27  ;;  %v26566_v5 = vld [vmem:[%s36414_s1 + $0x4864] ss:$8 sps:$4 sm:$0xff]   ;;  %v26561_v36 = vld [vmem:[%s36414_s1 + $0x1f60] ss:$8 sps:$4 sm:$0xff]  }
 0x7a2   :  { %v26564_v27 = vld [vmem:[%s36414_s1 + $0x4860] ss:$8 sps:$4 sm:$0xff]  }
 0x7a4   :  { %17830 = vmatpush1.bf16.msra.mxu1 %v26473_v28  ;;  %19511 = vmatpush1.bf16.msra.mxu0 %v26476_v37  ;;  %v26569_v28 = vld [vmem:[%s36414_s1 + $0x1f74] ss:$8 sps:$4 sm:$0xff]  }
 0x7a5   :  { %17831 = vmatprep.subr.bf16.mxu1 %v26481_v38  ;;  %19512 = vmatprep.subr.bf16.mxu0 %v26484_v11  ;;  %v26572_v37 = vld [vmem:[%s36414_s1 + $0x4874] ss:$8 sps:$4 sm:$0xff]   ;;  %v26567_v38 = vld [vmem:[%s36414_s1 + $0x1f70] ss:$8 sps:$4 sm:$0xff]  }
 0x7a6   :  { %v26570_v11 = vld [vmem:[%s36414_s1 + $0x4870] ss:$8 sps:$4 sm:$0xff]  }
 0x7a8   :  { %17832 = vmatpush1.bf16.msra.mxu1 %v26479_v42  ;;  %19513 = vmatpush1.bf16.msra.mxu0 %v26482_v34  ;;  %v26575_v42 = vld [vmem:[%s36414_s1 + $0x1f84] ss:$8 sps:$4 sm:$0xff]  }
 0x7a9   :  { %17833 = vmatprep.subr.bf16.mxu1 %v26487_v35  ;;  %19514 = vmatprep.subr.bf16.mxu0 %v26490_v43  ;;  %v26578_v34 = vld [vmem:[%s36414_s1 + $0x4884] ss:$8 sps:$4 sm:$0xff]   ;;  %v26573_v35 = vld [vmem:[%s36414_s1 + $0x1f80] ss:$8 sps:$4 sm:$0xff]  }
 0x7aa   :  { %v26576_v43 = vld [vmem:[%s36414_s1 + $0x4880] ss:$8 sps:$4 sm:$0xff]  }
 0x7ac   :  { %17834 = vmatpush1.bf16.msra.mxu1 %v26485_v44  ;;  %19515 = vmatpush1.bf16.msra.mxu0 %v26488_v17  ;;  %v26581_v44 = vld [vmem:[%s36414_s1 + $0x1f94] ss:$8 sps:$4 sm:$0xff]  }
 0x7ad   :  { %17835 = vmatprep.subr.bf16.mxu1 %v26493_v48  ;;  %19516 = vmatprep.subr.bf16.mxu0 %v26496_v40  ;;  %v26584_v17 = vld [vmem:[%s36414_s1 + $0x4894] ss:$8 sps:$4 sm:$0xff]   ;;  %v26579_v48 = vld [vmem:[%s36414_s1 + $0x1f90] ss:$8 sps:$4 sm:$0xff]  }
 0x7ae   :  { %v26582_v40 = vld [vmem:[%s36414_s1 + $0x4890] ss:$8 sps:$4 sm:$0xff]  }
 0x7b0   :  { %17836 = vmatpush1.bf16.msra.mxu1 %v26491_v41  ;;  %19517 = vmatpush1.bf16.msra.mxu0 %v26494_v49  ;;  %v26587_v41 = vld [vmem:[%s36414_s1 + $0x1fa4] ss:$8 sps:$4 sm:$0xff]  }
 0x7b1   :  { %17837 = vmatprep.subr.bf16.mxu1 %v26499_v50  ;;  %19518 = vmatprep.subr.bf16.mxu0 %v26502_v18  ;;  %v26590_v49 = vld [vmem:[%s36414_s1 + $0x48a4] ss:$8 sps:$4 sm:$0xff]   ;;  %v26585_v50 = vld [vmem:[%s36414_s1 + $0x1fa0] ss:$8 sps:$4 sm:$0xff]  }
 0x7b2   :  { %v26588_v18 = vld [vmem:[%s36414_s1 + $0x48a0] ss:$8 sps:$4 sm:$0xff]  }
 0x7b4   :  { %17838 = vmatpush1.bf16.msra.mxu1 %v26497_v54  ;;  %19519 = vmatpush1.bf16.msra.mxu0 %v26500_v46  ;;  %v26593_v54 = vld [vmem:[%s36414_s1 + $0x1fb4] ss:$8 sps:$4 sm:$0xff]  }
 0x7b5   :  { %17839 = vmatprep.subr.bf16.mxu1 %v26505_v47  ;;  %19520 = vmatprep.subr.bf16.mxu0 %v26508_v55  ;;  %v26596_v46 = vld [vmem:[%s36414_s1 + $0x48b4] ss:$8 sps:$4 sm:$0xff]   ;;  %v26591_v47 = vld [vmem:[%s36414_s1 + $0x1fb0] ss:$8 sps:$4 sm:$0xff]  }
 0x7b6   :  { %v26594_v55 = vld [vmem:[%s36414_s1 + $0x48b0] ss:$8 sps:$4 sm:$0xff]  }
 0x7b8   :  { %17840 = vmatpush1.bf16.msra.mxu1 %v26503_v56  ;;  %19521 = vmatpush1.bf16.msra.mxu0 %v26506_v25  ;;  %v26599_v56 = vld [vmem:[%s36414_s1 + $0x1fc4] ss:$8 sps:$4 sm:$0xff]  }
 0x7b9   :  { %17841 = vmatprep.subr.bf16.mxu1 %v26511_v60  ;;  %19522 = vmatprep.subr.bf16.mxu0 %v26514_v52  ;;  %v26602_v25 = vld [vmem:[%s36414_s1 + $0x48c4] ss:$8 sps:$4 sm:$0xff]   ;;  %v26597_v60 = vld [vmem:[%s36414_s1 + $0x1fc0] ss:$8 sps:$4 sm:$0xff]  }
 0x7ba   :  { %v26600_v52 = vld [vmem:[%s36414_s1 + $0x48c0] ss:$8 sps:$4 sm:$0xff]  }
 0x7bc   :  { %17842 = vmatpush1.bf16.msra.mxu1 %v26509_v53  ;;  %19523 = vmatpush1.bf16.msra.mxu0 %v26512_v61  ;;  %v26605_v53 = vld [vmem:[%s36414_s1 + $0x1fd4] ss:$8 sps:$4 sm:$0xff]  }
 0x7bd   :  { %17843 = vmatprep.subr.bf16.mxu1 %v26517_v62  ;;  %19524 = vmatprep.subr.bf16.mxu0 %v26520_v20  ;;  %v26608_v61 = vld [vmem:[%s36414_s1 + $0x48d4] ss:$8 sps:$4 sm:$0xff]   ;;  %v26603_v62 = vld [vmem:[%s36414_s1 + $0x1fd0] ss:$8 sps:$4 sm:$0xff]  }
 0x7be   :  { %v26606_v20 = vld [vmem:[%s36414_s1 + $0x48d0] ss:$8 sps:$4 sm:$0xff]  }
 0x7c0   :  { %17844 = vmatpush1.bf16.msra.mxu1 %v26515_v2  ;;  %19525 = vmatpush1.bf16.msra.mxu0 %v26518_v58  ;;  %v26611_v2 = vld [vmem:[%s36414_s1 + $0x1fe4] ss:$8 sps:$4 sm:$0xff]  }
 0x7c1   :  { %17854 = vmatprep.subr.bf16.mxu1 %v26525_v59  ;;  %19535 = vmatprep.subr.bf16.mxu0 %v26530_v3  ;;  %v26614_v58 = vld [vmem:[%s36414_s1 + $0x48e4] ss:$8 sps:$4 sm:$0xff]   ;;  %v26609_v59 = vld [vmem:[%s36414_s1 + $0x1fe0] ss:$8 sps:$4 sm:$0xff]  }
 0x7c2   :  { %v26612_v3 = vld [vmem:[%s36414_s1 + $0x48e0] ss:$8 sps:$4 sm:$0xff]  }
 0x7c3   :  { %17846 = vmatmul.mubr.bf16.vlgmr.msra.gmra.mrb[0].mxu1 %v20273_v4  ;;  %19527 = vmatmul.mubr.bf16.vlgmr.msra.gmra.mrb[0].mxu0 %v20355_v32  ;;  %v26617_v4 = vld [vmem:[%s36414_s1 + $0x1ff4] ss:$8 sps:$4 sm:$0xff]  }
 0x7c4   :  { %17855 = vmatpush1.bf16.msra.mxu1 %v26523_v8  ;;  %19536 = vmatpush1.bf16.msra.mxu0 %v26528_v0  ;;  %v26620_v32 = vld [vmem:[%s36414_s1 + $0x48f4] ss:$8 sps:$4 sm:$0xff]   ;;  %v26615_v8 = vld [vmem:[%s36414_s1 + $0x1ff0] ss:$8 sps:$4 sm:$0xff]  }
 0x7c5   :  { %17856 = vmatprep.subr.bf16.mxu1 %v26533_v1  ;;  %19537 = vmatprep.subr.bf16.mxu0 %v26536_v9  ;;  %v26618_v0 = vld [vmem:[%s36414_s1 + $0x48f0] ss:$8 sps:$4 sm:$0xff]   ;;  %v26625_v1 = vld [vmem:[%s36414_s1 + $0x2004] ss:$8 sps:$4 sm:$0xff]  }
 0x7c6   :  { %17886 = vmatprep.mubr.bf16.mxu1 %v20276_v10  ;;  %19567 = vmatprep.mubr.bf16.mxu0 %v20358_v29  ;;  %v26630_v9 = vld [vmem:[%s36414_s1 + $0x4904] ss:$8 sps:$4 sm:$0xff]   ;;  %v20275_v10 = vcombine.low %v34139_v6, %v34139_v6  ;;  %v20357_v29 = vcombine.low %v34144_v7, %v34144_v7  ;;  %v26628_v6 = vld [vmem:[%s36414_s1 + $0x4900] ss:$8 sps:$4 sm:$0xff]   ;;  %v26633_v7 = vld [vmem:[%s36414_s1 + $0x2014] ss:$8 sps:$4 sm:$0xff]  }
 0x7c8   :  { %17857 = vmatpush1.bf16.msra.mxu1 %v26531_v12  ;;  %19538 = vmatpush1.bf16.msra.mxu0 %v26534_v13  ;;  %v34349_v12 = vld [vmem:[%s36413_s0 + $0x100] sm:$0xff]  ;;  %v34354_v13 = vld [vmem:[%s36413_s0 + $0x248] sm:$0xff] }
 0x7c9   :  { %17858 = vmatprep.subr.bf16.mxu1 %v26539_v14  ;;  %19539 = vmatprep.subr.bf16.mxu0 %v26542_v15  ;;  %v26623_v14 = vld [vmem:[%s36414_s1 + $0x2000] ss:$8 sps:$4 sm:$0xff]   ;;  %v26636_v15 = vld [vmem:[%s36414_s1 + $0x4914] ss:$8 sps:$4 sm:$0xff]  }
 0x7cc   :  { %17859 = vmatpush1.bf16.msra.mxu1 %v26537_v16  ;;  %19540 = vmatpush1.bf16.msra.mxu0 %v26540_v33  ;;  %v20278_v16 = vcombine.high %v34349_v12, %v34349_v12  ;;  %v20360_v33 = vcombine.high %v34354_v13, %v34354_v13 }
 0x7cd   :  { %17860 = vmatprep.subr.bf16.mxu1 %v26545_v45  ;;  %19541 = vmatprep.subr.bf16.mxu0 %v26548_v57  ;;  %v26631_v45 = vld [vmem:[%s36414_s1 + $0x2010] ss:$8 sps:$4 sm:$0xff]  }
 0x7ce   :  { %v26634_v57 = vld [vmem:[%s36414_s1 + $0x4910] ss:$8 sps:$4 sm:$0xff]  }
 0x7d0   :  { %17861 = vmatpush1.bf16.msra.mxu1 %v26543_v22  ;;  %19542 = vmatpush1.bf16.msra.mxu0 %v26546_v39  ;;  %v26639_v22 = vld [vmem:[%s36414_s1 + $0x2024] ss:$8 sps:$4 sm:$0xff]  }
 0x7d1   :  { %17862 = vmatprep.subr.bf16.mxu1 %v26551_v51  ;;  %19543 = vmatprep.subr.bf16.mxu0 %v26554_v23  ;;  %v26642_v39 = vld [vmem:[%s36414_s1 + $0x4924] ss:$8 sps:$4 sm:$0xff]   ;;  %v26637_v51 = vld [vmem:[%s36414_s1 + $0x2020] ss:$8 sps:$4 sm:$0xff]  }
 0x7d2   :  { %v26640_v23 = vld [vmem:[%s36414_s1 + $0x4920] ss:$8 sps:$4 sm:$0xff]  }
 0x7d4   :  { %17863 = vmatpush1.bf16.msra.mxu1 %v26549_v26  ;;  %19544 = vmatpush1.bf16.msra.mxu0 %v26552_v63  ;;  %v26645_v26 = vld [vmem:[%s36414_s1 + $0x2034] ss:$8 sps:$4 sm:$0xff]  }
 0x7d5   :  { %17864 = vmatprep.subr.bf16.mxu1 %v26557_v30  ;;  %19545 = vmatprep.subr.bf16.mxu0 %v26560_v19  ;;  %v26648_v63 = vld [vmem:[%s36414_s1 + $0x4934] ss:$8 sps:$4 sm:$0xff]   ;;  %v26643_v30 = vld [vmem:[%s36414_s1 + $0x2030] ss:$8 sps:$4 sm:$0xff]  }
 0x7d6   :  { %v26646_v19 = vld [vmem:[%s36414_s1 + $0x4930] ss:$8 sps:$4 sm:$0xff]  }
 0x7d8   :  { %17865 = vmatpush1.bf16.msra.mxu1 %v26555_v21  ;;  %19546 = vmatpush1.bf16.msra.mxu0 %v26558_v31  ;;  %v26651_v21 = vld [vmem:[%s36414_s1 + $0x2044] ss:$8 sps:$4 sm:$0xff]  }
 0x7d9   :  { %17866 = vmatprep.subr.bf16.mxu1 %v26563_v24  ;;  %19547 = vmatprep.subr.bf16.mxu0 %v26566_v5  ;;  %v26654_v31 = vld [vmem:[%s36414_s1 + $0x4944] ss:$8 sps:$4 sm:$0xff]   ;;  %v26649_v24 = vld [vmem:[%s36414_s1 + $0x2040] ss:$8 sps:$4 sm:$0xff]  }
 0x7da   :  { %v26652_v5 = vld [vmem:[%s36414_s1 + $0x4940] ss:$8 sps:$4 sm:$0xff]  }
 0x7dc   :  { %17867 = vmatpush1.bf16.msra.mxu1 %v26561_v36  ;;  %19548 = vmatpush1.bf16.msra.mxu0 %v26564_v27  ;;  %v26657_v36 = vld [vmem:[%s36414_s1 + $0x2054] ss:$8 sps:$4 sm:$0xff]  }
 0x7dd   :  { %17868 = vmatprep.subr.bf16.mxu1 %v26569_v28  ;;  %19549 = vmatprep.subr.bf16.mxu0 %v26572_v37  ;;  %v26660_v27 = vld [vmem:[%s36414_s1 + $0x4954] ss:$8 sps:$4 sm:$0xff]   ;;  %v26655_v28 = vld [vmem:[%s36414_s1 + $0x2050] ss:$8 sps:$4 sm:$0xff]  }
 0x7de   :  { %v26658_v37 = vld [vmem:[%s36414_s1 + $0x4950] ss:$8 sps:$4 sm:$0xff]  }
 0x7e0   :  { %17869 = vmatpush1.bf16.msra.mxu1 %v26567_v38  ;;  %19550 = vmatpush1.bf16.msra.mxu0 %v26570_v11  ;;  %v26663_v38 = vld [vmem:[%s36414_s1 + $0x2064] ss:$8 sps:$4 sm:$0xff]  }
 0x7e1   :  { %17870 = vmatprep.subr.bf16.mxu1 %v26575_v42  ;;  %19551 = vmatprep.subr.bf16.mxu0 %v26578_v34  ;;  %v26666_v11 = vld [vmem:[%s36414_s1 + $0x4964] ss:$8 sps:$4 sm:$0xff]   ;;  %v26661_v42 = vld [vmem:[%s36414_s1 + $0x2060] ss:$8 sps:$4 sm:$0xff]  }
 0x7e2   :  { %v26664_v34 = vld [vmem:[%s36414_s1 + $0x4960] ss:$8 sps:$4 sm:$0xff]  }
 0x7e4   :  { %17871 = vmatpush1.bf16.msra.mxu1 %v26573_v35  ;;  %19552 = vmatpush1.bf16.msra.mxu0 %v26576_v43  ;;  %v26669_v35 = vld [vmem:[%s36414_s1 + $0x2074] ss:$8 sps:$4 sm:$0xff]  }
 0x7e5   :  { %17872 = vmatprep.subr.bf16.mxu1 %v26581_v44  ;;  %19553 = vmatprep.subr.bf16.mxu0 %v26584_v17  ;;  %v26672_v43 = vld [vmem:[%s36414_s1 + $0x4974] ss:$8 sps:$4 sm:$0xff]   ;;  %v26667_v44 = vld [vmem:[%s36414_s1 + $0x2070] ss:$8 sps:$4 sm:$0xff]  }
 0x7e6   :  { %v26670_v17 = vld [vmem:[%s36414_s1 + $0x4970] ss:$8 sps:$4 sm:$0xff]  }
 0x7e8   :  { %17873 = vmatpush1.bf16.msra.mxu1 %v26579_v48  ;;  %19554 = vmatpush1.bf16.msra.mxu0 %v26582_v40  ;;  %v26675_v48 = vld [vmem:[%s36414_s1 + $0x2084] ss:$8 sps:$4 sm:$0xff]  }
 0x7e9   :  { %17874 = vmatprep.subr.bf16.mxu1 %v26587_v41  ;;  %19555 = vmatprep.subr.bf16.mxu0 %v26590_v49  ;;  %v26678_v40 = vld [vmem:[%s36414_s1 + $0x4984] ss:$8 sps:$4 sm:$0xff]   ;;  %v26673_v41 = vld [vmem:[%s36414_s1 + $0x2080] ss:$8 sps:$4 sm:$0xff]  }
 0x7ea   :  { %v26676_v49 = vld [vmem:[%s36414_s1 + $0x4980] ss:$8 sps:$4 sm:$0xff]  }
 0x7ec   :  { %17875 = vmatpush1.bf16.msra.mxu1 %v26585_v50  ;;  %19556 = vmatpush1.bf16.msra.mxu0 %v26588_v18  ;;  %v26681_v50 = vld [vmem:[%s36414_s1 + $0x2094] ss:$8 sps:$4 sm:$0xff]  }
 0x7ed   :  { %17876 = vmatprep.subr.bf16.mxu1 %v26593_v54  ;;  %19557 = vmatprep.subr.bf16.mxu0 %v26596_v46  ;;  %v26684_v18 = vld [vmem:[%s36414_s1 + $0x4994] ss:$8 sps:$4 sm:$0xff]   ;;  %v26679_v54 = vld [vmem:[%s36414_s1 + $0x2090] ss:$8 sps:$4 sm:$0xff]  }
 0x7ee   :  { %v26682_v46 = vld [vmem:[%s36414_s1 + $0x4990] ss:$8 sps:$4 sm:$0xff]  }
 0x7f0   :  { %17877 = vmatpush1.bf16.msra.mxu1 %v26591_v47  ;;  %19558 = vmatpush1.bf16.msra.mxu0 %v26594_v55  ;;  %v26687_v47 = vld [vmem:[%s36414_s1 + $0x20a4] ss:$8 sps:$4 sm:$0xff]  }
 0x7f1   :  { %17878 = vmatprep.subr.bf16.mxu1 %v26599_v56  ;;  %19559 = vmatprep.subr.bf16.mxu0 %v26602_v25  ;;  %v26690_v55 = vld [vmem:[%s36414_s1 + $0x49a4] ss:$8 sps:$4 sm:$0xff]   ;;  %v26685_v56 = vld [vmem:[%s36414_s1 + $0x20a0] ss:$8 sps:$4 sm:$0xff]  }
 0x7f2   :  { %v26688_v25 = vld [vmem:[%s36414_s1 + $0x49a0] ss:$8 sps:$4 sm:$0xff]  }
 0x7f4   :  { %17879 = vmatpush1.bf16.msra.mxu1 %v26597_v60  ;;  %19560 = vmatpush1.bf16.msra.mxu0 %v26600_v52  ;;  %v26693_v60 = vld [vmem:[%s36414_s1 + $0x20b4] ss:$8 sps:$4 sm:$0xff]  }
 0x7f5   :  { %17880 = vmatprep.subr.bf16.mxu1 %v26605_v53  ;;  %19561 = vmatprep.subr.bf16.mxu0 %v26608_v61  ;;  %v26696_v52 = vld [vmem:[%s36414_s1 + $0x49b4] ss:$8 sps:$4 sm:$0xff]   ;;  %v26691_v53 = vld [vmem:[%s36414_s1 + $0x20b0] ss:$8 sps:$4 sm:$0xff]  }
 0x7f6   :  { %v26694_v61 = vld [vmem:[%s36414_s1 + $0x49b0] ss:$8 sps:$4 sm:$0xff]  }
 0x7f8   :  { %17881 = vmatpush1.bf16.msra.mxu1 %v26603_v62  ;;  %19562 = vmatpush1.bf16.msra.mxu0 %v26606_v20  ;;  %v26699_v62 = vld [vmem:[%s36414_s1 + $0x20c4] ss:$8 sps:$4 sm:$0xff]  }
 0x7f9   :  { %17882 = vmatprep.subr.bf16.mxu1 %v26611_v2  ;;  %19563 = vmatprep.subr.bf16.mxu0 %v26614_v58  ;;  %v26702_v20 = vld [vmem:[%s36414_s1 + $0x49c4] ss:$8 sps:$4 sm:$0xff]   ;;  %v26697_v2 = vld [vmem:[%s36414_s1 + $0x20c0] ss:$8 sps:$4 sm:$0xff]  }
 0x7fa   :  { %v26700_v58 = vld [vmem:[%s36414_s1 + $0x49c0] ss:$8 sps:$4 sm:$0xff]  }
 0x7fc   :  { %17883 = vmatpush1.bf16.msra.mxu1 %v26609_v59  ;;  %19564 = vmatpush1.bf16.msra.mxu0 %v26612_v3  ;;  %v26705_v59 = vld [vmem:[%s36414_s1 + $0x20d4] ss:$8 sps:$4 sm:$0xff]  }
 0x7fd   :  { %17884 = vmatprep.subr.bf16.mxu1 %v26617_v4  ;;  %19565 = vmatprep.subr.bf16.mxu0 %v26620_v32  ;;  %v26708_v3 = vld [vmem:[%s36414_s1 + $0x49d4] ss:$8 sps:$4 sm:$0xff]   ;;  %v26703_v4 = vld [vmem:[%s36414_s1 + $0x20d0] ss:$8 sps:$4 sm:$0xff]  }
 0x7fe   :  { %v26706_v32 = vld [vmem:[%s36414_s1 + $0x49d0] ss:$8 sps:$4 sm:$0xff]  }
 0x800   :  { %17885 = vmatpush1.bf16.msra.mxu1 %v26615_v8  ;;  %19566 = vmatpush1.bf16.msra.mxu0 %v26618_v0  ;;  %v26711_v8 = vld [vmem:[%s36414_s1 + $0x20e4] ss:$8 sps:$4 sm:$0xff]  }
 0x801   :  { %17895 = vmatprep.subr.bf16.mxu1 %v26625_v1  ;;  %19576 = vmatprep.subr.bf16.mxu0 %v26630_v9  ;;  %v26714_v0 = vld [vmem:[%s36414_s1 + $0x49e4] ss:$8 sps:$4 sm:$0xff]   ;;  %v26709_v1 = vld [vmem:[%s36414_s1 + $0x20e0] ss:$8 sps:$4 sm:$0xff]  }
 0x802   :  { %v26712_v9 = vld [vmem:[%s36414_s1 + $0x49e0] ss:$8 sps:$4 sm:$0xff]  }
 0x803   :  { %17887 = vmatmul.mubr.bf16.vlgmr.msra.gmra.mrb[0].mxu1 %v20275_v10  ;;  %19568 = vmatmul.mubr.bf16.vlgmr.msra.gmra.mrb[0].mxu0 %v20357_v29  ;;  %v26717_v10 = vld [vmem:[%s36414_s1 + $0x20f4] ss:$8 sps:$4 sm:$0xff]  }
 0x804   :  { %17896 = vmatpush1.bf16.msra.mxu1 %v26623_v14  ;;  %19577 = vmatpush1.bf16.msra.mxu0 %v26628_v6  ;;  %v26720_v29 = vld [vmem:[%s36414_s1 + $0x49f4] ss:$8 sps:$4 sm:$0xff]   ;;  %v26715_v14 = vld [vmem:[%s36414_s1 + $0x20f0] ss:$8 sps:$4 sm:$0xff]  }
 0x805   :  { %17897 = vmatprep.subr.bf16.mxu1 %v26633_v7  ;;  %19578 = vmatprep.subr.bf16.mxu0 %v26636_v15  ;;  %v26718_v6 = vld [vmem:[%s36414_s1 + $0x49f0] ss:$8 sps:$4 sm:$0xff]   ;;  %v26725_v7 = vld [vmem:[%s36414_s1 + $0x2104] ss:$8 sps:$4 sm:$0xff]  }
 0x806   :  { %17927 = vmatprep.mubr.bf16.mxu1 %v20278_v16  ;;  %19608 = vmatprep.mubr.bf16.mxu0 %v20360_v33  ;;  %v26730_v15 = vld [vmem:[%s36414_s1 + $0x4a04] ss:$8 sps:$4 sm:$0xff]   ;;  %v20277_v16 = vcombine.low %v34349_v12, %v34349_v12  ;;  %v20359_v33 = vcombine.low %v34354_v13, %v34354_v13  ;;  %v26728_v12 = vld [vmem:[%s36414_s1 + $0x4a00] ss:$8 sps:$4 sm:$0xff]   ;;  %v26733_v13 = vld [vmem:[%s36414_s1 + $0x2114] ss:$8 sps:$4 sm:$0xff]  }
 0x808   :  { %17898 = vmatpush1.bf16.msra.mxu1 %v26631_v45  ;;  %19579 = vmatpush1.bf16.msra.mxu0 %v26634_v57  ;;  %v34559_v45 = vld [vmem:[%s36413_s0 + $0x108] sm:$0xff]  ;;  %v34564_v57 = vld [vmem:[%s36413_s0 + $0x250] sm:$0xff] }
 0x809   :  { %17899 = vmatprep.subr.bf16.mxu1 %v26639_v22  ;;  %19580 = vmatprep.subr.bf16.mxu0 %v26642_v39  ;;  %v26723_v22 = vld [vmem:[%s36414_s1 + $0x2100] ss:$8 sps:$4 sm:$0xff]   ;;  %v26736_v39 = vld [vmem:[%s36414_s1 + $0x4a14] ss:$8 sps:$4 sm:$0xff]  }
 0x80c   :  { %17900 = vmatpush1.bf16.msra.mxu1 %v26637_v51  ;;  %19581 = vmatpush1.bf16.msra.mxu0 %v26640_v23  ;;  %v20280_v51 = vcombine.high %v34559_v45, %v34559_v45  ;;  %v20362_v23 = vcombine.high %v34564_v57, %v34564_v57 }
 0x80d   :  { %17901 = vmatprep.subr.bf16.mxu1 %v26645_v26  ;;  %19582 = vmatprep.subr.bf16.mxu0 %v26648_v63  ;;  %v26731_v26 = vld [vmem:[%s36414_s1 + $0x2110] ss:$8 sps:$4 sm:$0xff]  }
 0x80e   :  { %v26734_v63 = vld [vmem:[%s36414_s1 + $0x4a10] ss:$8 sps:$4 sm:$0xff]  }
 0x810   :  { %17902 = vmatpush1.bf16.msra.mxu1 %v26643_v30  ;;  %19583 = vmatpush1.bf16.msra.mxu0 %v26646_v19  ;;  %v26739_v30 = vld [vmem:[%s36414_s1 + $0x2124] ss:$8 sps:$4 sm:$0xff]  }
 0x811   :  { %17903 = vmatprep.subr.bf16.mxu1 %v26651_v21  ;;  %19584 = vmatprep.subr.bf16.mxu0 %v26654_v31  ;;  %v26742_v19 = vld [vmem:[%s36414_s1 + $0x4a24] ss:$8 sps:$4 sm:$0xff]   ;;  %v26737_v21 = vld [vmem:[%s36414_s1 + $0x2120] ss:$8 sps:$4 sm:$0xff]  }
 0x812   :  { %v26740_v31 = vld [vmem:[%s36414_s1 + $0x4a20] ss:$8 sps:$4 sm:$0xff]  }
 0x814   :  { %17904 = vmatpush1.bf16.msra.mxu1 %v26649_v24  ;;  %19585 = vmatpush1.bf16.msra.mxu0 %v26652_v5  ;;  %v26745_v24 = vld [vmem:[%s36414_s1 + $0x2134] ss:$8 sps:$4 sm:$0xff]  }
 0x815   :  { %17905 = vmatprep.subr.bf16.mxu1 %v26657_v36  ;;  %19586 = vmatprep.subr.bf16.mxu0 %v26660_v27  ;;  %v26748_v5 = vld [vmem:[%s36414_s1 + $0x4a34] ss:$8 sps:$4 sm:$0xff]   ;;  %v26743_v36 = vld [vmem:[%s36414_s1 + $0x2130] ss:$8 sps:$4 sm:$0xff]  }
 0x816   :  { %v26746_v27 = vld [vmem:[%s36414_s1 + $0x4a30] ss:$8 sps:$4 sm:$0xff]  }
 0x818   :  { %17906 = vmatpush1.bf16.msra.mxu1 %v26655_v28  ;;  %19587 = vmatpush1.bf16.msra.mxu0 %v26658_v37  ;;  %v26751_v28 = vld [vmem:[%s36414_s1 + $0x2144] ss:$8 sps:$4 sm:$0xff]  }
 0x819   :  { %17907 = vmatprep.subr.bf16.mxu1 %v26663_v38  ;;  %19588 = vmatprep.subr.bf16.mxu0 %v26666_v11  ;;  %v26754_v37 = vld [vmem:[%s36414_s1 + $0x4a44] ss:$8 sps:$4 sm:$0xff]   ;;  %v26749_v38 = vld [vmem:[%s36414_s1 + $0x2140] ss:$8 sps:$4 sm:$0xff]  }
 0x81a   :  { %v26752_v11 = vld [vmem:[%s36414_s1 + $0x4a40] ss:$8 sps:$4 sm:$0xff]  }
 0x81c   :  { %17908 = vmatpush1.bf16.msra.mxu1 %v26661_v42  ;;  %19589 = vmatpush1.bf16.msra.mxu0 %v26664_v34  ;;  %v26757_v42 = vld [vmem:[%s36414_s1 + $0x2154] ss:$8 sps:$4 sm:$0xff]  }
 0x81d   :  { %17909 = vmatprep.subr.bf16.mxu1 %v26669_v35  ;;  %19590 = vmatprep.subr.bf16.mxu0 %v26672_v43  ;;  %v26760_v34 = vld [vmem:[%s36414_s1 + $0x4a54] ss:$8 sps:$4 sm:$0xff]   ;;  %v26755_v35 = vld [vmem:[%s36414_s1 + $0x2150] ss:$8 sps:$4 sm:$0xff]  }
 0x81e   :  { %v26758_v43 = vld [vmem:[%s36414_s1 + $0x4a50] ss:$8 sps:$4 sm:$0xff]  }
 0x820   :  { %17910 = vmatpush1.bf16.msra.mxu1 %v26667_v44  ;;  %19591 = vmatpush1.bf16.msra.mxu0 %v26670_v17  ;;  %v26763_v44 = vld [vmem:[%s36414_s1 + $0x2164] ss:$8 sps:$4 sm:$0xff]  }
 0x821   :  { %17911 = vmatprep.subr.bf16.mxu1 %v26675_v48  ;;  %19592 = vmatprep.subr.bf16.mxu0 %v26678_v40  ;;  %v26766_v17 = vld [vmem:[%s36414_s1 + $0x4a64] ss:$8 sps:$4 sm:$0xff]   ;;  %v26761_v48 = vld [vmem:[%s36414_s1 + $0x2160] ss:$8 sps:$4 sm:$0xff]  }
 0x822   :  { %v26764_v40 = vld [vmem:[%s36414_s1 + $0x4a60] ss:$8 sps:$4 sm:$0xff]  }
 0x824   :  { %17912 = vmatpush1.bf16.msra.mxu1 %v26673_v41  ;;  %19593 = vmatpush1.bf16.msra.mxu0 %v26676_v49  ;;  %v26769_v41 = vld [vmem:[%s36414_s1 + $0x2174] ss:$8 sps:$4 sm:$0xff]  }
 0x825   :  { %17913 = vmatprep.subr.bf16.mxu1 %v26681_v50  ;;  %19594 = vmatprep.subr.bf16.mxu0 %v26684_v18  ;;  %v26772_v49 = vld [vmem:[%s36414_s1 + $0x4a74] ss:$8 sps:$4 sm:$0xff]   ;;  %v26767_v50 = vld [vmem:[%s36414_s1 + $0x2170] ss:$8 sps:$4 sm:$0xff]  }
 0x826   :  { %v26770_v18 = vld [vmem:[%s36414_s1 + $0x4a70] ss:$8 sps:$4 sm:$0xff]  }
 0x828   :  { %17914 = vmatpush1.bf16.msra.mxu1 %v26679_v54  ;;  %19595 = vmatpush1.bf16.msra.mxu0 %v26682_v46  ;;  %v26775_v54 = vld [vmem:[%s36414_s1 + $0x2184] ss:$8 sps:$4 sm:$0xff]  }
 0x829   :  { %17915 = vmatprep.subr.bf16.mxu1 %v26687_v47  ;;  %19596 = vmatprep.subr.bf16.mxu0 %v26690_v55  ;;  %v26778_v46 = vld [vmem:[%s36414_s1 + $0x4a84] ss:$8 sps:$4 sm:$0xff]   ;;  %v26773_v47 = vld [vmem:[%s36414_s1 + $0x2180] ss:$8 sps:$4 sm:$0xff]  }
 0x82a   :  { %v26776_v55 = vld [vmem:[%s36414_s1 + $0x4a80] ss:$8 sps:$4 sm:$0xff]  }
 0x82c   :  { %17916 = vmatpush1.bf16.msra.mxu1 %v26685_v56  ;;  %19597 = vmatpush1.bf16.msra.mxu0 %v26688_v25  ;;  %v26781_v56 = vld [vmem:[%s36414_s1 + $0x2194] ss:$8 sps:$4 sm:$0xff]  }
 0x82d   :  { %17917 = vmatprep.subr.bf16.mxu1 %v26693_v60  ;;  %19598 = vmatprep.subr.bf16.mxu0 %v26696_v52  ;;  %v26784_v25 = vld [vmem:[%s36414_s1 + $0x4a94] ss:$8 sps:$4 sm:$0xff]   ;;  %v26779_v60 = vld [vmem:[%s36414_s1 + $0x2190] ss:$8 sps:$4 sm:$0xff]  }
 0x82e   :  { %v26782_v52 = vld [vmem:[%s36414_s1 + $0x4a90] ss:$8 sps:$4 sm:$0xff]  }
 0x830   :  { %17918 = vmatpush1.bf16.msra.mxu1 %v26691_v53  ;;  %19599 = vmatpush1.bf16.msra.mxu0 %v26694_v61  ;;  %v26787_v53 = vld [vmem:[%s36414_s1 + $0x21a4] ss:$8 sps:$4 sm:$0xff]  }
 0x831   :  { %17919 = vmatprep.subr.bf16.mxu1 %v26699_v62  ;;  %19600 = vmatprep.subr.bf16.mxu0 %v26702_v20  ;;  %v26790_v61 = vld [vmem:[%s36414_s1 + $0x4aa4] ss:$8 sps:$4 sm:$0xff]   ;;  %v26785_v62 = vld [vmem:[%s36414_s1 + $0x21a0] ss:$8 sps:$4 sm:$0xff]  }
 0x832   :  { %v26788_v20 = vld [vmem:[%s36414_s1 + $0x4aa0] ss:$8 sps:$4 sm:$0xff]  }
 0x834   :  { %17920 = vmatpush1.bf16.msra.mxu1 %v26697_v2  ;;  %19601 = vmatpush1.bf16.msra.mxu0 %v26700_v58  ;;  %v26793_v2 = vld [vmem:[%s36414_s1 + $0x21b4] ss:$8 sps:$4 sm:$0xff]  }
 0x835   :  { %17921 = vmatprep.subr.bf16.mxu1 %v26705_v59  ;;  %19602 = vmatprep.subr.bf16.mxu0 %v26708_v3  ;;  %v26796_v58 = vld [vmem:[%s36414_s1 + $0x4ab4] ss:$8 sps:$4 sm:$0xff]   ;;  %v26791_v59 = vld [vmem:[%s36414_s1 + $0x21b0] ss:$8 sps:$4 sm:$0xff]  }
 0x836   :  { %v26794_v3 = vld [vmem:[%s36414_s1 + $0x4ab0] ss:$8 sps:$4 sm:$0xff]  }
 0x838   :  { %17922 = vmatpush1.bf16.msra.mxu1 %v26703_v4  ;;  %19603 = vmatpush1.bf16.msra.mxu0 %v26706_v32  ;;  %v26799_v4 = vld [vmem:[%s36414_s1 + $0x21c4] ss:$8 sps:$4 sm:$0xff]  }
 0x839   :  { %17923 = vmatprep.subr.bf16.mxu1 %v26711_v8  ;;  %19604 = vmatprep.subr.bf16.mxu0 %v26714_v0  ;;  %v26802_v32 = vld [vmem:[%s36414_s1 + $0x4ac4] ss:$8 sps:$4 sm:$0xff]   ;;  %v26797_v8 = vld [vmem:[%s36414_s1 + $0x21c0] ss:$8 sps:$4 sm:$0xff]  }
 0x83a   :  { %v26800_v0 = vld [vmem:[%s36414_s1 + $0x4ac0] ss:$8 sps:$4 sm:$0xff]  }
 0x83c   :  { %17924 = vmatpush1.bf16.msra.mxu1 %v26709_v1  ;;  %19605 = vmatpush1.bf16.msra.mxu0 %v26712_v9  ;;  %v26805_v1 = vld [vmem:[%s36414_s1 + $0x21d4] ss:$8 sps:$4 sm:$0xff]  }
 0x83d   :  { %17925 = vmatprep.subr.bf16.mxu1 %v26717_v10  ;;  %19606 = vmatprep.subr.bf16.mxu0 %v26720_v29  ;;  %v26808_v9 = vld [vmem:[%s36414_s1 + $0x4ad4] ss:$8 sps:$4 sm:$0xff]   ;;  %v26803_v10 = vld [vmem:[%s36414_s1 + $0x21d0] ss:$8 sps:$4 sm:$0xff]  }
 0x83e   :  { %v26806_v29 = vld [vmem:[%s36414_s1 + $0x4ad0] ss:$8 sps:$4 sm:$0xff]  }
 0x840   :  { %17926 = vmatpush1.bf16.msra.mxu1 %v26715_v14  ;;  %19607 = vmatpush1.bf16.msra.mxu0 %v26718_v6  ;;  %v26811_v14 = vld [vmem:[%s36414_s1 + $0x21e4] ss:$8 sps:$4 sm:$0xff]  }
 0x841   :  { %17936 = vmatprep.subr.bf16.mxu1 %v26725_v7  ;;  %19617 = vmatprep.subr.bf16.mxu0 %v26730_v15  ;;  %v26814_v6 = vld [vmem:[%s36414_s1 + $0x4ae4] ss:$8 sps:$4 sm:$0xff]   ;;  %v26809_v7 = vld [vmem:[%s36414_s1 + $0x21e0] ss:$8 sps:$4 sm:$0xff]  }
 0x842   :  { %v26812_v15 = vld [vmem:[%s36414_s1 + $0x4ae0] ss:$8 sps:$4 sm:$0xff]  }
 0x843   :  { %17928 = vmatmul.mubr.bf16.vlgmr.msra.gmra.mrb[0].mxu1 %v20277_v16  ;;  %19609 = vmatmul.mubr.bf16.vlgmr.msra.gmra.mrb[0].mxu0 %v20359_v33  ;;  %v26817_v16 = vld [vmem:[%s36414_s1 + $0x21f4] ss:$8 sps:$4 sm:$0xff]  }
 0x844   :  { %17937 = vmatpush1.bf16.msra.mxu1 %v26723_v22  ;;  %19618 = vmatpush1.bf16.msra.mxu0 %v26728_v12  ;;  %v26820_v33 = vld [vmem:[%s36414_s1 + $0x4af4] ss:$8 sps:$4 sm:$0xff]   ;;  %v26815_v22 = vld [vmem:[%s36414_s1 + $0x21f0] ss:$8 sps:$4 sm:$0xff]  }
 0x845   :  { %17938 = vmatprep.subr.bf16.mxu1 %v26733_v13  ;;  %19619 = vmatprep.subr.bf16.mxu0 %v26736_v39  ;;  %v26818_v12 = vld [vmem:[%s36414_s1 + $0x4af0] ss:$8 sps:$4 sm:$0xff]   ;;  %v26825_v13 = vld [vmem:[%s36414_s1 + $0x2204] ss:$8 sps:$4 sm:$0xff]  }
 0x846   :  { %17968 = vmatprep.mubr.bf16.mxu1 %v20280_v51  ;;  %19649 = vmatprep.mubr.bf16.mxu0 %v20362_v23  ;;  %v26830_v39 = vld [vmem:[%s36414_s1 + $0x4b04] ss:$8 sps:$4 sm:$0xff]   ;;  %v20279_v51 = vcombine.low %v34559_v45, %v34559_v45  ;;  %v20361_v23 = vcombine.low %v34564_v57, %v34564_v57  ;;  %v26828_v45 = vld [vmem:[%s36414_s1 + $0x4b00] ss:$8 sps:$4 sm:$0xff]   ;;  %v26833_v57 = vld [vmem:[%s36414_s1 + $0x2214] ss:$8 sps:$4 sm:$0xff]  }
 0x848   :  { %17939 = vmatpush1.bf16.msra.mxu1 %v26731_v26  ;;  %19620 = vmatpush1.bf16.msra.mxu0 %v26734_v63  ;;  %v34769_v26 = vld [vmem:[%s36413_s0 + $0x110] sm:$0xff]  ;;  %v34774_v63 = vld [vmem:[%s36413_s0 + $0x258] sm:$0xff] }
 0x849   :  { %17940 = vmatprep.subr.bf16.mxu1 %v26739_v30  ;;  %19621 = vmatprep.subr.bf16.mxu0 %v26742_v19  ;;  %v26823_v30 = vld [vmem:[%s36414_s1 + $0x2200] ss:$8 sps:$4 sm:$0xff]   ;;  %v26836_v19 = vld [vmem:[%s36414_s1 + $0x4b14] ss:$8 sps:$4 sm:$0xff]  }
 0x84c   :  { %17941 = vmatpush1.bf16.msra.mxu1 %v26737_v21  ;;  %19622 = vmatpush1.bf16.msra.mxu0 %v26740_v31  ;;  %v20282_v21 = vcombine.high %v34769_v26, %v34769_v26  ;;  %v20364_v31 = vcombine.high %v34774_v63, %v34774_v63 }
 0x84d   :  { %17942 = vmatprep.subr.bf16.mxu1 %v26745_v24  ;;  %19623 = vmatprep.subr.bf16.mxu0 %v26748_v5  ;;  %v26831_v24 = vld [vmem:[%s36414_s1 + $0x2210] ss:$8 sps:$4 sm:$0xff]  }
 0x84e   :  { %v26834_v5 = vld [vmem:[%s36414_s1 + $0x4b10] ss:$8 sps:$4 sm:$0xff]  }
 0x850   :  { %17943 = vmatpush1.bf16.msra.mxu1 %v26743_v36  ;;  %19624 = vmatpush1.bf16.msra.mxu0 %v26746_v27  ;;  %v26839_v36 = vld [vmem:[%s36414_s1 + $0x2224] ss:$8 sps:$4 sm:$0xff]  }
 0x851   :  { %17944 = vmatprep.subr.bf16.mxu1 %v26751_v28  ;;  %19625 = vmatprep.subr.bf16.mxu0 %v26754_v37  ;;  %v26842_v27 = vld [vmem:[%s36414_s1 + $0x4b24] ss:$8 sps:$4 sm:$0xff]   ;;  %v26837_v28 = vld [vmem:[%s36414_s1 + $0x2220] ss:$8 sps:$4 sm:$0xff]  }
 0x852   :  { %v26840_v37 = vld [vmem:[%s36414_s1 + $0x4b20] ss:$8 sps:$4 sm:$0xff]  }
 0x854   :  { %17945 = vmatpush1.bf16.msra.mxu1 %v26749_v38  ;;  %19626 = vmatpush1.bf16.msra.mxu0 %v26752_v11  ;;  %v26845_v38 = vld [vmem:[%s36414_s1 + $0x2234] ss:$8 sps:$4 sm:$0xff]  }
 0x855   :  { %17946 = vmatprep.subr.bf16.mxu1 %v26757_v42  ;;  %19627 = vmatprep.subr.bf16.mxu0 %v26760_v34  ;;  %v26848_v11 = vld [vmem:[%s36414_s1 + $0x4b34] ss:$8 sps:$4 sm:$0xff]   ;;  %v26843_v42 = vld [vmem:[%s36414_s1 + $0x2230] ss:$8 sps:$4 sm:$0xff]  }
 0x856   :  { %v26846_v34 = vld [vmem:[%s36414_s1 + $0x4b30] ss:$8 sps:$4 sm:$0xff]  }
 0x858   :  { %17947 = vmatpush1.bf16.msra.mxu1 %v26755_v35  ;;  %19628 = vmatpush1.bf16.msra.mxu0 %v26758_v43  ;;  %v26851_v35 = vld [vmem:[%s36414_s1 + $0x2244] ss:$8 sps:$4 sm:$0xff]  }
 0x859   :  { %17948 = vmatprep.subr.bf16.mxu1 %v26763_v44  ;;  %19629 = vmatprep.subr.bf16.mxu0 %v26766_v17  ;;  %v26854_v43 = vld [vmem:[%s36414_s1 + $0x4b44] ss:$8 sps:$4 sm:$0xff]   ;;  %v26849_v44 = vld [vmem:[%s36414_s1 + $0x2240] ss:$8 sps:$4 sm:$0xff]  }
 0x85a   :  { %v26852_v17 = vld [vmem:[%s36414_s1 + $0x4b40] ss:$8 sps:$4 sm:$0xff]  }
 0x85c   :  { %17949 = vmatpush1.bf16.msra.mxu1 %v26761_v48  ;;  %19630 = vmatpush1.bf16.msra.mxu0 %v26764_v40  ;;  %v26857_v48 = vld [vmem:[%s36414_s1 + $0x2254] ss:$8 sps:$4 sm:$0xff]  }
 0x85d   :  { %17950 = vmatprep.subr.bf16.mxu1 %v26769_v41  ;;  %19631 = vmatprep.subr.bf16.mxu0 %v26772_v49  ;;  %v26860_v40 = vld [vmem:[%s36414_s1 + $0x4b54] ss:$8 sps:$4 sm:$0xff]   ;;  %v26855_v41 = vld [vmem:[%s36414_s1 + $0x2250] ss:$8 sps:$4 sm:$0xff]  }
 0x85e   :  { %v26858_v49 = vld [vmem:[%s36414_s1 + $0x4b50] ss:$8 sps:$4 sm:$0xff]  }
 0x860   :  { %17951 = vmatpush1.bf16.msra.mxu1 %v26767_v50  ;;  %19632 = vmatpush1.bf16.msra.mxu0 %v26770_v18  ;;  %v26863_v50 = vld [vmem:[%s36414_s1 + $0x2264] ss:$8 sps:$4 sm:$0xff]  }
 0x861   :  { %17952 = vmatprep.subr.bf16.mxu1 %v26775_v54  ;;  %19633 = vmatprep.subr.bf16.mxu0 %v26778_v46  ;;  %v26866_v18 = vld [vmem:[%s36414_s1 + $0x4b64] ss:$8 sps:$4 sm:$0xff]   ;;  %v26861_v54 = vld [vmem:[%s36414_s1 + $0x2260] ss:$8 sps:$4 sm:$0xff]  }
 0x862   :  { %v26864_v46 = vld [vmem:[%s36414_s1 + $0x4b60] ss:$8 sps:$4 sm:$0xff]  }
 0x864   :  { %17953 = vmatpush1.bf16.msra.mxu1 %v26773_v47  ;;  %19634 = vmatpush1.bf16.msra.mxu0 %v26776_v55  ;;  %v26869_v47 = vld [vmem:[%s36414_s1 + $0x2274] ss:$8 sps:$4 sm:$0xff]  }
 0x865   :  { %17954 = vmatprep.subr.bf16.mxu1 %v26781_v56  ;;  %19635 = vmatprep.subr.bf16.mxu0 %v26784_v25  ;;  %v26872_v55 = vld [vmem:[%s36414_s1 + $0x4b74] ss:$8 sps:$4 sm:$0xff]   ;;  %v26867_v56 = vld [vmem:[%s36414_s1 + $0x2270] ss:$8 sps:$4 sm:$0xff]  }
 0x866   :  { %v26870_v25 = vld [vmem:[%s36414_s1 + $0x4b70] ss:$8 sps:$4 sm:$0xff]  }
 0x868   :  { %17955 = vmatpush1.bf16.msra.mxu1 %v26779_v60  ;;  %19636 = vmatpush1.bf16.msra.mxu0 %v26782_v52  ;;  %v26875_v60 = vld [vmem:[%s36414_s1 + $0x2284] ss:$8 sps:$4 sm:$0xff]  }
 0x869   :  { %17956 = vmatprep.subr.bf16.mxu1 %v26787_v53  ;;  %19637 = vmatprep.subr.bf16.mxu0 %v26790_v61  ;;  %v26878_v52 = vld [vmem:[%s36414_s1 + $0x4b84] ss:$8 sps:$4 sm:$0xff]   ;;  %v26873_v53 = vld [vmem:[%s36414_s1 + $0x2280] ss:$8 sps:$4 sm:$0xff]  }
 0x86a   :  { %v26876_v61 = vld [vmem:[%s36414_s1 + $0x4b80] ss:$8 sps:$4 sm:$0xff]  }
 0x86c   :  { %17957 = vmatpush1.bf16.msra.mxu1 %v26785_v62  ;;  %19638 = vmatpush1.bf16.msra.mxu0 %v26788_v20  ;;  %v26881_v62 = vld [vmem:[%s36414_s1 + $0x2294] ss:$8 sps:$4 sm:$0xff]  }
 0x86d   :  { %17958 = vmatprep.subr.bf16.mxu1 %v26793_v2  ;;  %19639 = vmatprep.subr.bf16.mxu0 %v26796_v58  ;;  %v26884_v20 = vld [vmem:[%s36414_s1 + $0x4b94] ss:$8 sps:$4 sm:$0xff]   ;;  %v26879_v2 = vld [vmem:[%s36414_s1 + $0x2290] ss:$8 sps:$4 sm:$0xff]  }
 0x86e   :  { %v26882_v58 = vld [vmem:[%s36414_s1 + $0x4b90] ss:$8 sps:$4 sm:$0xff]  }
 0x870   :  { %17959 = vmatpush1.bf16.msra.mxu1 %v26791_v59  ;;  %19640 = vmatpush1.bf16.msra.mxu0 %v26794_v3  ;;  %v26887_v59 = vld [vmem:[%s36414_s1 + $0x22a4] ss:$8 sps:$4 sm:$0xff]  }
 0x871   :  { %17960 = vmatprep.subr.bf16.mxu1 %v26799_v4  ;;  %19641 = vmatprep.subr.bf16.mxu0 %v26802_v32  ;;  %v26890_v3 = vld [vmem:[%s36414_s1 + $0x4ba4] ss:$8 sps:$4 sm:$0xff]   ;;  %v26885_v4 = vld [vmem:[%s36414_s1 + $0x22a0] ss:$8 sps:$4 sm:$0xff]  }
 0x872   :  { %v26888_v32 = vld [vmem:[%s36414_s1 + $0x4ba0] ss:$8 sps:$4 sm:$0xff]  }
 0x874   :  { %17961 = vmatpush1.bf16.msra.mxu1 %v26797_v8  ;;  %19642 = vmatpush1.bf16.msra.mxu0 %v26800_v0  ;;  %v26893_v8 = vld [vmem:[%s36414_s1 + $0x22b4] ss:$8 sps:$4 sm:$0xff]  }
 0x875   :  { %17962 = vmatprep.subr.bf16.mxu1 %v26805_v1  ;;  %19643 = vmatprep.subr.bf16.mxu0 %v26808_v9  ;;  %v26896_v0 = vld [vmem:[%s36414_s1 + $0x4bb4] ss:$8 sps:$4 sm:$0xff]   ;;  %v26891_v1 = vld [vmem:[%s36414_s1 + $0x22b0] ss:$8 sps:$4 sm:$0xff]  }
 0x876   :  { %v26894_v9 = vld [vmem:[%s36414_s1 + $0x4bb0] ss:$8 sps:$4 sm:$0xff]  }
 0x878   :  { %17963 = vmatpush1.bf16.msra.mxu1 %v26803_v10  ;;  %19644 = vmatpush1.bf16.msra.mxu0 %v26806_v29  ;;  %v26899_v10 = vld [vmem:[%s36414_s1 + $0x22c4] ss:$8 sps:$4 sm:$0xff]  }
 0x879   :  { %17964 = vmatprep.subr.bf16.mxu1 %v26811_v14  ;;  %19645 = vmatprep.subr.bf16.mxu0 %v26814_v6  ;;  %v26902_v29 = vld [vmem:[%s36414_s1 + $0x4bc4] ss:$8 sps:$4 sm:$0xff]   ;;  %v26897_v14 = vld [vmem:[%s36414_s1 + $0x22c0] ss:$8 sps:$4 sm:$0xff]  }
 0x87a   :  { %v26900_v6 = vld [vmem:[%s36414_s1 + $0x4bc0] ss:$8 sps:$4 sm:$0xff]  }
 0x87c   :  { %17965 = vmatpush1.bf16.msra.mxu1 %v26809_v7  ;;  %19646 = vmatpush1.bf16.msra.mxu0 %v26812_v15  ;;  %v26905_v7 = vld [vmem:[%s36414_s1 + $0x22d4] ss:$8 sps:$4 sm:$0xff]  }
 0x87d   :  { %17966 = vmatprep.subr.bf16.mxu1 %v26817_v16  ;;  %19647 = vmatprep.subr.bf16.mxu0 %v26820_v33  ;;  %v26908_v15 = vld [vmem:[%s36414_s1 + $0x4bd4] ss:$8 sps:$4 sm:$0xff]   ;;  %v26903_v16 = vld [vmem:[%s36414_s1 + $0x22d0] ss:$8 sps:$4 sm:$0xff]  }
 0x87e   :  { %v26906_v33 = vld [vmem:[%s36414_s1 + $0x4bd0] ss:$8 sps:$4 sm:$0xff]  }
 0x880   :  { %17967 = vmatpush1.bf16.msra.mxu1 %v26815_v22  ;;  %19648 = vmatpush1.bf16.msra.mxu0 %v26818_v12  ;;  %v26911_v22 = vld [vmem:[%s36414_s1 + $0x22e4] ss:$8 sps:$4 sm:$0xff]  }
 0x881   :  { %17977 = vmatprep.subr.bf16.mxu1 %v26825_v13  ;;  %19658 = vmatprep.subr.bf16.mxu0 %v26830_v39  ;;  %v26914_v12 = vld [vmem:[%s36414_s1 + $0x4be4] ss:$8 sps:$4 sm:$0xff]   ;;  %v26909_v13 = vld [vmem:[%s36414_s1 + $0x22e0] ss:$8 sps:$4 sm:$0xff]  }
 0x882   :  { %v26912_v39 = vld [vmem:[%s36414_s1 + $0x4be0] ss:$8 sps:$4 sm:$0xff]  }
 0x883   :  { %17969 = vmatmul.mubr.bf16.vlgmr.msra.gmra.mrb[0].mxu1 %v20279_v51  ;;  %19650 = vmatmul.mubr.bf16.vlgmr.msra.gmra.mrb[0].mxu0 %v20361_v23  ;;  %v26917_v51 = vld [vmem:[%s36414_s1 + $0x22f4] ss:$8 sps:$4 sm:$0xff]  }
 0x884   :  { %17978 = vmatpush1.bf16.msra.mxu1 %v26823_v30  ;;  %19659 = vmatpush1.bf16.msra.mxu0 %v26828_v45  ;;  %v26920_v23 = vld [vmem:[%s36414_s1 + $0x4bf4] ss:$8 sps:$4 sm:$0xff]   ;;  %v26915_v30 = vld [vmem:[%s36414_s1 + $0x22f0] ss:$8 sps:$4 sm:$0xff]  }
 0x885   :  { %17979 = vmatprep.subr.bf16.mxu1 %v26833_v57  ;;  %19660 = vmatprep.subr.bf16.mxu0 %v26836_v19  ;;  %v26918_v45 = vld [vmem:[%s36414_s1 + $0x4bf0] ss:$8 sps:$4 sm:$0xff]   ;;  %v26925_v57 = vld [vmem:[%s36414_s1 + $0x2304] ss:$8 sps:$4 sm:$0xff]  }
 0x886   :  { %18009 = vmatprep.mubr.bf16.mxu1 %v20282_v21  ;;  %19690 = vmatprep.mubr.bf16.mxu0 %v20364_v31  ;;  %v26930_v19 = vld [vmem:[%s36414_s1 + $0x4c04] ss:$8 sps:$4 sm:$0xff]   ;;  %v20281_v21 = vcombine.low %v34769_v26, %v34769_v26  ;;  %v20363_v31 = vcombine.low %v34774_v63, %v34774_v63  ;;  %v26928_v26 = vld [vmem:[%s36414_s1 + $0x4c00] ss:$8 sps:$4 sm:$0xff]   ;;  %v26933_v63 = vld [vmem:[%s36414_s1 + $0x2314] ss:$8 sps:$4 sm:$0xff]  }
 0x888   :  { %17980 = vmatpush1.bf16.msra.mxu1 %v26831_v24  ;;  %19661 = vmatpush1.bf16.msra.mxu0 %v26834_v5  ;;  %v34979_v24 = vld [vmem:[%s36413_s0 + $0x118] sm:$0xff]  ;;  %v34984_v5 = vld [vmem:[%s36413_s0 + $0x260] sm:$0xff] }
 0x889   :  { %17981 = vmatprep.subr.bf16.mxu1 %v26839_v36  ;;  %19662 = vmatprep.subr.bf16.mxu0 %v26842_v27  ;;  %v26923_v36 = vld [vmem:[%s36414_s1 + $0x2300] ss:$8 sps:$4 sm:$0xff]   ;;  %v26936_v27 = vld [vmem:[%s36414_s1 + $0x4c14] ss:$8 sps:$4 sm:$0xff]  }
 0x88c   :  { %17982 = vmatpush1.bf16.msra.mxu1 %v26837_v28  ;;  %19663 = vmatpush1.bf16.msra.mxu0 %v26840_v37  ;;  %v20284_v28 = vcombine.high %v34979_v24, %v34979_v24  ;;  %v20366_v37 = vcombine.high %v34984_v5, %v34984_v5 }
 0x88d   :  { %17983 = vmatprep.subr.bf16.mxu1 %v26845_v38  ;;  %19664 = vmatprep.subr.bf16.mxu0 %v26848_v11  ;;  %v26931_v38 = vld [vmem:[%s36414_s1 + $0x2310] ss:$8 sps:$4 sm:$0xff]  }
 0x88e   :  { %v26934_v11 = vld [vmem:[%s36414_s1 + $0x4c10] ss:$8 sps:$4 sm:$0xff]  }
 0x890   :  { %17984 = vmatpush1.bf16.msra.mxu1 %v26843_v42  ;;  %19665 = vmatpush1.bf16.msra.mxu0 %v26846_v34  ;;  %v26939_v42 = vld [vmem:[%s36414_s1 + $0x2324] ss:$8 sps:$4 sm:$0xff]  }
 0x891   :  { %17985 = vmatprep.subr.bf16.mxu1 %v26851_v35  ;;  %19666 = vmatprep.subr.bf16.mxu0 %v26854_v43  ;;  %v26942_v34 = vld [vmem:[%s36414_s1 + $0x4c24] ss:$8 sps:$4 sm:$0xff]   ;;  %v26937_v35 = vld [vmem:[%s36414_s1 + $0x2320] ss:$8 sps:$4 sm:$0xff]  }
 0x892   :  { %v26940_v43 = vld [vmem:[%s36414_s1 + $0x4c20] ss:$8 sps:$4 sm:$0xff]  }
 0x894   :  { %17986 = vmatpush1.bf16.msra.mxu1 %v26849_v44  ;;  %19667 = vmatpush1.bf16.msra.mxu0 %v26852_v17  ;;  %v26945_v44 = vld [vmem:[%s36414_s1 + $0x2334] ss:$8 sps:$4 sm:$0xff]  }
 0x895   :  { %17987 = vmatprep.subr.bf16.mxu1 %v26857_v48  ;;  %19668 = vmatprep.subr.bf16.mxu0 %v26860_v40  ;;  %v26948_v17 = vld [vmem:[%s36414_s1 + $0x4c34] ss:$8 sps:$4 sm:$0xff]   ;;  %v26943_v48 = vld [vmem:[%s36414_s1 + $0x2330] ss:$8 sps:$4 sm:$0xff]  }
 0x896   :  { %v26946_v40 = vld [vmem:[%s36414_s1 + $0x4c30] ss:$8 sps:$4 sm:$0xff]  }
 0x898   :  { %17988 = vmatpush1.bf16.msra.mxu1 %v26855_v41  ;;  %19669 = vmatpush1.bf16.msra.mxu0 %v26858_v49  ;;  %v26951_v41 = vld [vmem:[%s36414_s1 + $0x2344] ss:$8 sps:$4 sm:$0xff]  }
 0x899   :  { %17989 = vmatprep.subr.bf16.mxu1 %v26863_v50  ;;  %19670 = vmatprep.subr.bf16.mxu0 %v26866_v18  ;;  %v26954_v49 = vld [vmem:[%s36414_s1 + $0x4c44] ss:$8 sps:$4 sm:$0xff]   ;;  %v26949_v50 = vld [vmem:[%s36414_s1 + $0x2340] ss:$8 sps:$4 sm:$0xff]  }
 0x89a   :  { %v26952_v18 = vld [vmem:[%s36414_s1 + $0x4c40] ss:$8 sps:$4 sm:$0xff]  }
 0x89c   :  { %17990 = vmatpush1.bf16.msra.mxu1 %v26861_v54  ;;  %19671 = vmatpush1.bf16.msra.mxu0 %v26864_v46  ;;  %v26957_v54 = vld [vmem:[%s36414_s1 + $0x2354] ss:$8 sps:$4 sm:$0xff]  }
 0x89d   :  { %17991 = vmatprep.subr.bf16.mxu1 %v26869_v47  ;;  %19672 = vmatprep.subr.bf16.mxu0 %v26872_v55  ;;  %v26960_v46 = vld [vmem:[%s36414_s1 + $0x4c54] ss:$8 sps:$4 sm:$0xff]   ;;  %v26955_v47 = vld [vmem:[%s36414_s1 + $0x2350] ss:$8 sps:$4 sm:$0xff]  }
 0x89e   :  { %v26958_v55 = vld [vmem:[%s36414_s1 + $0x4c50] ss:$8 sps:$4 sm:$0xff]  }
 0x8a0   :  { %17992 = vmatpush1.bf16.msra.mxu1 %v26867_v56  ;;  %19673 = vmatpush1.bf16.msra.mxu0 %v26870_v25  ;;  %v26963_v56 = vld [vmem:[%s36414_s1 + $0x2364] ss:$8 sps:$4 sm:$0xff]  }
 0x8a1   :  { %17993 = vmatprep.subr.bf16.mxu1 %v26875_v60  ;;  %19674 = vmatprep.subr.bf16.mxu0 %v26878_v52  ;;  %v26966_v25 = vld [vmem:[%s36414_s1 + $0x4c64] ss:$8 sps:$4 sm:$0xff]   ;;  %v26961_v60 = vld [vmem:[%s36414_s1 + $0x2360] ss:$8 sps:$4 sm:$0xff]  }
 0x8a2   :  { %v26964_v52 = vld [vmem:[%s36414_s1 + $0x4c60] ss:$8 sps:$4 sm:$0xff]  }
 0x8a4   :  { %17994 = vmatpush1.bf16.msra.mxu1 %v26873_v53  ;;  %19675 = vmatpush1.bf16.msra.mxu0 %v26876_v61  ;;  %v26969_v53 = vld [vmem:[%s36414_s1 + $0x2374] ss:$8 sps:$4 sm:$0xff]  }
 0x8a5   :  { %17995 = vmatprep.subr.bf16.mxu1 %v26881_v62  ;;  %19676 = vmatprep.subr.bf16.mxu0 %v26884_v20  ;;  %v26972_v61 = vld [vmem:[%s36414_s1 + $0x4c74] ss:$8 sps:$4 sm:$0xff]   ;;  %v26967_v62 = vld [vmem:[%s36414_s1 + $0x2370] ss:$8 sps:$4 sm:$0xff]  }
 0x8a6   :  { %v26970_v20 = vld [vmem:[%s36414_s1 + $0x4c70] ss:$8 sps:$4 sm:$0xff]  }
 0x8a8   :  { %17996 = vmatpush1.bf16.msra.mxu1 %v26879_v2  ;;  %19677 = vmatpush1.bf16.msra.mxu0 %v26882_v58  ;;  %v26975_v2 = vld [vmem:[%s36414_s1 + $0x2384] ss:$8 sps:$4 sm:$0xff]  }
 0x8a9   :  { %17997 = vmatprep.subr.bf16.mxu1 %v26887_v59  ;;  %19678 = vmatprep.subr.bf16.mxu0 %v26890_v3  ;;  %v26978_v58 = vld [vmem:[%s36414_s1 + $0x4c84] ss:$8 sps:$4 sm:$0xff]   ;;  %v26973_v59 = vld [vmem:[%s36414_s1 + $0x2380] ss:$8 sps:$4 sm:$0xff]  }
 0x8aa   :  { %v26976_v3 = vld [vmem:[%s36414_s1 + $0x4c80] ss:$8 sps:$4 sm:$0xff]  }
 0x8ac   :  { %17998 = vmatpush1.bf16.msra.mxu1 %v26885_v4  ;;  %19679 = vmatpush1.bf16.msra.mxu0 %v26888_v32  ;;  %v26981_v4 = vld [vmem:[%s36414_s1 + $0x2394] ss:$8 sps:$4 sm:$0xff]  }
 0x8ad   :  { %17999 = vmatprep.subr.bf16.mxu1 %v26893_v8  ;;  %19680 = vmatprep.subr.bf16.mxu0 %v26896_v0  ;;  %v26984_v32 = vld [vmem:[%s36414_s1 + $0x4c94] ss:$8 sps:$4 sm:$0xff]   ;;  %v26979_v8 = vld [vmem:[%s36414_s1 + $0x2390] ss:$8 sps:$4 sm:$0xff]  }
 0x8ae   :  { %v26982_v0 = vld [vmem:[%s36414_s1 + $0x4c90] ss:$8 sps:$4 sm:$0xff]  }
 0x8b0   :  { %18000 = vmatpush1.bf16.msra.mxu1 %v26891_v1  ;;  %19681 = vmatpush1.bf16.msra.mxu0 %v26894_v9  ;;  %v26987_v1 = vld [vmem:[%s36414_s1 + $0x23a4] ss:$8 sps:$4 sm:$0xff]  }
 0x8b1   :  { %18001 = vmatprep.subr.bf16.mxu1 %v26899_v10  ;;  %19682 = vmatprep.subr.bf16.mxu0 %v26902_v29  ;;  %v26990_v9 = vld [vmem:[%s36414_s1 + $0x4ca4] ss:$8 sps:$4 sm:$0xff]   ;;  %v26985_v10 = vld [vmem:[%s36414_s1 + $0x23a0] ss:$8 sps:$4 sm:$0xff]  }
 0x8b2   :  { %v26988_v29 = vld [vmem:[%s36414_s1 + $0x4ca0] ss:$8 sps:$4 sm:$0xff]  }
 0x8b4   :  { %18002 = vmatpush1.bf16.msra.mxu1 %v26897_v14  ;;  %19683 = vmatpush1.bf16.msra.mxu0 %v26900_v6  ;;  %v26993_v14 = vld [vmem:[%s36414_s1 + $0x23b4] ss:$8 sps:$4 sm:$0xff]  }
 0x8b5   :  { %18003 = vmatprep.subr.bf16.mxu1 %v26905_v7  ;;  %19684 = vmatprep.subr.bf16.mxu0 %v26908_v15  ;;  %v26996_v6 = vld [vmem:[%s36414_s1 + $0x4cb4] ss:$8 sps:$4 sm:$0xff]   ;;  %v26991_v7 = vld [vmem:[%s36414_s1 + $0x23b0] ss:$8 sps:$4 sm:$0xff]  }
 0x8b6   :  { %v26994_v15 = vld [vmem:[%s36414_s1 + $0x4cb0] ss:$8 sps:$4 sm:$0xff]  }
 0x8b8   :  { %18004 = vmatpush1.bf16.msra.mxu1 %v26903_v16  ;;  %19685 = vmatpush1.bf16.msra.mxu0 %v26906_v33  ;;  %v26999_v16 = vld [vmem:[%s36414_s1 + $0x23c4] ss:$8 sps:$4 sm:$0xff]  }
 0x8b9   :  { %18005 = vmatprep.subr.bf16.mxu1 %v26911_v22  ;;  %19686 = vmatprep.subr.bf16.mxu0 %v26914_v12  ;;  %v27002_v33 = vld [vmem:[%s36414_s1 + $0x4cc4] ss:$8 sps:$4 sm:$0xff]   ;;  %v26997_v22 = vld [vmem:[%s36414_s1 + $0x23c0] ss:$8 sps:$4 sm:$0xff]  }
 0x8ba   :  { %v27000_v12 = vld [vmem:[%s36414_s1 + $0x4cc0] ss:$8 sps:$4 sm:$0xff]  }
 0x8bc   :  { %18006 = vmatpush1.bf16.msra.mxu1 %v26909_v13  ;;  %19687 = vmatpush1.bf16.msra.mxu0 %v26912_v39  ;;  %v27005_v13 = vld [vmem:[%s36414_s1 + $0x23d4] ss:$8 sps:$4 sm:$0xff]  }
 0x8bd   :  { %18007 = vmatprep.subr.bf16.mxu1 %v26917_v51  ;;  %19688 = vmatprep.subr.bf16.mxu0 %v26920_v23  ;;  %v27008_v39 = vld [vmem:[%s36414_s1 + $0x4cd4] ss:$8 sps:$4 sm:$0xff]   ;;  %v27003_v51 = vld [vmem:[%s36414_s1 + $0x23d0] ss:$8 sps:$4 sm:$0xff]  }
 0x8be   :  { %v27006_v23 = vld [vmem:[%s36414_s1 + $0x4cd0] ss:$8 sps:$4 sm:$0xff]  }
 0x8c0   :  { %18008 = vmatpush1.bf16.msra.mxu1 %v26915_v30  ;;  %19689 = vmatpush1.bf16.msra.mxu0 %v26918_v45  ;;  %v27011_v30 = vld [vmem:[%s36414_s1 + $0x23e4] ss:$8 sps:$4 sm:$0xff]  }
 0x8c1   :  { %18018 = vmatprep.subr.bf16.mxu1 %v26925_v57  ;;  %19699 = vmatprep.subr.bf16.mxu0 %v26930_v19  ;;  %v27014_v45 = vld [vmem:[%s36414_s1 + $0x4ce4] ss:$8 sps:$4 sm:$0xff]   ;;  %v27009_v57 = vld [vmem:[%s36414_s1 + $0x23e0] ss:$8 sps:$4 sm:$0xff]  }
 0x8c2   :  { %v27012_v19 = vld [vmem:[%s36414_s1 + $0x4ce0] ss:$8 sps:$4 sm:$0xff]  }
 0x8c3   :  { %18010 = vmatmul.mubr.bf16.vlgmr.msra.gmra.mrb[0].mxu1 %v20281_v21  ;;  %19691 = vmatmul.mubr.bf16.vlgmr.msra.gmra.mrb[0].mxu0 %v20363_v31  ;;  %v27017_v21 = vld [vmem:[%s36414_s1 + $0x23f4] ss:$8 sps:$4 sm:$0xff]  }
 0x8c4   :  { %18019 = vmatpush1.bf16.msra.mxu1 %v26923_v36  ;;  %19700 = vmatpush1.bf16.msra.mxu0 %v26928_v26  ;;  %v27020_v31 = vld [vmem:[%s36414_s1 + $0x4cf4] ss:$8 sps:$4 sm:$0xff]   ;;  %v27015_v36 = vld [vmem:[%s36414_s1 + $0x23f0] ss:$8 sps:$4 sm:$0xff]  }
 0x8c5   :  { %18020 = vmatprep.subr.bf16.mxu1 %v26933_v63  ;;  %19701 = vmatprep.subr.bf16.mxu0 %v26936_v27  ;;  %v27018_v26 = vld [vmem:[%s36414_s1 + $0x4cf0] ss:$8 sps:$4 sm:$0xff]   ;;  %v27025_v63 = vld [vmem:[%s36414_s1 + $0x2404] ss:$8 sps:$4 sm:$0xff]  }
 0x8c6   :  { %18050 = vmatprep.mubr.bf16.mxu1 %v20284_v28  ;;  %19731 = vmatprep.mubr.bf16.mxu0 %v20366_v37  ;;  %v27030_v27 = vld [vmem:[%s36414_s1 + $0x4d04] ss:$8 sps:$4 sm:$0xff]   ;;  %v20283_v28 = vcombine.low %v34979_v24, %v34979_v24  ;;  %v20365_v37 = vcombine.low %v34984_v5, %v34984_v5  ;;  %v27028_v24 = vld [vmem:[%s36414_s1 + $0x4d00] ss:$8 sps:$4 sm:$0xff]   ;;  %v27033_v5 = vld [vmem:[%s36414_s1 + $0x2414] ss:$8 sps:$4 sm:$0xff]  }
 0x8c8   :  { %18021 = vmatpush1.bf16.msra.mxu1 %v26931_v38  ;;  %19702 = vmatpush1.bf16.msra.mxu0 %v26934_v11  ;;  %v35189_v38 = vld [vmem:[%s36413_s0 + $0x120] sm:$0xff]  ;;  %v35194_v11 = vld [vmem:[%s36413_s0 + $0x268] sm:$0xff] }
 0x8c9   :  { %18022 = vmatprep.subr.bf16.mxu1 %v26939_v42  ;;  %19703 = vmatprep.subr.bf16.mxu0 %v26942_v34  ;;  %v27023_v42 = vld [vmem:[%s36414_s1 + $0x2400] ss:$8 sps:$4 sm:$0xff]   ;;  %v27036_v34 = vld [vmem:[%s36414_s1 + $0x4d14] ss:$8 sps:$4 sm:$0xff]  }
 0x8cc   :  { %18023 = vmatpush1.bf16.msra.mxu1 %v26937_v35  ;;  %19704 = vmatpush1.bf16.msra.mxu0 %v26940_v43  ;;  %v20286_v35 = vcombine.high %v35189_v38, %v35189_v38  ;;  %v20368_v43 = vcombine.high %v35194_v11, %v35194_v11 }
 0x8cd   :  { %18024 = vmatprep.subr.bf16.mxu1 %v26945_v44  ;;  %19705 = vmatprep.subr.bf16.mxu0 %v26948_v17  ;;  %v27031_v44 = vld [vmem:[%s36414_s1 + $0x2410] ss:$8 sps:$4 sm:$0xff]  }
 0x8ce   :  { %v27034_v17 = vld [vmem:[%s36414_s1 + $0x4d10] ss:$8 sps:$4 sm:$0xff]  }
 0x8d0   :  { %18025 = vmatpush1.bf16.msra.mxu1 %v26943_v48  ;;  %19706 = vmatpush1.bf16.msra.mxu0 %v26946_v40  ;;  %v27039_v48 = vld [vmem:[%s36414_s1 + $0x2424] ss:$8 sps:$4 sm:$0xff]  }
 0x8d1   :  { %18026 = vmatprep.subr.bf16.mxu1 %v26951_v41  ;;  %19707 = vmatprep.subr.bf16.mxu0 %v26954_v49  ;;  %v27042_v40 = vld [vmem:[%s36414_s1 + $0x4d24] ss:$8 sps:$4 sm:$0xff]   ;;  %v27037_v41 = vld [vmem:[%s36414_s1 + $0x2420] ss:$8 sps:$4 sm:$0xff]  }
 0x8d2   :  { %v27040_v49 = vld [vmem:[%s36414_s1 + $0x4d20] ss:$8 sps:$4 sm:$0xff]  }
 0x8d4   :  { %18027 = vmatpush1.bf16.msra.mxu1 %v26949_v50  ;;  %19708 = vmatpush1.bf16.msra.mxu0 %v26952_v18  ;;  %v27045_v50 = vld [vmem:[%s36414_s1 + $0x2434] ss:$8 sps:$4 sm:$0xff]  }
 0x8d5   :  { %18028 = vmatprep.subr.bf16.mxu1 %v26957_v54  ;;  %19709 = vmatprep.subr.bf16.mxu0 %v26960_v46  ;;  %v27048_v18 = vld [vmem:[%s36414_s1 + $0x4d34] ss:$8 sps:$4 sm:$0xff]   ;;  %v27043_v54 = vld [vmem:[%s36414_s1 + $0x2430] ss:$8 sps:$4 sm:$0xff]  }
 0x8d6   :  { %v27046_v46 = vld [vmem:[%s36414_s1 + $0x4d30] ss:$8 sps:$4 sm:$0xff]  }
 0x8d8   :  { %18029 = vmatpush1.bf16.msra.mxu1 %v26955_v47  ;;  %19710 = vmatpush1.bf16.msra.mxu0 %v26958_v55  ;;  %v27051_v47 = vld [vmem:[%s36414_s1 + $0x2444] ss:$8 sps:$4 sm:$0xff]  }
 0x8d9   :  { %18030 = vmatprep.subr.bf16.mxu1 %v26963_v56  ;;  %19711 = vmatprep.subr.bf16.mxu0 %v26966_v25  ;;  %v27054_v55 = vld [vmem:[%s36414_s1 + $0x4d44] ss:$8 sps:$4 sm:$0xff]   ;;  %v27049_v56 = vld [vmem:[%s36414_s1 + $0x2440] ss:$8 sps:$4 sm:$0xff]  }
 0x8da   :  { %v27052_v25 = vld [vmem:[%s36414_s1 + $0x4d40] ss:$8 sps:$4 sm:$0xff]  }
 0x8dc   :  { %18031 = vmatpush1.bf16.msra.mxu1 %v26961_v60  ;;  %19712 = vmatpush1.bf16.msra.mxu0 %v26964_v52  ;;  %v27057_v60 = vld [vmem:[%s36414_s1 + $0x2454] ss:$8 sps:$4 sm:$0xff]  }
 0x8dd   :  { %18032 = vmatprep.subr.bf16.mxu1 %v26969_v53  ;;  %19713 = vmatprep.subr.bf16.mxu0 %v26972_v61  ;;  %v27060_v52 = vld [vmem:[%s36414_s1 + $0x4d54] ss:$8 sps:$4 sm:$0xff]   ;;  %v27055_v53 = vld [vmem:[%s36414_s1 + $0x2450] ss:$8 sps:$4 sm:$0xff]  }
 0x8de   :  { %v27058_v61 = vld [vmem:[%s36414_s1 + $0x4d50] ss:$8 sps:$4 sm:$0xff]  }
 0x8e0   :  { %18033 = vmatpush1.bf16.msra.mxu1 %v26967_v62  ;;  %19714 = vmatpush1.bf16.msra.mxu0 %v26970_v20  ;;  %v27063_v62 = vld [vmem:[%s36414_s1 + $0x2464] ss:$8 sps:$4 sm:$0xff]  }
 0x8e1   :  { %18034 = vmatprep.subr.bf16.mxu1 %v26975_v2  ;;  %19715 = vmatprep.subr.bf16.mxu0 %v26978_v58  ;;  %v27066_v20 = vld [vmem:[%s36414_s1 + $0x4d64] ss:$8 sps:$4 sm:$0xff]   ;;  %v27061_v2 = vld [vmem:[%s36414_s1 + $0x2460] ss:$8 sps:$4 sm:$0xff]  }
 0x8e2   :  { %v27064_v58 = vld [vmem:[%s36414_s1 + $0x4d60] ss:$8 sps:$4 sm:$0xff]  }
 0x8e4   :  { %18035 = vmatpush1.bf16.msra.mxu1 %v26973_v59  ;;  %19716 = vmatpush1.bf16.msra.mxu0 %v26976_v3  ;;  %v27069_v59 = vld [vmem:[%s36414_s1 + $0x2474] ss:$8 sps:$4 sm:$0xff]  }
 0x8e5   :  { %18036 = vmatprep.subr.bf16.mxu1 %v26981_v4  ;;  %19717 = vmatprep.subr.bf16.mxu0 %v26984_v32  ;;  %v27072_v3 = vld [vmem:[%s36414_s1 + $0x4d74] ss:$8 sps:$4 sm:$0xff]   ;;  %v27067_v4 = vld [vmem:[%s36414_s1 + $0x2470] ss:$8 sps:$4 sm:$0xff]  }
 0x8e6   :  { %v27070_v32 = vld [vmem:[%s36414_s1 + $0x4d70] ss:$8 sps:$4 sm:$0xff]  }
 0x8e8   :  { %18037 = vmatpush1.bf16.msra.mxu1 %v26979_v8  ;;  %19718 = vmatpush1.bf16.msra.mxu0 %v26982_v0  ;;  %v27075_v8 = vld [vmem:[%s36414_s1 + $0x2484] ss:$8 sps:$4 sm:$0xff]  }
 0x8e9   :  { %18038 = vmatprep.subr.bf16.mxu1 %v26987_v1  ;;  %19719 = vmatprep.subr.bf16.mxu0 %v26990_v9  ;;  %v27078_v0 = vld [vmem:[%s36414_s1 + $0x4d84] ss:$8 sps:$4 sm:$0xff]   ;;  %v27073_v1 = vld [vmem:[%s36414_s1 + $0x2480] ss:$8 sps:$4 sm:$0xff]  }
 0x8ea   :  { %v27076_v9 = vld [vmem:[%s36414_s1 + $0x4d80] ss:$8 sps:$4 sm:$0xff]  }
 0x8ec   :  { %18039 = vmatpush1.bf16.msra.mxu1 %v26985_v10  ;;  %19720 = vmatpush1.bf16.msra.mxu0 %v26988_v29  ;;  %v27081_v10 = vld [vmem:[%s36414_s1 + $0x2494] ss:$8 sps:$4 sm:$0xff]  }
 0x8ed   :  { %18040 = vmatprep.subr.bf16.mxu1 %v26993_v14  ;;  %19721 = vmatprep.subr.bf16.mxu0 %v26996_v6  ;;  %v27084_v29 = vld [vmem:[%s36414_s1 + $0x4d94] ss:$8 sps:$4 sm:$0xff]   ;;  %v27079_v14 = vld [vmem:[%s36414_s1 + $0x2490] ss:$8 sps:$4 sm:$0xff]  }
 0x8ee   :  { %v27082_v6 = vld [vmem:[%s36414_s1 + $0x4d90] ss:$8 sps:$4 sm:$0xff]  }
 0x8f0   :  { %18041 = vmatpush1.bf16.msra.mxu1 %v26991_v7  ;;  %19722 = vmatpush1.bf16.msra.mxu0 %v26994_v15  ;;  %v27087_v7 = vld [vmem:[%s36414_s1 + $0x24a4] ss:$8 sps:$4 sm:$0xff]  }
 0x8f1   :  { %18042 = vmatprep.subr.bf16.mxu1 %v26999_v16  ;;  %19723 = vmatprep.subr.bf16.mxu0 %v27002_v33  ;;  %v27090_v15 = vld [vmem:[%s36414_s1 + $0x4da4] ss:$8 sps:$4 sm:$0xff]   ;;  %v27085_v16 = vld [vmem:[%s36414_s1 + $0x24a0] ss:$8 sps:$4 sm:$0xff]  }
 0x8f2   :  { %v27088_v33 = vld [vmem:[%s36414_s1 + $0x4da0] ss:$8 sps:$4 sm:$0xff]  }
 0x8f4   :  { %18043 = vmatpush1.bf16.msra.mxu1 %v26997_v22  ;;  %19724 = vmatpush1.bf16.msra.mxu0 %v27000_v12  ;;  %v27093_v22 = vld [vmem:[%s36414_s1 + $0x24b4] ss:$8 sps:$4 sm:$0xff]  }
 0x8f5   :  { %18044 = vmatprep.subr.bf16.mxu1 %v27005_v13  ;;  %19725 = vmatprep.subr.bf16.mxu0 %v27008_v39  ;;  %v27096_v12 = vld [vmem:[%s36414_s1 + $0x4db4] ss:$8 sps:$4 sm:$0xff]   ;;  %v27091_v13 = vld [vmem:[%s36414_s1 + $0x24b0] ss:$8 sps:$4 sm:$0xff]  }
 0x8f6   :  { %v27094_v39 = vld [vmem:[%s36414_s1 + $0x4db0] ss:$8 sps:$4 sm:$0xff]  }
 0x8f8   :  { %18045 = vmatpush1.bf16.msra.mxu1 %v27003_v51  ;;  %19726 = vmatpush1.bf16.msra.mxu0 %v27006_v23  ;;  %v27099_v51 = vld [vmem:[%s36414_s1 + $0x24c4] ss:$8 sps:$4 sm:$0xff]  }
 0x8f9   :  { %18046 = vmatprep.subr.bf16.mxu1 %v27011_v30  ;;  %19727 = vmatprep.subr.bf16.mxu0 %v27014_v45  ;;  %v27102_v23 = vld [vmem:[%s36414_s1 + $0x4dc4] ss:$8 sps:$4 sm:$0xff]   ;;  %v27097_v30 = vld [vmem:[%s36414_s1 + $0x24c0] ss:$8 sps:$4 sm:$0xff]  }
 0x8fa   :  { %v27100_v45 = vld [vmem:[%s36414_s1 + $0x4dc0] ss:$8 sps:$4 sm:$0xff]  }
 0x8fc   :  { %18047 = vmatpush1.bf16.msra.mxu1 %v27009_v57  ;;  %19728 = vmatpush1.bf16.msra.mxu0 %v27012_v19  ;;  %v27105_v57 = vld [vmem:[%s36414_s1 + $0x24d4] ss:$8 sps:$4 sm:$0xff]  }
 0x8fd   :  { %18048 = vmatprep.subr.bf16.mxu1 %v27017_v21  ;;  %19729 = vmatprep.subr.bf16.mxu0 %v27020_v31  ;;  %v27108_v19 = vld [vmem:[%s36414_s1 + $0x4dd4] ss:$8 sps:$4 sm:$0xff]   ;;  %v27103_v21 = vld [vmem:[%s36414_s1 + $0x24d0] ss:$8 sps:$4 sm:$0xff]  }
 0x8fe   :  { %v27106_v31 = vld [vmem:[%s36414_s1 + $0x4dd0] ss:$8 sps:$4 sm:$0xff]  }
 0x900   :  { %18049 = vmatpush1.bf16.msra.mxu1 %v27015_v36  ;;  %19730 = vmatpush1.bf16.msra.mxu0 %v27018_v26  ;;  %v27111_v36 = vld [vmem:[%s36414_s1 + $0x24e4] ss:$8 sps:$4 sm:$0xff]  }
 0x901   :  { %18059 = vmatprep.subr.bf16.mxu1 %v27025_v63  ;;  %19740 = vmatprep.subr.bf16.mxu0 %v27030_v27  ;;  %v27114_v26 = vld [vmem:[%s36414_s1 + $0x4de4] ss:$8 sps:$4 sm:$0xff]   ;;  %v27109_v63 = vld [vmem:[%s36414_s1 + $0x24e0] ss:$8 sps:$4 sm:$0xff]  }
 0x902   :  { %v27112_v27 = vld [vmem:[%s36414_s1 + $0x4de0] ss:$8 sps:$4 sm:$0xff]  }
 0x903   :  { %18051 = vmatmul.mubr.bf16.vlgmr.msra.gmra.mrb[0].mxu1 %v20283_v28  ;;  %19732 = vmatmul.mubr.bf16.vlgmr.msra.gmra.mrb[0].mxu0 %v20365_v37  ;;  %v27117_v28 = vld [vmem:[%s36414_s1 + $0x24f4] ss:$8 sps:$4 sm:$0xff]  }
 0x904   :  { %18060 = vmatpush1.bf16.msra.mxu1 %v27023_v42  ;;  %19741 = vmatpush1.bf16.msra.mxu0 %v27028_v24  ;;  %v27120_v37 = vld [vmem:[%s36414_s1 + $0x4df4] ss:$8 sps:$4 sm:$0xff]   ;;  %v27115_v42 = vld [vmem:[%s36414_s1 + $0x24f0] ss:$8 sps:$4 sm:$0xff]  }
 0x905   :  { %18061 = vmatprep.subr.bf16.mxu1 %v27033_v5  ;;  %19742 = vmatprep.subr.bf16.mxu0 %v27036_v34  ;;  %v27118_v24 = vld [vmem:[%s36414_s1 + $0x4df0] ss:$8 sps:$4 sm:$0xff]   ;;  %v27125_v5 = vld [vmem:[%s36414_s1 + $0x2504] ss:$8 sps:$4 sm:$0xff]  }
 0x906   :  { %18091 = vmatprep.mubr.bf16.mxu1 %v20286_v35  ;;  %19772 = vmatprep.mubr.bf16.mxu0 %v20368_v43  ;;  %v27130_v34 = vld [vmem:[%s36414_s1 + $0x4e04] ss:$8 sps:$4 sm:$0xff]   ;;  %v20285_v35 = vcombine.low %v35189_v38, %v35189_v38  ;;  %v20367_v43 = vcombine.low %v35194_v11, %v35194_v11  ;;  %v27128_v38 = vld [vmem:[%s36414_s1 + $0x4e00] ss:$8 sps:$4 sm:$0xff]   ;;  %v27133_v11 = vld [vmem:[%s36414_s1 + $0x2514] ss:$8 sps:$4 sm:$0xff]  }
 0x908   :  { %18062 = vmatpush1.bf16.msra.mxu1 %v27031_v44  ;;  %19743 = vmatpush1.bf16.msra.mxu0 %v27034_v17  ;;  %v35399_v44 = vld [vmem:[%s36413_s0 + $0x128] sm:$0xff]  ;;  %v35404_v17 = vld [vmem:[%s36413_s0 + $0x270] sm:$0xff] }
 0x909   :  { %18063 = vmatprep.subr.bf16.mxu1 %v27039_v48  ;;  %19744 = vmatprep.subr.bf16.mxu0 %v27042_v40  ;;  %v27123_v48 = vld [vmem:[%s36414_s1 + $0x2500] ss:$8 sps:$4 sm:$0xff]   ;;  %v27136_v40 = vld [vmem:[%s36414_s1 + $0x4e14] ss:$8 sps:$4 sm:$0xff]  }
 0x90c   :  { %18064 = vmatpush1.bf16.msra.mxu1 %v27037_v41  ;;  %19745 = vmatpush1.bf16.msra.mxu0 %v27040_v49  ;;  %v20288_v41 = vcombine.high %v35399_v44, %v35399_v44  ;;  %v20370_v49 = vcombine.high %v35404_v17, %v35404_v17 }
 0x90d   :  { %18065 = vmatprep.subr.bf16.mxu1 %v27045_v50  ;;  %19746 = vmatprep.subr.bf16.mxu0 %v27048_v18  ;;  %v27131_v50 = vld [vmem:[%s36414_s1 + $0x2510] ss:$8 sps:$4 sm:$0xff]  }
 0x90e   :  { %v27134_v18 = vld [vmem:[%s36414_s1 + $0x4e10] ss:$8 sps:$4 sm:$0xff]  }
 0x910   :  { %18066 = vmatpush1.bf16.msra.mxu1 %v27043_v54  ;;  %19747 = vmatpush1.bf16.msra.mxu0 %v27046_v46  ;;  %v27139_v54 = vld [vmem:[%s36414_s1 + $0x2524] ss:$8 sps:$4 sm:$0xff]  }
 0x911   :  { %18067 = vmatprep.subr.bf16.mxu1 %v27051_v47  ;;  %19748 = vmatprep.subr.bf16.mxu0 %v27054_v55  ;;  %v27142_v46 = vld [vmem:[%s36414_s1 + $0x4e24] ss:$8 sps:$4 sm:$0xff]   ;;  %v27137_v47 = vld [vmem:[%s36414_s1 + $0x2520] ss:$8 sps:$4 sm:$0xff]  }
 0x912   :  { %v27140_v55 = vld [vmem:[%s36414_s1 + $0x4e20] ss:$8 sps:$4 sm:$0xff]  }
 0x914   :  { %18068 = vmatpush1.bf16.msra.mxu1 %v27049_v56  ;;  %19749 = vmatpush1.bf16.msra.mxu0 %v27052_v25  ;;  %v27145_v56 = vld [vmem:[%s36414_s1 + $0x2534] ss:$8 sps:$4 sm:$0xff]  }
 0x915   :  { %18069 = vmatprep.subr.bf16.mxu1 %v27057_v60  ;;  %19750 = vmatprep.subr.bf16.mxu0 %v27060_v52  ;;  %v27148_v25 = vld [vmem:[%s36414_s1 + $0x4e34] ss:$8 sps:$4 sm:$0xff]   ;;  %v27143_v60 = vld [vmem:[%s36414_s1 + $0x2530] ss:$8 sps:$4 sm:$0xff]  }
 0x916   :  { %v27146_v52 = vld [vmem:[%s36414_s1 + $0x4e30] ss:$8 sps:$4 sm:$0xff]  }
 0x918   :  { %18070 = vmatpush1.bf16.msra.mxu1 %v27055_v53  ;;  %19751 = vmatpush1.bf16.msra.mxu0 %v27058_v61  ;;  %v27151_v53 = vld [vmem:[%s36414_s1 + $0x2544] ss:$8 sps:$4 sm:$0xff]  }
 0x919   :  { %18071 = vmatprep.subr.bf16.mxu1 %v27063_v62  ;;  %19752 = vmatprep.subr.bf16.mxu0 %v27066_v20  ;;  %v27154_v61 = vld [vmem:[%s36414_s1 + $0x4e44] ss:$8 sps:$4 sm:$0xff]   ;;  %v27149_v62 = vld [vmem:[%s36414_s1 + $0x2540] ss:$8 sps:$4 sm:$0xff]  }
 0x91a   :  { %v27152_v20 = vld [vmem:[%s36414_s1 + $0x4e40] ss:$8 sps:$4 sm:$0xff]  }
 0x91c   :  { %18072 = vmatpush1.bf16.msra.mxu1 %v27061_v2  ;;  %19753 = vmatpush1.bf16.msra.mxu0 %v27064_v58  ;;  %v27157_v2 = vld [vmem:[%s36414_s1 + $0x2554] ss:$8 sps:$4 sm:$0xff]  }
 0x91d   :  { %18073 = vmatprep.subr.bf16.mxu1 %v27069_v59  ;;  %19754 = vmatprep.subr.bf16.mxu0 %v27072_v3  ;;  %v27160_v58 = vld [vmem:[%s36414_s1 + $0x4e54] ss:$8 sps:$4 sm:$0xff]   ;;  %v27155_v59 = vld [vmem:[%s36414_s1 + $0x2550] ss:$8 sps:$4 sm:$0xff]  }
 0x91e   :  { %v27158_v3 = vld [vmem:[%s36414_s1 + $0x4e50] ss:$8 sps:$4 sm:$0xff]  }
 0x920   :  { %18074 = vmatpush1.bf16.msra.mxu1 %v27067_v4  ;;  %19755 = vmatpush1.bf16.msra.mxu0 %v27070_v32  ;;  %v27163_v4 = vld [vmem:[%s36414_s1 + $0x2564] ss:$8 sps:$4 sm:$0xff]  }
 0x921   :  { %18075 = vmatprep.subr.bf16.mxu1 %v27075_v8  ;;  %19756 = vmatprep.subr.bf16.mxu0 %v27078_v0  ;;  %v27166_v32 = vld [vmem:[%s36414_s1 + $0x4e64] ss:$8 sps:$4 sm:$0xff]   ;;  %v27161_v8 = vld [vmem:[%s36414_s1 + $0x2560] ss:$8 sps:$4 sm:$0xff]  }
 0x922   :  { %v27164_v0 = vld [vmem:[%s36414_s1 + $0x4e60] ss:$8 sps:$4 sm:$0xff]  }
 0x924   :  { %18076 = vmatpush1.bf16.msra.mxu1 %v27073_v1  ;;  %19757 = vmatpush1.bf16.msra.mxu0 %v27076_v9  ;;  %v27169_v1 = vld [vmem:[%s36414_s1 + $0x2574] ss:$8 sps:$4 sm:$0xff]  }
 0x925   :  { %18077 = vmatprep.subr.bf16.mxu1 %v27081_v10  ;;  %19758 = vmatprep.subr.bf16.mxu0 %v27084_v29  ;;  %v27172_v9 = vld [vmem:[%s36414_s1 + $0x4e74] ss:$8 sps:$4 sm:$0xff]   ;;  %v27167_v10 = vld [vmem:[%s36414_s1 + $0x2570] ss:$8 sps:$4 sm:$0xff]  }
 0x926   :  { %v27170_v29 = vld [vmem:[%s36414_s1 + $0x4e70] ss:$8 sps:$4 sm:$0xff]  }
 0x928   :  { %18078 = vmatpush1.bf16.msra.mxu1 %v27079_v14  ;;  %19759 = vmatpush1.bf16.msra.mxu0 %v27082_v6  ;;  %v27175_v14 = vld [vmem:[%s36414_s1 + $0x2584] ss:$8 sps:$4 sm:$0xff]  }
 0x929   :  { %18079 = vmatprep.subr.bf16.mxu1 %v27087_v7  ;;  %19760 = vmatprep.subr.bf16.mxu0 %v27090_v15  ;;  %v27178_v6 = vld [vmem:[%s36414_s1 + $0x4e84] ss:$8 sps:$4 sm:$0xff]   ;;  %v27173_v7 = vld [vmem:[%s36414_s1 + $0x2580] ss:$8 sps:$4 sm:$0xff]  }
 0x92a   :  { %v27176_v15 = vld [vmem:[%s36414_s1 + $0x4e80] ss:$8 sps:$4 sm:$0xff]  }
 0x92c   :  { %18080 = vmatpush1.bf16.msra.mxu1 %v27085_v16  ;;  %19761 = vmatpush1.bf16.msra.mxu0 %v27088_v33  ;;  %v27181_v16 = vld [vmem:[%s36414_s1 + $0x2594] ss:$8 sps:$4 sm:$0xff]  }
 0x92d   :  { %18081 = vmatprep.subr.bf16.mxu1 %v27093_v22  ;;  %19762 = vmatprep.subr.bf16.mxu0 %v27096_v12  ;;  %v27184_v33 = vld [vmem:[%s36414_s1 + $0x4e94] ss:$8 sps:$4 sm:$0xff]   ;;  %v27179_v22 = vld [vmem:[%s36414_s1 + $0x2590] ss:$8 sps:$4 sm:$0xff]  }
 0x92e   :  { %v27182_v12 = vld [vmem:[%s36414_s1 + $0x4e90] ss:$8 sps:$4 sm:$0xff]  }
 0x930   :  { %18082 = vmatpush1.bf16.msra.mxu1 %v27091_v13  ;;  %19763 = vmatpush1.bf16.msra.mxu0 %v27094_v39  ;;  %v27187_v13 = vld [vmem:[%s36414_s1 + $0x25a4] ss:$8 sps:$4 sm:$0xff]  }
 0x931   :  { %18083 = vmatprep.subr.bf16.mxu1 %v27099_v51  ;;  %19764 = vmatprep.subr.bf16.mxu0 %v27102_v23  ;;  %v27190_v39 = vld [vmem:[%s36414_s1 + $0x4ea4] ss:$8 sps:$4 sm:$0xff]   ;;  %v27185_v51 = vld [vmem:[%s36414_s1 + $0x25a0] ss:$8 sps:$4 sm:$0xff]  }
 0x932   :  { %v27188_v23 = vld [vmem:[%s36414_s1 + $0x4ea0] ss:$8 sps:$4 sm:$0xff]  }
 0x934   :  { %18084 = vmatpush1.bf16.msra.mxu1 %v27097_v30  ;;  %19765 = vmatpush1.bf16.msra.mxu0 %v27100_v45  ;;  %v27193_v30 = vld [vmem:[%s36414_s1 + $0x25b4] ss:$8 sps:$4 sm:$0xff]  }
 0x935   :  { %18085 = vmatprep.subr.bf16.mxu1 %v27105_v57  ;;  %19766 = vmatprep.subr.bf16.mxu0 %v27108_v19  ;;  %v27196_v45 = vld [vmem:[%s36414_s1 + $0x4eb4] ss:$8 sps:$4 sm:$0xff]   ;;  %v27191_v57 = vld [vmem:[%s36414_s1 + $0x25b0] ss:$8 sps:$4 sm:$0xff]  }
 0x936   :  { %v27194_v19 = vld [vmem:[%s36414_s1 + $0x4eb0] ss:$8 sps:$4 sm:$0xff]  }
 0x938   :  { %18086 = vmatpush1.bf16.msra.mxu1 %v27103_v21  ;;  %19767 = vmatpush1.bf16.msra.mxu0 %v27106_v31  ;;  %v27199_v21 = vld [vmem:[%s36414_s1 + $0x25c4] ss:$8 sps:$4 sm:$0xff]  }
 0x939   :  { %18087 = vmatprep.subr.bf16.mxu1 %v27111_v36  ;;  %19768 = vmatprep.subr.bf16.mxu0 %v27114_v26  ;;  %v27202_v31 = vld [vmem:[%s36414_s1 + $0x4ec4] ss:$8 sps:$4 sm:$0xff]   ;;  %v27197_v36 = vld [vmem:[%s36414_s1 + $0x25c0] ss:$8 sps:$4 sm:$0xff]  }
 0x93a   :  { %v27200_v26 = vld [vmem:[%s36414_s1 + $0x4ec0] ss:$8 sps:$4 sm:$0xff]  }
 0x93c   :  { %18088 = vmatpush1.bf16.msra.mxu1 %v27109_v63  ;;  %19769 = vmatpush1.bf16.msra.mxu0 %v27112_v27  ;;  %v27205_v63 = vld [vmem:[%s36414_s1 + $0x25d4] ss:$8 sps:$4 sm:$0xff]  }
 0x93d   :  { %18089 = vmatprep.subr.bf16.mxu1 %v27117_v28  ;;  %19770 = vmatprep.subr.bf16.mxu0 %v27120_v37  ;;  %v27208_v27 = vld [vmem:[%s36414_s1 + $0x4ed4] ss:$8 sps:$4 sm:$0xff]   ;;  %v27203_v28 = vld [vmem:[%s36414_s1 + $0x25d0] ss:$8 sps:$4 sm:$0xff]  }
 0x93e   :  { %v27206_v37 = vld [vmem:[%s36414_s1 + $0x4ed0] ss:$8 sps:$4 sm:$0xff]  }
 0x940   :  { %18090 = vmatpush1.bf16.msra.mxu1 %v27115_v42  ;;  %19771 = vmatpush1.bf16.msra.mxu0 %v27118_v24  ;;  %v27211_v42 = vld [vmem:[%s36414_s1 + $0x25e4] ss:$8 sps:$4 sm:$0xff]  }
 0x941   :  { %18100 = vmatprep.subr.bf16.mxu1 %v27125_v5  ;;  %19781 = vmatprep.subr.bf16.mxu0 %v27130_v34  ;;  %v27214_v24 = vld [vmem:[%s36414_s1 + $0x4ee4] ss:$8 sps:$4 sm:$0xff]   ;;  %v27209_v5 = vld [vmem:[%s36414_s1 + $0x25e0] ss:$8 sps:$4 sm:$0xff]  }
 0x942   :  { %v27212_v34 = vld [vmem:[%s36414_s1 + $0x4ee0] ss:$8 sps:$4 sm:$0xff]  }
 0x943   :  { %18092 = vmatmul.mubr.bf16.vlgmr.msra.gmra.mrb[0].mxu1 %v20285_v35  ;;  %19773 = vmatmul.mubr.bf16.vlgmr.msra.gmra.mrb[0].mxu0 %v20367_v43  ;;  %v27217_v35 = vld [vmem:[%s36414_s1 + $0x25f4] ss:$8 sps:$4 sm:$0xff]  }
 0x944   :  { %18101 = vmatpush1.bf16.msra.mxu1 %v27123_v48  ;;  %19782 = vmatpush1.bf16.msra.mxu0 %v27128_v38  ;;  %v27220_v43 = vld [vmem:[%s36414_s1 + $0x4ef4] ss:$8 sps:$4 sm:$0xff]   ;;  %v27215_v48 = vld [vmem:[%s36414_s1 + $0x25f0] ss:$8 sps:$4 sm:$0xff]  }
 0x945   :  { %18102 = vmatprep.subr.bf16.mxu1 %v27133_v11  ;;  %19783 = vmatprep.subr.bf16.mxu0 %v27136_v40  ;;  %v27218_v38 = vld [vmem:[%s36414_s1 + $0x4ef0] ss:$8 sps:$4 sm:$0xff]   ;;  %v27225_v11 = vld [vmem:[%s36414_s1 + $0x2604] ss:$8 sps:$4 sm:$0xff]  }
 0x946   :  { %18132 = vmatprep.mubr.bf16.mxu1 %v20288_v41  ;;  %19813 = vmatprep.mubr.bf16.mxu0 %v20370_v49  ;;  %v27230_v40 = vld [vmem:[%s36414_s1 + $0x4f04] ss:$8 sps:$4 sm:$0xff]   ;;  %v20287_v41 = vcombine.low %v35399_v44, %v35399_v44  ;;  %v20369_v49 = vcombine.low %v35404_v17, %v35404_v17  ;;  %v27228_v44 = vld [vmem:[%s36414_s1 + $0x4f00] ss:$8 sps:$4 sm:$0xff]   ;;  %v27233_v17 = vld [vmem:[%s36414_s1 + $0x2614] ss:$8 sps:$4 sm:$0xff]  }
 0x948   :  { %18103 = vmatpush1.bf16.msra.mxu1 %v27131_v50  ;;  %19784 = vmatpush1.bf16.msra.mxu0 %v27134_v18  ;;  %v35609_v50 = vld [vmem:[%s36413_s0 + $0x130] sm:$0xff]  ;;  %v35614_v18 = vld [vmem:[%s36413_s0 + $0x278] sm:$0xff] }
 0x949   :  { %18104 = vmatprep.subr.bf16.mxu1 %v27139_v54  ;;  %19785 = vmatprep.subr.bf16.mxu0 %v27142_v46  ;;  %v27223_v54 = vld [vmem:[%s36414_s1 + $0x2600] ss:$8 sps:$4 sm:$0xff]   ;;  %v27236_v46 = vld [vmem:[%s36414_s1 + $0x4f14] ss:$8 sps:$4 sm:$0xff]  }
 0x94c   :  { %18105 = vmatpush1.bf16.msra.mxu1 %v27137_v47  ;;  %19786 = vmatpush1.bf16.msra.mxu0 %v27140_v55  ;;  %v20290_v47 = vcombine.high %v35609_v50, %v35609_v50  ;;  %v20372_v55 = vcombine.high %v35614_v18, %v35614_v18 }
 0x94d   :  { %18106 = vmatprep.subr.bf16.mxu1 %v27145_v56  ;;  %19787 = vmatprep.subr.bf16.mxu0 %v27148_v25  ;;  %v27231_v56 = vld [vmem:[%s36414_s1 + $0x2610] ss:$8 sps:$4 sm:$0xff]  }
 0x94e   :  { %v27234_v25 = vld [vmem:[%s36414_s1 + $0x4f10] ss:$8 sps:$4 sm:$0xff]  }
 0x950   :  { %18107 = vmatpush1.bf16.msra.mxu1 %v27143_v60  ;;  %19788 = vmatpush1.bf16.msra.mxu0 %v27146_v52  ;;  %v27239_v60 = vld [vmem:[%s36414_s1 + $0x2624] ss:$8 sps:$4 sm:$0xff]  }
 0x951   :  { %18108 = vmatprep.subr.bf16.mxu1 %v27151_v53  ;;  %19789 = vmatprep.subr.bf16.mxu0 %v27154_v61  ;;  %v27242_v52 = vld [vmem:[%s36414_s1 + $0x4f24] ss:$8 sps:$4 sm:$0xff]   ;;  %v27237_v53 = vld [vmem:[%s36414_s1 + $0x2620] ss:$8 sps:$4 sm:$0xff]  }
 0x952   :  { %v27240_v61 = vld [vmem:[%s36414_s1 + $0x4f20] ss:$8 sps:$4 sm:$0xff]  }
 0x954   :  { %18109 = vmatpush1.bf16.msra.mxu1 %v27149_v62  ;;  %19790 = vmatpush1.bf16.msra.mxu0 %v27152_v20  ;;  %v27245_v62 = vld [vmem:[%s36414_s1 + $0x2634] ss:$8 sps:$4 sm:$0xff]  }
 0x955   :  { %18110 = vmatprep.subr.bf16.mxu1 %v27157_v2  ;;  %19791 = vmatprep.subr.bf16.mxu0 %v27160_v58  ;;  %v27248_v20 = vld [vmem:[%s36414_s1 + $0x4f34] ss:$8 sps:$4 sm:$0xff]   ;;  %v27243_v2 = vld [vmem:[%s36414_s1 + $0x2630] ss:$8 sps:$4 sm:$0xff]  }
 0x956   :  { %v27246_v58 = vld [vmem:[%s36414_s1 + $0x4f30] ss:$8 sps:$4 sm:$0xff]  }
 0x958   :  { %18111 = vmatpush1.bf16.msra.mxu1 %v27155_v59  ;;  %19792 = vmatpush1.bf16.msra.mxu0 %v27158_v3  ;;  %v27251_v59 = vld [vmem:[%s36414_s1 + $0x2644] ss:$8 sps:$4 sm:$0xff]  }
 0x959   :  { %18112 = vmatprep.subr.bf16.mxu1 %v27163_v4  ;;  %19793 = vmatprep.subr.bf16.mxu0 %v27166_v32  ;;  %v27254_v3 = vld [vmem:[%s36414_s1 + $0x4f44] ss:$8 sps:$4 sm:$0xff]   ;;  %v27249_v4 = vld [vmem:[%s36414_s1 + $0x2640] ss:$8 sps:$4 sm:$0xff]  }
 0x95a   :  { %v27252_v32 = vld [vmem:[%s36414_s1 + $0x4f40] ss:$8 sps:$4 sm:$0xff]  }
 0x95c   :  { %18113 = vmatpush1.bf16.msra.mxu1 %v27161_v8  ;;  %19794 = vmatpush1.bf16.msra.mxu0 %v27164_v0  ;;  %v27257_v8 = vld [vmem:[%s36414_s1 + $0x2654] ss:$8 sps:$4 sm:$0xff]  }
 0x95d   :  { %18114 = vmatprep.subr.bf16.mxu1 %v27169_v1  ;;  %19795 = vmatprep.subr.bf16.mxu0 %v27172_v9  ;;  %v27260_v0 = vld [vmem:[%s36414_s1 + $0x4f54] ss:$8 sps:$4 sm:$0xff]   ;;  %v27255_v1 = vld [vmem:[%s36414_s1 + $0x2650] ss:$8 sps:$4 sm:$0xff]  }
 0x95e   :  { %v27258_v9 = vld [vmem:[%s36414_s1 + $0x4f50] ss:$8 sps:$4 sm:$0xff]  }
 0x960   :  { %18115 = vmatpush1.bf16.msra.mxu1 %v27167_v10  ;;  %19796 = vmatpush1.bf16.msra.mxu0 %v27170_v29  ;;  %v27263_v10 = vld [vmem:[%s36414_s1 + $0x2664] ss:$8 sps:$4 sm:$0xff]  }
 0x961   :  { %18116 = vmatprep.subr.bf16.mxu1 %v27175_v14  ;;  %19797 = vmatprep.subr.bf16.mxu0 %v27178_v6  ;;  %v27266_v29 = vld [vmem:[%s36414_s1 + $0x4f64] ss:$8 sps:$4 sm:$0xff]   ;;  %v27261_v14 = vld [vmem:[%s36414_s1 + $0x2660] ss:$8 sps:$4 sm:$0xff]  }
 0x962   :  { %v27264_v6 = vld [vmem:[%s36414_s1 + $0x4f60] ss:$8 sps:$4 sm:$0xff]  }
 0x964   :  { %18117 = vmatpush1.bf16.msra.mxu1 %v27173_v7  ;;  %19798 = vmatpush1.bf16.msra.mxu0 %v27176_v15  ;;  %v27269_v7 = vld [vmem:[%s36414_s1 + $0x2674] ss:$8 sps:$4 sm:$0xff]  }
 0x965   :  { %18118 = vmatprep.subr.bf16.mxu1 %v27181_v16  ;;  %19799 = vmatprep.subr.bf16.mxu0 %v27184_v33  ;;  %v27272_v15 = vld [vmem:[%s36414_s1 + $0x4f74] ss:$8 sps:$4 sm:$0xff]   ;;  %v27267_v16 = vld [vmem:[%s36414_s1 + $0x2670] ss:$8 sps:$4 sm:$0xff]  }
 0x966   :  { %v27270_v33 = vld [vmem:[%s36414_s1 + $0x4f70] ss:$8 sps:$4 sm:$0xff]  }
 0x968   :  { %18119 = vmatpush1.bf16.msra.mxu1 %v27179_v22  ;;  %19800 = vmatpush1.bf16.msra.mxu0 %v27182_v12  ;;  %v27275_v22 = vld [vmem:[%s36414_s1 + $0x2684] ss:$8 sps:$4 sm:$0xff]  }
 0x969   :  { %18120 = vmatprep.subr.bf16.mxu1 %v27187_v13  ;;  %19801 = vmatprep.subr.bf16.mxu0 %v27190_v39  ;;  %v27278_v12 = vld [vmem:[%s36414_s1 + $0x4f84] ss:$8 sps:$4 sm:$0xff]   ;;  %v27273_v13 = vld [vmem:[%s36414_s1 + $0x2680] ss:$8 sps:$4 sm:$0xff]  }
 0x96a   :  { %v27276_v39 = vld [vmem:[%s36414_s1 + $0x4f80] ss:$8 sps:$4 sm:$0xff]  }
 0x96c   :  { %18121 = vmatpush1.bf16.msra.mxu1 %v27185_v51  ;;  %19802 = vmatpush1.bf16.msra.mxu0 %v27188_v23  ;;  %v27281_v51 = vld [vmem:[%s36414_s1 + $0x2694] ss:$8 sps:$4 sm:$0xff]  }
 0x96d   :  { %18122 = vmatprep.subr.bf16.mxu1 %v27193_v30  ;;  %19803 = vmatprep.subr.bf16.mxu0 %v27196_v45  ;;  %v27284_v23 = vld [vmem:[%s36414_s1 + $0x4f94] ss:$8 sps:$4 sm:$0xff]   ;;  %v27279_v30 = vld [vmem:[%s36414_s1 + $0x2690] ss:$8 sps:$4 sm:$0xff]  }
 0x96e   :  { %v27282_v45 = vld [vmem:[%s36414_s1 + $0x4f90] ss:$8 sps:$4 sm:$0xff]  }
 0x970   :  { %18123 = vmatpush1.bf16.msra.mxu1 %v27191_v57  ;;  %19804 = vmatpush1.bf16.msra.mxu0 %v27194_v19  ;;  %v27287_v57 = vld [vmem:[%s36414_s1 + $0x26a4] ss:$8 sps:$4 sm:$0xff]  }
 0x971   :  { %18124 = vmatprep.subr.bf16.mxu1 %v27199_v21  ;;  %19805 = vmatprep.subr.bf16.mxu0 %v27202_v31  ;;  %v27290_v19 = vld [vmem:[%s36414_s1 + $0x4fa4] ss:$8 sps:$4 sm:$0xff]   ;;  %v27285_v21 = vld [vmem:[%s36414_s1 + $0x26a0] ss:$8 sps:$4 sm:$0xff]  }
 0x972   :  { %v27288_v31 = vld [vmem:[%s36414_s1 + $0x4fa0] ss:$8 sps:$4 sm:$0xff]  }
 0x974   :  { %18125 = vmatpush1.bf16.msra.mxu1 %v27197_v36  ;;  %19806 = vmatpush1.bf16.msra.mxu0 %v27200_v26  ;;  %v27293_v36 = vld [vmem:[%s36414_s1 + $0x26b4] ss:$8 sps:$4 sm:$0xff]  }
 0x975   :  { %18126 = vmatprep.subr.bf16.mxu1 %v27205_v63  ;;  %19807 = vmatprep.subr.bf16.mxu0 %v27208_v27  ;;  %v27296_v26 = vld [vmem:[%s36414_s1 + $0x4fb4] ss:$8 sps:$4 sm:$0xff]   ;;  %v27291_v63 = vld [vmem:[%s36414_s1 + $0x26b0] ss:$8 sps:$4 sm:$0xff]  }
 0x976   :  { %v27294_v27 = vld [vmem:[%s36414_s1 + $0x4fb0] ss:$8 sps:$4 sm:$0xff]  }
 0x978   :  { %18127 = vmatpush1.bf16.msra.mxu1 %v27203_v28  ;;  %19808 = vmatpush1.bf16.msra.mxu0 %v27206_v37  ;;  %v27299_v28 = vld [vmem:[%s36414_s1 + $0x26c4] ss:$8 sps:$4 sm:$0xff]  }
 0x979   :  { %18128 = vmatprep.subr.bf16.mxu1 %v27211_v42  ;;  %19809 = vmatprep.subr.bf16.mxu0 %v27214_v24  ;;  %v27302_v37 = vld [vmem:[%s36414_s1 + $0x4fc4] ss:$8 sps:$4 sm:$0xff]   ;;  %v27297_v42 = vld [vmem:[%s36414_s1 + $0x26c0] ss:$8 sps:$4 sm:$0xff]  }
 0x97a   :  { %v27300_v24 = vld [vmem:[%s36414_s1 + $0x4fc0] ss:$8 sps:$4 sm:$0xff]  }
 0x97c   :  { %18129 = vmatpush1.bf16.msra.mxu1 %v27209_v5  ;;  %19810 = vmatpush1.bf16.msra.mxu0 %v27212_v34  ;;  %v27305_v5 = vld [vmem:[%s36414_s1 + $0x26d4] ss:$8 sps:$4 sm:$0xff]  }
 0x97d   :  { %18130 = vmatprep.subr.bf16.mxu1 %v27217_v35  ;;  %19811 = vmatprep.subr.bf16.mxu0 %v27220_v43  ;;  %v27308_v34 = vld [vmem:[%s36414_s1 + $0x4fd4] ss:$8 sps:$4 sm:$0xff]   ;;  %v27303_v35 = vld [vmem:[%s36414_s1 + $0x26d0] ss:$8 sps:$4 sm:$0xff]  }
 0x97e   :  { %v27306_v43 = vld [vmem:[%s36414_s1 + $0x4fd0] ss:$8 sps:$4 sm:$0xff]  }
 0x980   :  { %18131 = vmatpush1.bf16.msra.mxu1 %v27215_v48  ;;  %19812 = vmatpush1.bf16.msra.mxu0 %v27218_v38  ;;  %v27311_v48 = vld [vmem:[%s36414_s1 + $0x26e4] ss:$8 sps:$4 sm:$0xff]  }
 0x981   :  { %18141 = vmatprep.subr.bf16.mxu1 %v27225_v11  ;;  %19822 = vmatprep.subr.bf16.mxu0 %v27230_v40  ;;  %v27314_v38 = vld [vmem:[%s36414_s1 + $0x4fe4] ss:$8 sps:$4 sm:$0xff]   ;;  %v27309_v11 = vld [vmem:[%s36414_s1 + $0x26e0] ss:$8 sps:$4 sm:$0xff]  }
 0x982   :  { %v27312_v40 = vld [vmem:[%s36414_s1 + $0x4fe0] ss:$8 sps:$4 sm:$0xff]  }
 0x983   :  { %18133 = vmatmul.mubr.bf16.vlgmr.msra.gmra.mrb[0].mxu1 %v20287_v41  ;;  %19814 = vmatmul.mubr.bf16.vlgmr.msra.gmra.mrb[0].mxu0 %v20369_v49  ;;  %v27317_v41 = vld [vmem:[%s36414_s1 + $0x26f4] ss:$8 sps:$4 sm:$0xff]  }
 0x984   :  { %18142 = vmatpush1.bf16.msra.mxu1 %v27223_v54  ;;  %19823 = vmatpush1.bf16.msra.mxu0 %v27228_v44  ;;  %v27320_v49 = vld [vmem:[%s36414_s1 + $0x4ff4] ss:$8 sps:$4 sm:$0xff]   ;;  %v27315_v54 = vld [vmem:[%s36414_s1 + $0x26f0] ss:$8 sps:$4 sm:$0xff]  }
 0x985   :  { %18143 = vmatprep.subr.bf16.mxu1 %v27233_v17  ;;  %19824 = vmatprep.subr.bf16.mxu0 %v27236_v46  ;;  %v27318_v44 = vld [vmem:[%s36414_s1 + $0x4ff0] ss:$8 sps:$4 sm:$0xff]   ;;  %v27325_v17 = vld [vmem:[%s36414_s1 + $0x2704] ss:$8 sps:$4 sm:$0xff]  }
 0x986   :  { %18173 = vmatprep.mubr.bf16.mxu1 %v20290_v47  ;;  %19854 = vmatprep.mubr.bf16.mxu0 %v20372_v55  ;;  %v27330_v46 = vld [vmem:[%s36414_s1 + $0x5004] ss:$8 sps:$4 sm:$0xff]   ;;  %v20289_v47 = vcombine.low %v35609_v50, %v35609_v50  ;;  %v20371_v55 = vcombine.low %v35614_v18, %v35614_v18  ;;  %v27328_v50 = vld [vmem:[%s36414_s1 + $0x5000] ss:$8 sps:$4 sm:$0xff]   ;;  %v27333_v18 = vld [vmem:[%s36414_s1 + $0x2714] ss:$8 sps:$4 sm:$0xff]  }
 0x988   :  { %18144 = vmatpush1.bf16.msra.mxu1 %v27231_v56  ;;  %19825 = vmatpush1.bf16.msra.mxu0 %v27234_v25  ;;  %v35819_v56 = vld [vmem:[%s36413_s0 + $0x138] sm:$0xff]  ;;  %v35824_v25 = vld [vmem:[%s36413_s0 + $0x280] sm:$0xff] }
 0x989   :  { %18145 = vmatprep.subr.bf16.mxu1 %v27239_v60  ;;  %19826 = vmatprep.subr.bf16.mxu0 %v27242_v52  ;;  %v27323_v60 = vld [vmem:[%s36414_s1 + $0x2700] ss:$8 sps:$4 sm:$0xff]   ;;  %v27336_v52 = vld [vmem:[%s36414_s1 + $0x5014] ss:$8 sps:$4 sm:$0xff]  }
 0x98c   :  { %18146 = vmatpush1.bf16.msra.mxu1 %v27237_v53  ;;  %19827 = vmatpush1.bf16.msra.mxu0 %v27240_v61  ;;  %v20292_v53 = vcombine.high %v35819_v56, %v35819_v56  ;;  %v20374_v61 = vcombine.high %v35824_v25, %v35824_v25 }
 0x98d   :  { %18147 = vmatprep.subr.bf16.mxu1 %v27245_v62  ;;  %19828 = vmatprep.subr.bf16.mxu0 %v27248_v20  ;;  %v27331_v62 = vld [vmem:[%s36414_s1 + $0x2710] ss:$8 sps:$4 sm:$0xff]  }
 0x98e   :  { %v27334_v20 = vld [vmem:[%s36414_s1 + $0x5010] ss:$8 sps:$4 sm:$0xff]  }
 0x990   :  { %18148 = vmatpush1.bf16.msra.mxu1 %v27243_v2  ;;  %19829 = vmatpush1.bf16.msra.mxu0 %v27246_v58  ;;  %v27339_v2 = vld [vmem:[%s36414_s1 + $0x2724] ss:$8 sps:$4 sm:$0xff]  }
 0x991   :  { %18149 = vmatprep.subr.bf16.mxu1 %v27251_v59  ;;  %19830 = vmatprep.subr.bf16.mxu0 %v27254_v3  ;;  %v27342_v58 = vld [vmem:[%s36414_s1 + $0x5024] ss:$8 sps:$4 sm:$0xff]   ;;  %v27337_v59 = vld [vmem:[%s36414_s1 + $0x2720] ss:$8 sps:$4 sm:$0xff]  }
 0x992   :  { %v27340_v3 = vld [vmem:[%s36414_s1 + $0x5020] ss:$8 sps:$4 sm:$0xff]  }
 0x994   :  { %18150 = vmatpush1.bf16.msra.mxu1 %v27249_v4  ;;  %19831 = vmatpush1.bf16.msra.mxu0 %v27252_v32  ;;  %v27345_v4 = vld [vmem:[%s36414_s1 + $0x2734] ss:$8 sps:$4 sm:$0xff]  }
 0x995   :  { %18151 = vmatprep.subr.bf16.mxu1 %v27257_v8  ;;  %19832 = vmatprep.subr.bf16.mxu0 %v27260_v0  ;;  %v27348_v32 = vld [vmem:[%s36414_s1 + $0x5034] ss:$8 sps:$4 sm:$0xff]   ;;  %v27343_v8 = vld [vmem:[%s36414_s1 + $0x2730] ss:$8 sps:$4 sm:$0xff]  }
 0x996   :  { %v27346_v0 = vld [vmem:[%s36414_s1 + $0x5030] ss:$8 sps:$4 sm:$0xff]  }
 0x998   :  { %18152 = vmatpush1.bf16.msra.mxu1 %v27255_v1  ;;  %19833 = vmatpush1.bf16.msra.mxu0 %v27258_v9  ;;  %v27351_v1 = vld [vmem:[%s36414_s1 + $0x2744] ss:$8 sps:$4 sm:$0xff]  }
 0x999   :  { %18153 = vmatprep.subr.bf16.mxu1 %v27263_v10  ;;  %19834 = vmatprep.subr.bf16.mxu0 %v27266_v29  ;;  %v27354_v9 = vld [vmem:[%s36414_s1 + $0x5044] ss:$8 sps:$4 sm:$0xff]   ;;  %v27349_v10 = vld [vmem:[%s36414_s1 + $0x2740] ss:$8 sps:$4 sm:$0xff]  }
 0x99a   :  { %v27352_v29 = vld [vmem:[%s36414_s1 + $0x5040] ss:$8 sps:$4 sm:$0xff]  }
 0x99c   :  { %18154 = vmatpush1.bf16.msra.mxu1 %v27261_v14  ;;  %19835 = vmatpush1.bf16.msra.mxu0 %v27264_v6  ;;  %v27357_v14 = vld [vmem:[%s36414_s1 + $0x2754] ss:$8 sps:$4 sm:$0xff]  }
 0x99d   :  { %18155 = vmatprep.subr.bf16.mxu1 %v27269_v7  ;;  %19836 = vmatprep.subr.bf16.mxu0 %v27272_v15  ;;  %v27360_v6 = vld [vmem:[%s36414_s1 + $0x5054] ss:$8 sps:$4 sm:$0xff]   ;;  %v27355_v7 = vld [vmem:[%s36414_s1 + $0x2750] ss:$8 sps:$4 sm:$0xff]  }
 0x99e   :  { %v27358_v15 = vld [vmem:[%s36414_s1 + $0x5050] ss:$8 sps:$4 sm:$0xff]  }
 0x9a0   :  { %18156 = vmatpush1.bf16.msra.mxu1 %v27267_v16  ;;  %19837 = vmatpush1.bf16.msra.mxu0 %v27270_v33  ;;  %v27363_v16 = vld [vmem:[%s36414_s1 + $0x2764] ss:$8 sps:$4 sm:$0xff]  }
 0x9a1   :  { %18157 = vmatprep.subr.bf16.mxu1 %v27275_v22  ;;  %19838 = vmatprep.subr.bf16.mxu0 %v27278_v12  ;;  %v27366_v33 = vld [vmem:[%s36414_s1 + $0x5064] ss:$8 sps:$4 sm:$0xff]   ;;  %v27361_v22 = vld [vmem:[%s36414_s1 + $0x2760] ss:$8 sps:$4 sm:$0xff]  }
 0x9a2   :  { %v27364_v12 = vld [vmem:[%s36414_s1 + $0x5060] ss:$8 sps:$4 sm:$0xff]  }
 0x9a4   :  { %18158 = vmatpush1.bf16.msra.mxu1 %v27273_v13  ;;  %19839 = vmatpush1.bf16.msra.mxu0 %v27276_v39  ;;  %v27369_v13 = vld [vmem:[%s36414_s1 + $0x2774] ss:$8 sps:$4 sm:$0xff]  }
 0x9a5   :  { %18159 = vmatprep.subr.bf16.mxu1 %v27281_v51  ;;  %19840 = vmatprep.subr.bf16.mxu0 %v27284_v23  ;;  %v27372_v39 = vld [vmem:[%s36414_s1 + $0x5074] ss:$8 sps:$4 sm:$0xff]   ;;  %v27367_v51 = vld [vmem:[%s36414_s1 + $0x2770] ss:$8 sps:$4 sm:$0xff]  }
 0x9a6   :  { %v27370_v23 = vld [vmem:[%s36414_s1 + $0x5070] ss:$8 sps:$4 sm:$0xff]  }
 0x9a8   :  { %18160 = vmatpush1.bf16.msra.mxu1 %v27279_v30  ;;  %19841 = vmatpush1.bf16.msra.mxu0 %v27282_v45  ;;  %v27375_v30 = vld [vmem:[%s36414_s1 + $0x2784] ss:$8 sps:$4 sm:$0xff]  }
 0x9a9   :  { %18161 = vmatprep.subr.bf16.mxu1 %v27287_v57  ;;  %19842 = vmatprep.subr.bf16.mxu0 %v27290_v19  ;;  %v27378_v45 = vld [vmem:[%s36414_s1 + $0x5084] ss:$8 sps:$4 sm:$0xff]   ;;  %v27373_v57 = vld [vmem:[%s36414_s1 + $0x2780] ss:$8 sps:$4 sm:$0xff]  }
 0x9aa   :  { %v27376_v19 = vld [vmem:[%s36414_s1 + $0x5080] ss:$8 sps:$4 sm:$0xff]  }
 0x9ac   :  { %18162 = vmatpush1.bf16.msra.mxu1 %v27285_v21  ;;  %19843 = vmatpush1.bf16.msra.mxu0 %v27288_v31  ;;  %v27381_v21 = vld [vmem:[%s36414_s1 + $0x2794] ss:$8 sps:$4 sm:$0xff]  }
 0x9ad   :  { %18163 = vmatprep.subr.bf16.mxu1 %v27293_v36  ;;  %19844 = vmatprep.subr.bf16.mxu0 %v27296_v26  ;;  %v27384_v31 = vld [vmem:[%s36414_s1 + $0x5094] ss:$8 sps:$4 sm:$0xff]   ;;  %v27379_v36 = vld [vmem:[%s36414_s1 + $0x2790] ss:$8 sps:$4 sm:$0xff]  }
 0x9ae   :  { %v27382_v26 = vld [vmem:[%s36414_s1 + $0x5090] ss:$8 sps:$4 sm:$0xff]  }
 0x9b0   :  { %18164 = vmatpush1.bf16.msra.mxu1 %v27291_v63  ;;  %19845 = vmatpush1.bf16.msra.mxu0 %v27294_v27  ;;  %v27387_v63 = vld [vmem:[%s36414_s1 + $0x27a4] ss:$8 sps:$4 sm:$0xff]  }
 0x9b1   :  { %18165 = vmatprep.subr.bf16.mxu1 %v27299_v28  ;;  %19846 = vmatprep.subr.bf16.mxu0 %v27302_v37  ;;  %v27390_v27 = vld [vmem:[%s36414_s1 + $0x50a4] ss:$8 sps:$4 sm:$0xff]   ;;  %v27385_v28 = vld [vmem:[%s36414_s1 + $0x27a0] ss:$8 sps:$4 sm:$0xff]  }
 0x9b2   :  { %v27388_v37 = vld [vmem:[%s36414_s1 + $0x50a0] ss:$8 sps:$4 sm:$0xff]  }
 0x9b4   :  { %18166 = vmatpush1.bf16.msra.mxu1 %v27297_v42  ;;  %19847 = vmatpush1.bf16.msra.mxu0 %v27300_v24  ;;  %v27393_v42 = vld [vmem:[%s36414_s1 + $0x27b4] ss:$8 sps:$4 sm:$0xff]  }
 0x9b5   :  { %18167 = vmatprep.subr.bf16.mxu1 %v27305_v5  ;;  %19848 = vmatprep.subr.bf16.mxu0 %v27308_v34  ;;  %v27396_v24 = vld [vmem:[%s36414_s1 + $0x50b4] ss:$8 sps:$4 sm:$0xff]   ;;  %v27391_v5 = vld [vmem:[%s36414_s1 + $0x27b0] ss:$8 sps:$4 sm:$0xff]  }
 0x9b6   :  { %v27394_v34 = vld [vmem:[%s36414_s1 + $0x50b0] ss:$8 sps:$4 sm:$0xff]  }
 0x9b8   :  { %18168 = vmatpush1.bf16.msra.mxu1 %v27303_v35  ;;  %19849 = vmatpush1.bf16.msra.mxu0 %v27306_v43  ;;  %v27399_v35 = vld [vmem:[%s36414_s1 + $0x27c4] ss:$8 sps:$4 sm:$0xff]  }
 0x9b9   :  { %18169 = vmatprep.subr.bf16.mxu1 %v27311_v48  ;;  %19850 = vmatprep.subr.bf16.mxu0 %v27314_v38  ;;  %v27402_v43 = vld [vmem:[%s36414_s1 + $0x50c4] ss:$8 sps:$4 sm:$0xff]   ;;  %v27397_v48 = vld [vmem:[%s36414_s1 + $0x27c0] ss:$8 sps:$4 sm:$0xff]  }
 0x9ba   :  { %v27400_v38 = vld [vmem:[%s36414_s1 + $0x50c0] ss:$8 sps:$4 sm:$0xff]  }
 0x9bc   :  { %18170 = vmatpush1.bf16.msra.mxu1 %v27309_v11  ;;  %19851 = vmatpush1.bf16.msra.mxu0 %v27312_v40  ;;  %v27405_v11 = vld [vmem:[%s36414_s1 + $0x27d4] ss:$8 sps:$4 sm:$0xff]  }
 0x9bd   :  { %18171 = vmatprep.subr.bf16.mxu1 %v27317_v41  ;;  %19852 = vmatprep.subr.bf16.mxu0 %v27320_v49  ;;  %v27408_v40 = vld [vmem:[%s36414_s1 + $0x50d4] ss:$8 sps:$4 sm:$0xff]   ;;  %v27403_v41 = vld [vmem:[%s36414_s1 + $0x27d0] ss:$8 sps:$4 sm:$0xff]  }
 0x9be   :  { %v27406_v49 = vld [vmem:[%s36414_s1 + $0x50d0] ss:$8 sps:$4 sm:$0xff]  }
 0x9c0   :  { %18172 = vmatpush1.bf16.msra.mxu1 %v27315_v54  ;;  %19853 = vmatpush1.bf16.msra.mxu0 %v27318_v44  ;;  %v27411_v54 = vld [vmem:[%s36414_s1 + $0x27e4] ss:$8 sps:$4 sm:$0xff]  }
 0x9c1   :  { %18182 = vmatprep.subr.bf16.mxu1 %v27325_v17  ;;  %19863 = vmatprep.subr.bf16.mxu0 %v27330_v46  ;;  %v27414_v44 = vld [vmem:[%s36414_s1 + $0x50e4] ss:$8 sps:$4 sm:$0xff]   ;;  %v27409_v17 = vld [vmem:[%s36414_s1 + $0x27e0] ss:$8 sps:$4 sm:$0xff]  }
 0x9c2   :  { %v27412_v46 = vld [vmem:[%s36414_s1 + $0x50e0] ss:$8 sps:$4 sm:$0xff]  }
 0x9c3   :  { %18174 = vmatmul.mubr.bf16.vlgmr.msra.gmra.mrb[0].mxu1 %v20289_v47  ;;  %19855 = vmatmul.mubr.bf16.vlgmr.msra.gmra.mrb[0].mxu0 %v20371_v55  ;;  %v27417_v47 = vld [vmem:[%s36414_s1 + $0x27f4] ss:$8 sps:$4 sm:$0xff]  }
 0x9c4   :  { %18183 = vmatpush1.bf16.msra.mxu1 %v27323_v60  ;;  %19864 = vmatpush1.bf16.msra.mxu0 %v27328_v50  ;;  %v27420_v55 = vld [vmem:[%s36414_s1 + $0x50f4] ss:$8 sps:$4 sm:$0xff]   ;;  %v27415_v60 = vld [vmem:[%s36414_s1 + $0x27f0] ss:$8 sps:$4 sm:$0xff]  }
 0x9c5   :  { %18184 = vmatprep.subr.bf16.mxu1 %v27333_v18  ;;  %19865 = vmatprep.subr.bf16.mxu0 %v27336_v52  ;;  %v27418_v50 = vld [vmem:[%s36414_s1 + $0x50f0] ss:$8 sps:$4 sm:$0xff]   ;;  %v27425_v18 = vld [vmem:[%s36414_s1 + $0x2804] ss:$8 sps:$4 sm:$0xff]  }
 0x9c6   :  { %18214 = vmatprep.mubr.bf16.mxu1 %v20292_v53  ;;  %19895 = vmatprep.mubr.bf16.mxu0 %v20374_v61  ;;  %v27430_v52 = vld [vmem:[%s36414_s1 + $0x5104] ss:$8 sps:$4 sm:$0xff]   ;;  %v20291_v53 = vcombine.low %v35819_v56, %v35819_v56  ;;  %v20373_v61 = vcombine.low %v35824_v25, %v35824_v25  ;;  %v27428_v56 = vld [vmem:[%s36414_s1 + $0x5100] ss:$8 sps:$4 sm:$0xff]   ;;  %v27433_v25 = vld [vmem:[%s36414_s1 + $0x2814] ss:$8 sps:$4 sm:$0xff]  }
 0x9c8   :  { %18185 = vmatpush1.bf16.msra.mxu1 %v27331_v62  ;;  %19866 = vmatpush1.bf16.msra.mxu0 %v27334_v20  ;;  %v36029_v62 = vld [vmem:[%s36413_s0 + $0x140] sm:$0xff]  ;;  %v36034_v20 = vld [vmem:[%s36413_s0 + $0x288] sm:$0xff] }
 0x9c9   :  { %18186 = vmatprep.subr.bf16.mxu1 %v27339_v2  ;;  %19867 = vmatprep.subr.bf16.mxu0 %v27342_v58  ;;  %v27423_v2 = vld [vmem:[%s36414_s1 + $0x2800] ss:$8 sps:$4 sm:$0xff]   ;;  %v27436_v58 = vld [vmem:[%s36414_s1 + $0x5114] ss:$8 sps:$4 sm:$0xff]  }
 0x9cc   :  { %18187 = vmatpush1.bf16.msra.mxu1 %v27337_v59  ;;  %19868 = vmatpush1.bf16.msra.mxu0 %v27340_v3  ;;  %v20294_v59 = vcombine.high %v36029_v62, %v36029_v62  ;;  %v20376_v3 = vcombine.high %v36034_v20, %v36034_v20 }
 0x9cd   :  { %18188 = vmatprep.subr.bf16.mxu1 %v27345_v4  ;;  %19869 = vmatprep.subr.bf16.mxu0 %v27348_v32  ;;  %v27431_v4 = vld [vmem:[%s36414_s1 + $0x2810] ss:$8 sps:$4 sm:$0xff]  }
 0x9ce   :  { %v27434_v32 = vld [vmem:[%s36414_s1 + $0x5110] ss:$8 sps:$4 sm:$0xff]  }
 0x9d0   :  { %18189 = vmatpush1.bf16.msra.mxu1 %v27343_v8  ;;  %19870 = vmatpush1.bf16.msra.mxu0 %v27346_v0  ;;  %v27439_v8 = vld [vmem:[%s36414_s1 + $0x2824] ss:$8 sps:$4 sm:$0xff]  }
 0x9d1   :  { %18190 = vmatprep.subr.bf16.mxu1 %v27351_v1  ;;  %19871 = vmatprep.subr.bf16.mxu0 %v27354_v9  ;;  %v27442_v0 = vld [vmem:[%s36414_s1 + $0x5124] ss:$8 sps:$4 sm:$0xff]   ;;  %v27437_v1 = vld [vmem:[%s36414_s1 + $0x2820] ss:$8 sps:$4 sm:$0xff]  }
 0x9d2   :  { %v27440_v9 = vld [vmem:[%s36414_s1 + $0x5120] ss:$8 sps:$4 sm:$0xff]  }
 0x9d4   :  { %18191 = vmatpush1.bf16.msra.mxu1 %v27349_v10  ;;  %19872 = vmatpush1.bf16.msra.mxu0 %v27352_v29  ;;  %v27445_v10 = vld [vmem:[%s36414_s1 + $0x2834] ss:$8 sps:$4 sm:$0xff]  }
 0x9d5   :  { %18192 = vmatprep.subr.bf16.mxu1 %v27357_v14  ;;  %19873 = vmatprep.subr.bf16.mxu0 %v27360_v6  ;;  %v27448_v29 = vld [vmem:[%s36414_s1 + $0x5134] ss:$8 sps:$4 sm:$0xff]   ;;  %v27443_v14 = vld [vmem:[%s36414_s1 + $0x2830] ss:$8 sps:$4 sm:$0xff]  }
 0x9d6   :  { %v27446_v6 = vld [vmem:[%s36414_s1 + $0x5130] ss:$8 sps:$4 sm:$0xff]  }
 0x9d8   :  { %18193 = vmatpush1.bf16.msra.mxu1 %v27355_v7  ;;  %19874 = vmatpush1.bf16.msra.mxu0 %v27358_v15  ;;  %v27451_v7 = vld [vmem:[%s36414_s1 + $0x2844] ss:$8 sps:$4 sm:$0xff]  }
 0x9d9   :  { %18194 = vmatprep.subr.bf16.mxu1 %v27363_v16  ;;  %19875 = vmatprep.subr.bf16.mxu0 %v27366_v33  ;;  %v27454_v15 = vld [vmem:[%s36414_s1 + $0x5144] ss:$8 sps:$4 sm:$0xff]   ;;  %v27449_v16 = vld [vmem:[%s36414_s1 + $0x2840] ss:$8 sps:$4 sm:$0xff]  }
 0x9da   :  { %v27452_v33 = vld [vmem:[%s36414_s1 + $0x5140] ss:$8 sps:$4 sm:$0xff]  }
 0x9dc   :  { %18195 = vmatpush1.bf16.msra.mxu1 %v27361_v22  ;;  %19876 = vmatpush1.bf16.msra.mxu0 %v27364_v12  ;;  %v27457_v22 = vld [vmem:[%s36414_s1 + $0x2854] ss:$8 sps:$4 sm:$0xff]  }
 0x9dd   :  { %18196 = vmatprep.subr.bf16.mxu1 %v27369_v13  ;;  %19877 = vmatprep.subr.bf16.mxu0 %v27372_v39  ;;  %v27460_v12 = vld [vmem:[%s36414_s1 + $0x5154] ss:$8 sps:$4 sm:$0xff]   ;;  %v27455_v13 = vld [vmem:[%s36414_s1 + $0x2850] ss:$8 sps:$4 sm:$0xff]  }
 0x9de   :  { %v27458_v39 = vld [vmem:[%s36414_s1 + $0x5150] ss:$8 sps:$4 sm:$0xff]  }
 0x9e0   :  { %18197 = vmatpush1.bf16.msra.mxu1 %v27367_v51  ;;  %19878 = vmatpush1.bf16.msra.mxu0 %v27370_v23  ;;  %v27463_v51 = vld [vmem:[%s36414_s1 + $0x2864] ss:$8 sps:$4 sm:$0xff]  }
 0x9e1   :  { %18198 = vmatprep.subr.bf16.mxu1 %v27375_v30  ;;  %19879 = vmatprep.subr.bf16.mxu0 %v27378_v45  ;;  %v27466_v23 = vld [vmem:[%s36414_s1 + $0x5164] ss:$8 sps:$4 sm:$0xff]   ;;  %v27461_v30 = vld [vmem:[%s36414_s1 + $0x2860] ss:$8 sps:$4 sm:$0xff]  }
 0x9e2   :  { %v27464_v45 = vld [vmem:[%s36414_s1 + $0x5160] ss:$8 sps:$4 sm:$0xff]  }
 0x9e4   :  { %18199 = vmatpush1.bf16.msra.mxu1 %v27373_v57  ;;  %19880 = vmatpush1.bf16.msra.mxu0 %v27376_v19  ;;  %v27469_v57 = vld [vmem:[%s36414_s1 + $0x2874] ss:$8 sps:$4 sm:$0xff]  }
 0x9e5   :  { %18200 = vmatprep.subr.bf16.mxu1 %v27381_v21  ;;  %19881 = vmatprep.subr.bf16.mxu0 %v27384_v31  ;;  %v27472_v19 = vld [vmem:[%s36414_s1 + $0x5174] ss:$8 sps:$4 sm:$0xff]   ;;  %v27467_v21 = vld [vmem:[%s36414_s1 + $0x2870] ss:$8 sps:$4 sm:$0xff]  }
 0x9e6   :  { %v27470_v31 = vld [vmem:[%s36414_s1 + $0x5170] ss:$8 sps:$4 sm:$0xff]  }
 0x9e8   :  { %18201 = vmatpush1.bf16.msra.mxu1 %v27379_v36  ;;  %19882 = vmatpush1.bf16.msra.mxu0 %v27382_v26  ;;  %v27475_v36 = vld [vmem:[%s36414_s1 + $0x2884] ss:$8 sps:$4 sm:$0xff]  }
 0x9e9   :  { %18202 = vmatprep.subr.bf16.mxu1 %v27387_v63  ;;  %19883 = vmatprep.subr.bf16.mxu0 %v27390_v27  ;;  %v27478_v26 = vld [vmem:[%s36414_s1 + $0x5184] ss:$8 sps:$4 sm:$0xff]   ;;  %v27473_v63 = vld [vmem:[%s36414_s1 + $0x2880] ss:$8 sps:$4 sm:$0xff]  }
 0x9ea   :  { %v27476_v27 = vld [vmem:[%s36414_s1 + $0x5180] ss:$8 sps:$4 sm:$0xff]  }
 0x9ec   :  { %18203 = vmatpush1.bf16.msra.mxu1 %v27385_v28  ;;  %19884 = vmatpush1.bf16.msra.mxu0 %v27388_v37  ;;  %v27481_v28 = vld [vmem:[%s36414_s1 + $0x2894] ss:$8 sps:$4 sm:$0xff]  }
 0x9ed   :  { %18204 = vmatprep.subr.bf16.mxu1 %v27393_v42  ;;  %19885 = vmatprep.subr.bf16.mxu0 %v27396_v24  ;;  %v27484_v37 = vld [vmem:[%s36414_s1 + $0x5194] ss:$8 sps:$4 sm:$0xff]   ;;  %v27479_v42 = vld [vmem:[%s36414_s1 + $0x2890] ss:$8 sps:$4 sm:$0xff]  }
 0x9ee   :  { %v27482_v24 = vld [vmem:[%s36414_s1 + $0x5190] ss:$8 sps:$4 sm:$0xff]  }
 0x9f0   :  { %18205 = vmatpush1.bf16.msra.mxu1 %v27391_v5  ;;  %19886 = vmatpush1.bf16.msra.mxu0 %v27394_v34  ;;  %v27487_v5 = vld [vmem:[%s36414_s1 + $0x28a4] ss:$8 sps:$4 sm:$0xff]  }
 0x9f1   :  { %18206 = vmatprep.subr.bf16.mxu1 %v27399_v35  ;;  %19887 = vmatprep.subr.bf16.mxu0 %v27402_v43  ;;  %v27490_v34 = vld [vmem:[%s36414_s1 + $0x51a4] ss:$8 sps:$4 sm:$0xff]   ;;  %v27485_v35 = vld [vmem:[%s36414_s1 + $0x28a0] ss:$8 sps:$4 sm:$0xff]  }
 0x9f2   :  { %v27488_v43 = vld [vmem:[%s36414_s1 + $0x51a0] ss:$8 sps:$4 sm:$0xff]  }
 0x9f4   :  { %18207 = vmatpush1.bf16.msra.mxu1 %v27397_v48  ;;  %19888 = vmatpush1.bf16.msra.mxu0 %v27400_v38  ;;  %v27493_v48 = vld [vmem:[%s36414_s1 + $0x28b4] ss:$8 sps:$4 sm:$0xff]  }
 0x9f5   :  { %18208 = vmatprep.subr.bf16.mxu1 %v27405_v11  ;;  %19889 = vmatprep.subr.bf16.mxu0 %v27408_v40  ;;  %v27496_v38 = vld [vmem:[%s36414_s1 + $0x51b4] ss:$8 sps:$4 sm:$0xff]   ;;  %v27491_v11 = vld [vmem:[%s36414_s1 + $0x28b0] ss:$8 sps:$4 sm:$0xff]  }
 0x9f6   :  { %v27494_v40 = vld [vmem:[%s36414_s1 + $0x51b0] ss:$8 sps:$4 sm:$0xff]  }
 0x9f8   :  { %18209 = vmatpush1.bf16.msra.mxu1 %v27403_v41  ;;  %19890 = vmatpush1.bf16.msra.mxu0 %v27406_v49  ;;  %v27499_v41 = vld [vmem:[%s36414_s1 + $0x28c4] ss:$8 sps:$4 sm:$0xff]  }
 0x9f9   :  { %18210 = vmatprep.subr.bf16.mxu1 %v27411_v54  ;;  %19891 = vmatprep.subr.bf16.mxu0 %v27414_v44  ;;  %v27502_v49 = vld [vmem:[%s36414_s1 + $0x51c4] ss:$8 sps:$4 sm:$0xff]   ;;  %v27497_v54 = vld [vmem:[%s36414_s1 + $0x28c0] ss:$8 sps:$4 sm:$0xff]  }
 0x9fa   :  { %v27500_v44 = vld [vmem:[%s36414_s1 + $0x51c0] ss:$8 sps:$4 sm:$0xff]  }
 0x9fc   :  { %18211 = vmatpush1.bf16.msra.mxu1 %v27409_v17  ;;  %19892 = vmatpush1.bf16.msra.mxu0 %v27412_v46  ;;  %v27505_v17 = vld [vmem:[%s36414_s1 + $0x28d4] ss:$8 sps:$4 sm:$0xff]  }
 0x9fd   :  { %18212 = vmatprep.subr.bf16.mxu1 %v27417_v47  ;;  %19893 = vmatprep.subr.bf16.mxu0 %v27420_v55  ;;  %v27508_v46 = vld [vmem:[%s36414_s1 + $0x51d4] ss:$8 sps:$4 sm:$0xff]   ;;  %v27503_v47 = vld [vmem:[%s36414_s1 + $0x28d0] ss:$8 sps:$4 sm:$0xff]  }
 0x9fe   :  { %v27506_v55 = vld [vmem:[%s36414_s1 + $0x51d0] ss:$8 sps:$4 sm:$0xff]  }
 0xa00   :  { %18213 = vmatpush1.bf16.msra.mxu1 %v27415_v60  ;;  %19894 = vmatpush1.bf16.msra.mxu0 %v27418_v50  ;;  %v27511_v60 = vld [vmem:[%s36414_s1 + $0x28e4] ss:$8 sps:$4 sm:$0xff]  }
 0xa01   :  { %18223 = vmatprep.subr.bf16.mxu1 %v27425_v18  ;;  %19904 = vmatprep.subr.bf16.mxu0 %v27430_v52  ;;  %v27514_v50 = vld [vmem:[%s36414_s1 + $0x51e4] ss:$8 sps:$4 sm:$0xff]   ;;  %v27509_v18 = vld [vmem:[%s36414_s1 + $0x28e0] ss:$8 sps:$4 sm:$0xff]  }
 0xa02   :  { %v27512_v52 = vld [vmem:[%s36414_s1 + $0x51e0] ss:$8 sps:$4 sm:$0xff]  }
 0xa03   :  { %18215 = vmatmul.mubr.bf16.vlgmr.msra.gmra.mrb[0].mxu1 %v20291_v53  ;;  %19896 = vmatmul.mubr.bf16.vlgmr.msra.gmra.mrb[0].mxu0 %v20373_v61  ;;  %v27517_v53 = vld [vmem:[%s36414_s1 + $0x28f4] ss:$8 sps:$4 sm:$0xff]  }
 0xa04   :  { %18224 = vmatpush1.bf16.msra.mxu1 %v27423_v2  ;;  %19905 = vmatpush1.bf16.msra.mxu0 %v27428_v56  ;;  %v27520_v61 = vld [vmem:[%s36414_s1 + $0x51f4] ss:$8 sps:$4 sm:$0xff]   ;;  %v27515_v2 = vld [vmem:[%s36414_s1 + $0x28f0] ss:$8 sps:$4 sm:$0xff]  }
 0xa05   :  { %18225 = vmatprep.subr.bf16.mxu1 %v27433_v25  ;;  %19906 = vmatprep.subr.bf16.mxu0 %v27436_v58  ;;  %v27518_v56 = vld [vmem:[%s36414_s1 + $0x51f0] ss:$8 sps:$4 sm:$0xff]   ;;  %v27527_v25 = vld [vmem:[%s36414_s1 + $0x5204] ss:$8 sps:$4 sm:$0xff]  }
 0xa06   :  { %18255 = vmatprep.mubr.bf16.mxu1 %v20294_v59  ;;  %19936 = vmatprep.mubr.bf16.mxu0 %v20376_v3  ;;  %v110_v58 = vld [vmem:[%s36413_s0 + $0x290] sm:$0xff]  ;;  %v20293_v59 = vcombine.low %v36029_v62, %v36029_v62  ;;  %v20375_v3 = vcombine.low %v36034_v20, %v36034_v20  ;;  %v27533_v20 = vld [vmem:[%s36414_s1 + $0x5224] ss:$8 sps:$4 sm:$0xff]  }
 0xa07   :  { %v27528_v62 = vld [vmem:[%s36414_s1 + $0x5210] ss:$8 sps:$4 sm:$0xff]  }
 0xa08   :  { %18226 = vmatpush1.bf16.msra.mxu1 %v27431_v4  ;;  %19907 = vmatpush1.bf16.msra.mxu0 %v27434_v32  ;;  %v27525_v4 = vld [vmem:[%s36414_s1 + $0x5200] ss:$8 sps:$4 sm:$0xff]   ;;  %v20378_v32 = vcombine.high %v110_v58, %v110_v58 }
 0xa09   :  { %18227 = vmatprep.subr.bf16.mxu1 %v27439_v8  ;;  %19908 = vmatprep.subr.bf16.mxu0 %v27442_v0  ;;  %v27530_v8 = vld [vmem:[%s36414_s1 + $0x5214] ss:$8 sps:$4 sm:$0xff]   ;;  %v27531_v0 = vld [vmem:[%s36414_s1 + $0x5220] ss:$8 sps:$4 sm:$0xff]  }
 0xa0c   :  { %18228 = vmatpush1.bf16.msra.mxu1 %v27437_v1  ;;  %19909 = vmatpush1.bf16.msra.mxu0 %v27440_v9  ;;  %v27536_v1 = vld [vmem:[%s36414_s1 + $0x5234] ss:$8 sps:$4 sm:$0xff]   ;;  %v27534_v9 = vld [vmem:[%s36414_s1 + $0x5230] ss:$8 sps:$4 sm:$0xff]  }
 0xa0d   :  { %18229 = vmatprep.subr.bf16.mxu1 %v27445_v10  ;;  %19910 = vmatprep.subr.bf16.mxu0 %v27448_v29  ;;  %v27539_v10 = vld [vmem:[%s36414_s1 + $0x5244] ss:$8 sps:$4 sm:$0xff]   ;;  %v27537_v29 = vld [vmem:[%s36414_s1 + $0x5240] ss:$8 sps:$4 sm:$0xff]  }
 0xa10   :  { %18230 = vmatpush1.bf16.msra.mxu1 %v27443_v14  ;;  %19911 = vmatpush1.bf16.msra.mxu0 %v27446_v6  ;;  %v27542_v14 = vld [vmem:[%s36414_s1 + $0x5254] ss:$8 sps:$4 sm:$0xff]   ;;  %v27540_v6 = vld [vmem:[%s36414_s1 + $0x5250] ss:$8 sps:$4 sm:$0xff]  }
 0xa11   :  { %18231 = vmatprep.subr.bf16.mxu1 %v27451_v7  ;;  %19912 = vmatprep.subr.bf16.mxu0 %v27454_v15  ;;  %v27545_v7 = vld [vmem:[%s36414_s1 + $0x5264] ss:$8 sps:$4 sm:$0xff]   ;;  %v27543_v15 = vld [vmem:[%s36414_s1 + $0x5260] ss:$8 sps:$4 sm:$0xff]  }
 0xa14   :  { %18232 = vmatpush1.bf16.msra.mxu1 %v27449_v16  ;;  %19913 = vmatpush1.bf16.msra.mxu0 %v27452_v33  ;;  %v27548_v16 = vld [vmem:[%s36414_s1 + $0x5274] ss:$8 sps:$4 sm:$0xff]   ;;  %v27546_v33 = vld [vmem:[%s36414_s1 + $0x5270] ss:$8 sps:$4 sm:$0xff]  }
 0xa15   :  { %18233 = vmatprep.subr.bf16.mxu1 %v27457_v22  ;;  %19914 = vmatprep.subr.bf16.mxu0 %v27460_v12  ;;  %v27551_v22 = vld [vmem:[%s36414_s1 + $0x5284] ss:$8 sps:$4 sm:$0xff]   ;;  %v27549_v12 = vld [vmem:[%s36414_s1 + $0x5280] ss:$8 sps:$4 sm:$0xff]  }
 0xa18   :  { %18234 = vmatpush1.bf16.msra.mxu1 %v27455_v13  ;;  %19915 = vmatpush1.bf16.msra.mxu0 %v27458_v39  ;;  %v27554_v13 = vld [vmem:[%s36414_s1 + $0x5294] ss:$8 sps:$4 sm:$0xff]   ;;  %v27552_v39 = vld [vmem:[%s36414_s1 + $0x5290] ss:$8 sps:$4 sm:$0xff]  }
 0xa19   :  { %18235 = vmatprep.subr.bf16.mxu1 %v27463_v51  ;;  %19916 = vmatprep.subr.bf16.mxu0 %v27466_v23  ;;  %v27557_v51 = vld [vmem:[%s36414_s1 + $0x52a4] ss:$8 sps:$4 sm:$0xff]   ;;  %v27555_v23 = vld [vmem:[%s36414_s1 + $0x52a0] ss:$8 sps:$4 sm:$0xff]  }
 0xa1c   :  { %18236 = vmatpush1.bf16.msra.mxu1 %v27461_v30  ;;  %19917 = vmatpush1.bf16.msra.mxu0 %v27464_v45  ;;  %v20377_v30 = vcombine.low %v110_v58, %v110_v58  ;;  %v19988_v45 = vld [vmem:[%s36416_s3] sm:$0xff] }
 0xa1d   :  { %18237 = vmatprep.subr.bf16.mxu1 %v27469_v57  ;;  %19918 = vmatprep.subr.bf16.mxu0 %v27472_v19  ;;  %v19989_v57 = vld [vmem:[%s36416_s3 + $0x8] sm:$0xff]  ;;  %v19990_v19 = vld [vmem:[%s36416_s3 + $0x10] sm:$0xff] }
 0xa20   :  { %18238 = vmatpush1.bf16.msra.mxu1 %v27467_v21  ;;  %19919 = vmatpush1.bf16.msra.mxu0 %v27470_v31  ;;  %v27588_v21 = vmov 0.0|0.0   ;;  %v23058_v31 = vpack.c.bf16 %v19989_v57, %v19988_v45 }
 0xa21   :  { %18239 = vmatprep.subr.bf16.mxu1 %v27475_v36  ;;  %19920 = vmatprep.subr.bf16.mxu0 %v27478_v26  ;;  %v19991_v36 = vld [vmem:[%s36416_s3 + $0x18] sm:$0xff] }
 0xa22   :  { %v23061_v26 = vpack.c.bf16 %v19991_v36, %v19990_v19  ;;  %v23029_v19 = vld [vmem:[%s36419_s6] ss:$0 sm:$0xff] }
 0xa24   :  { %18240 = vmatpush1.bf16.msra.mxu1 %v27473_v63  ;;  %19921 = vmatpush1.bf16.msra.mxu0 %v27476_v27  ;;  %v19992_v63 = vld [vmem:[%s36416_s3 + $0x20] sm:$0xff]  ;;  %v19993_v27 = vld [vmem:[%s36416_s3 + $0x28] sm:$0xff] }
 0xa25   :  { %18241 = vmatprep.subr.bf16.mxu1 %v27481_v28  ;;  %19922 = vmatprep.subr.bf16.mxu0 %v27484_v37  ;;  %v23064_v28 = vpack.c.bf16 %v19993_v27, %v19992_v63  ;;  %v19994_v37 = vld [vmem:[%s36416_s3 + $0x30] sm:$0xff] }
 0xa28   :  { %18242 = vmatpush1.bf16.msra.mxu1 %v27479_v42  ;;  %19923 = vmatpush1.bf16.msra.mxu0 %v27482_v24  ;;  %v19995_v42 = vld [vmem:[%s36416_s3 + $0x38] sm:$0xff] }
 0xa29   :  { %18243 = vmatprep.subr.bf16.mxu1 %v27487_v5  ;;  %19924 = vmatprep.subr.bf16.mxu0 %v27490_v34  ;;  %v23067_v24 = vpack.c.bf16 %v19995_v42, %v19994_v37  ;;  %v19996_v5 = vld [vmem:[%s36416_s3 + $0x40] sm:$0xff]  ;;  %v19997_v34 = vld [vmem:[%s36416_s3 + $0x48] sm:$0xff] }
 0xa2c   :  { %18244 = vmatpush1.bf16.msra.mxu1 %v27485_v35  ;;  %19925 = vmatpush1.bf16.msra.mxu0 %v27488_v43  ;;  %v23070_v35 = vpack.c.bf16 %v19997_v34, %v19996_v5  ;;  %v19998_v43 = vld [vmem:[%s36416_s3 + $0x50] sm:$0xff] }
 0xa2d   :  { %18245 = vmatprep.subr.bf16.mxu1 %v27493_v48  ;;  %19926 = vmatprep.subr.bf16.mxu0 %v27496_v38  ;;  %v19999_v48 = vld [vmem:[%s36416_s3 + $0x58] sm:$0xff] }
 0xa2e   :  { %v23073_v38 = vpack.c.bf16 %v19999_v48, %v19998_v43 }
 0xa30   :  { %18246 = vmatpush1.bf16.msra.mxu1 %v27491_v11  ;;  %19927 = vmatpush1.bf16.msra.mxu0 %v27494_v40  ;;  %v20000_v11 = vld [vmem:[%s36416_s3 + $0x60] sm:$0xff]  ;;  %v20001_v40 = vld [vmem:[%s36416_s3 + $0x68] sm:$0xff] }
 0xa31   :  { %18247 = vmatprep.subr.bf16.mxu1 %v27499_v41  ;;  %19928 = vmatprep.subr.bf16.mxu0 %v27502_v49  ;;  %v23076_v41 = vpack.c.bf16 %v20001_v40, %v20000_v11  ;;  %v20002_v49 = vld [vmem:[%s36416_s3 + $0x70] sm:$0xff] }
 0xa34   :  { %18248 = vmatpush1.bf16.msra.mxu1 %v27497_v54  ;;  %19929 = vmatpush1.bf16.msra.mxu0 %v27500_v44  ;;  %v20003_v54 = vld [vmem:[%s36416_s3 + $0x78] sm:$0xff] }
 0xa35   :  { %18249 = vmatprep.subr.bf16.mxu1 %v27505_v17  ;;  %19930 = vmatprep.subr.bf16.mxu0 %v27508_v46  ;;  %v23079_v44 = vpack.c.bf16 %v20003_v54, %v20002_v49  ;;  %v20004_v17 = vld [vmem:[%s36416_s3 + $0x80] sm:$0xff]  ;;  %v20005_v46 = vld [vmem:[%s36416_s3 + $0x88] sm:$0xff] }
 0xa38   :  { %18250 = vmatpush1.bf16.msra.mxu1 %v27503_v47  ;;  %19931 = vmatpush1.bf16.msra.mxu0 %v27506_v55  ;;  %v23082_v47 = vpack.c.bf16 %v20005_v46, %v20004_v17  ;;  %v20006_v55 = vld [vmem:[%s36416_s3 + $0x90] sm:$0x3f] }
 0xa39   :  { %18251 = vmatprep.subr.bf16.mxu1 %v27511_v60  ;;  %19932 = vmatprep.subr.bf16.mxu0 %v27514_v50  ;;  %v27589_v60 = vmov 0.0  }
 0xa3c   :  { %18252 = vmatpush1.bf16.msra.mxu1 %v27509_v18  ;;  %19933 = vmatpush1.bf16.msra.mxu0 %v27512_v52 }
 0xa3d   :  { %18253 = vmatprep.subr.bf16.mxu1 %v27517_v53  ;;  %19934 = vmatprep.subr.bf16.mxu0 %v27520_v61  ;;  %v2759_v61 = vlaneseq }
 0xa40   :  { %18254 = vmatpush1.bf16.msra.mxu1 %v27515_v2  ;;  %19935 = vmatpush1.bf16.msra.mxu0 %v27518_v56  ;;  %v2760_v2 = vshrl.u32 %v2759_v61, 7 }
 0xa41   :  { %19945 = vmatprep.subr.bf16.mxu0 %v27527_v25  ;;  %23057 = vmatprep.subr.bf16.mxu1 %v27588_v21  ;;  %v2757_v25 = vld [vmem:[%s36415_s2] sm:$0x3] }
 0xa42   :  { %v2761_v56 = vsub.s32 0, %v2760_v2  ;;  %v2765_v58 = vsub.s32 1, %v2760_v2 }
 0xa43   :  { %18256 = vmatmul.mubr.bf16.vlgmr.msra.gmra.mrb[0].mxu1 %v20293_v59  ;;  %19937 = vmatmul.mubr.bf16.vlgmr.msra.gmra.mrb[0].mxu0 %v20375_v3 }
 0xa44   :  { %19946 = vmatpush1.bf16.msra.mxu0 %v27525_v4  ;;  %23025 = vmatprep.mubr.msk.bf16.mxu0 %vm16579_vm0, %v20378_v32  ;;  %v2762_v59 = vrot.slane %v2757_v25, %v2761_v56  ;;  %v2766_v3 = vrot.slane %v2757_v25, %v2765_v58 }
 0xa45   :  { %19947 = vmatprep.subr.bf16.mxu0 %v27530_v8  ;;  %23059 = vmatpush1.bf16.msra.mxu1 %v23058_v31 }
 0xa46   :  { %23060 = vmatprep.subr.bf16.mxu1 %v27588_v21 }
 0xa48   :  { %19948 = vmatpush1.bf16.msra.mxu0 %v27528_v62 }
 0xa49   :  { %19949 = vmatprep.subr.bf16.mxu0 %v27533_v20  ;;  %23062 = vmatpush1.bf16.msra.mxu1 %v23061_v26 }
 0xa4a   :  { %23063 = vmatprep.subr.bf16.mxu1 %v27588_v21 }
 0xa4c   :  { %19950 = vmatpush1.bf16.msra.mxu0 %v27531_v0  ;;  %v20093_v0 = vld [vmem:[%s36418_s5] sm:$0xff] }
 0xa4d   :  { %19951 = vmatprep.subr.bf16.mxu0 %v27536_v1  ;;  %23065 = vmatpush1.bf16.msra.mxu1 %v23064_v28  ;;  %v20094_v1 = vld [vmem:[%s36418_s5 + $0x8] sm:$0xff] }
 0xa4e   :  { %23066 = vmatprep.subr.bf16.mxu1 %v27588_v21 }
 0xa50   :  { %19952 = vmatpush1.bf16.msra.mxu0 %v27534_v9 }
 0xa51   :  { %19953 = vmatprep.subr.bf16.mxu0 %v27539_v10  ;;  %23068 = vmatpush1.bf16.msra.mxu1 %v23067_v24 }
 0xa52   :  { %23069 = vmatprep.subr.bf16.mxu1 %v27588_v21 }
 0xa54   :  { %19954 = vmatpush1.bf16.msra.mxu0 %v27537_v29 }
 0xa55   :  { %19955 = vmatprep.subr.bf16.mxu0 %v27542_v14  ;;  %23071 = vmatpush1.bf16.msra.mxu1 %v23070_v35 }
 0xa56   :  { %23072 = vmatprep.subr.bf16.mxu1 %v27588_v21 }
 0xa58   :  { %19956 = vmatpush1.bf16.msra.mxu0 %v27540_v6  ;;  %v23085_v6 = vpack.c.bf16 %v20094_v1, %v20093_v0 }
 0xa59   :  { %19957 = vmatprep.subr.bf16.mxu0 %v27545_v7  ;;  %23074 = vmatpush1.bf16.msra.mxu1 %v23073_v38 }
 0xa5a   :  { %23075 = vmatprep.subr.bf16.mxu1 %v27588_v21 }
 0xa5c   :  { %19958 = vmatpush1.bf16.msra.mxu0 %v27543_v15  ;;  %v20095_v15 = vld [vmem:[%s36418_s5 + $0x10] sm:$0xff] }
 0xa5d   :  { %19959 = vmatprep.subr.bf16.mxu0 %v27548_v16  ;;  %23077 = vmatpush1.bf16.msra.mxu1 %v23076_v41  ;;  %v20096_v16 = vld [vmem:[%s36418_s5 + $0x18] sm:$0xff] }
 0xa5e   :  { %23078 = vmatprep.subr.bf16.mxu1 %v27588_v21 }
 0xa60   :  { %19960 = vmatpush1.bf16.msra.mxu0 %v27546_v33  ;;  %v23088_v33 = vpack.c.bf16 %v20096_v16, %v20095_v15 }
 0xa61   :  { %19961 = vmatprep.subr.bf16.mxu0 %v27551_v22  ;;  %23080 = vmatpush1.bf16.msra.mxu1 %v23079_v44  ;;  %v20097_v22 = vld [vmem:[%s36418_s5 + $0x20] sm:$0xff] }
 0xa62   :  { %23081 = vmatprep.subr.bf16.mxu1 %v27588_v21 }
 0xa64   :  { %19962 = vmatpush1.bf16.msra.mxu0 %v27549_v12  ;;  %v20098_v12 = vld [vmem:[%s36418_s5 + $0x28] sm:$0xff] }
 0xa65   :  { %19963 = vmatprep.subr.bf16.mxu0 %v27554_v13  ;;  %23083 = vmatpush1.bf16.msra.mxu1 %v23082_v47  ;;  %v23091_v13 = vpack.c.bf16 %v20098_v12, %v20097_v22 }
 0xa66   :  { %20058 = vmatprep.subr.mxu1 %v27589_v60 }
 0xa68   :  { %19964 = vmatpush1.bf16.msra.mxu0 %v27552_v39  ;;  %v20099_v39 = vld [vmem:[%s36418_s5 + $0x30] sm:$0x3] }
 0xa69   :  { %19965 = vmatprep.subr.bf16.mxu0 %v27557_v51  ;;  %23027 = vmatpush1.msk.msra.mxu1 %vm20018_vm1, %v20006_v55  ;;  %v23026_v51 = vld [vmem:[%s36417_s4] ss:$0 sm:$0xff]  ;;  %s27591_s4 = smov [#allocation2]  }
 0xa6a   :  { %23084 = vmatprep.subr.bf16.mxu1 %v27588_v21  ;;  %s20205_s5 = sshll.u32 %s27591_s4, 4  ;;  %s20206_s5 = int_to_ptr.vmem [resolvable:$true] %s20205_s5 }
 0xa6b   :  { %s27564_s6 = scalar_lea.vmem %s20206_s5, 128  ;;  %p27569_p1 = scmp.lt.s32.totalorder %s20206_s5, %s20206_s5 }
 0xa6c   :  { %19966 = vmatpush1.bf16.msra.mxu0 %v27555_v23  ;;  %p27565_p0 = scmp.ne.s32.totalorder %s20206_s5, %s27564_s6  ;;  %p27570_p2 = scmp.lt.s32.totalorder %s27564_s6, %s27564_s6 }
 0xa6e   :  { %p27571_p3 = por %p27570_p2, %p27569_p1 }
 0xa6f   :  { %19978 = vmatmul.mubr.bf16.vlgmr.msra.gmra.mrb[0].mxu0 %v20377_v30 }
 0xa70   :  { %p27572_p4 = pnand %p27571_p3, %p27565_p0 }
 0xb16   :  { %v18257_v50 = vpop.f32.mrb[0].mxu1 }
 0xb17   :  { %v18259_v18 = vpop.f32.mrb[1].mxu1  ;;  %v23093_v4 = vadd.f32 %v18257_v50, %v2762_v59 }
 0xb18   :  { %v18261_v52 = vpop.f32.mrb[2].mxu1  ;;  %v23095_v32 = vadd.f32 %v18259_v18, %v2766_v3 }
 0xb19   :  { %v18262_v53 = vpop.f32.mrb[3].mxu1 }
 0xb42   :  { %v19979_v8 = vpop.f32.mrb[0].mxu0 }
 0xb43   :  { %v23094_v62 = vadd.f32 %v23093_v4, %v19979_v8  ;;  %v19981_v20 = vpop.f32.mrb[1].mxu0 }
 0xb44   :  { %v23096_v9 = vadd.f32 %v23095_v32, %v19981_v20  ;;  %v19983_v10 = vpop.f32.mrb[2].mxu0 }
 0xb45   :  { %v19984_v29 = vpop.f32.mrb[3].mxu0  ;;  %v19986_v7 = vmax.f32 %v23094_v62, 0.0 }
 0xb46   :  { %v19987_v14 = vmax.f32 %v23096_v9, 0.0 }
 0xb48   :  { %23028 = vmatprep.mubr.msk.f32.mxu1 %vm20014_vm2, %v19987_v14 }
 0xb49   :  { %20087 = vmatmul.mubr.f32.vlgmr.msra.gmra.mrb[4].mxu1 %v19986_v7 }
 0xb4a   :  { %23086 = vmatpush3.bf16.msra.mxu1 %v23085_v6  ;;  %23054 = vmatprep.mubr.msk.f32.mxu1 %vm27590_vm4, %v27589_v60 }
 0xb4b   :  { %23087 = vmatprep.subr.bf16.mxu1 %v27588_v21 }
 0xb4e   :  { %23089 = vmatpush3.bf16.msra.mxu1 %v23088_v33 }
 0xb4f   :  { %23090 = vmatprep.subr.bf16.mxu1 %v27588_v21 }
 0xb52   :  { %23092 = vmatpush3.bf16.msra.mxu1 %v23091_v13 }
 0xb53   :  { %23052 = vmatprep.subr.mxu1 %v27589_v60 }
 0xb56   :  { %23053 = vmatpush3.msk.msra.mxu1 %vm20111_vm3, %v20099_v39 }
 0xc1c   :  { %v20088_v23 = vpop.f32.mrb[4].mxu1 }
 0xc1d   :  { %v20089_v30 = vadd.f32 %v23026_v51, %v20088_v23  ;;  %v20090_v45 = vpop.f32.mrb[5].mxu1 }
 0xc1f   :  { %v20092_v57 = vmax.f32 %v20089_v30, 0.0 }
 0xc21   :  { %23055 = vmatmul.mubr.msk.f32.vlgmr.msra.gmra.mrb[6].mxu1 %vm20107_vm5, %v20092_v57 }
 0xcf4   :  { %v20181_v21 = vpop.f32.mrb[6].mxu1 }
 0xcf5   :  { %v20182_v31 = vadd.f32 %v23029_v19, %v20181_v21  ;;  %v23056_v36 = vpop.f32.mrb[7].mxu1 }
 0xcf7   :  { %v20186_v26 = vsel %vm20185_vm6, %v20182_v31, -inf }
 0xcf8   :  { %20187 = vmax.xlane.f32.xlu0 %v20186_v26 }
 0xd85   :  { %v20188_v63 = vpop.xlane.xlu0 %20187 }
 0xd86   :  { %v20189_v27 = vsub.f32 %v20182_v31, %v20188_v63 }
 0xd88   :  { %v20190_v28 = vmul.f32 1.442695, %v20189_v27 }
 0xd8a   :  { %27560 = vpow2.f32 %v20190_v28 }
 0xd94   :  { %v27561_v37 = vpop.eup %27560 }
 0xd95   :  { %v20192_v42 = vsel %vm20185_vm6, %v27561_v37, 0.0 }
 0xd96   :  { %20193 = vadd.xlane.f32.xlu0 %v20192_v42 }
 0xe23   :  { %v20194_v24 = vpop.xlane.xlu0 %20193 }
 0xe24   :  { %27562 = vlog2.f32 %v20194_v24 }
 0xe2e   :  { %v27563_v5 = vpop.eup %27562 }
 0xe2f   :  { %v20196_v34 = vmul.f32 0.6931472, %v27563_v5 }
 0xe31   :  { %v20197_v35 = vsub.f32 %v20189_v27, %v20196_v34 }
 0xe33   :  { %20198 = vst.msk [vmem:[#allocation2] sm:$0xff] %vm20185_vm6, %v20197_v35 }
 0xe34   :  { %27575 = shalt.err (!%p27572_p4)
}
 0xe35   :  { %s27576_s13 = scalar_lea.hbm %s36420_s7, 128 }
 0xe36   :  { %p27577_p5 = scmp.ne.s32.totalorder %s36420_s7, %s27576_s13  ;;  %p27580_p6 = scmp.lt.u32.totalorder %s27576_s13, %s36420_s7 }
 0xe38   :  { %p27582_p7 = pnand %p27580_p6, %p27577_p5 }
 0xe3a   :  { %27585 = shalt.err (!%p27582_p7)
}
 0xe3b   :  { %20208 = dma.vmem_to_hbm [thread:$0]  %s20206_s5, 128, %s36420_s7, [#allocation3]  }
 0xe3c   :  { %27586 = dma.done.wait [#allocation3], 128  }
 0xe3d   :  { %27587 = vsyncadd [#allocation3], 4294967168 }
 0xe3e   :  { %20212 = vsyncpa [#allocation3], 1 }

</bundles_post_ra>
